<compile_context>
chip_gen: v7x
topology: tpu7x:2x2x1
jax: 0.10.0
libtpu: 0.0.40
codegen_flags: <defaults>
</compile_context>

<pallas_src>
import functools

import jax
import jax.numpy as jnp
from jax.experimental import pallas as pl
from jax.experimental.pallas import tpu as pltpu


ACT_DTYPE = jnp.bfloat16   # MXU input path (activations + weights)
ACC_DTYPE = jnp.float32    # accumulation / bias / epilogue


# ----------------------------------------------------------------------------
# Pallas kernel: out = [head]( relu( sum_i x_i @ w_i + b ) )
# ----------------------------------------------------------------------------
def _fused_matmul_kernel(*refs, n_in, relu, has_head):
    """x_i:(TM,K_i) bf16, w_i:(K_i,N) bf16, b:(1,N) f32 ->
    optional head: wh:(N,NH) bf16, bh:(1,NH) f32 -> out:(TM, N or NH).

    Each x_i@w_i is a single deep-K MXU matmul (conv taps concatenated along K);
    partial sums across input groups (fused channel concat) stay in f32 vregs.
    """
    xs = refs[:n_in]
    ws = refs[n_in:2 * n_in]
    b_ref = refs[2 * n_in]
    if has_head:
        wh_ref, bh_ref, o_ref = refs[2 * n_in + 1:]
    else:
        o_ref = refs[2 * n_in + 1]

    acc = jnp.dot(xs[0][...], ws[0][...], preferred_element_type=jnp.float32)
    for i in range(1, n_in):          # fused concat: few partial matmuls, summed
        acc = acc + jnp.dot(xs[i][...], ws[i][...],
                            preferred_element_type=jnp.float32)
    acc = acc + b_ref[...]            # (1, N) broadcasts over rows
    if relu:
        acc = jnp.maximum(acc, 0.0)
    if has_head:                      # fused trailing 1x1 conv (lane-padded N)
        acc = jnp.dot(acc.astype(wh_ref.dtype), wh_ref[...],
                      preferred_element_type=jnp.float32) + bh_ref[...]
    o_ref[...] = acc.astype(o_ref.dtype)


# ----------------------------------------------------------------------------
# pallas_call wrapper (M-tiled, "parallel" grid)
# ----------------------------------------------------------------------------
def _fused_matmul(xs, ws, b, *, relu, head=None, out_dtype=ACT_DTYPE,
                  max_tile_m=256):
    n_in = len(xs)
    M = xs[0].shape[0]
    N = ws[0].shape[1]
    tm = M if M <= max_tile_m else max_tile_m
    assert M % tm == 0 and tm % 8 == 0

    xs = [x.astype(ACT_DTYPE) for x in xs]
    ws = [w.astype(ACT_DTYPE) for w in ws]

    in_specs, args = [], []
    for x in xs:
        in_specs.append(pl.BlockSpec((tm, x.shape[1]), lambda i: (i, 0)))
        args.append(x)
    for w in ws:                       # weights: whole-array block, stays resident
        in_specs.append(pl.BlockSpec(w.shape, lambda i: (0, 0)))
        args.append(w)
    in_specs.append(pl.BlockSpec((1, N), lambda i: (0, 0)))
    args.append(b.astype(ACC_DTYPE).reshape(1, N))

    has_head = head is not None
    n_out = N
    if has_head:
        wh, bh = head
        n_out = wh.shape[1]
        in_specs.append(pl.BlockSpec(wh.shape, lambda i: (0, 0)))
        args.append(wh.astype(ACT_DTYPE))
        in_specs.append(pl.BlockSpec((1, n_out), lambda i: (0, 0)))
        args.append(bh.astype(ACC_DTYPE).reshape(1, n_out))

    kernel = functools.partial(_fused_matmul_kernel, n_in=n_in, relu=relu,
                               has_head=has_head)
    return pl.pallas_call(
        kernel,
        out_shape=jax.ShapeDtypeStruct((M, n_out), out_dtype),
        grid=(M // tm,),
        in_specs=in_specs,
        out_specs=pl.BlockSpec((tm, n_out), lambda i: (i, 0)),
        compiler_params=pltpu.CompilerParams(
            dimension_semantics=("parallel",)),   # v7x: shard M over both TCs
    )(*args)


# ----------------------------------------------------------------------------
# Layer wrappers (layout plumbing in plain JAX; XLA fuses it into the im2col)
# ----------------------------------------------------------------------------
def _im2col3x3(x):
    """NHWC -> (N*H*W, 9*C); K order = (dy, dx) major, channel minor."""
    n, h, w, c = x.shape
    xp = jnp.pad(x, ((0, 0), (1, 1), (1, 1), (0, 0)))
    cols = [xp[:, dy:dy + h, dx:dx + w, :].reshape(n * h * w, c)
            for dy in range(3) for dx in range(3)]
    return jnp.concatenate(cols, axis=-1)


def _w3x3_deepk(w):
    """torch (Cout, Cin, 3, 3) -> (9*Cin, Cout); K order matches _im2col3x3."""
    cout, cin = w.shape[:2]
    return jnp.transpose(w, (2, 3, 1, 0)).reshape(9 * cin, cout)


def conv3x3_fused(inputs, w, b, *, relu, head=None, out_dtype=ACT_DTYPE):
    """3x3 conv (padding=1) over the channel-concat of `inputs` (list of NHWC).

    The concat is fused: each input gets its own im2col slab + weight slice and
    the kernel sums the partial matmuls, so the concat never materializes.
    """
    n, h, wd, _ = inputs[0].shape
    xs, ws, off = [], [], 0
    for x in inputs:
        c = x.shape[-1]
        xs.append(_im2col3x3(x))
        ws.append(_w3x3_deepk(w[:, off:off + c]))
        off += c
    out = _fused_matmul(xs, ws, b, relu=relu, head=head, out_dtype=out_dtype)
    return out.reshape(n, h, wd, out.shape[-1])


def conv_transpose2x2(x, w, b):
    """ConvTranspose2d(k=2, stride=2).  x: NHWC, w: torch (Cin, Cout, 2, 2).

    Kernel writes a lane-dense (M, 4*Cout) slab; the (di, dj) interleave below is
    layout glue fused by XLA into the consumer conv's im2col producer.
    """
    n, h, wd, cin = x.shape
    cout = w.shape[1]
    w_r = jnp.transpose(w, (0, 2, 3, 1)).reshape(cin, 4 * cout)   # (Cin, di*dj*Cout)
    b_r = jnp.tile(b, 4)
    out = _fused_matmul([x.reshape(n * h * wd, cin)], [w_r], b_r, relu=False)
    out = out.reshape(n, h, wd, 2, 2, cout)
    out = out.transpose(0, 1, 3, 2, 4, 5).reshape(n, 2 * h, 2 * wd, cout)
    return out


def maxpool2x2(x):
    """nn.MaxPool2d(2) on NHWC — pure elementwise-max glue; XLA fuses it into the
    consumer's im2col, so the pooled tensor is never separately round-tripped."""
    return jnp.maximum(
        jnp.maximum(x[:, 0::2, 0::2, :], x[:, 0::2, 1::2, :]),
        jnp.maximum(x[:, 1::2, 0::2, :], x[:, 1::2, 1::2, :]))


# ----------------------------------------------------------------------------
# UNET forward (mirrors the PyTorch module; no ReLU between the two convs of
# each up_block Sequential — ReLU applies only after the block)
# ----------------------------------------------------------------------------
def unet_forward(x_nchw, p):
    x = jnp.transpose(x_nchw, (0, 2, 3, 1)).astype(ACT_DTYPE)    # NCHW -> NHWC

    u1 = conv3x3_fused([x], *p["up1a"], relu=False)
    u1 = conv3x3_fused([u1], *p["up1b"], relu=True)              # up1_no_pool
    u1p = maxpool2x2(u1)

    u2 = conv3x3_fused([u1p], *p["up2a"], relu=False)
    u2 = conv3x3_fused([u2], *p["up2b"], relu=True)              # up2_no_pool
    u2p = maxpool2x2(u2)

    bn = conv3x3_fused([u2p], *p["bottleneck"], relu=True)       # bottleneck_conv
    bnp = maxpool2x2(bn)

    d1 = conv_transpose2x2(bnp, *p["dec1"])
    d1 = conv3x3_fused([d1, bn], *p["dec_conv1"], relu=True)     # fused cat(dec1, bn)

    d2 = conv_transpose2x2(d1, *p["dec2"])
    d2 = conv3x3_fused([d2, u2], *p["dec_conv2"], relu=True)     # fused cat(dec2, u2)

    d3 = conv_transpose2x2(d2, *p["dec3"])

    # dec_conv3 + ReLU + final 1x1 conv fused into one kernel; the Cout=1 final
    # column is lane-padded to 128 for unmasked stores and sliced here.
    wf, bf = p["final"]                                          # (1, 64, 1, 1), (1,)
    wh = jnp.zeros((64, 128), jnp.float32).at[:, 0].set(wf[0, :, 0, 0])
    bh = jnp.zeros((128,), jnp.float32).at[0].set(bf[0])
    out = conv3x3_fused([d3, u1], *p["dec_conv3"], relu=True,
                        head=(wh, bh), out_dtype=jnp.float32)    # (N, H, W, 128)
    out = out[..., :1]                                           # (N, H, W, 1)
    return jnp.transpose(out, (0, 3, 1, 2))                      # NHWC -> NCHW


# ----------------------------------------------------------------------------
# Deterministic parameter init (PyTorch-shaped weights, uniform(+-1/sqrt(fan_in)))
# ----------------------------------------------------------------------------
def _init_conv(key, cout, cin, kh, kw):
    k1, k2 = jax.random.split(key)
    bound = 1.0 / float(jnp.sqrt(cin * kh * kw))
    w = jax.random.uniform(k1, (cout, cin, kh, kw), jnp.float32, -bound, bound)
    b = jax.random.uniform(k2, (cout,), jnp.float32, -bound, bound)
    return w, b


def _init_convT(key, cin, cout, kh, kw):
    k1, k2 = jax.random.split(key)
    bound = 1.0 / float(jnp.sqrt(cin * kh * kw))
    w = jax.random.uniform(k1, (cin, cout, kh, kw), jnp.float32, -bound, bound)
    b = jax.random.uniform(k2, (cout,), jnp.float32, -bound, bound)
    return w, b


if __name__ == "__main__":
    root = jax.random.PRNGKey(0)
    keys = jax.random.split(root, 13)

    params = {
        "up1a":       _init_conv(keys[0], 64, 3, 3, 3),
        "up1b":       _init_conv(keys[1], 64, 64, 3, 3),
        "up2a":       _init_conv(keys[2], 128, 64, 3, 3),
        "up2b":       _init_conv(keys[3], 128, 128, 3, 3),
        "bottleneck": _init_conv(keys[4], 256, 128, 3, 3),
        "dec1":       _init_convT(keys[5], 256, 128, 2, 2),
        "dec_conv1":  _init_conv(keys[6], 128, 384, 3, 3),
        "dec2":       _init_convT(keys[7], 128, 64, 2, 2),
        "dec_conv2":  _init_conv(keys[8], 64, 192, 3, 3),
        "dec3":       _init_convT(keys[9], 64, 32, 2, 2),
        "dec_conv3":  _init_conv(keys[10], 64, 96, 3, 3),
        "final":      _init_conv(keys[11], 1, 64, 1, 1),
    }

    # Input matches PyTorch NCHW convention: (batch=2, channels=3, 16, 16).
    # Spatial size is a multiple of 8 so the three 2x2 pools divide evenly.
    x = jax.random.normal(keys[12], (2, 3, 16, 16), jnp.float32)

    out = jax.jit(unet_forward)(x, params)
    out = jax.block_until_ready(out)

    assert out.shape == (2, 1, 16, 16), out.shape
    assert out.dtype == jnp.float32
    assert bool(jnp.all(jnp.isfinite(out)))
    print("KERNEL_OK")
</pallas_src>

<mosaic_0001>
module attributes {stable_mosaic.version = 11 : i64} {
  func.func @_fused_matmul_kernel(%arg0: i32, %arg1: memref<256x27xbf16, #tpu.memory_space<vmem>>, %arg2: memref<27x64xbf16, #tpu.memory_space<vmem>>, %arg3: memref<1x64xf32, #tpu.memory_space<vmem>>, %arg4: memref<256x64xbf16, #tpu.memory_space<vmem>>) attributes {dimension_semantics = [#tpu.dimension_semantics<parallel>], iteration_bounds = array<i64: 2>, scalar_prefetch = 0 : i64, scratch_operands = 0 : i64, tpu.core_type = #tpu.core_type<tc>, window_params = [{transform_indices = @transform_0, window_bounds = array<i64: 256, 27>}, {pipeline_mode = #tpu.pipeline_mode<synchronous>, transform_indices = @transform_1, window_bounds = array<i64: 27, 64>}, {pipeline_mode = #tpu.pipeline_mode<synchronous>, transform_indices = @transform_2, window_bounds = array<i64: 1, 64>}, {transform_indices = @transform_3, window_bounds = array<i64: 256, 64>}]} {
    %c0 = arith.constant 0 : index
    %c0_0 = arith.constant 0 : index
    %0 = vector.load %arg1[%c0, %c0_0] : memref<256x27xbf16, #tpu.memory_space<vmem>>, vector<256x27xbf16>
    %c0_1 = arith.constant 0 : index
    %c0_2 = arith.constant 0 : index
    %1 = vector.load %arg2[%c0_1, %c0_2] : memref<27x64xbf16, #tpu.memory_space<vmem>>, vector<27x64xbf16>
    %cst = arith.constant dense<0.000000e+00> : vector<256x64xf32>
    %2 = tpu.matmul %0, %1, %cst {dimension_numbers = #tpu.dot_dimension_numbers<[1], [0], [0], [1], [0, 0, 1, 1], [], []>} : vector<256x27xbf16>, vector<27x64xbf16>, vector<256x64xf32> -> vector<256x64xf32>
    %c0_3 = arith.constant 0 : index
    %c0_4 = arith.constant 0 : index
    %3 = vector.load %arg3[%c0_3, %c0_4] : memref<1x64xf32, #tpu.memory_space<vmem>>, vector<1x64xf32>
    %4 = vector.broadcast %3 : vector<1x64xf32> to vector<256x64xf32>
    %5 = arith.addf %2, %4 : vector<256x64xf32>
    %6 = arith.truncf %5 : vector<256x64xf32> to vector<256x64xbf16>
    %c0_5 = arith.constant 0 : index
    %c0_6 = arith.constant 0 : index
    %7 = vector.load %arg4[%c0_5, %c0_6] : memref<256x64xbf16, #tpu.memory_space<vmem>>, vector<256x64xbf16>
    tpu.vector_store %arg4[%c0_5, %c0_6], %6 {strides = array<i32>} : memref<256x64xbf16, #tpu.memory_space<vmem>>, vector<256x64xbf16>,
    return
  }
  func.func @transform_0(%arg0: i32) -> (i32, i32) {
    %c0_i32 = arith.constant 0 : i32
    %c0_i32_0 = arith.constant 0 : i32
    return %arg0, %c0_i32 : i32, i32
  }
  func.func @transform_1(%arg0: i32) -> (i32, i32) {
    %c0_i32 = arith.constant 0 : i32
    %c0_i32_0 = arith.constant 0 : i32
    %c0_i32_1 = arith.constant 0 : i32
    return %c0_i32, %c0_i32_0 : i32, i32
  }
  func.func @transform_2(%arg0: i32) -> (i32, i32) {
    %c0_i32 = arith.constant 0 : i32
    %c0_i32_0 = arith.constant 0 : i32
    %c0_i32_1 = arith.constant 0 : i32
    return %c0_i32, %c0_i32_0 : i32, i32
  }
  func.func @transform_3(%arg0: i32) -> (i32, i32) {
    %c0_i32 = arith.constant 0 : i32
    %c0_i32_0 = arith.constant 0 : i32
    return %arg0, %c0_i32 : i32, i32
  }
}

module attributes {stable_mosaic.version = 11 : i64} {
  func.func @_fused_matmul_kernel(%arg0: i32, %arg1: memref<256x576xbf16, #tpu.memory_space<vmem>>, %arg2: memref<576x64xbf16, #tpu.memory_space<vmem>>, %arg3: memref<1x64xf32, #tpu.memory_space<vmem>>, %arg4: memref<256x64xbf16, #tpu.memory_space<vmem>>) attributes {dimension_semantics = [#tpu.dimension_semantics<parallel>], iteration_bounds = array<i64: 2>, scalar_prefetch = 0 : i64, scratch_operands = 0 : i64, tpu.core_type = #tpu.core_type<tc>, window_params = [{transform_indices = @transform_0, window_bounds = array<i64: 256, 576>}, {pipeline_mode = #tpu.pipeline_mode<synchronous>, transform_indices = @transform_1, window_bounds = array<i64: 576, 64>}, {pipeline_mode = #tpu.pipeline_mode<synchronous>, transform_indices = @transform_2, window_bounds = array<i64: 1, 64>}, {transform_indices = @transform_3, window_bounds = array<i64: 256, 64>}]} {
    %c0 = arith.constant 0 : index
    %c0_0 = arith.constant 0 : index
    %0 = vector.load %arg1[%c0, %c0_0] : memref<256x576xbf16, #tpu.memory_space<vmem>>, vector<256x576xbf16>
    %c0_1 = arith.constant 0 : index
    %c0_2 = arith.constant 0 : index
    %1 = vector.load %arg2[%c0_1, %c0_2] : memref<576x64xbf16, #tpu.memory_space<vmem>>, vector<576x64xbf16>
    %cst = arith.constant dense<0.000000e+00> : vector<256x64xf32>
    %2 = tpu.matmul %0, %1, %cst {dimension_numbers = #tpu.dot_dimension_numbers<[1], [0], [0], [1], [0, 0, 1, 1], [], []>} : vector<256x576xbf16>, vector<576x64xbf16>, vector<256x64xf32> -> vector<256x64xf32>
    %c0_3 = arith.constant 0 : index
    %c0_4 = arith.constant 0 : index
    %3 = vector.load %arg3[%c0_3, %c0_4] : memref<1x64xf32, #tpu.memory_space<vmem>>, vector<1x64xf32>
    %4 = vector.broadcast %3 : vector<1x64xf32> to vector<256x64xf32>
    %5 = arith.addf %2, %4 : vector<256x64xf32>
    %cst_5 = arith.constant 0.000000e+00 : f32
    %6 = vector.broadcast %cst_5 : f32 to vector<256x64xf32>
    %7 = arith.maximumf %5, %6 : vector<256x64xf32>
    %8 = arith.truncf %7 : vector<256x64xf32> to vector<256x64xbf16>
    %c0_6 = arith.constant 0 : index
    %c0_7 = arith.constant 0 : index
    %9 = vector.load %arg4[%c0_6, %c0_7] : memref<256x64xbf16, #tpu.memory_space<vmem>>, vector<256x64xbf16>
    tpu.vector_store %arg4[%c0_6, %c0_7], %8 {strides = array<i32>} : memref<256x64xbf16, #tpu.memory_space<vmem>>, vector<256x64xbf16>,
    return
  }
  func.func @transform_0(%arg0: i32) -> (i32, i32) {
    %c0_i32 = arith.constant 0 : i32
    %c0_i32_0 = arith.constant 0 : i32
    return %arg0, %c0_i32 : i32, i32
  }
  func.func @transform_1(%arg0: i32) -> (i32, i32) {
    %c0_i32 = arith.constant 0 : i32
    %c0_i32_0 = arith.constant 0 : i32
    %c0_i32_1 = arith.constant 0 : i32
    return %c0_i32, %c0_i32_0 : i32, i32
  }
  func.func @transform_2(%arg0: i32) -> (i32, i32) {
    %c0_i32 = arith.constant 0 : i32
    %c0_i32_0 = arith.constant 0 : i32
    %c0_i32_1 = arith.constant 0 : i32
    return %c0_i32, %c0_i32_0 : i32, i32
  }
  func.func @transform_3(%arg0: i32) -> (i32, i32) {
    %c0_i32 = arith.constant 0 : i32
    %c0_i32_0 = arith.constant 0 : i32
    return %arg0, %c0_i32 : i32, i32
  }
}

module attributes {stable_mosaic.version = 11 : i64} {
  func.func @_fused_matmul_kernel(%arg0: i32, %arg1: memref<128x576xbf16, #tpu.memory_space<vmem>>, %arg2: memref<576x128xbf16, #tpu.memory_space<vmem>>, %arg3: memref<1x128xf32, #tpu.memory_space<vmem>>, %arg4: memref<128x128xbf16, #tpu.memory_space<vmem>>) attributes {dimension_semantics = [#tpu.dimension_semantics<parallel>], iteration_bounds = array<i64: 1>, scalar_prefetch = 0 : i64, scratch_operands = 0 : i64, tpu.core_type = #tpu.core_type<tc>, window_params = [{transform_indices = @transform_0, window_bounds = array<i64: 128, 576>}, {pipeline_mode = #tpu.pipeline_mode<synchronous>, transform_indices = @transform_1, window_bounds = array<i64: 576, 128>}, {pipeline_mode = #tpu.pipeline_mode<synchronous>, transform_indices = @transform_2, window_bounds = array<i64: 1, 128>}, {transform_indices = @transform_3, window_bounds = array<i64: 128, 128>}]} {
    %c0 = arith.constant 0 : index
    %c0_0 = arith.constant 0 : index
    %0 = vector.load %arg1[%c0, %c0_0] : memref<128x576xbf16, #tpu.memory_space<vmem>>, vector<128x576xbf16>
    %c0_1 = arith.constant 0 : index
    %c0_2 = arith.constant 0 : index
    %1 = vector.load %arg2[%c0_1, %c0_2] : memref<576x128xbf16, #tpu.memory_space<vmem>>, vector<576x128xbf16>
    %cst = arith.constant dense<0.000000e+00> : vector<128x128xf32>
    %2 = tpu.matmul %0, %1, %cst {dimension_numbers = #tpu.dot_dimension_numbers<[1], [0], [0], [1], [0, 0, 1, 1], [], []>} : vector<128x576xbf16>, vector<576x128xbf16>, vector<128x128xf32> -> vector<128x128xf32>
    %c0_3 = arith.constant 0 : index
    %c0_4 = arith.constant 0 : index
    %3 = vector.load %arg3[%c0_3, %c0_4] : memref<1x128xf32, #tpu.memory_space<vmem>>, vector<1x128xf32>
    %4 = vector.broadcast %3 : vector<1x128xf32> to vector<128x128xf32>
    %5 = arith.addf %2, %4 : vector<128x128xf32>
    %6 = arith.truncf %5 : vector<128x128xf32> to vector<128x128xbf16>
    %c0_5 = arith.constant 0 : index
    %c0_6 = arith.constant 0 : index
    %7 = vector.load %arg4[%c0_5, %c0_6] : memref<128x128xbf16, #tpu.memory_space<vmem>>, vector<128x128xbf16>
    tpu.vector_store %arg4[%c0_5, %c0_6], %6 {strides = array<i32>} : memref<128x128xbf16, #tpu.memory_space<vmem>>, vector<128x128xbf16>,
    return
  }
  func.func @transform_0(%arg0: i32) -> (i32, i32) {
    %c0_i32 = arith.constant 0 : i32
    %c0_i32_0 = arith.constant 0 : i32
    return %arg0, %c0_i32 : i32, i32
  }
  func.func @transform_1(%arg0: i32) -> (i32, i32) {
    %c0_i32 = arith.constant 0 : i32
    %c0_i32_0 = arith.constant 0 : i32
    %c0_i32_1 = arith.constant 0 : i32
    return %c0_i32, %c0_i32_0 : i32, i32
  }
  func.func @transform_2(%arg0: i32) -> (i32, i32) {
    %c0_i32 = arith.constant 0 : i32
    %c0_i32_0 = arith.constant 0 : i32
    %c0_i32_1 = arith.constant 0 : i32
    return %c0_i32, %c0_i32_0 : i32, i32
  }
  func.func @transform_3(%arg0: i32) -> (i32, i32) {
    %c0_i32 = arith.constant 0 : i32
    %c0_i32_0 = arith.constant 0 : i32
    return %arg0, %c0_i32 : i32, i32
  }
}

module attributes {stable_mosaic.version = 11 : i64} {
  func.func @_fused_matmul_kernel(%arg0: i32, %arg1: memref<128x1152xbf16, #tpu.memory_space<vmem>>, %arg2: memref<1152x128xbf16, #tpu.memory_space<vmem>>, %arg3: memref<1x128xf32, #tpu.memory_space<vmem>>, %arg4: memref<128x128xbf16, #tpu.memory_space<vmem>>) attributes {dimension_semantics = [#tpu.dimension_semantics<parallel>], iteration_bounds = array<i64: 1>, scalar_prefetch = 0 : i64, scratch_operands = 0 : i64, tpu.core_type = #tpu.core_type<tc>, window_params = [{transform_indices = @transform_0, window_bounds = array<i64: 128, 1152>}, {pipeline_mode = #tpu.pipeline_mode<synchronous>, transform_indices = @transform_1, window_bounds = array<i64: 1152, 128>}, {pipeline_mode = #tpu.pipeline_mode<synchronous>, transform_indices = @transform_2, window_bounds = array<i64: 1, 128>}, {transform_indices = @transform_3, window_bounds = array<i64: 128, 128>}]} {
    %c0 = arith.constant 0 : index
    %c0_0 = arith.constant 0 : index
    %0 = vector.load %arg1[%c0, %c0_0] : memref<128x1152xbf16, #tpu.memory_space<vmem>>, vector<128x1152xbf16>
    %c0_1 = arith.constant 0 : index
    %c0_2 = arith.constant 0 : index
    %1 = vector.load %arg2[%c0_1, %c0_2] : memref<1152x128xbf16, #tpu.memory_space<vmem>>, vector<1152x128xbf16>
    %cst = arith.constant dense<0.000000e+00> : vector<128x128xf32>
    %2 = tpu.matmul %0, %1, %cst {dimension_numbers = #tpu.dot_dimension_numbers<[1], [0], [0], [1], [0, 0, 1, 1], [], []>} : vector<128x1152xbf16>, vector<1152x128xbf16>, vector<128x128xf32> -> vector<128x128xf32>
    %c0_3 = arith.constant 0 : index
    %c0_4 = arith.constant 0 : index
    %3 = vector.load %arg3[%c0_3, %c0_4] : memref<1x128xf32, #tpu.memory_space<vmem>>, vector<1x128xf32>
    %4 = vector.broadcast %3 : vector<1x128xf32> to vector<128x128xf32>
    %5 = arith.addf %2, %4 : vector<128x128xf32>
    %cst_5 = arith.constant 0.000000e+00 : f32
    %6 = vector.broadcast %cst_5 : f32 to vector<128x128xf32>
    %7 = arith.maximumf %5, %6 : vector<128x128xf32>
    %8 = arith.truncf %7 : vector<128x128xf32> to vector<128x128xbf16>
    %c0_6 = arith.constant 0 : index
    %c0_7 = arith.constant 0 : index
    %9 = vector.load %arg4[%c0_6, %c0_7] : memref<128x128xbf16, #tpu.memory_space<vmem>>, vector<128x128xbf16>
    tpu.vector_store %arg4[%c0_6, %c0_7], %8 {strides = array<i32>} : memref<128x128xbf16, #tpu.memory_space<vmem>>, vector<128x128xbf16>,
    return
  }
  func.func @transform_0(%arg0: i32) -> (i32, i32) {
    %c0_i32 = arith.constant 0 : i32
    %c0_i32_0 = arith.constant 0 : i32
    return %arg0, %c0_i32 : i32, i32
  }
  func.func @transform_1(%arg0: i32) -> (i32, i32) {
    %c0_i32 = arith.constant 0 : i32
    %c0_i32_0 = arith.constant 0 : i32
    %c0_i32_1 = arith.constant 0 : i32
    return %c0_i32, %c0_i32_0 : i32, i32
  }
  func.func @transform_2(%arg0: i32) -> (i32, i32) {
    %c0_i32 = arith.constant 0 : i32
    %c0_i32_0 = arith.constant 0 : i32
    %c0_i32_1 = arith.constant 0 : i32
    return %c0_i32, %c0_i32_0 : i32, i32
  }
  func.func @transform_3(%arg0: i32) -> (i32, i32) {
    %c0_i32 = arith.constant 0 : i32
    %c0_i32_0 = arith.constant 0 : i32
    return %arg0, %c0_i32 : i32, i32
  }
}

module attributes {stable_mosaic.version = 11 : i64} {
  func.func @_fused_matmul_kernel(%arg0: i32, %arg1: memref<32x1152xbf16, #tpu.memory_space<vmem>>, %arg2: memref<1152x256xbf16, #tpu.memory_space<vmem>>, %arg3: memref<1x256xf32, #tpu.memory_space<vmem>>, %arg4: memref<32x256xbf16, #tpu.memory_space<vmem>>) attributes {dimension_semantics = [#tpu.dimension_semantics<parallel>], iteration_bounds = array<i64: 1>, scalar_prefetch = 0 : i64, scratch_operands = 0 : i64, tpu.core_type = #tpu.core_type<tc>, window_params = [{transform_indices = @transform_0, window_bounds = array<i64: 32, 1152>}, {pipeline_mode = #tpu.pipeline_mode<synchronous>, transform_indices = @transform_1, window_bounds = array<i64: 1152, 256>}, {pipeline_mode = #tpu.pipeline_mode<synchronous>, transform_indices = @transform_2, window_bounds = array<i64: 1, 256>}, {transform_indices = @transform_3, window_bounds = array<i64: 32, 256>}]} {
    %c0 = arith.constant 0 : index
    %c0_0 = arith.constant 0 : index
    %0 = vector.load %arg1[%c0, %c0_0] : memref<32x1152xbf16, #tpu.memory_space<vmem>>, vector<32x1152xbf16>
    %c0_1 = arith.constant 0 : index
    %c0_2 = arith.constant 0 : index
    %1 = vector.load %arg2[%c0_1, %c0_2] : memref<1152x256xbf16, #tpu.memory_space<vmem>>, vector<1152x256xbf16>
    %cst = arith.constant dense<0.000000e+00> : vector<32x256xf32>
    %2 = tpu.matmul %0, %1, %cst {dimension_numbers = #tpu.dot_dimension_numbers<[1], [0], [0], [1], [0, 0, 1, 1], [], []>} : vector<32x1152xbf16>, vector<1152x256xbf16>, vector<32x256xf32> -> vector<32x256xf32>
    %c0_3 = arith.constant 0 : index
    %c0_4 = arith.constant 0 : index
    %3 = vector.load %arg3[%c0_3, %c0_4] : memref<1x256xf32, #tpu.memory_space<vmem>>, vector<1x256xf32>
    %4 = vector.broadcast %3 : vector<1x256xf32> to vector<32x256xf32>
    %5 = arith.addf %2, %4 : vector<32x256xf32>
    %cst_5 = arith.constant 0.000000e+00 : f32
    %6 = vector.broadcast %cst_5 : f32 to vector<32x256xf32>
    %7 = arith.maximumf %5, %6 : vector<32x256xf32>
    %8 = arith.truncf %7 : vector<32x256xf32> to vector<32x256xbf16>
    %c0_6 = arith.constant 0 : index
    %c0_7 = arith.constant 0 : index
    %9 = vector.load %arg4[%c0_6, %c0_7] : memref<32x256xbf16, #tpu.memory_space<vmem>>, vector<32x256xbf16>
    tpu.vector_store %arg4[%c0_6, %c0_7], %8 {strides = array<i32>} : memref<32x256xbf16, #tpu.memory_space<vmem>>, vector<32x256xbf16>,
    return
  }
  func.func @transform_0(%arg0: i32) -> (i32, i32) {
    %c0_i32 = arith.constant 0 : i32
    %c0_i32_0 = arith.constant 0 : i32
    return %arg0, %c0_i32 : i32, i32
  }
  func.func @transform_1(%arg0: i32) -> (i32, i32) {
    %c0_i32 = arith.constant 0 : i32
    %c0_i32_0 = arith.constant 0 : i32
    %c0_i32_1 = arith.constant 0 : i32
    return %c0_i32, %c0_i32_0 : i32, i32
  }
  func.func @transform_2(%arg0: i32) -> (i32, i32) {
    %c0_i32 = arith.constant 0 : i32
    %c0_i32_0 = arith.constant 0 : i32
    %c0_i32_1 = arith.constant 0 : i32
    return %c0_i32, %c0_i32_0 : i32, i32
  }
  func.func @transform_3(%arg0: i32) -> (i32, i32) {
    %c0_i32 = arith.constant 0 : i32
    %c0_i32_0 = arith.constant 0 : i32
    return %arg0, %c0_i32 : i32, i32
  }
}

module attributes {stable_mosaic.version = 11 : i64} {
  func.func @_fused_matmul_kernel(%arg0: i32, %arg1: memref<8x256xbf16, #tpu.memory_space<vmem>>, %arg2: memref<256x512xbf16, #tpu.memory_space<vmem>>, %arg3: memref<1x512xf32, #tpu.memory_space<vmem>>, %arg4: memref<8x512xbf16, #tpu.memory_space<vmem>>) attributes {dimension_semantics = [#tpu.dimension_semantics<parallel>], iteration_bounds = array<i64: 1>, scalar_prefetch = 0 : i64, scratch_operands = 0 : i64, tpu.core_type = #tpu.core_type<tc>, window_params = [{transform_indices = @transform_0, window_bounds = array<i64: 8, 256>}, {pipeline_mode = #tpu.pipeline_mode<synchronous>, transform_indices = @transform_1, window_bounds = array<i64: 256, 512>}, {pipeline_mode = #tpu.pipeline_mode<synchronous>, transform_indices = @transform_2, window_bounds = array<i64: 1, 512>}, {transform_indices = @transform_3, window_bounds = array<i64: 8, 512>}]} {
    %c0 = arith.constant 0 : index
    %c0_0 = arith.constant 0 : index
    %0 = vector.load %arg1[%c0, %c0_0] : memref<8x256xbf16, #tpu.memory_space<vmem>>, vector<8x256xbf16>
    %c0_1 = arith.constant 0 : index
    %c0_2 = arith.constant 0 : index
    %1 = vector.load %arg2[%c0_1, %c0_2] : memref<256x512xbf16, #tpu.memory_space<vmem>>, vector<256x512xbf16>
    %cst = arith.constant dense<0.000000e+00> : vector<8x512xf32>
    %2 = tpu.matmul %0, %1, %cst {dimension_numbers = #tpu.dot_dimension_numbers<[1], [0], [0], [1], [0, 0, 1, 1], [], []>} : vector<8x256xbf16>, vector<256x512xbf16>, vector<8x512xf32> -> vector<8x512xf32>
    %c0_3 = arith.constant 0 : index
    %c0_4 = arith.constant 0 : index
    %3 = vector.load %arg3[%c0_3, %c0_4] : memref<1x512xf32, #tpu.memory_space<vmem>>, vector<1x512xf32>
    %4 = vector.broadcast %3 : vector<1x512xf32> to vector<8x512xf32>
    %5 = arith.addf %2, %4 : vector<8x512xf32>
    %6 = arith.truncf %5 : vector<8x512xf32> to vector<8x512xbf16>
    %c0_5 = arith.constant 0 : index
    %c0_6 = arith.constant 0 : index
    %7 = vector.load %arg4[%c0_5, %c0_6] : memref<8x512xbf16, #tpu.memory_space<vmem>>, vector<8x512xbf16>
    tpu.vector_store %arg4[%c0_5, %c0_6], %6 {strides = array<i32>} : memref<8x512xbf16, #tpu.memory_space<vmem>>, vector<8x512xbf16>,
    return
  }
  func.func @transform_0(%arg0: i32) -> (i32, i32) {
    %c0_i32 = arith.constant 0 : i32
    %c0_i32_0 = arith.constant 0 : i32
    return %arg0, %c0_i32 : i32, i32
  }
  func.func @transform_1(%arg0: i32) -> (i32, i32) {
    %c0_i32 = arith.constant 0 : i32
    %c0_i32_0 = arith.constant 0 : i32
    %c0_i32_1 = arith.constant 0 : i32
    return %c0_i32, %c0_i32_0 : i32, i32
  }
  func.func @transform_2(%arg0: i32) -> (i32, i32) {
    %c0_i32 = arith.constant 0 : i32
    %c0_i32_0 = arith.constant 0 : i32
    %c0_i32_1 = arith.constant 0 : i32
    return %c0_i32, %c0_i32_0 : i32, i32
  }
  func.func @transform_3(%arg0: i32) -> (i32, i32) {
    %c0_i32 = arith.constant 0 : i32
    %c0_i32_0 = arith.constant 0 : i32
    return %arg0, %c0_i32 : i32, i32
  }
}

module attributes {stable_mosaic.version = 11 : i64} {
  func.func @_fused_matmul_kernel(%arg0: i32, %arg1: memref<32x1152xbf16, #tpu.memory_space<vmem>>, %arg2: memref<32x2304xbf16, #tpu.memory_space<vmem>>, %arg3: memref<1152x128xbf16, #tpu.memory_space<vmem>>, %arg4: memref<2304x128xbf16, #tpu.memory_space<vmem>>, %arg5: memref<1x128xf32, #tpu.memory_space<vmem>>, %arg6: memref<32x128xbf16, #tpu.memory_space<vmem>>) attributes {dimension_semantics = [#tpu.dimension_semantics<parallel>], iteration_bounds = array<i64: 1>, scalar_prefetch = 0 : i64, scratch_operands = 0 : i64, tpu.core_type = #tpu.core_type<tc>, window_params = [{transform_indices = @transform_0, window_bounds = array<i64: 32, 1152>}, {transform_indices = @transform_1, window_bounds = array<i64: 32, 2304>}, {pipeline_mode = #tpu.pipeline_mode<synchronous>, transform_indices = @transform_2, window_bounds = array<i64: 1152, 128>}, {pipeline_mode = #tpu.pipeline_mode<synchronous>, transform_indices = @transform_3, window_bounds = array<i64: 2304, 128>}, {pipeline_mode = #tpu.pipeline_mode<synchronous>, transform_indices = @transform_4, window_bounds = array<i64: 1, 128>}, {transform_indices = @transform_5, window_bounds = array<i64: 32, 128>}]} {
    %c0 = arith.constant 0 : index
    %c0_0 = arith.constant 0 : index
    %0 = vector.load %arg1[%c0, %c0_0] : memref<32x1152xbf16, #tpu.memory_space<vmem>>, vector<32x1152xbf16>
    %c0_1 = arith.constant 0 : index
    %c0_2 = arith.constant 0 : index
    %1 = vector.load %arg3[%c0_1, %c0_2] : memref<1152x128xbf16, #tpu.memory_space<vmem>>, vector<1152x128xbf16>
    %cst = arith.constant dense<0.000000e+00> : vector<32x128xf32>
    %2 = tpu.matmul %0, %1, %cst {dimension_numbers = #tpu.dot_dimension_numbers<[1], [0], [0], [1], [0, 0, 1, 1], [], []>} : vector<32x1152xbf16>, vector<1152x128xbf16>, vector<32x128xf32> -> vector<32x128xf32>
    %c0_3 = arith.constant 0 : index
    %c0_4 = arith.constant 0 : index
    %3 = vector.load %arg2[%c0_3, %c0_4] : memref<32x2304xbf16, #tpu.memory_space<vmem>>, vector<32x2304xbf16>
    %c0_5 = arith.constant 0 : index
    %c0_6 = arith.constant 0 : index
    %4 = vector.load %arg4[%c0_5, %c0_6] : memref<2304x128xbf16, #tpu.memory_space<vmem>>, vector<2304x128xbf16>
    %cst_7 = arith.constant dense<0.000000e+00> : vector<32x128xf32>
    %5 = tpu.matmul %3, %4, %cst_7 {dimension_numbers = #tpu.dot_dimension_numbers<[1], [0], [0], [1], [0, 0, 1, 1], [], []>} : vector<32x2304xbf16>, vector<2304x128xbf16>, vector<32x128xf32> -> vector<32x128xf32>
    %6 = arith.addf %2, %5 : vector<32x128xf32>
    %c0_8 = arith.constant 0 : index
    %c0_9 = arith.constant 0 : index
    %7 = vector.load %arg5[%c0_8, %c0_9] : memref<1x128xf32, #tpu.memory_space<vmem>>, vector<1x128xf32>
    %8 = vector.broadcast %7 : vector<1x128xf32> to vector<32x128xf32>
    %9 = arith.addf %6, %8 : vector<32x128xf32>
    %cst_10 = arith.constant 0.000000e+00 : f32
    %10 = vector.broadcast %cst_10 : f32 to vector<32x128xf32>
    %11 = arith.maximumf %9, %10 : vector<32x128xf32>
    %12 = arith.truncf %11 : vector<32x128xf32> to vector<32x128xbf16>
    %c0_11 = arith.constant 0 : index
    %c0_12 = arith.constant 0 : index
    %13 = vector.load %arg6[%c0_11, %c0_12] : memref<32x128xbf16, #tpu.memory_space<vmem>>, vector<32x128xbf16>
    tpu.vector_store %arg6[%c0_11, %c0_12], %12 {strides = array<i32>} : memref<32x128xbf16, #tpu.memory_space<vmem>>, vector<32x128xbf16>,
    return
  }
  func.func @transform_0(%arg0: i32) -> (i32, i32) {
    %c0_i32 = arith.constant 0 : i32
    %c0_i32_0 = arith.constant 0 : i32
    return %arg0, %c0_i32 : i32, i32
  }
  func.func @transform_1(%arg0: i32) -> (i32, i32) {
    %c0_i32 = arith.constant 0 : i32
    %c0_i32_0 = arith.constant 0 : i32
    return %arg0, %c0_i32 : i32, i32
  }
  func.func @transform_2(%arg0: i32) -> (i32, i32) {
    %c0_i32 = arith.constant 0 : i32
    %c0_i32_0 = arith.constant 0 : i32
    %c0_i32_1 = arith.constant 0 : i32
    return %c0_i32, %c0_i32_0 : i32, i32
  }
  func.func @transform_3(%arg0: i32) -> (i32, i32) {
    %c0_i32 = arith.constant 0 : i32
    %c0_i32_0 = arith.constant 0 : i32
    %c0_i32_1 = arith.constant 0 : i32
    return %c0_i32, %c0_i32_0 : i32, i32
  }
  func.func @transform_4(%arg0: i32) -> (i32, i32) {
    %c0_i32 = arith.constant 0 : i32
    %c0_i32_0 = arith.constant 0 : i32
    %c0_i32_1 = arith.constant 0 : i32
    return %c0_i32, %c0_i32_0 : i32, i32
  }
  func.func @transform_5(%arg0: i32) -> (i32, i32) {
    %c0_i32 = arith.constant 0 : i32
    %c0_i32_0 = arith.constant 0 : i32
    return %arg0, %c0_i32 : i32, i32
  }
}

module attributes {stable_mosaic.version = 11 : i64} {
  func.func @_fused_matmul_kernel(%arg0: i32, %arg1: memref<32x128xbf16, #tpu.memory_space<vmem>>, %arg2: memref<128x256xbf16, #tpu.memory_space<vmem>>, %arg3: memref<1x256xf32, #tpu.memory_space<vmem>>, %arg4: memref<32x256xbf16, #tpu.memory_space<vmem>>) attributes {dimension_semantics = [#tpu.dimension_semantics<parallel>], iteration_bounds = array<i64: 1>, scalar_prefetch = 0 : i64, scratch_operands = 0 : i64, tpu.core_type = #tpu.core_type<tc>, window_params = [{transform_indices = @transform_0, window_bounds = array<i64: 32, 128>}, {pipeline_mode = #tpu.pipeline_mode<synchronous>, transform_indices = @transform_1, window_bounds = array<i64: 128, 256>}, {pipeline_mode = #tpu.pipeline_mode<synchronous>, transform_indices = @transform_2, window_bounds = array<i64: 1, 256>}, {transform_indices = @transform_3, window_bounds = array<i64: 32, 256>}]} {
    %c0 = arith.constant 0 : index
    %c0_0 = arith.constant 0 : index
    %0 = vector.load %arg1[%c0, %c0_0] : memref<32x128xbf16, #tpu.memory_space<vmem>>, vector<32x128xbf16>
    %c0_1 = arith.constant 0 : index
    %c0_2 = arith.constant 0 : index
    %1 = vector.load %arg2[%c0_1, %c0_2] : memref<128x256xbf16, #tpu.memory_space<vmem>>, vector<128x256xbf16>
    %cst = arith.constant dense<0.000000e+00> : vector<32x256xf32>
    %2 = tpu.matmul %0, %1, %cst {dimension_numbers = #tpu.dot_dimension_numbers<[1], [0], [0], [1], [0, 0, 1, 1], [], []>} : vector<32x128xbf16>, vector<128x256xbf16>, vector<32x256xf32> -> vector<32x256xf32>
    %c0_3 = arith.constant 0 : index
    %c0_4 = arith.constant 0 : index
    %3 = vector.load %arg3[%c0_3, %c0_4] : memref<1x256xf32, #tpu.memory_space<vmem>>, vector<1x256xf32>
    %4 = vector.broadcast %3 : vector<1x256xf32> to vector<32x256xf32>
    %5 = arith.addf %2, %4 : vector<32x256xf32>
    %6 = arith.truncf %5 : vector<32x256xf32> to vector<32x256xbf16>
    %c0_5 = arith.constant 0 : index
    %c0_6 = arith.constant 0 : index
    %7 = vector.load %arg4[%c0_5, %c0_6] : memref<32x256xbf16, #tpu.memory_space<vmem>>, vector<32x256xbf16>
    tpu.vector_store %arg4[%c0_5, %c0_6], %6 {strides = array<i32>} : memref<32x256xbf16, #tpu.memory_space<vmem>>, vector<32x256xbf16>,
    return
  }
  func.func @transform_0(%arg0: i32) -> (i32, i32) {
    %c0_i32 = arith.constant 0 : i32
    %c0_i32_0 = arith.constant 0 : i32
    return %arg0, %c0_i32 : i32, i32
  }
  func.func @transform_1(%arg0: i32) -> (i32, i32) {
    %c0_i32 = arith.constant 0 : i32
    %c0_i32_0 = arith.constant 0 : i32
    %c0_i32_1 = arith.constant 0 : i32
    return %c0_i32, %c0_i32_0 : i32, i32
  }
  func.func @transform_2(%arg0: i32) -> (i32, i32) {
    %c0_i32 = arith.constant 0 : i32
    %c0_i32_0 = arith.constant 0 : i32
    %c0_i32_1 = arith.constant 0 : i32
    return %c0_i32, %c0_i32_0 : i32, i32
  }
  func.func @transform_3(%arg0: i32) -> (i32, i32) {
    %c0_i32 = arith.constant 0 : i32
    %c0_i32_0 = arith.constant 0 : i32
    return %arg0, %c0_i32 : i32, i32
  }
}

module attributes {stable_mosaic.version = 11 : i64} {
  func.func @_fused_matmul_kernel(%arg0: i32, %arg1: memref<128x576xbf16, #tpu.memory_space<vmem>>, %arg2: memref<128x1152xbf16, #tpu.memory_space<vmem>>, %arg3: memref<576x64xbf16, #tpu.memory_space<vmem>>, %arg4: memref<1152x64xbf16, #tpu.memory_space<vmem>>, %arg5: memref<1x64xf32, #tpu.memory_space<vmem>>, %arg6: memref<128x64xbf16, #tpu.memory_space<vmem>>) attributes {dimension_semantics = [#tpu.dimension_semantics<parallel>], iteration_bounds = array<i64: 1>, scalar_prefetch = 0 : i64, scratch_operands = 0 : i64, tpu.core_type = #tpu.core_type<tc>, window_params = [{transform_indices = @transform_0, window_bounds = array<i64: 128, 576>}, {transform_indices = @transform_1, window_bounds = array<i64: 128, 1152>}, {pipeline_mode = #tpu.pipeline_mode<synchronous>, transform_indices = @transform_2, window_bounds = array<i64: 576, 64>}, {pipeline_mode = #tpu.pipeline_mode<synchronous>, transform_indices = @transform_3, window_bounds = array<i64: 1152, 64>}, {pipeline_mode = #tpu.pipeline_mode<synchronous>, transform_indices = @transform_4, window_bounds = array<i64: 1, 64>}, {transform_indices = @transform_5, window_bounds = array<i64: 128, 64>}]} {
    %c0 = arith.constant 0 : index
    %c0_0 = arith.constant 0 : index
    %0 = vector.load %arg1[%c0, %c0_0] : memref<128x576xbf16, #tpu.memory_space<vmem>>, vector<128x576xbf16>
    %c0_1 = arith.constant 0 : index
    %c0_2 = arith.constant 0 : index
    %1 = vector.load %arg3[%c0_1, %c0_2] : memref<576x64xbf16, #tpu.memory_space<vmem>>, vector<576x64xbf16>
    %cst = arith.constant dense<0.000000e+00> : vector<128x64xf32>
    %2 = tpu.matmul %0, %1, %cst {dimension_numbers = #tpu.dot_dimension_numbers<[1], [0], [0], [1], [0, 0, 1, 1], [], []>} : vector<128x576xbf16>, vector<576x64xbf16>, vector<128x64xf32> -> vector<128x64xf32>
    %c0_3 = arith.constant 0 : index
    %c0_4 = arith.constant 0 : index
    %3 = vector.load %arg2[%c0_3, %c0_4] : memref<128x1152xbf16, #tpu.memory_space<vmem>>, vector<128x1152xbf16>
    %c0_5 = arith.constant 0 : index
    %c0_6 = arith.constant 0 : index
    %4 = vector.load %arg4[%c0_5, %c0_6] : memref<1152x64xbf16, #tpu.memory_space<vmem>>, vector<1152x64xbf16>
    %cst_7 = arith.constant dense<0.000000e+00> : vector<128x64xf32>
    %5 = tpu.matmul %3, %4, %cst_7 {dimension_numbers = #tpu.dot_dimension_numbers<[1], [0], [0], [1], [0, 0, 1, 1], [], []>} : vector<128x1152xbf16>, vector<1152x64xbf16>, vector<128x64xf32> -> vector<128x64xf32>
    %6 = arith.addf %2, %5 : vector<128x64xf32>
    %c0_8 = arith.constant 0 : index
    %c0_9 = arith.constant 0 : index
    %7 = vector.load %arg5[%c0_8, %c0_9] : memref<1x64xf32, #tpu.memory_space<vmem>>, vector<1x64xf32>
    %8 = vector.broadcast %7 : vector<1x64xf32> to vector<128x64xf32>
    %9 = arith.addf %6, %8 : vector<128x64xf32>
    %cst_10 = arith.constant 0.000000e+00 : f32
    %10 = vector.broadcast %cst_10 : f32 to vector<128x64xf32>
    %11 = arith.maximumf %9, %10 : vector<128x64xf32>
    %12 = arith.truncf %11 : vector<128x64xf32> to vector<128x64xbf16>
    %c0_11 = arith.constant 0 : index
    %c0_12 = arith.constant 0 : index
    %13 = vector.load %arg6[%c0_11, %c0_12] : memref<128x64xbf16, #tpu.memory_space<vmem>>, vector<128x64xbf16>
    tpu.vector_store %arg6[%c0_11, %c0_12], %12 {strides = array<i32>} : memref<128x64xbf16, #tpu.memory_space<vmem>>, vector<128x64xbf16>,
    return
  }
  func.func @transform_0(%arg0: i32) -> (i32, i32) {
    %c0_i32 = arith.constant 0 : i32
    %c0_i32_0 = arith.constant 0 : i32
    return %arg0, %c0_i32 : i32, i32
  }
  func.func @transform_1(%arg0: i32) -> (i32, i32) {
    %c0_i32 = arith.constant 0 : i32
    %c0_i32_0 = arith.constant 0 : i32
    return %arg0, %c0_i32 : i32, i32
  }
  func.func @transform_2(%arg0: i32) -> (i32, i32) {
    %c0_i32 = arith.constant 0 : i32
    %c0_i32_0 = arith.constant 0 : i32
    %c0_i32_1 = arith.constant 0 : i32
    return %c0_i32, %c0_i32_0 : i32, i32
  }
  func.func @transform_3(%arg0: i32) -> (i32, i32) {
    %c0_i32 = arith.constant 0 : i32
    %c0_i32_0 = arith.constant 0 : i32
    %c0_i32_1 = arith.constant 0 : i32
    return %c0_i32, %c0_i32_0 : i32, i32
  }
  func.func @transform_4(%arg0: i32) -> (i32, i32) {
    %c0_i32 = arith.constant 0 : i32
    %c0_i32_0 = arith.constant 0 : i32
    %c0_i32_1 = arith.constant 0 : i32
    return %c0_i32, %c0_i32_0 : i32, i32
  }
  func.func @transform_5(%arg0: i32) -> (i32, i32) {
    %c0_i32 = arith.constant 0 : i32
    %c0_i32_0 = arith.constant 0 : i32
    return %arg0, %c0_i32 : i32, i32
  }
}

module attributes {stable_mosaic.version = 11 : i64} {
  func.func @_fused_matmul_kernel(%arg0: i32, %arg1: memref<128x64xbf16, #tpu.memory_space<vmem>>, %arg2: memref<64x128xbf16, #tpu.memory_space<vmem>>, %arg3: memref<1x128xf32, #tpu.memory_space<vmem>>, %arg4: memref<128x128xbf16, #tpu.memory_space<vmem>>) attributes {dimension_semantics = [#tpu.dimension_semantics<parallel>], iteration_bounds = array<i64: 1>, scalar_prefetch = 0 : i64, scratch_operands = 0 : i64, tpu.core_type = #tpu.core_type<tc>, window_params = [{transform_indices = @transform_0, window_bounds = array<i64: 128, 64>}, {pipeline_mode = #tpu.pipeline_mode<synchronous>, transform_indices = @transform_1, window_bounds = array<i64: 64, 128>}, {pipeline_mode = #tpu.pipeline_mode<synchronous>, transform_indices = @transform_2, window_bounds = array<i64: 1, 128>}, {transform_indices = @transform_3, window_bounds = array<i64: 128, 128>}]} {
    %c0 = arith.constant 0 : index
    %c0_0 = arith.constant 0 : index
    %0 = vector.load %arg1[%c0, %c0_0] : memref<128x64xbf16, #tpu.memory_space<vmem>>, vector<128x64xbf16>
    %c0_1 = arith.constant 0 : index
    %c0_2 = arith.constant 0 : index
    %1 = vector.load %arg2[%c0_1, %c0_2] : memref<64x128xbf16, #tpu.memory_space<vmem>>, vector<64x128xbf16>
    %cst = arith.constant dense<0.000000e+00> : vector<128x128xf32>
    %2 = tpu.matmul %0, %1, %cst {dimension_numbers = #tpu.dot_dimension_numbers<[1], [0], [0], [1], [0, 0, 1, 1], [], []>} : vector<128x64xbf16>, vector<64x128xbf16>, vector<128x128xf32> -> vector<128x128xf32>
    %c0_3 = arith.constant 0 : index
    %c0_4 = arith.constant 0 : index
    %3 = vector.load %arg3[%c0_3, %c0_4] : memref<1x128xf32, #tpu.memory_space<vmem>>, vector<1x128xf32>
    %4 = vector.broadcast %3 : vector<1x128xf32> to vector<128x128xf32>
    %5 = arith.addf %2, %4 : vector<128x128xf32>
    %6 = arith.truncf %5 : vector<128x128xf32> to vector<128x128xbf16>
    %c0_5 = arith.constant 0 : index
    %c0_6 = arith.constant 0 : index
    %7 = vector.load %arg4[%c0_5, %c0_6] : memref<128x128xbf16, #tpu.memory_space<vmem>>, vector<128x128xbf16>
    tpu.vector_store %arg4[%c0_5, %c0_6], %6 {strides = array<i32>} : memref<128x128xbf16, #tpu.memory_space<vmem>>, vector<128x128xbf16>,
    return
  }
  func.func @transform_0(%arg0: i32) -> (i32, i32) {
    %c0_i32 = arith.constant 0 : i32
    %c0_i32_0 = arith.constant 0 : i32
    return %arg0, %c0_i32 : i32, i32
  }
  func.func @transform_1(%arg0: i32) -> (i32, i32) {
    %c0_i32 = arith.constant 0 : i32
    %c0_i32_0 = arith.constant 0 : i32
    %c0_i32_1 = arith.constant 0 : i32
    return %c0_i32, %c0_i32_0 : i32, i32
  }
  func.func @transform_2(%arg0: i32) -> (i32, i32) {
    %c0_i32 = arith.constant 0 : i32
    %c0_i32_0 = arith.constant 0 : i32
    %c0_i32_1 = arith.constant 0 : i32
    return %c0_i32, %c0_i32_0 : i32, i32
  }
  func.func @transform_3(%arg0: i32) -> (i32, i32) {
    %c0_i32 = arith.constant 0 : i32
    %c0_i32_0 = arith.constant 0 : i32
    return %arg0, %c0_i32 : i32, i32
  }
}

module attributes {stable_mosaic.version = 11 : i64} {
  func.func @_fused_matmul_kernel(%arg0: i32, %arg1: memref<256x288xbf16, #tpu.memory_space<vmem>>, %arg2: memref<256x576xbf16, #tpu.memory_space<vmem>>, %arg3: memref<288x64xbf16, #tpu.memory_space<vmem>>, %arg4: memref<576x64xbf16, #tpu.memory_space<vmem>>, %arg5: memref<1x64xf32, #tpu.memory_space<vmem>>, %arg6: memref<64x128xbf16, #tpu.memory_space<vmem>>, %arg7: memref<1x128xf32, #tpu.memory_space<vmem>>, %arg8: memref<256x128xf32, #tpu.memory_space<vmem>>) attributes {dimension_semantics = [#tpu.dimension_semantics<parallel>], iteration_bounds = array<i64: 2>, scalar_prefetch = 0 : i64, scratch_operands = 0 : i64, tpu.core_type = #tpu.core_type<tc>, window_params = [{transform_indices = @transform_0, window_bounds = array<i64: 256, 288>}, {transform_indices = @transform_1, window_bounds = array<i64: 256, 576>}, {pipeline_mode = #tpu.pipeline_mode<synchronous>, transform_indices = @transform_2, window_bounds = array<i64: 288, 64>}, {pipeline_mode = #tpu.pipeline_mode<synchronous>, transform_indices = @transform_3, window_bounds = array<i64: 576, 64>}, {pipeline_mode = #tpu.pipeline_mode<synchronous>, transform_indices = @transform_4, window_bounds = array<i64: 1, 64>}, {pipeline_mode = #tpu.pipeline_mode<synchronous>, transform_indices = @transform_5, window_bounds = array<i64: 64, 128>}, {pipeline_mode = #tpu.pipeline_mode<synchronous>, transform_indices = @transform_6, window_bounds = array<i64: 1, 128>}, {transform_indices = @transform_7, window_bounds = array<i64: 256, 128>}]} {
    %c0 = arith.constant 0 : index
    %c0_0 = arith.constant 0 : index
    %0 = vector.load %arg1[%c0, %c0_0] : memref<256x288xbf16, #tpu.memory_space<vmem>>, vector<256x288xbf16>
    %c0_1 = arith.constant 0 : index
    %c0_2 = arith.constant 0 : index
    %1 = vector.load %arg3[%c0_1, %c0_2] : memref<288x64xbf16, #tpu.memory_space<vmem>>, vector<288x64xbf16>
    %cst = arith.constant dense<0.000000e+00> : vector<256x64xf32>
    %2 = tpu.matmul %0, %1, %cst {dimension_numbers = #tpu.dot_dimension_numbers<[1], [0], [0], [1], [0, 0, 1, 1], [], []>} : vector<256x288xbf16>, vector<288x64xbf16>, vector<256x64xf32> -> vector<256x64xf32>
    %c0_3 = arith.constant 0 : index
    %c0_4 = arith.constant 0 : index
    %3 = vector.load %arg2[%c0_3, %c0_4] : memref<256x576xbf16, #tpu.memory_space<vmem>>, vector<256x576xbf16>
    %c0_5 = arith.constant 0 : index
    %c0_6 = arith.constant 0 : index
    %4 = vector.load %arg4[%c0_5, %c0_6] : memref<576x64xbf16, #tpu.memory_space<vmem>>, vector<576x64xbf16>
    %cst_7 = arith.constant dense<0.000000e+00> : vector<256x64xf32>
    %5 = tpu.matmul %3, %4, %cst_7 {dimension_numbers = #tpu.dot_dimension_numbers<[1], [0], [0], [1], [0, 0, 1, 1], [], []>} : vector<256x576xbf16>, vector<576x64xbf16>, vector<256x64xf32> -> vector<256x64xf32>
    %6 = arith.addf %2, %5 : vector<256x64xf32>
    %c0_8 = arith.constant 0 : index
    %c0_9 = arith.constant 0 : index
    %7 = vector.load %arg5[%c0_8, %c0_9] : memref<1x64xf32, #tpu.memory_space<vmem>>, vector<1x64xf32>
    %8 = vector.broadcast %7 : vector<1x64xf32> to vector<256x64xf32>
    %9 = arith.addf %6, %8 : vector<256x64xf32>
    %cst_10 = arith.constant 0.000000e+00 : f32
    %10 = vector.broadcast %cst_10 : f32 to vector<256x64xf32>
    %11 = arith.maximumf %9, %10 : vector<256x64xf32>
    %12 = arith.truncf %11 : vector<256x64xf32> to vector<256x64xbf16>
    %c0_11 = arith.constant 0 : index
    %c0_12 = arith.constant 0 : index
    %13 = vector.load %arg6[%c0_11, %c0_12] : memref<64x128xbf16, #tpu.memory_space<vmem>>, vector<64x128xbf16>
    %cst_13 = arith.constant dense<0.000000e+00> : vector<256x128xf32>
    %14 = tpu.matmul %12, %13, %cst_13 {dimension_numbers = #tpu.dot_dimension_numbers<[1], [0], [0], [1], [0, 0, 1, 1], [], []>} : vector<256x64xbf16>, vector<64x128xbf16>, vector<256x128xf32> -> vector<256x128xf32>
    %c0_14 = arith.constant 0 : index
    %c0_15 = arith.constant 0 : index
    %15 = vector.load %arg7[%c0_14, %c0_15] : memref<1x128xf32, #tpu.memory_space<vmem>>, vector<1x128xf32>
    %16 = vector.broadcast %15 : vector<1x128xf32> to vector<256x128xf32>
    %17 = arith.addf %14, %16 : vector<256x128xf32>
    %c0_16 = arith.constant 0 : index
    %c0_17 = arith.constant 0 : index
    %18 = vector.load %arg8[%c0_16, %c0_17] : memref<256x128xf32, #tpu.memory_space<vmem>>, vector<256x128xf32>
    tpu.vector_store %arg8[%c0_16, %c0_17], %17 {strides = array<i32>} : memref<256x128xf32, #tpu.memory_space<vmem>>, vector<256x128xf32>,
    return
  }
  func.func @transform_0(%arg0: i32) -> (i32, i32) {
    %c0_i32 = arith.constant 0 : i32
    %c0_i32_0 = arith.constant 0 : i32
    return %arg0, %c0_i32 : i32, i32
  }
  func.func @transform_1(%arg0: i32) -> (i32, i32) {
    %c0_i32 = arith.constant 0 : i32
    %c0_i32_0 = arith.constant 0 : i32
    return %arg0, %c0_i32 : i32, i32
  }
  func.func @transform_2(%arg0: i32) -> (i32, i32) {
    %c0_i32 = arith.constant 0 : i32
    %c0_i32_0 = arith.constant 0 : i32
    %c0_i32_1 = arith.constant 0 : i32
    return %c0_i32, %c0_i32_0 : i32, i32
  }
  func.func @transform_3(%arg0: i32) -> (i32, i32) {
    %c0_i32 = arith.constant 0 : i32
    %c0_i32_0 = arith.constant 0 : i32
    %c0_i32_1 = arith.constant 0 : i32
    return %c0_i32, %c0_i32_0 : i32, i32
  }
  func.func @transform_4(%arg0: i32) -> (i32, i32) {
    %c0_i32 = arith.constant 0 : i32
    %c0_i32_0 = arith.constant 0 : i32
    %c0_i32_1 = arith.constant 0 : i32
    return %c0_i32, %c0_i32_0 : i32, i32
  }
  func.func @transform_5(%arg0: i32) -> (i32, i32) {
    %c0_i32 = arith.constant 0 : i32
    %c0_i32_0 = arith.constant 0 : i32
    %c0_i32_1 = arith.constant 0 : i32
    return %c0_i32, %c0_i32_0 : i32, i32
  }
  func.func @transform_6(%arg0: i32) -> (i32, i32) {
    %c0_i32 = arith.constant 0 : i32
    %c0_i32_0 = arith.constant 0 : i32
    %c0_i32_1 = arith.constant 0 : i32
    return %c0_i32, %c0_i32_0 : i32, i32
  }
  func.func @transform_7(%arg0: i32) -> (i32, i32) {
    %c0_i32 = arith.constant 0 : i32
    %c0_i32_0 = arith.constant 0 : i32
    return %arg0, %c0_i32 : i32, i32
  }
}

</mosaic_0001>

<bundles_post_ra>
// kernel: unet_forward.11
= control target key start
LH: loop header
LB: loop body
LE: loop exit
PB: predicated region body
PF: predicated region fallthrough
CT: control target
= control target key end

     0   :  { %s967_s12 = smov 0   ;;  %s1134_s0 = inlined_call_operand.vmem [shape: bf16[512,27], index: 0, kind: input, shape index: {}]   ;;  %s1135_s1 = inlined_call_operand.vmem [shape: bf16[27,64], index: 1, kind: input, shape index: {}]   ;;  %s1136_s2 = inlined_call_operand.vmem [shape: f32[1,64], index: 2, kind: input, shape index: {}]   ;;  %s1137_s3 = inlined_call_operand.vmem [shape: bf16[512,64], index: 3, kind: output, shape index: {}]  }
   0x1 LB: > { %s743_s13 = sadd.s32 4294967295, %s944_s12   ;;  %p747_p0 = scmp.ge.s32.totalorder %s944_s12, 1  ;;  %s944_s12 = sphi %s967_s12, %s13_s12  }
   0x2   : > { %p138_p1 = scmp.lt.s32.totalorder %s944_s12, 3 }
   0x4   : > { %p139_p2 = pnand %p747_p0, %p138_p1 }
   0x5   : > { %v920_v0 = vld [vmem:[%s1135_s1] sm:$0xff] (!%p139_p2)   ;;  %vm358_vm0 = vcmask (!%p139_p2), 1044480   ;;  %v921_v1 = vld [vmem:[%s1135_s1 + $0x8] sm:$0x3f] (!%p139_p2)   ;;  %vm359_vm1 = vcmask (!%p139_p2), 1045504   ;;  %s748_s18 = sshll.u32 (!%p139_p2), %s743_s13, 5 }
   0x6   : > { %142 = sbr.rel (%p139_p2) target bundleno = 263 (0x107), region = 32  ;;  %871 = vmatprep.subr.bf16.mxu0 (!%p139_p2), %v920_v0  ;;  %907 = vmatprep.subr.bf16.mxu1 (!%p139_p2), %v920_v0  ;;  %v946_v2 = vmov (!%p139_p2), 65535   ;;  %p163_p3 = scmp.lt.s32.totalorder (!%p139_p2), %s748_s18, 63  ;;  %vm309_vm2 = vcmask (!%p139_p2), 220160   ;;  %v1026_v22 = vld [vmem:[%s1136_s2] ss:$0 sm:$0xff] (!%p139_p2) }
   0x7   : > { %872 = vmatpush3.bf16.msra.mxu0 (!%p139_p2), %v920_v0  ;;  %909 = vmatpush3.bf16.msra.mxu1 (!%p139_p2), %v920_v0  ;;  %v360_v3 = vsel (!%p139_p2), %vm358_vm0, 4294967295, %v946_v2  ;;  %vm654_vm3 = vcmask (!%p139_p2), 519168  }
   0x8   : > { %v361_v4 = vsel (!%p139_p2), %vm359_vm1, %v360_v3, 0 }
   0x9   : > { %v363_v5 = vand.u32 (!%p139_p2), %v921_v1, %v361_v4 }
   0xb   : > { %873 = vmatprep.subr.bf16.mxu0 (!%p139_p2), %v363_v5  ;;  %908 = vmatprep.subr.bf16.mxu1 (!%p139_p2), %v363_v5 }
   0xc   : > { %874 = vmatpush3.bf16.msra.mxu0 (!%p139_p2), %v363_v5  ;;  %910 = vmatpush3.bf16.msra.mxu1 (!%p139_p2), %v363_v5 }
   0xd   : > { %s1139_s18 = smov (!%p163_p3, %s748_s18), 63 }
   0xe   : > { %s749_s19 = sshll.u32 %s1139_s18, 2 }
   0xf   : > { %s989_s22 = scalar_lea.vmem %s1134_s0, %s749_s19  ;;  %s1034_s27 = scalar_lea.vmem %s1137_s3, %s749_s19 }
  0x10   : > { %v922_v6 = vld [vmem:[%s989_s22] sm:$0xff]   ;;  %v924_v8 = vld [vmem:[%s989_s22 + $0x8] sm:$0xff]   ;;  %v926_v10 = vld [vmem:[%s989_s22 + $0x10] sm:$0xff]  }
  0x11   : > { %v923_v7 = vld [vmem:[%s989_s22 + $0x40] sm:$0xff]   ;;  %875 = vmatprep.mubr.msk.bf16.mxu0 %vm309_vm2, %v922_v6  ;;  %v925_v9 = vld [vmem:[%s989_s22 + $0x48] sm:$0xff]   ;;  %v927_v11 = vld [vmem:[%s989_s22 + $0x50] sm:$0xff]  }
  0x12   : > { %891 = vmatprep.mubr.msk.bf16.mxu1 %vm309_vm2, %v923_v7  ;;  %876 = vmatmul.mubr.msk.bf16.vlgmr.msra.gmra.mrb[0].mxu0 %vm309_vm2, %v924_v8  ;;  %v928_v12 = vld [vmem:[%s989_s22 + $0x18] sm:$0xff]   ;;  %v930_v14 = vld [vmem:[%s989_s22 + $0x20] sm:$0xff]   ;;  %v932_v16 = vld [vmem:[%s989_s22 + $0x28] sm:$0xff]  }
  0x13   : > { %892 = vmatmul.mubr.msk.bf16.vlgmr.msra.gmra.mrb[0].mxu1 %vm309_vm2, %v925_v9  ;;  %879 = vmatprep.mubr.msk.bf16.mxu0 %vm309_vm2, %v926_v10  ;;  %v929_v13 = vld [vmem:[%s989_s22 + $0x58] sm:$0xff]   ;;  %v931_v15 = vld [vmem:[%s989_s22 + $0x60] sm:$0xff]   ;;  %v933_v17 = vld [vmem:[%s989_s22 + $0x68] sm:$0xff]  }
  0x14   : > { %895 = vmatprep.mubr.msk.bf16.mxu1 %vm309_vm2, %v927_v11  ;;  %v934_v18 = vld [vmem:[%s989_s22 + $0x30] sm:$0xff]   ;;  %v936_v20 = vld [vmem:[%s989_s22 + $0x38] sm:$0xff]  }
  0x15   : > { %v935_v19 = vld [vmem:[%s989_s22 + $0x70] sm:$0xff]   ;;  %v937_v21 = vld [vmem:[%s989_s22 + $0x78] sm:$0xff]  }
  0x1a   : > { %880 = vmatmul.mubr.msk.bf16.gmra.mrb[4].mxu0 %vm309_vm2, %v928_v12 }
  0x1b   : > { %896 = vmatmul.mubr.msk.bf16.gmra.mrb[4].mxu1 %vm309_vm2, %v929_v13  ;;  %883 = vmatprep.mubr.msk.bf16.mxu0 %vm309_vm2, %v930_v14 }
  0x1c   : > { %899 = vmatprep.mubr.msk.bf16.mxu1 %vm309_vm2, %v931_v15 }
  0x22   : > { %884 = vmatmul.mubr.msk.bf16.gmra.mrb[8].mxu0 %vm309_vm2, %v932_v16 }
  0x23   : > { %900 = vmatmul.mubr.msk.bf16.gmra.mrb[8].mxu1 %vm309_vm2, %v933_v17  ;;  %887 = vmatprep.mubr.msk.bf16.mxu0 %vm309_vm2, %v934_v18 }
  0x24   : > { %903 = vmatprep.mubr.msk.bf16.mxu1 %vm309_vm2, %v935_v19 }
  0x2a   : > { %888 = vmatmul.mubr.msk.bf16.gmra.mrb[12].mxu0 %vm309_vm2, %v936_v20 }
  0x2b   : > { %904 = vmatmul.mubr.msk.bf16.gmra.mrb[12].mxu1 %vm309_vm2, %v937_v21 }
  0xe5   : > { %v877_v23 = vpop.f32.mrb[0].mxu0 }
  0xe6   : > { %v408_v24 = vadd.f32 %v877_v23, %v1026_v22  ;;  %v893_v25 = vpop.f32.mrb[0].mxu1  ;;  %v399_v26 = vpop.f32.mrb[1].mxu0 }
  0xe7   : > { %v472_v27 = vadd.f32 %v893_v25, %v1026_v22  ;;  %v400_v28 = vadd.f32 %v1026_v22, %v399_v26  ;;  %v463_v29 = vpop.f32.mrb[1].mxu1  ;;  %v878_v30 = vpop.f32.mrb[2].mxu0 }
  0xe8   : > { %v823_v31 = vpack.c.bf16 %v408_v24, %v408_v24  ;;  %v464_v32 = vadd.f32 %v1026_v22, %v463_v29  ;;  %v411_v33 = vadd.f32 %v878_v30, %v1026_v22  ;;  %v894_v34 = vpop.f32.mrb[2].mxu1  ;;  %v402_v35 = vpop.f32.mrb[3].mxu0 }
  0xe9   : > { %v839_v36 = vpack.c.bf16 %v472_v27, %v472_v27  ;;  %v821_v37 = vpack.c.bf16 %v400_v28, %v400_v28  ;;  %v475_v38 = vadd.f32 %v894_v34, %v1026_v22  ;;  %v403_v39 = vadd.f32 %v1026_v22, %v402_v35  ;;  %v466_v40 = vpop.f32.mrb[3].mxu1 }
  0xea   : > { %657 = vst.msk [vmem:[%s1034_s27 + $0x8] sm:$0xf] %vm654_vm3, %v823_v31  ;;  %v837_v41 = vpack.c.bf16 %v464_v32, %v464_v32  ;;  %v824_v42 = vpack.c.bf16 %v411_v33, %v411_v33  ;;  %v467_v43 = vadd.f32 %v1026_v22, %v466_v40 }
  0xeb   : > { %673 = vst.msk [vmem:[%s1034_s27 + $0x48] sm:$0xf] %vm654_vm3, %v839_v36  ;;  %655 = vst.msk [vmem:[%s1034_s27] sm:$0xf] %vm654_vm3, %v821_v37  ;;  %v840_v44 = vpack.c.bf16 %v475_v38, %v475_v38  ;;  %v822_v45 = vpack.c.bf16 %v403_v39, %v403_v39 }
  0xec   : > { %671 = vst.msk [vmem:[%s1034_s27 + $0x40] sm:$0xf] %vm654_vm3, %v837_v41  ;;  %658 = vst.msk [vmem:[%s1034_s27 + $0xc] sm:$0xf] %vm654_vm3, %v824_v42  ;;  %v838_v46 = vpack.c.bf16 %v467_v43, %v467_v43 }
  0xed   : > { %674 = vst.msk [vmem:[%s1034_s27 + $0x4c] sm:$0xf] %vm654_vm3, %v840_v44  ;;  %656 = vst.msk [vmem:[%s1034_s27 + $0x4] sm:$0xf] %vm654_vm3, %v822_v45  ;;  %v881_v47 = vpop.f32.mrb[4].mxu0 }
  0xee   : > { %672 = vst.msk [vmem:[%s1034_s27 + $0x44] sm:$0xf] %vm654_vm3, %v838_v46  ;;  %v424_v48 = vadd.f32 %v881_v47, %v1026_v22  ;;  %v897_v49 = vpop.f32.mrb[4].mxu1  ;;  %v415_v50 = vpop.f32.mrb[5].mxu0 }
  0xef   : > { %v488_v51 = vadd.f32 %v897_v49, %v1026_v22  ;;  %v416_v52 = vadd.f32 %v1026_v22, %v415_v50  ;;  %v479_v53 = vpop.f32.mrb[5].mxu1  ;;  %v882_v54 = vpop.f32.mrb[6].mxu0 }
  0xf0   : > { %v827_v55 = vpack.c.bf16 %v424_v48, %v424_v48  ;;  %v480_v56 = vadd.f32 %v1026_v22, %v479_v53  ;;  %v427_v57 = vadd.f32 %v882_v54, %v1026_v22  ;;  %v898_v58 = vpop.f32.mrb[6].mxu1  ;;  %v418_v59 = vpop.f32.mrb[7].mxu0 }
  0xf1   : > { %v843_v60 = vpack.c.bf16 %v488_v51, %v488_v51  ;;  %v825_v61 = vpack.c.bf16 %v416_v52, %v416_v52  ;;  %v491_v62 = vadd.f32 %v898_v58, %v1026_v22  ;;  %v419_v63 = vadd.f32 %v1026_v22, %v418_v59  ;;  %v482_v0 = vpop.f32.mrb[7].mxu1 }
  0xf2   : > { %661 = vst.msk [vmem:[%s1034_s27 + $0x18] sm:$0xf] %vm654_vm3, %v827_v55  ;;  %v841_v1 = vpack.c.bf16 %v480_v56, %v480_v56  ;;  %v828_v2 = vpack.c.bf16 %v427_v57, %v427_v57  ;;  %v483_v3 = vadd.f32 %v1026_v22, %v482_v0 }
  0xf3   : > { %677 = vst.msk [vmem:[%s1034_s27 + $0x58] sm:$0xf] %vm654_vm3, %v843_v60  ;;  %659 = vst.msk [vmem:[%s1034_s27 + $0x10] sm:$0xf] %vm654_vm3, %v825_v61  ;;  %v844_v4 = vpack.c.bf16 %v491_v62, %v491_v62  ;;  %v826_v5 = vpack.c.bf16 %v419_v63, %v419_v63 }
  0xf4   : > { %675 = vst.msk [vmem:[%s1034_s27 + $0x50] sm:$0xf] %vm654_vm3, %v841_v1  ;;  %662 = vst.msk [vmem:[%s1034_s27 + $0x1c] sm:$0xf] %vm654_vm3, %v828_v2  ;;  %v842_v6 = vpack.c.bf16 %v483_v3, %v483_v3 }
  0xf5   : > { %678 = vst.msk [vmem:[%s1034_s27 + $0x5c] sm:$0xf] %vm654_vm3, %v844_v4  ;;  %660 = vst.msk [vmem:[%s1034_s27 + $0x14] sm:$0xf] %vm654_vm3, %v826_v5  ;;  %v885_v7 = vpop.f32.mrb[8].mxu0 }
  0xf6   : > { %676 = vst.msk [vmem:[%s1034_s27 + $0x54] sm:$0xf] %vm654_vm3, %v842_v6  ;;  %v440_v8 = vadd.f32 %v885_v7, %v1026_v22  ;;  %v901_v9 = vpop.f32.mrb[8].mxu1  ;;  %v431_v10 = vpop.f32.mrb[9].mxu0 }
  0xf7   : > { %v504_v11 = vadd.f32 %v901_v9, %v1026_v22  ;;  %v432_v12 = vadd.f32 %v1026_v22, %v431_v10  ;;  %v495_v13 = vpop.f32.mrb[9].mxu1  ;;  %v886_v14 = vpop.f32.mrb[10].mxu0 }
  0xf8   : > { %v831_v15 = vpack.c.bf16 %v440_v8, %v440_v8  ;;  %v496_v16 = vadd.f32 %v1026_v22, %v495_v13  ;;  %v443_v17 = vadd.f32 %v886_v14, %v1026_v22  ;;  %v902_v18 = vpop.f32.mrb[10].mxu1  ;;  %v434_v19 = vpop.f32.mrb[11].mxu0 }
  0xf9   : > { %v847_v20 = vpack.c.bf16 %v504_v11, %v504_v11  ;;  %v829_v21 = vpack.c.bf16 %v432_v12, %v432_v12  ;;  %v507_v23 = vadd.f32 %v902_v18, %v1026_v22  ;;  %v435_v24 = vadd.f32 %v1026_v22, %v434_v19  ;;  %v498_v25 = vpop.f32.mrb[11].mxu1 }
  0xfa   : > { %665 = vst.msk [vmem:[%s1034_s27 + $0x28] sm:$0xf] %vm654_vm3, %v831_v15  ;;  %v845_v26 = vpack.c.bf16 %v496_v16, %v496_v16  ;;  %v832_v27 = vpack.c.bf16 %v443_v17, %v443_v17  ;;  %v499_v28 = vadd.f32 %v1026_v22, %v498_v25 }
  0xfb   : > { %681 = vst.msk [vmem:[%s1034_s27 + $0x68] sm:$0xf] %vm654_vm3, %v847_v20  ;;  %663 = vst.msk [vmem:[%s1034_s27 + $0x20] sm:$0xf] %vm654_vm3, %v829_v21  ;;  %v848_v29 = vpack.c.bf16 %v507_v23, %v507_v23  ;;  %v830_v30 = vpack.c.bf16 %v435_v24, %v435_v24 }
  0xfc   : > { %679 = vst.msk [vmem:[%s1034_s27 + $0x60] sm:$0xf] %vm654_vm3, %v845_v26  ;;  %666 = vst.msk [vmem:[%s1034_s27 + $0x2c] sm:$0xf] %vm654_vm3, %v832_v27  ;;  %v846_v31 = vpack.c.bf16 %v499_v28, %v499_v28 }
  0xfd   : > { %682 = vst.msk [vmem:[%s1034_s27 + $0x6c] sm:$0xf] %vm654_vm3, %v848_v29  ;;  %664 = vst.msk [vmem:[%s1034_s27 + $0x24] sm:$0xf] %vm654_vm3, %v830_v30  ;;  %v889_v32 = vpop.f32.mrb[12].mxu0 }
  0xfe   : > { %680 = vst.msk [vmem:[%s1034_s27 + $0x64] sm:$0xf] %vm654_vm3, %v846_v31  ;;  %v456_v33 = vadd.f32 %v889_v32, %v1026_v22  ;;  %v905_v34 = vpop.f32.mrb[12].mxu1  ;;  %v447_v35 = vpop.f32.mrb[13].mxu0 }
  0xff   : > { %v520_v36 = vadd.f32 %v905_v34, %v1026_v22  ;;  %v448_v37 = vadd.f32 %v1026_v22, %v447_v35  ;;  %v511_v38 = vpop.f32.mrb[13].mxu1  ;;  %v890_v39 = vpop.f32.mrb[14].mxu0 }
 0x100   : > { %v835_v40 = vpack.c.bf16 %v456_v33, %v456_v33  ;;  %v512_v41 = vadd.f32 %v1026_v22, %v511_v38  ;;  %v459_v42 = vadd.f32 %v890_v39, %v1026_v22  ;;  %v906_v43 = vpop.f32.mrb[14].mxu1  ;;  %v450_v44 = vpop.f32.mrb[15].mxu0 }
 0x101   : > { %v851_v45 = vpack.c.bf16 %v520_v36, %v520_v36  ;;  %v833_v46 = vpack.c.bf16 %v448_v37, %v448_v37  ;;  %v523_v47 = vadd.f32 %v906_v43, %v1026_v22  ;;  %v451_v48 = vadd.f32 %v1026_v22, %v450_v44  ;;  %v514_v49 = vpop.f32.mrb[15].mxu1 }
 0x102   : > { %669 = vst.msk [vmem:[%s1034_s27 + $0x38] sm:$0xf] %vm654_vm3, %v835_v40  ;;  %v849_v50 = vpack.c.bf16 %v512_v41, %v512_v41  ;;  %v836_v51 = vpack.c.bf16 %v459_v42, %v459_v42  ;;  %v515_v52 = vadd.f32 %v1026_v22, %v514_v49 }
 0x103   : > { %685 = vst.msk [vmem:[%s1034_s27 + $0x78] sm:$0xf] %vm654_vm3, %v851_v45  ;;  %667 = vst.msk [vmem:[%s1034_s27 + $0x30] sm:$0xf] %vm654_vm3, %v833_v46  ;;  %v852_v53 = vpack.c.bf16 %v523_v47, %v523_v47  ;;  %v834_v54 = vpack.c.bf16 %v451_v48, %v451_v48 }
 0x104   : > { %683 = vst.msk [vmem:[%s1034_s27 + $0x70] sm:$0xf] %vm654_vm3, %v849_v50  ;;  %670 = vst.msk [vmem:[%s1034_s27 + $0x3c] sm:$0xf] %vm654_vm3, %v836_v51  ;;  %v850_v55 = vpack.c.bf16 %v515_v52, %v515_v52 }
 0x105   : > { %686 = vst.msk [vmem:[%s1034_s27 + $0x7c] sm:$0xf] %vm654_vm3, %v852_v53  ;;  %668 = vst.msk [vmem:[%s1034_s27 + $0x34] sm:$0xf] %vm654_vm3, %v834_v54 }
 0x106   : > { %684 = vst.msk [vmem:[%s1034_s27 + $0x74] sm:$0xf] %vm654_vm3, %v850_v55 }
 0x107 PF: > { %s13_s12 = sadd.s32 1, %s944_s12  }
 0x108   : > { %p10_p4 = scmp.ge.s32.totalorder %s13_s12, 4  }
 0x10a   :  { %12 = sbr.rel (!%p10_p4) target bundleno = 1 (0x1), region = 62 }

// kernel: unet_forward.12
= control target key start
LH: loop header
LB: loop body
LE: loop exit
PB: predicated region body
PF: predicated region fallthrough
CT: control target
= control target key end

     0   :  { %s2443_s12 = smov 0   ;;  %s2884_s0 = inlined_call_operand.vmem [shape: bf16[512,576], index: 0, kind: input, shape index: {}]   ;;  %s2885_s1 = inlined_call_operand.vmem [shape: bf16[576,64], index: 1, kind: input, shape index: {}]   ;;  %s2886_s2 = inlined_call_operand.vmem [shape: f32[1,64], index: 2, kind: input, shape index: {}]   ;;  %s2887_s3 = inlined_call_operand.vmem [shape: bf16[512,64], index: 3, kind: output, shape index: {}]  }
   0x1 LB: > { %s1750_s13 = sadd.s32 4294967295, %s2421_s12   ;;  %p1754_p0 = scmp.ge.s32.totalorder %s2421_s12, 1  ;;  %s2421_s12 = sphi %s2443_s12, %s13_s12  }
   0x2   : > { %p139_p1 = scmp.lt.s32.totalorder %s2421_s12, 3 }
   0x4   : > { %p140_p2 = pnand %p1754_p0, %p139_p1 }
   0x5   : > { %v2267_v0 = vld [vmem:[%s2885_s1 + $0x40] sm:$0xff] (!%p140_p2)   ;;  %s1755_s16 = sshll.u32 (!%p140_p2), %s1750_s13, 5  ;;  %v2269_v2 = vld [vmem:[%s2885_s1 + $0x48] sm:$0xff] (!%p140_p2)   ;;  %v2271_v4 = vld [vmem:[%s2885_s1 + $0x50] sm:$0xff] (!%p140_p2)   ;;  %vm969_vm0 = vcmask (!%p140_p2), 523264   ;;  %vm1661_vm1 = vcmask (!%p140_p2), 519168  }
   0x6   : > { %143 = sbr.rel (%p140_p2) target bundleno = 416 (0x1a0), region = 32  ;;  %v2268_v1 = vld [vmem:[%s2885_s1] sm:$0xff] (!%p140_p2)   ;;  %1958 = vmatprep.subr.bf16.mxu0 (!%p140_p2), %v2267_v0  ;;  %2242 = vmatprep.subr.bf16.mxu1 (!%p140_p2), %v2267_v0  ;;  %p165_p3 = scmp.lt.s32.totalorder (!%p140_p2), %s1755_s16, 63  ;;  %v2270_v3 = vld [vmem:[%s2885_s1 + $0x8] sm:$0xff] (!%p140_p2)   ;;  %v2272_v5 = vld [vmem:[%s2885_s1 + $0x10] sm:$0xff] (!%p140_p2)  }
   0x7   : > { %1959 = vmatpush3.bf16.msra.mxu0 (!%p140_p2), %v2268_v1  ;;  %2250 = vmatpush3.bf16.msra.mxu1 (!%p140_p2), %v2268_v1  ;;  %v2273_v6 = vld [vmem:[%s2885_s1 + $0x58] sm:$0xff] (!%p140_p2)   ;;  %v2275_v8 = vld [vmem:[%s2885_s1 + $0x60] sm:$0xff] (!%p140_p2)   ;;  %v2277_v10 = vld [vmem:[%s2885_s1 + $0x68] sm:$0xff] (!%p140_p2)  }
   0x8   : > { %1960 = vmatprep.subr.bf16.mxu0 (!%p140_p2), %v2269_v2  ;;  %2243 = vmatprep.subr.bf16.mxu1 (!%p140_p2), %v2269_v2  ;;  %v2274_v7 = vld [vmem:[%s2885_s1 + $0x18] sm:$0xff] (!%p140_p2)   ;;  %v2276_v9 = vld [vmem:[%s2885_s1 + $0x20] sm:$0xff] (!%p140_p2)   ;;  %v2278_v13 = vld [vmem:[%s2885_s1 + $0x28] sm:$0xff] (!%p140_p2)  }
   0x9   : > { %v2279_v14 = vld [vmem:[%s2885_s1 + $0x70] sm:$0xff] (!%p140_p2)   ;;  %v2281_v16 = vld [vmem:[%s2885_s1 + $0x78] sm:$0xff] (!%p140_p2)   ;;  %v2289_v18 = vld [vmem:[%s2885_s1 + $0xc0] sm:$0xff] (!%p140_p2)  }
   0xa   : > { %v2280_v15 = vld [vmem:[%s2885_s1 + $0x30] sm:$0xff] (!%p140_p2)   ;;  %v2282_v17 = vld [vmem:[%s2885_s1 + $0x38] sm:$0xff] (!%p140_p2)   ;;  %v2292_v19 = vld [vmem:[%s2885_s1 + $0x100] sm:$0xff] (!%p140_p2)  }
   0xb   : > { %1961 = vmatpush3.bf16.msra.mxu0 (!%p140_p2), %v2270_v3  ;;  %2251 = vmatpush3.bf16.msra.mxu1 (!%p140_p2), %v2270_v3  ;;  %v2290_v22 = vld [vmem:[%s2885_s1 + $0x80] sm:$0xff] (!%p140_p2)   ;;  %v2291_v23 = vld [vmem:[%s2885_s1 + $0xc8] sm:$0xff] (!%p140_p2)   ;;  %v2300_v28 = vld [vmem:[%s2885_s1 + $0xd0] sm:$0xff] (!%p140_p2)  }
   0xc   : > { %1962 = vmatprep.subr.bf16.mxu0 (!%p140_p2), %v2271_v4  ;;  %2244 = vmatprep.subr.bf16.mxu1 (!%p140_p2), %v2271_v4  ;;  %v2293_v26 = vld [vmem:[%s2885_s1 + $0x88] sm:$0xff] (!%p140_p2)   ;;  %v2301_v30 = vld [vmem:[%s2885_s1 + $0x90] sm:$0xff] (!%p140_p2)   ;;  %v2302_v31 = vld [vmem:[%s2885_s1 + $0xd8] sm:$0xff] (!%p140_p2)  }
   0xd   : > { %s2889_s16 = smov (!%p165_p3, %s1755_s16), 63  ;;  %v2303_v34 = vld [vmem:[%s2885_s1 + $0x98] sm:$0xff]   ;;  %v2323_v35 = vld [vmem:[%s2885_s1 + $0x108] sm:$0xff]   ;;  %v2310_v37 = vld [vmem:[%s2885_s1 + $0xe0] sm:$0xff]  }
   0xe   : > { %s2258_s29 = smul.u32 20, %s2889_s16  ;;  %v2311_v39 = vld [vmem:[%s2885_s1 + $0xa0] sm:$0xff]   ;;  %v2312_v40 = vld [vmem:[%s2885_s1 + $0xe8] sm:$0xff]   ;;  %v2320_v46 = vld [vmem:[%s2885_s1 + $0xf0] sm:$0xff]   ;;  %s1758_s19 = sshll.u32 %s2889_s16, 2 }
   0xf   : > { %1963 = vmatpush3.bf16.msra.mxu0 %v2272_v5  ;;  %2252 = vmatpush3.bf16.msra.mxu1 %v2272_v5  ;;  %v2313_v43 = vld [vmem:[%s2885_s1 + $0xa8] sm:$0xff]   ;;  %v2343_v47 = vld [vmem:[%s2885_s1 + $0x110] sm:$0xff]   ;;  %v2322_v49 = vld [vmem:[%s2885_s1 + $0xf8] sm:$0xff]   ;;  %s2756_s21 = scalar_lea.vmem %s2887_s3, %s1758_s19 }
  0x10   : > { %1964 = vmatprep.subr.bf16.mxu0 %v2273_v6  ;;  %2245 = vmatprep.subr.bf16.mxu1 %v2273_v6  ;;  %s2484_s9 = scalar_lea.vmem %s2884_s0, %s2258_s29  ;;  %v2321_v48 = vld [vmem:[%s2885_s1 + $0xb0] sm:$0xff]   ;;  %v2324_v52 = vld [vmem:[%s2885_s1 + $0xb8] sm:$0xff]  }
  0x11   : > { %v2285_v11 = vld [vmem:[%s2484_s9 + $0x4] ss:$20 sps:$4 sm:$0xff]   ;;  %v2283_v20 = vld [vmem:[%s2484_s9] ss:$20 sps:$4 sm:$0xff]   ;;  %v2298_v27 = vld [vmem:[%s2484_s9 + $0x28] ss:$20 sps:$4 sm:$0xff]  }
  0x12   : > { %v2288_v12 = vld [vmem:[%s2484_s9 + $0x1e4] ss:$20 sps:$4 sm:$0xff]   ;;  %1050 = vmatprep.mubr.bf16.mxu0 %v2285_v11  ;;  %v2286_v21 = vld [vmem:[%s2484_s9 + $0x1e0] ss:$20 sps:$4 sm:$0xff]   ;;  %v2299_v29 = vld [vmem:[%s2484_s9 + $0x208] ss:$20 sps:$4 sm:$0xff]  }
  0x13   : > { %1965 = vmatpush3.bf16.msra.mxu0 %v2274_v7  ;;  %2253 = vmatpush3.bf16.msra.mxu1 %v2274_v7  ;;  %v2294_v24 = vld [vmem:[%s2484_s9 + $0x2c] ss:$20 sps:$4 sm:$0xff]   ;;  %v2304_v32 = vld [vmem:[%s2484_s9 + $0x54] ss:$20 sps:$4 sm:$0xff]   ;;  %v2308_v36 = vld [vmem:[%s2484_s9 + $0x50] ss:$20 sps:$4 sm:$0xff]  }
  0x14   : > { %1966 = vmatprep.subr.bf16.mxu0 %v2275_v8  ;;  %2246 = vmatprep.subr.bf16.mxu1 %v2275_v8  ;;  %v2296_v25 = vld [vmem:[%s2484_s9 + $0x20c] ss:$20 sps:$4 sm:$0xff]   ;;  %v2306_v33 = vld [vmem:[%s2484_s9 + $0x234] ss:$20 sps:$4 sm:$0xff]   ;;  %v2309_v38 = vld [vmem:[%s2484_s9 + $0x230] ss:$20 sps:$4 sm:$0xff]  }
  0x15   : > { %1146 = vmatprep.mubr.bf16.mxu1 %v2288_v12  ;;  %v2314_v41 = vld [vmem:[%s2484_s9 + $0x7c] ss:$20 sps:$4 sm:$0xff]   ;;  %v2318_v44 = vld [vmem:[%s2484_s9 + $0x78] ss:$20 sps:$4 sm:$0xff]   ;;  %v2330_v54 = vld [vmem:[%s2484_s9 + $0xa0] ss:$20 sps:$4 sm:$0xff]  }
  0x16   : > { %v2316_v42 = vld [vmem:[%s2484_s9 + $0x25c] ss:$20 sps:$4 sm:$0xff]   ;;  %v2319_v45 = vld [vmem:[%s2484_s9 + $0x258] ss:$20 sps:$4 sm:$0xff]   ;;  %v2333_v57 = vld [vmem:[%s2484_s9 + $0x34] ss:$20 sps:$4 sm:$0xff]  }
  0x17   : > { %1967 = vmatpush3.bf16.msra.mxu0 %v2276_v9  ;;  %2254 = vmatpush3.bf16.msra.mxu1 %v2276_v9  ;;  %v2325_v50 = vld [vmem:[%s2484_s9 + $0xa4] ss:$20 sps:$4 sm:$0xff]   ;;  %v2329_v51 = vld [vmem:[%s2484_s9 + $0xc] ss:$20 sps:$4 sm:$0xff]   ;;  %v2327_v53 = vld [vmem:[%s2484_s9 + $0x8] ss:$20 sps:$4 sm:$0xff]  }
  0x18   : > { %1968 = vmatprep.subr.bf16.mxu0 %v2277_v10  ;;  %2247 = vmatprep.subr.bf16.mxu1 %v2277_v10  ;;  %v2331_v55 = vld [vmem:[%s2484_s9 + $0xcc] ss:$20 sps:$4 sm:$0xff]   ;;  %v2362_v56 = vld [vmem:[%s2885_s1 + $0x118] sm:$0xff]   ;;  %v2336_v59 = vld [vmem:[%s2484_s9 + $0x30] ss:$20 sps:$4 sm:$0xff]  }
  0x19   : > { %v2335_v58 = vld [vmem:[%s2484_s9 + $0xc8] ss:$20 sps:$4 sm:$0xff]   ;;  %v2341_v62 = vld [vmem:[%s2484_s9 + $0xf0] ss:$20 sps:$4 sm:$0xff]   ;;  %v2342_v63 = vld [vmem:[%s2484_s9 + $0x58] ss:$20 sps:$4 sm:$0xff]  }
  0x1a   : > { %v2337_v60 = vld [vmem:[%s2484_s9 + $0xf4] ss:$20 sps:$4 sm:$0xff]   ;;  %v2339_v61 = vld [vmem:[%s2484_s9 + $0x5c] ss:$20 sps:$4 sm:$0xff]   ;;  %v2346_v1 = vld [vmem:[%s2484_s9 + $0x84] ss:$20 sps:$4 sm:$0xff]  }
  0x1b   : > { %1969 = vmatpush3.bf16.msra.mxu0 %v2278_v13  ;;  %2255 = vmatpush3.bf16.msra.mxu1 %v2278_v13  ;;  %v2344_v0 = vld [vmem:[%s2484_s9 + $0x11c] ss:$20 sps:$4 sm:$0xff]   ;;  %v2348_v2 = vld [vmem:[%s2484_s9 + $0x118] ss:$20 sps:$4 sm:$0xff]   ;;  %v2349_v3 = vld [vmem:[%s2484_s9 + $0x80] ss:$20 sps:$4 sm:$0xff]  }
  0x1c   : > { %1970 = vmatprep.subr.bf16.mxu0 %v2279_v14  ;;  %2248 = vmatprep.subr.bf16.mxu1 %v2279_v14  ;;  %v2350_v4 = vld [vmem:[%s2484_s9 + $0x144] ss:$20 sps:$4 sm:$0xff]   ;;  %v2352_v5 = vld [vmem:[%s2484_s9 + $0xac] ss:$20 sps:$4 sm:$0xff]   ;;  %v2355_v7 = vld [vmem:[%s2484_s9 + $0xa8] ss:$20 sps:$4 sm:$0xff]  }
  0x1d   : > { %v2354_v6 = vld [vmem:[%s2484_s9 + $0x140] ss:$20 sps:$4 sm:$0xff]   ;;  %v2360_v10 = vld [vmem:[%s2484_s9 + $0x168] ss:$20 sps:$4 sm:$0xff]   ;;  %v2361_v11 = vld [vmem:[%s2484_s9 + $0xd0] ss:$20 sps:$4 sm:$0xff]  }
  0x1e   : > { %v2356_v8 = vld [vmem:[%s2484_s9 + $0x16c] ss:$20 sps:$4 sm:$0xff]   ;;  %v2358_v9 = vld [vmem:[%s2484_s9 + $0xd4] ss:$20 sps:$4 sm:$0xff]   ;;  %v2365_v13 = vld [vmem:[%s2484_s9 + $0xfc] ss:$20 sps:$4 sm:$0xff]  }
  0x1f   : > { %1971 = vmatpush3.bf16.msra.mxu0 %v2280_v15  ;;  %2256 = vmatpush3.bf16.msra.mxu1 %v2280_v15  ;;  %v2363_v12 = vld [vmem:[%s2484_s9 + $0x194] ss:$20 sps:$4 sm:$0xff]   ;;  %v2367_v14 = vld [vmem:[%s2484_s9 + $0x190] ss:$20 sps:$4 sm:$0xff]   ;;  %v2368_v15 = vld [vmem:[%s2484_s9 + $0xf8] ss:$20 sps:$4 sm:$0xff]  }
  0x20   : > { %1972 = vmatprep.subr.bf16.mxu0 %v2281_v16  ;;  %2249 = vmatprep.subr.bf16.mxu1 %v2281_v16  ;;  %v2369_v16 = vld [vmem:[%s2484_s9 + $0x1bc] ss:$20 sps:$4 sm:$0xff]  }
  0x23   : > { %1973 = vmatpush3.bf16.msra.mxu0 %v2282_v17  ;;  %2257 = vmatpush3.bf16.msra.mxu1 %v2282_v17  ;;  %v2371_v17 = vld [vmem:[%s2484_s9 + $0x124] ss:$20 sps:$4 sm:$0xff]  }
  0x24   : > { %2070 = vmatprep.subr.bf16.mxu1 %v2289_v18  ;;  %2202 = vmatprep.subr.bf16.mxu0 %v2292_v19  ;;  %v2373_v18 = vld [vmem:[%s2484_s9 + $0x1b8] ss:$20 sps:$4 sm:$0xff]  }
  0x26   : > { %1051 = vmatmul.mubr.bf16.vlgmr.msra.gmra.mrb[0].mxu0 %v2283_v20  ;;  %1147 = vmatmul.mubr.bf16.vlgmr.msra.gmra.mrb[0].mxu1 %v2286_v21  ;;  %v2375_v20 = vld [vmem:[%s2484_s9 + $0x14c] ss:$20 sps:$4 sm:$0xff]   ;;  %v2377_v21 = vld [vmem:[%s2484_s9 + $0x10] ss:$20 sps:$4 sm:$0xff]  }
  0x27   : > { %2071 = vmatpush3.bf16.msra.mxu1 %v2290_v22  ;;  %2203 = vmatpush3.bf16.msra.mxu0 %v2292_v19  ;;  %v2374_v19 = vld [vmem:[%s2484_s9 + $0x120] ss:$20 sps:$4 sm:$0xff]   ;;  %v2378_v22 = vld [vmem:[%s2484_s9 + $0x148] ss:$20 sps:$4 sm:$0xff]  }
  0x28   : > { %2072 = vmatprep.subr.bf16.mxu1 %v2291_v23  ;;  %1058 = vmatprep.mubr.bf16.mxu0 %v2294_v24  ;;  %v2379_v23 = vld [vmem:[%s2484_s9 + $0x38] ss:$20 sps:$4 sm:$0xff]   ;;  %v2380_v24 = vld [vmem:[%s2484_s9 + $0x174] ss:$20 sps:$4 sm:$0xff]  }
  0x29   : > { %1154 = vmatprep.mubr.bf16.mxu1 %v2296_v25  ;;  %2204 = vmatprep.subr.bf16.mxu0 %v2323_v35  ;;  %v2382_v25 = vld [vmem:[%s2484_s9 + $0x60] ss:$20 sps:$4 sm:$0xff]  }
  0x2b   : > { %2073 = vmatpush3.bf16.msra.mxu1 %v2293_v26  ;;  %2205 = vmatpush3.bf16.msra.mxu0 %v2323_v35  ;;  %v2383_v26 = vld [vmem:[%s2484_s9 + $0x170] ss:$20 sps:$4 sm:$0xff]   ;;  %v2394_v35 = vld [vmem:[%s2484_s9 + $0x128] ss:$20 sps:$4 sm:$0xff]  }
  0x2c   : > { %2074 = vmatprep.subr.bf16.mxu1 %v2300_v28  ;;  %2206 = vmatprep.subr.bf16.mxu0 %v2343_v47  ;;  %v2385_v28 = vld [vmem:[%s2484_s9 + $0x19c] ss:$20 sps:$4 sm:$0xff]  }
  0x2e   : > { %1059 = vmatmul.mubr.bf16.gmra.mrb[4].mxu0 %v2298_v27  ;;  %1155 = vmatmul.mubr.bf16.gmra.mrb[4].mxu1 %v2299_v29  ;;  %v2384_v27 = vld [vmem:[%s2484_s9 + $0x88] ss:$20 sps:$4 sm:$0xff]   ;;  %v2387_v29 = vld [vmem:[%s2484_s9 + $0xb0] ss:$20 sps:$4 sm:$0xff]  }
  0x2f   : > { %2075 = vmatpush3.bf16.msra.mxu1 %v2301_v30  ;;  %1066 = vmatprep.mubr.bf16.mxu0 %v2304_v32  ;;  %v2388_v30 = vld [vmem:[%s2484_s9 + $0x198] ss:$20 sps:$4 sm:$0xff]  }
  0x30   : > { %2076 = vmatprep.subr.bf16.mxu1 %v2302_v31  ;;  %1162 = vmatprep.mubr.bf16.mxu1 %v2306_v33  ;;  %v2389_v31 = vld [vmem:[%s2484_s9 + $0xd8] ss:$20 sps:$4 sm:$0xff]   ;;  %v2392_v33 = vld [vmem:[%s2484_s9 + $0x100] ss:$20 sps:$4 sm:$0xff]  }
  0x31   : > { %2207 = vmatpush3.bf16.msra.mxu0 %v2343_v47  ;;  %v2390_v32 = vld [vmem:[%s2484_s9 + $0x1c4] ss:$20 sps:$4 sm:$0xff]  }
  0x32   : > { %2208 = vmatprep.subr.bf16.mxu0 %v2362_v56  ;;  %v2409_v47 = vld [vmem:[%s2484_s9 + $0x218] ss:$20 sps:$4 sm:$0xff]  }
  0x33   : > { %2077 = vmatpush3.bf16.msra.mxu1 %v2303_v34  ;;  %v2393_v34 = vld [vmem:[%s2484_s9 + $0x1c0] ss:$20 sps:$4 sm:$0xff]  }
  0x34   : > { %2078 = vmatprep.subr.bf16.mxu1 %v2310_v37  ;;  %v2397_v37 = vld [vmem:[%s2484_s9 + $0x150] ss:$20 sps:$4 sm:$0xff]  }
  0x35   : > { %2209 = vmatpush3.bf16.msra.mxu0 %v2362_v56 }
  0x36   : > { %1067 = vmatmul.mubr.bf16.gmra.mrb[8].mxu0 %v2308_v36  ;;  %1163 = vmatmul.mubr.bf16.gmra.mrb[8].mxu1 %v2309_v38  ;;  %v2395_v36 = vld [vmem:[%s2484_s9 + $0x1ec] ss:$20 sps:$4 sm:$0xff]   ;;  %v2398_v38 = vld [vmem:[%s2484_s9 + $0x1e8] ss:$20 sps:$4 sm:$0xff]  }
  0x37   : > { %2079 = vmatpush3.bf16.msra.mxu1 %v2311_v39  ;;  %1074 = vmatprep.mubr.bf16.mxu0 %v2314_v41  ;;  %v2399_v39 = vld [vmem:[%s2484_s9 + $0x178] ss:$20 sps:$4 sm:$0xff]   ;;  %v2402_v41 = vld [vmem:[%s2484_s9 + $0x1a0] ss:$20 sps:$4 sm:$0xff]  }
  0x38   : > { %2080 = vmatprep.subr.bf16.mxu1 %v2312_v40  ;;  %1170 = vmatprep.mubr.bf16.mxu1 %v2316_v42  ;;  %v2400_v40 = vld [vmem:[%s2484_s9 + $0x214] ss:$20 sps:$4 sm:$0xff]   ;;  %v2403_v42 = vld [vmem:[%s2484_s9 + $0x210] ss:$20 sps:$4 sm:$0xff]  }
  0x3b   : > { %2081 = vmatpush3.bf16.msra.mxu1 %v2313_v43  ;;  %v2404_v43 = vld [vmem:[%s2484_s9 + $0x1c8] ss:$20 sps:$4 sm:$0xff]  }
  0x3c   : > { %2082 = vmatprep.subr.bf16.mxu1 %v2320_v46  ;;  %v2408_v46 = vld [vmem:[%s2484_s9 + $0x238] ss:$20 sps:$4 sm:$0xff]  }
  0x3e   : > { %1075 = vmatmul.mubr.bf16.gmra.mrb[12].mxu0 %v2318_v44  ;;  %1171 = vmatmul.mubr.bf16.gmra.mrb[12].mxu1 %v2319_v45  ;;  %v2405_v44 = vld [vmem:[%s2484_s9 + $0x23c] ss:$20 sps:$4 sm:$0xff]  }
  0x3f   : > { %2083 = vmatpush3.bf16.msra.mxu1 %v2321_v48  ;;  %1082 = vmatprep.mubr.bf16.mxu0 %v2325_v50  ;;  %v2407_v45 = vld [vmem:[%s2484_s9 + $0x1f0] ss:$20 sps:$4 sm:$0xff]   ;;  %v2413_v50 = vld [vmem:[%s2484_s9 + $0x260] ss:$20 sps:$4 sm:$0xff]  }
  0x40   : > { %2084 = vmatprep.subr.bf16.mxu1 %v2322_v49  ;;  %1211 = vmatprep.mubr.bf16.mxu1 %v2329_v51  ;;  %v2410_v48 = vld [vmem:[%s2484_s9 + $0x264] ss:$20 sps:$4 sm:$0xff]   ;;  %v2412_v49 = vld [vmem:[%s2484_s9 + $0x240] ss:$20 sps:$4 sm:$0xff]   ;;  %v2414_v51 = vld [vmem:[%s2484_s9 + $0x268] ss:$20 sps:$4 sm:$0xff]  }
  0x43   : > { %2085 = vmatpush3.bf16.msra.mxu1 %v2324_v52 }
  0x46   : > { %1083 = vmatmul.mubr.bf16.gmra.mrb[16].mxu0 %v2330_v54  ;;  %1212 = vmatmul.mubr.bf16.vlgmr.msra.gmra.mrb[16].mxu1 %v2327_v53 }
  0x47   : > { %1090 = vmatprep.mubr.bf16.mxu0 %v2331_v55  ;;  %1219 = vmatprep.mubr.bf16.mxu1 %v2333_v57 }
  0x4e   : > { %1091 = vmatmul.mubr.bf16.gmra.mrb[20].mxu0 %v2335_v58  ;;  %1220 = vmatmul.mubr.bf16.gmra.mrb[20].mxu1 %v2336_v59 }
  0x4f   : > { %1098 = vmatprep.mubr.bf16.mxu0 %v2337_v60  ;;  %1227 = vmatprep.mubr.bf16.mxu1 %v2339_v61 }
  0x56   : > { %1099 = vmatmul.mubr.bf16.gmra.mrb[24].mxu0 %v2341_v62  ;;  %1228 = vmatmul.mubr.bf16.gmra.mrb[24].mxu1 %v2342_v63 }
  0x57   : > { %1106 = vmatprep.mubr.bf16.mxu0 %v2344_v0  ;;  %1235 = vmatprep.mubr.bf16.mxu1 %v2346_v1 }
  0x5e   : > { %1107 = vmatmul.mubr.bf16.gmra.mrb[28].mxu0 %v2348_v2  ;;  %1236 = vmatmul.mubr.bf16.gmra.mrb[28].mxu1 %v2349_v3 }
  0x5f   : > { %1114 = vmatprep.mubr.bf16.mxu0 %v2350_v4  ;;  %1243 = vmatprep.mubr.bf16.mxu1 %v2352_v5 }
  0x66   : > { %1115 = vmatmul.mubr.bf16.gmra.mrb[32].mxu0 %v2354_v6  ;;  %1244 = vmatmul.mubr.bf16.gmra.mrb[32].mxu1 %v2355_v7 }
  0x67   : > { %1122 = vmatprep.mubr.bf16.mxu0 %v2356_v8  ;;  %1251 = vmatprep.mubr.bf16.mxu1 %v2358_v9 }
  0x6e   : > { %1123 = vmatmul.mubr.bf16.gmra.mrb[36].mxu0 %v2360_v10  ;;  %1252 = vmatmul.mubr.bf16.gmra.mrb[36].mxu1 %v2361_v11 }
  0x6f   : > { %1130 = vmatprep.mubr.bf16.mxu0 %v2363_v12  ;;  %1259 = vmatprep.mubr.bf16.mxu1 %v2365_v13 }
  0x76   : > { %1131 = vmatmul.mubr.bf16.gmra.mrb[40].mxu0 %v2367_v14  ;;  %1260 = vmatmul.mubr.bf16.gmra.mrb[40].mxu1 %v2368_v15 }
  0x77   : > { %1138 = vmatprep.mubr.bf16.mxu0 %v2369_v16  ;;  %1267 = vmatprep.mubr.bf16.mxu1 %v2371_v17 }
  0x7e   : > { %1139 = vmatmul.mubr.bf16.gmra.mrb[44].mxu0 %v2373_v18  ;;  %1268 = vmatmul.mubr.bf16.gmra.mrb[44].mxu1 %v2374_v19 }
  0x7f   : > { %1275 = vmatprep.mubr.bf16.mxu1 %v2375_v20  ;;  %2210 = vmatprep.mubr.msk.bf16.mxu0 %vm969_vm0, %v2377_v21 }
  0x86   : > { %1276 = vmatmul.mubr.bf16.gmra.mrb[48].mxu1 %v2378_v22  ;;  %2211 = vmatmul.mubr.msk.bf16.vlgmr.msra.gmra.mrb[48].mxu0 %vm969_vm0, %v2379_v23 }
  0x87   : > { %1283 = vmatprep.mubr.bf16.mxu1 %v2380_v24  ;;  %2214 = vmatprep.mubr.msk.bf16.mxu0 %vm969_vm0, %v2382_v25 }
  0x8e   : > { %1284 = vmatmul.mubr.bf16.gmra.mrb[52].mxu1 %v2383_v26  ;;  %2215 = vmatmul.mubr.msk.bf16.gmra.mrb[52].mxu0 %vm969_vm0, %v2384_v27 }
  0x8f   : > { %1291 = vmatprep.mubr.bf16.mxu1 %v2385_v28  ;;  %2218 = vmatprep.mubr.msk.bf16.mxu0 %vm969_vm0, %v2387_v29 }
  0x96   : > { %1292 = vmatmul.mubr.bf16.gmra.mrb[56].mxu1 %v2388_v30  ;;  %2219 = vmatmul.mubr.msk.bf16.gmra.mrb[56].mxu0 %vm969_vm0, %v2389_v31 }
  0x97   : > { %1299 = vmatprep.mubr.bf16.mxu1 %v2390_v32  ;;  %2222 = vmatprep.mubr.msk.bf16.mxu0 %vm969_vm0, %v2392_v33 }
  0x9e   : > { %1300 = vmatmul.mubr.bf16.gmra.mrb[60].mxu1 %v2393_v34  ;;  %2223 = vmatmul.mubr.msk.bf16.gmra.mrb[60].mxu0 %vm969_vm0, %v2394_v35 }
  0x9f   : > { %1307 = vmatprep.mubr.bf16.mxu1 %v2395_v36  ;;  %2226 = vmatprep.mubr.msk.bf16.mxu0 %vm969_vm0, %v2397_v37 }
  0xa6   : > { %1308 = vmatmul.mubr.bf16.gmra.mrb[64].mxu1 %v2398_v38  ;;  %2227 = vmatmul.mubr.msk.bf16.gmra.mrb[64].mxu0 %vm969_vm0, %v2399_v39  ;;  %v2682_v38 = vld [vmem:[%s2886_s2] ss:$0 sm:$0xff] }
  0xa7   : > { %1315 = vmatprep.mubr.bf16.mxu1 %v2400_v40  ;;  %2230 = vmatprep.mubr.msk.bf16.mxu0 %vm969_vm0, %v2402_v41 }
  0xae   : > { %1316 = vmatmul.mubr.bf16.gmra.mrb[68].mxu1 %v2403_v42  ;;  %2231 = vmatmul.mubr.msk.bf16.gmra.mrb[68].mxu0 %vm969_vm0, %v2404_v43 }
  0xaf   : > { %1323 = vmatprep.mubr.bf16.mxu1 %v2405_v44  ;;  %2234 = vmatprep.mubr.msk.bf16.mxu0 %vm969_vm0, %v2407_v45 }
  0xb6   : > { %1324 = vmatmul.mubr.bf16.gmra.mrb[72].mxu1 %v2408_v46  ;;  %2235 = vmatmul.mubr.msk.bf16.gmra.mrb[72].mxu0 %vm969_vm0, %v2409_v47 }
  0xb7   : > { %1331 = vmatprep.mubr.bf16.mxu1 %v2410_v48  ;;  %2238 = vmatprep.mubr.msk.bf16.mxu0 %vm969_vm0, %v2412_v49 }
  0xbe   : > { %1332 = vmatmul.mubr.bf16.gmra.mrb[76].mxu1 %v2413_v50  ;;  %2239 = vmatmul.mubr.msk.bf16.gmra.mrb[76].mxu0 %vm969_vm0, %v2414_v51 }
  0xf9   : > { %v2046_v52 = vpop.f32.mrb[0].mxu1  ;;  %v1974_v53 = vpop.f32.mrb[0].mxu0 }
  0xfa   : > { %v2047_v54 = vpop.f32.mrb[1].mxu1  ;;  %v1975_v55 = vpop.f32.mrb[1].mxu0 }
  0xfb   : > { %v2663_v56 = vadd.f32 %v2047_v54, %v2046_v52  ;;  %v2049_v57 = vpop.f32.mrb[2].mxu1  ;;  %v1976_v58 = vadd.f32 %v1975_v55, %v1974_v53  ;;  %v1977_v59 = vpop.f32.mrb[2].mxu0 }
  0xfc   : > { %v2050_v60 = vpop.f32.mrb[3].mxu1  ;;  %v1978_v61 = vpop.f32.mrb[3].mxu0 }
  0xfd   : > { %v2665_v62 = vadd.f32 %v2050_v60, %v2049_v57  ;;  %v1979_v63 = vadd.f32 %v1978_v61, %v1977_v59  ;;  %v1053_v41 = vadd.f32 %v1976_v58, %v2682_v38 }
  0xff   : > { %v1056_v48 = vadd.f32 %v1979_v63, %v2682_v38 }
 0x101   : > { %v2052_v0 = vpop.f32.mrb[4].mxu1  ;;  %v1980_v1 = vpop.f32.mrb[4].mxu0 }
 0x102   : > { %v2053_v2 = vpop.f32.mrb[5].mxu1  ;;  %v1981_v3 = vpop.f32.mrb[5].mxu0 }
 0x103   : > { %v2667_v4 = vadd.f32 %v2053_v2, %v2052_v0  ;;  %v2055_v5 = vpop.f32.mrb[6].mxu1  ;;  %v1982_v6 = vadd.f32 %v1981_v3, %v1980_v1  ;;  %v1983_v7 = vpop.f32.mrb[6].mxu0 }
 0x104   : > { %v2056_v8 = vpop.f32.mrb[7].mxu1  ;;  %v1984_v9 = vpop.f32.mrb[7].mxu0 }
 0x105   : > { %v2669_v10 = vadd.f32 %v2056_v8, %v2055_v5  ;;  %v1985_v11 = vadd.f32 %v1984_v9, %v1983_v7  ;;  %v1061_v58 = vadd.f32 %v1982_v6, %v2682_v38 }
 0x107   : > { %v1064_v63 = vadd.f32 %v1985_v11, %v2682_v38 }
 0x109   : > { %v2058_v12 = vpop.f32.mrb[8].mxu1  ;;  %v1986_v13 = vpop.f32.mrb[8].mxu0 }
 0x10a   : > { %v2059_v14 = vpop.f32.mrb[9].mxu1  ;;  %v1987_v15 = vpop.f32.mrb[9].mxu0 }
 0x10b   : > { %v2671_v16 = vadd.f32 %v2059_v14, %v2058_v12  ;;  %v2061_v17 = vpop.f32.mrb[10].mxu1  ;;  %v1988_v18 = vadd.f32 %v1987_v15, %v1986_v13  ;;  %v1989_v19 = vpop.f32.mrb[10].mxu0 }
 0x10c   : > { %v2062_v20 = vpop.f32.mrb[11].mxu1  ;;  %v1990_v21 = vpop.f32.mrb[11].mxu0 }
 0x10d   : > { %v2673_v22 = vadd.f32 %v2062_v20, %v2061_v17  ;;  %v1991_v23 = vadd.f32 %v1990_v21, %v1989_v19  ;;  %v1069_v6 = vadd.f32 %v1988_v18, %v2682_v38 }
 0x10f   : > { %v1072_v11 = vadd.f32 %v1991_v23, %v2682_v38 }
 0x111   : > { %v2064_v24 = vpop.f32.mrb[12].mxu1  ;;  %v1992_v25 = vpop.f32.mrb[12].mxu0 }
 0x112   : > { %v2065_v26 = vpop.f32.mrb[13].mxu1  ;;  %v1993_v27 = vpop.f32.mrb[13].mxu0 }
 0x113   : > { %v2675_v28 = vadd.f32 %v2065_v26, %v2064_v24  ;;  %v2067_v29 = vpop.f32.mrb[14].mxu1  ;;  %v1994_v30 = vadd.f32 %v1993_v27, %v1992_v25  ;;  %v1995_v31 = vpop.f32.mrb[14].mxu0 }
 0x114   : > { %v2068_v32 = vpop.f32.mrb[15].mxu1  ;;  %v1996_v33 = vpop.f32.mrb[15].mxu0 }
 0x115   : > { %v2677_v34 = vadd.f32 %v2068_v32, %v2067_v29  ;;  %v1997_v35 = vadd.f32 %v1996_v33, %v1995_v31  ;;  %v1077_v18 = vadd.f32 %v1994_v30, %v2682_v38 }
 0x117   : > { %v1080_v23 = vadd.f32 %v1997_v35, %v2682_v38 }
 0x119   : > { %v2086_v36 = vpop.f32.mrb[16].mxu1  ;;  %v1998_v37 = vpop.f32.mrb[16].mxu0 }
 0x11a   : > { %v2087_v39 = vpop.f32.mrb[17].mxu1  ;;  %v1999_v40 = vpop.f32.mrb[17].mxu0 }
 0x11b   : > { %v2088_v42 = vadd.f32 %v2087_v39, %v2086_v36  ;;  %v2089_v43 = vpop.f32.mrb[18].mxu1  ;;  %v2000_v44 = vadd.f32 %v1999_v40, %v1998_v37  ;;  %v2001_v45 = vpop.f32.mrb[18].mxu0 }
 0x11c   : > { %v2090_v46 = vpop.f32.mrb[19].mxu1  ;;  %v2002_v47 = vpop.f32.mrb[19].mxu0 }
 0x11d   : > { %v2091_v49 = vadd.f32 %v2090_v46, %v2089_v43  ;;  %v2003_v50 = vadd.f32 %v2002_v47, %v2001_v45  ;;  %v2686_v51 = vadd.f32 %v2088_v42, %v1053_v41  ;;  %v1085_v30 = vadd.f32 %v2000_v44, %v2682_v38 }
 0x11f   : > { %v2688_v52 = vadd.f32 %v2091_v49, %v1056_v48  ;;  %v1088_v35 = vadd.f32 %v2003_v50, %v2682_v38 }
 0x121   : > { %v2092_v53 = vpop.f32.mrb[20].mxu1  ;;  %v2004_v54 = vpop.f32.mrb[20].mxu0 }
 0x122   : > { %v2093_v55 = vpop.f32.mrb[21].mxu1  ;;  %v2005_v57 = vpop.f32.mrb[21].mxu0 }
 0x123   : > { %v2094_v59 = vadd.f32 %v2093_v55, %v2092_v53  ;;  %v2095_v60 = vpop.f32.mrb[22].mxu1  ;;  %v2006_v61 = vadd.f32 %v2005_v57, %v2004_v54  ;;  %v2007_v0 = vpop.f32.mrb[22].mxu0 }
 0x124   : > { %v2096_v1 = vpop.f32.mrb[23].mxu1  ;;  %v2008_v2 = vpop.f32.mrb[23].mxu0 }
 0x125   : > { %v2097_v3 = vadd.f32 %v2096_v1, %v2095_v60  ;;  %v2009_v5 = vadd.f32 %v2008_v2, %v2007_v0  ;;  %v2692_v7 = vadd.f32 %v2094_v59, %v1061_v58  ;;  %v1093_v44 = vadd.f32 %v2006_v61, %v2682_v38 }
 0x127   : > { %v2694_v8 = vadd.f32 %v2097_v3, %v1064_v63  ;;  %v1096_v50 = vadd.f32 %v2009_v5, %v2682_v38 }
 0x129   : > { %v2098_v9 = vpop.f32.mrb[24].mxu1  ;;  %v2010_v12 = vpop.f32.mrb[24].mxu0 }
 0x12a   : > { %v2099_v13 = vpop.f32.mrb[25].mxu1  ;;  %v2011_v14 = vpop.f32.mrb[25].mxu0 }
 0x12b   : > { %v2100_v15 = vadd.f32 %v2099_v13, %v2098_v9  ;;  %v2101_v17 = vpop.f32.mrb[26].mxu1  ;;  %v2012_v19 = vadd.f32 %v2011_v14, %v2010_v12  ;;  %v2013_v20 = vpop.f32.mrb[26].mxu0 }
 0x12c   : > { %v2102_v21 = vpop.f32.mrb[27].mxu1  ;;  %v2014_v24 = vpop.f32.mrb[27].mxu0 }
 0x12d   : > { %v2103_v25 = vadd.f32 %v2102_v21, %v2101_v17  ;;  %v2015_v26 = vadd.f32 %v2014_v24, %v2013_v20  ;;  %v2698_v27 = vadd.f32 %v2100_v15, %v1069_v6 }
 0x12f   : > { %v2700_v29 = vadd.f32 %v2103_v25, %v1072_v11 }
 0x131   : > { %v2104_v31 = vpop.f32.mrb[28].mxu1  ;;  %v2016_v32 = vpop.f32.mrb[28].mxu0 }
 0x132   : > { %v2105_v33 = vpop.f32.mrb[29].mxu1  ;;  %v2017_v36 = vpop.f32.mrb[29].mxu0 }
 0x133   : > { %v2106_v37 = vadd.f32 %v2105_v33, %v2104_v31  ;;  %v2107_v39 = vpop.f32.mrb[30].mxu1  ;;  %v2018_v40 = vadd.f32 %v2017_v36, %v2016_v32  ;;  %v2019_v41 = vpop.f32.mrb[30].mxu0 }
 0x134   : > { %v2108_v42 = vpop.f32.mrb[31].mxu1  ;;  %v2020_v43 = vpop.f32.mrb[31].mxu0 }
 0x135   : > { %v2109_v45 = vadd.f32 %v2108_v42, %v2107_v39  ;;  %v2021_v46 = vadd.f32 %v2020_v43, %v2019_v41  ;;  %v2704_v47 = vadd.f32 %v2106_v37, %v1077_v18  ;;  %v1101_v39 = vadd.f32 %v2012_v19, %v2682_v38 }
 0x137   : > { %v2706_v48 = vadd.f32 %v2109_v45, %v1080_v23 }
 0x139   : > { %v2110_v49 = vpop.f32.mrb[32].mxu1  ;;  %v2022_v53 = vpop.f32.mrb[32].mxu0 }
 0x13a   : > { %v2111_v54 = vpop.f32.mrb[33].mxu1  ;;  %v2023_v55 = vpop.f32.mrb[33].mxu0 }
 0x13b   : > { %v2112_v57 = vadd.f32 %v2111_v54, %v2110_v49  ;;  %v2113_v58 = vpop.f32.mrb[34].mxu1  ;;  %v2709_v59 = vadd.f32 %v2023_v55, %v2022_v53  ;;  %v2025_v60 = vpop.f32.mrb[34].mxu0  ;;  %v1104_v49 = vadd.f32 %v2015_v26, %v2682_v38 }
 0x13c   : > { %v2114_v0 = vpop.f32.mrb[35].mxu1  ;;  %v2026_v1 = vpop.f32.mrb[35].mxu0 }
 0x13d   : > { %v2115_v2 = vadd.f32 %v2114_v0, %v2113_v58  ;;  %v2027_v63 = vadd.f32 %v2026_v1, %v2025_v60  ;;  %v2712_v3 = vadd.f32 %v2112_v57, %v1085_v30  ;;  %v1109_v0 = vadd.f32 %v2018_v40, %v2682_v38 }
 0x13f   : > { %v2714_v9 = vadd.f32 %v2115_v2, %v1088_v35 }
 0x141   : > { %v2116_v12 = vpop.f32.mrb[36].mxu1  ;;  %v2028_v13 = vpop.f32.mrb[36].mxu0 }
 0x142   : > { %v2117_v14 = vpop.f32.mrb[37].mxu1  ;;  %v2029_v6 = vpop.f32.mrb[37].mxu0 }
 0x143   : > { %v2118_v15 = vadd.f32 %v2117_v14, %v2116_v12  ;;  %v2119_v17 = vpop.f32.mrb[38].mxu1  ;;  %v2717_v20 = vadd.f32 %v2029_v6, %v2028_v13  ;;  %v2031_v21 = vpop.f32.mrb[38].mxu0  ;;  %v1112_v14 = vadd.f32 %v2021_v46, %v2682_v38 }
 0x144   : > { %v2120_v24 = vpop.f32.mrb[39].mxu1  ;;  %v2032_v11 = vpop.f32.mrb[39].mxu0 }
 0x145   : > { %v2121_v25 = vadd.f32 %v2120_v24, %v2119_v17  ;;  %v2720_v31 = vadd.f32 %v2032_v11, %v2031_v21  ;;  %v2722_v32 = vadd.f32 %v2118_v15, %v1093_v44 }
 0x147   : > { %v2724_v33 = vadd.f32 %v2121_v25, %v1096_v50  ;;  %v1117_v25 = vadd.f32 %v2709_v59, %v2682_v38 }
 0x149   : > { %v2122_v36 = vpop.f32.mrb[40].mxu1  ;;  %v2034_v18 = vpop.f32.mrb[40].mxu0 }
 0x14a   : > { %v2123_v37 = vpop.f32.mrb[41].mxu1  ;;  %v2035_v61 = vpop.f32.mrb[41].mxu0 }
 0x14b   : > { %v2124_v41 = vadd.f32 %v2123_v37, %v2122_v36  ;;  %v2125_v42 = vpop.f32.mrb[42].mxu1  ;;  %v2727_v43 = vadd.f32 %v2035_v61, %v2034_v18  ;;  %v2037_v23 = vpop.f32.mrb[42].mxu0  ;;  %v1120_v61 = vadd.f32 %v2027_v63, %v2682_v38 }
 0x14c   : > { %v2126_v45 = vpop.f32.mrb[43].mxu1  ;;  %v2038_v5 = vpop.f32.mrb[43].mxu0 }
 0x14d   : > { %v2127_v53 = vadd.f32 %v2126_v45, %v2125_v42  ;;  %v2730_v54 = vadd.f32 %v2038_v5, %v2037_v23  ;;  %v2732_v55 = vadd.f32 %v2124_v41, %v1101_v39 }
 0x14f   : > { %v2734_v30 = vadd.f32 %v2127_v53, %v1104_v49 }
 0x151   : > { %v2128_v57 = vpop.f32.mrb[44].mxu1  ;;  %v2040_v58 = vpop.f32.mrb[44].mxu0 }
 0x152   : > { %v2129_v60 = vpop.f32.mrb[45].mxu1  ;;  %v2041_v19 = vpop.f32.mrb[45].mxu0 }
 0x153   : > { %v2130_v1 = vadd.f32 %v2129_v60, %v2128_v57  ;;  %v2131_v35 = vpop.f32.mrb[46].mxu1  ;;  %v2737_v2 = vadd.f32 %v2041_v19, %v2040_v58  ;;  %v2043_v12 = vpop.f32.mrb[46].mxu0 }
 0x154   : > { %v2132_v26 = vpop.f32.mrb[47].mxu1  ;;  %v2044_v13 = vpop.f32.mrb[47].mxu0 }
 0x155   : > { %v2133_v6 = vadd.f32 %v2132_v26, %v2131_v35  ;;  %v2740_v44 = vadd.f32 %v2044_v13, %v2043_v12  ;;  %v2742_v15 = vadd.f32 %v2130_v1, %v1109_v0  ;;  %v1125_v35 = vadd.f32 %v2717_v20, %v2682_v38 }
 0x157   : > { %v2744_v17 = vadd.f32 %v2133_v6, %v1112_v14  ;;  %v1128_v6 = vadd.f32 %v2720_v31, %v2682_v38 }
 0x159   : > { %v2134_v21 = vpop.f32.mrb[48].mxu1  ;;  %v2212_v24 = vpop.f32.mrb[48].mxu0 }
 0x15a   : > { %v1383_v40 = vadd.f32 %v2212_v24, %v2692_v7  ;;  %v2135_v11 = vpop.f32.mrb[49].mxu1  ;;  %v1374_v50 = vpop.f32.mrb[49].mxu0 }
 0x15b   : > { %v2136_v36 = vadd.f32 %v2135_v11, %v2134_v21  ;;  %v1375_v46 = vadd.f32 %v1374_v50, %v2686_v51  ;;  %v2137_v18 = vpop.f32.mrb[50].mxu1  ;;  %v2213_v37 = vpop.f32.mrb[50].mxu0 }
 0x15c   : > { %v1503_v39 = vmax.f32 %v1383_v40, 0.0  ;;  %v1386_v41 = vadd.f32 %v2213_v37, %v2694_v8  ;;  %v2138_v42 = vpop.f32.mrb[51].mxu1  ;;  %v1377_v23 = vpop.f32.mrb[51].mxu0 }
 0x15d   : > { %v1501_v7 = vmax.f32 %v1375_v46, 0.0  ;;  %v2139_v51 = vadd.f32 %v2138_v42, %v2137_v18  ;;  %v1378_v59 = vadd.f32 %v1377_v23, %v2688_v52  ;;  %v2759_v45 = vadd.f32 %v2136_v36, %v1117_v25 }
 0x15e   : > { %v1928_v63 = vpack.c.bf16 %v1503_v39, %v1503_v39  ;;  %v1504_v5 = vmax.f32 %v1386_v41, 0.0  ;;  %v1133_v23 = vadd.f32 %v2727_v43, %v2682_v38 }
 0x15f   : > { %v1926_v8 = vpack.c.bf16 %v1501_v7, %v1501_v7  ;;  %v1502_v49 = vmax.f32 %v1378_v59, 0.0  ;;  %v2761_v53 = vadd.f32 %v2139_v51, %v1120_v61 }
 0x160   : > { %1664 = vst.msk [vmem:[%s2756_s21 + $0x8] sm:$0xf] %vm1661_vm1, %v1928_v63  ;;  %v1929_v57 = vpack.c.bf16 %v1504_v5, %v1504_v5  ;;  %v1136_v5 = vadd.f32 %v2730_v54, %v2682_v38 }
 0x161   : > { %1662 = vst.msk [vmem:[%s2756_s21] sm:$0xf] %vm1661_vm1, %v1926_v8  ;;  %v1927_v58 = vpack.c.bf16 %v1502_v49, %v1502_v49  ;;  %v2140_v60 = vpop.f32.mrb[52].mxu1  ;;  %v2216_v19 = vpop.f32.mrb[52].mxu0 }
 0x162   : > { %1665 = vst.msk [vmem:[%s2756_s21 + $0xc] sm:$0xf] %vm1661_vm1, %v1929_v57  ;;  %v1399_v52 = vadd.f32 %v2216_v19, %v2704_v47  ;;  %v2141_v0 = vpop.f32.mrb[53].mxu1  ;;  %v1390_v1 = vpop.f32.mrb[53].mxu0 }
 0x163   : > { %1663 = vst.msk [vmem:[%s2756_s21 + $0x4] sm:$0xf] %vm1661_vm1, %v1927_v58  ;;  %v2142_v12 = vadd.f32 %v2141_v0, %v2140_v60  ;;  %v1391_v26 = vadd.f32 %v1390_v1, %v2698_v27  ;;  %v2143_v13 = vpop.f32.mrb[54].mxu1  ;;  %v2217_v14 = vpop.f32.mrb[54].mxu0 }
 0x164   : > { %v1507_v21 = vmax.f32 %v1399_v52, 0.0  ;;  %v1402_v47 = vadd.f32 %v2217_v14, %v2706_v48  ;;  %v2144_v24 = vpop.f32.mrb[55].mxu1  ;;  %v1393_v40 = vpop.f32.mrb[55].mxu0 }
 0x165   : > { %v1505_v11 = vmax.f32 %v1391_v26, 0.0  ;;  %v2145_v20 = vadd.f32 %v2144_v24, %v2143_v13  ;;  %v1394_v50 = vadd.f32 %v1393_v40, %v2700_v29  ;;  %v2779_v25 = vadd.f32 %v2142_v12, %v1125_v35 }
 0x166   : > { %v1932_v27 = vpack.c.bf16 %v1507_v21, %v1507_v21  ;;  %v1508_v36 = vmax.f32 %v1402_v47, 0.0 }
 0x167   : > { %v1930_v46 = vpack.c.bf16 %v1505_v11, %v1505_v11  ;;  %v1506_v18 = vmax.f32 %v1394_v50, 0.0  ;;  %v2781_v37 = vadd.f32 %v2145_v20, %v1128_v6  ;;  %v1141_v6 = vadd.f32 %v2737_v2, %v2682_v38 }
 0x168   : > { %1668 = vst.msk [vmem:[%s2756_s21 + $0x18] sm:$0xf] %vm1661_vm1, %v1932_v27  ;;  %v1933_v31 = vpack.c.bf16 %v1508_v36, %v1508_v36  ;;  %v1144_v11 = vadd.f32 %v2740_v44, %v2682_v38 }
 0x169   : > { %1666 = vst.msk [vmem:[%s2756_s21 + $0x10] sm:$0xf] %vm1661_vm1, %v1930_v46  ;;  %v1931_v48 = vpack.c.bf16 %v1506_v18, %v1506_v18  ;;  %v2146_v61 = vpop.f32.mrb[56].mxu1  ;;  %v2220_v39 = vpop.f32.mrb[56].mxu0 }
 0x16a   : > { %1669 = vst.msk [vmem:[%s2756_s21 + $0x1c] sm:$0xf] %vm1661_vm1, %v1933_v31  ;;  %v1415_v29 = vadd.f32 %v2220_v39, %v2722_v32  ;;  %v2147_v41 = vpop.f32.mrb[57].mxu1  ;;  %v1406_v42 = vpop.f32.mrb[57].mxu0 }
 0x16b   : > { %1667 = vst.msk [vmem:[%s2756_s21 + $0x14] sm:$0xf] %vm1661_vm1, %v1931_v48  ;;  %v2148_v7 = vadd.f32 %v2147_v41, %v2146_v61  ;;  %v1407_v51 = vadd.f32 %v1406_v42, %v2712_v3  ;;  %v2149_v59 = vpop.f32.mrb[58].mxu1  ;;  %v2221_v63 = vpop.f32.mrb[58].mxu0 }
 0x16c   : > { %v1511_v8 = vmax.f32 %v1415_v29, 0.0  ;;  %v1418_v32 = vadd.f32 %v2221_v63, %v2724_v33  ;;  %v2150_v49 = vpop.f32.mrb[59].mxu1  ;;  %v1409_v57 = vpop.f32.mrb[59].mxu0 }
 0x16d   : > { %v1509_v58 = vmax.f32 %v1407_v51, 0.0  ;;  %v2151_v43 = vadd.f32 %v2150_v49, %v2149_v59  ;;  %v1410_v60 = vadd.f32 %v1409_v57, %v2714_v9  ;;  %v2799_v19 = vadd.f32 %v2148_v7, %v1133_v23 }
 0x16e   : > { %v1936_v3 = vpack.c.bf16 %v1511_v8, %v1511_v8  ;;  %v1512_v52 = vmax.f32 %v1418_v32, 0.0  ;;  %v1149_v7 = vadd.f32 %v2663_v56, %v2682_v38  ;;  %v1152_v8 = vadd.f32 %v2665_v62, %v2682_v38 }
 0x16f   : > { %v1934_v0 = vpack.c.bf16 %v1509_v58, %v1509_v58  ;;  %v1510_v1 = vmax.f32 %v1410_v60, 0.0  ;;  %v2801_v35 = vadd.f32 %v2151_v43, %v1136_v5 }
 0x170   : > { %1672 = vst.msk [vmem:[%s2756_s21 + $0x28] sm:$0xf] %vm1661_vm1, %v1936_v3  ;;  %v1937_v54 = vpack.c.bf16 %v1512_v52, %v1512_v52 }
 0x171   : > { %1670 = vst.msk [vmem:[%s2756_s21 + $0x20] sm:$0xf] %vm1661_vm1, %v1934_v0  ;;  %v1935_v33 = vpack.c.bf16 %v1510_v1, %v1510_v1  ;;  %v2152_v12 = vpop.f32.mrb[60].mxu1  ;;  %v2224_v26 = vpop.f32.mrb[60].mxu0 }
 0x172   : > { %1673 = vst.msk [vmem:[%s2756_s21 + $0x2c] sm:$0xf] %vm1661_vm1, %v1937_v54  ;;  %v1431_v9 = vadd.f32 %v2224_v26, %v2742_v15  ;;  %v2153_v13 = vpop.f32.mrb[61].mxu1  ;;  %v1422_v14 = vpop.f32.mrb[61].mxu0 }
 0x173   : > { %1671 = vst.msk [vmem:[%s2756_s21 + $0x24] sm:$0xf] %vm1661_vm1, %v1935_v33  ;;  %v2154_v21 = vadd.f32 %v2153_v13, %v2152_v12  ;;  %v1423_v47 = vadd.f32 %v1422_v14, %v2732_v55  ;;  %v2155_v24 = vpop.f32.mrb[62].mxu1  ;;  %v2225_v40 = vpop.f32.mrb[62].mxu0 }
 0x174   : > { %v1515_v20 = vmax.f32 %v1431_v9, 0.0  ;;  %v1434_v15 = vadd.f32 %v2225_v40, %v2744_v17  ;;  %v2156_v50 = vpop.f32.mrb[63].mxu1  ;;  %v1425_v27 = vpop.f32.mrb[63].mxu0  ;;  %v1157_v9 = vadd.f32 %v2667_v4, %v2682_v38 }
 0x175   : > { %v1513_v36 = vmax.f32 %v1423_v47, 0.0  ;;  %v2157_v2 = vadd.f32 %v2156_v50, %v2155_v24  ;;  %v1426_v46 = vadd.f32 %v1425_v27, %v2734_v30  ;;  %v1302_v18 = vadd.f32 %v2154_v21, %v1141_v6 }
 0x176   : > { %v1940_v31 = vpack.c.bf16 %v1515_v20, %v1515_v20  ;;  %v1516_v55 = vmax.f32 %v1434_v15, 0.0  ;;  %v1160_v47 = vadd.f32 %v2669_v10, %v2682_v38 }
 0x177   : > { %v1938_v48 = vpack.c.bf16 %v1513_v36, %v1513_v36  ;;  %v1514_v61 = vmax.f32 %v1426_v46, 0.0  ;;  %v1305_v39 = vadd.f32 %v2157_v2, %v1144_v11 }
 0x178   : > { %1676 = vst.msk [vmem:[%s2756_s21 + $0x38] sm:$0xf] %vm1661_vm1, %v1940_v31  ;;  %v1941_v44 = vpack.c.bf16 %v1516_v55, %v1516_v55 }
 0x179   : > { %1674 = vst.msk [vmem:[%s2756_s21 + $0x30] sm:$0xf] %vm1661_vm1, %v1938_v48  ;;  %v1939_v17 = vpack.c.bf16 %v1514_v61, %v1514_v61  ;;  %v2158_v29 = vpop.f32.mrb[64].mxu1  ;;  %v2228_v41 = vpop.f32.mrb[64].mxu0 }
 0x17a   : > { %1677 = vst.msk [vmem:[%s2756_s21 + $0x3c] sm:$0xf] %vm1661_vm1, %v1941_v44  ;;  %v1447_v42 = vadd.f32 %v2228_v41, %v2779_v25  ;;  %v2159_v30 = vpop.f32.mrb[65].mxu1  ;;  %v1438_v23 = vpop.f32.mrb[65].mxu0  ;;  %v1165_v44 = vadd.f32 %v2671_v16, %v2682_v38 }
 0x17b   : > { %1675 = vst.msk [vmem:[%s2756_s21 + $0x34] sm:$0xf] %vm1661_vm1, %v1939_v17  ;;  %v2160_v51 = vadd.f32 %v2159_v30, %v2158_v29  ;;  %v1439_v59 = vadd.f32 %v1438_v23, %v2759_v45  ;;  %v2161_v63 = vpop.f32.mrb[66].mxu1  ;;  %v2229_v5 = vpop.f32.mrb[66].mxu0  ;;  %v1168_v30 = vadd.f32 %v2673_v22, %v2682_v38 }
 0x17c   : > { %v1519_v32 = vmax.f32 %v1447_v42, 0.0  ;;  %v1450_v25 = vadd.f32 %v2229_v5, %v2781_v37  ;;  %v2162_v49 = vpop.f32.mrb[67].mxu1  ;;  %v1441_v57 = vpop.f32.mrb[67].mxu0 }
 0x17d   : > { %v1517_v58 = vmax.f32 %v1439_v59, 0.0  ;;  %v2163_v56 = vadd.f32 %v2162_v49, %v2161_v63  ;;  %v1442_v43 = vadd.f32 %v1441_v57, %v2761_v53  ;;  %v1310_v60 = vadd.f32 %v2160_v51, %v1149_v7 }
 0x17e   : > { %v1944_v3 = vpack.c.bf16 %v1519_v32, %v1519_v32  ;;  %v1520_v45 = vmax.f32 %v1450_v25, 0.0 }
 0x17f   : > { %v1942_v52 = vpack.c.bf16 %v1517_v58, %v1517_v58  ;;  %v1518_v0 = vmax.f32 %v1442_v43, 0.0  ;;  %v1313_v1 = vadd.f32 %v2163_v56, %v1152_v8 }
 0x180   : > { %1680 = vst.msk [vmem:[%s2756_s21 + $0x48] sm:$0xf] %vm1661_vm1, %v1944_v3  ;;  %v1945_v62 = vpack.c.bf16 %v1520_v45, %v1520_v45 }
 0x181   : > { %1678 = vst.msk [vmem:[%s2756_s21 + $0x40] sm:$0xf] %vm1661_vm1, %v1942_v52  ;;  %v1943_v37 = vpack.c.bf16 %v1518_v0, %v1518_v0  ;;  %v2164_v54 = vpop.f32.mrb[68].mxu1  ;;  %v2232_v33 = vpop.f32.mrb[68].mxu0  ;;  %v1173_v52 = vadd.f32 %v2675_v28, %v2682_v38 }
 0x182   : > { %1681 = vst.msk [vmem:[%s2756_s21 + $0x4c] sm:$0xf] %vm1661_vm1, %v1945_v62  ;;  %v1463_v12 = vadd.f32 %v2232_v33, %v1302_v18  ;;  %v2165_v26 = vpop.f32.mrb[69].mxu1  ;;  %v1454_v53 = vpop.f32.mrb[69].mxu0 }
 0x183   : > { %1679 = vst.msk [vmem:[%s2756_s21 + $0x44] sm:$0xf] %vm1661_vm1, %v1943_v37  ;;  %v2166_v13 = vadd.f32 %v2165_v26, %v2164_v54  ;;  %v1455_v14 = vadd.f32 %v1454_v53, %v2799_v19  ;;  %v2167_v6 = vpop.f32.mrb[70].mxu1  ;;  %v2233_v21 = vpop.f32.mrb[70].mxu0  ;;  %v1176_v54 = vadd.f32 %v2677_v34, %v2682_v38 }
 0x184   : > { %v1523_v24 = vmax.f32 %v1463_v12, 0.0  ;;  %v1466_v40 = vadd.f32 %v2233_v21, %v1305_v39  ;;  %v2168_v11 = vpop.f32.mrb[71].mxu1  ;;  %v1457_v20 = vpop.f32.mrb[71].mxu0 }
 0x185   : > { %v1521_v15 = vmax.f32 %v1455_v14, 0.0  ;;  %v2169_v50 = vadd.f32 %v2168_v11, %v2167_v6  ;;  %v1458_v4 = vadd.f32 %v1457_v20, %v2801_v35  ;;  %v1318_v27 = vadd.f32 %v2166_v13, %v1157_v9 }
 0x186   : > { %v1948_v36 = vpack.c.bf16 %v1523_v24, %v1523_v24  ;;  %v1524_v19 = vmax.f32 %v1466_v40, 0.0 }
 0x187   : > { %v1946_v2 = vpack.c.bf16 %v1521_v15, %v1521_v15  ;;  %v1522_v46 = vmax.f32 %v1458_v4, 0.0  ;;  %v1321_v18 = vadd.f32 %v2169_v50, %v1160_v47 }
 0x188   : > { %1684 = vst.msk [vmem:[%s2756_s21 + $0x58] sm:$0xf] %vm1661_vm1, %v1948_v36  ;;  %v1949_v10 = vpack.c.bf16 %v1524_v19, %v1524_v19 }
 0x189   : > { %1682 = vst.msk [vmem:[%s2756_s21 + $0x50] sm:$0xf] %vm1661_vm1, %v1946_v2  ;;  %v1947_v31 = vpack.c.bf16 %v1522_v46, %v1522_v46  ;;  %v2170_v55 = vpop.f32.mrb[72].mxu1  ;;  %v2236_v48 = vpop.f32.mrb[72].mxu0 }
 0x18a   : > { %1685 = vst.msk [vmem:[%s2756_s21 + $0x5c] sm:$0xf] %vm1661_vm1, %v1949_v10  ;;  %v1479_v61 = vadd.f32 %v2236_v48, %v1318_v27  ;;  %v2171_v39 = vpop.f32.mrb[73].mxu1  ;;  %v1470_v35 = vpop.f32.mrb[73].mxu0 }
 0x18b   : > { %1683 = vst.msk [vmem:[%s2756_s21 + $0x54] sm:$0xf] %vm1661_vm1, %v1947_v31  ;;  %v2172_v17 = vadd.f32 %v2171_v39, %v2170_v55  ;;  %v1471_v29 = vadd.f32 %v1470_v35, %v1310_v60  ;;  %v2173_v41 = vpop.f32.mrb[74].mxu1  ;;  %v2237_v42 = vpop.f32.mrb[74].mxu0 }
 0x18c   : > { %v1527_v23 = vmax.f32 %v1479_v61, 0.0  ;;  %v1482_v7 = vadd.f32 %v2237_v42, %v1321_v18  ;;  %v2174_v51 = vpop.f32.mrb[75].mxu1  ;;  %v1473_v59 = vpop.f32.mrb[75].mxu0 }
 0x18d   : > { %v1525_v63 = vmax.f32 %v1471_v29, 0.0  ;;  %v2175_v5 = vadd.f32 %v2174_v51, %v2173_v41  ;;  %v1474_v8 = vadd.f32 %v1473_v59, %v1313_v1  ;;  %v1326_v16 = vadd.f32 %v2172_v17, %v1165_v44 }
 0x18e   : > { %v1952_v32 = vpack.c.bf16 %v1527_v23, %v1527_v23  ;;  %v1528_v25 = vmax.f32 %v1482_v7, 0.0 }
 0x18f   : > { %v1950_v49 = vpack.c.bf16 %v1525_v63, %v1525_v63  ;;  %v1526_v57 = vmax.f32 %v1474_v8, 0.0  ;;  %v1329_v58 = vadd.f32 %v2175_v5, %v1168_v30 }
 0x190   : > { %1688 = vst.msk [vmem:[%s2756_s21 + $0x68] sm:$0xf] %vm1661_vm1, %v1952_v32  ;;  %v1953_v56 = vpack.c.bf16 %v1528_v25, %v1528_v25 }
 0x191   : > { %1686 = vst.msk [vmem:[%s2756_s21 + $0x60] sm:$0xf] %vm1661_vm1, %v1950_v49  ;;  %v1951_v22 = vpack.c.bf16 %v1526_v57, %v1526_v57  ;;  %v2176_v43 = vpop.f32.mrb[76].mxu1  ;;  %v2240_v60 = vpop.f32.mrb[76].mxu0 }
 0x192   : > { %1689 = vst.msk [vmem:[%s2756_s21 + $0x6c] sm:$0xf] %vm1661_vm1, %v1953_v56  ;;  %v2177_v3 = vpop.f32.mrb[77].mxu1  ;;  %v1486_v45 = vpop.f32.mrb[77].mxu0 }
 0x193   : > { %1687 = vst.msk [vmem:[%s2756_s21 + $0x64] sm:$0xf] %vm1661_vm1, %v1951_v22  ;;  %v2178_v0 = vadd.f32 %v2177_v3, %v2176_v43  ;;  %v1487_v1 = vadd.f32 %v1486_v45, %v1326_v16  ;;  %v2179_v62 = vpop.f32.mrb[78].mxu1  ;;  %v2241_v37 = vpop.f32.mrb[78].mxu0 }
 0x194   : > { %v2180_v33 = vpop.f32.mrb[79].mxu1  ;;  %v1489_v12 = vpop.f32.mrb[79].mxu0 }
 0x195   : > { %v1334_v26 = vadd.f32 %v2178_v0, %v1173_v52  ;;  %v1529_v53 = vmax.f32 %v1487_v1, 0.0  ;;  %v2181_v9 = vadd.f32 %v2180_v33, %v2179_v62  ;;  %v1490_v13 = vadd.f32 %v1489_v12, %v1329_v58 }
 0x197   : > { %v1495_v28 = vadd.f32 %v2240_v60, %v1334_v26  ;;  %v1954_v14 = vpack.c.bf16 %v1529_v53, %v1529_v53  ;;  %v1337_v6 = vadd.f32 %v2181_v9, %v1176_v54  ;;  %v1530_v21 = vmax.f32 %v1490_v13, 0.0 }
 0x199   : > { %v1531_v47 = vmax.f32 %v1495_v28, 0.0  ;;  %1690 = vst.msk [vmem:[%s2756_s21 + $0x70] sm:$0xf] %vm1661_vm1, %v1954_v14  ;;  %v1498_v24 = vadd.f32 %v2241_v37, %v1337_v6  ;;  %v1955_v40 = vpack.c.bf16 %v1530_v21, %v1530_v21 }
 0x19b   : > { %v1956_v11 = vpack.c.bf16 %v1531_v47, %v1531_v47  ;;  %v1532_v34 = vmax.f32 %v1498_v24, 0.0  ;;  %1691 = vst.msk [vmem:[%s2756_s21 + $0x74] sm:$0xf] %vm1661_vm1, %v1955_v40 }
 0x19d   : > { %1692 = vst.msk [vmem:[%s2756_s21 + $0x78] sm:$0xf] %vm1661_vm1, %v1956_v11  ;;  %v1957_v38 = vpack.c.bf16 %v1532_v34, %v1532_v34 }
 0x19f   : > { %1693 = vst.msk [vmem:[%s2756_s21 + $0x7c] sm:$0xf] %vm1661_vm1, %v1957_v38 }
 0x1a0 PF: > { %s13_s12 = sadd.s32 1, %s2421_s12  }
 0x1a1   : > { %p10_p4 = scmp.ge.s32.totalorder %s13_s12, 4  }
 0x1a3   :  { %12 = sbr.rel (!%p10_p4) target bundleno = 1 (0x1), region = 62 }

// kernel: unet_forward.13
= control target key start
LH: loop header
LB: loop body
LE: loop exit
PB: predicated region body
PF: predicated region fallthrough
CT: control target
= control target key end

     0   :  { %vm558_vm0 = vcmask 523264   ;;  %s1714_s1 = inlined_call_operand.vmem [shape: bf16[576,128], index: 1, kind: input, shape index: {}]   ;;  %s1715_s0 = inlined_call_operand.vmem [shape: bf16[128,576], index: 0, kind: input, shape index: {}]   ;;  %s1716_s2 = inlined_call_operand.vmem [shape: f32[1,128], index: 2, kind: input, shape index: {}]   ;;  %s1717_s3 = inlined_call_operand.vmem [shape: bf16[128,128], index: 3, kind: output, shape index: {}]  }
   0x1   :  { %v1294_v0 = vld [vmem:[%s1714_s1 + $0x40] sm:$0xff]   ;;  %v1298_v4 = vld [vmem:[%s1714_s1 + $0x48] sm:$0xff]   ;;  %v1302_v8 = vld [vmem:[%s1714_s1 + $0x50] sm:$0xff]  }
   0x2   :  { %v1295_v1 = vld [vmem:[%s1714_s1 + $0xc0] sm:$0xff]   ;;  %1122 = vmatprep.subr.bf16.mxu0 %v1294_v0  ;;  %v1299_v5 = vld [vmem:[%s1714_s1 + $0xc8] sm:$0xff]   ;;  %v1303_v9 = vld [vmem:[%s1714_s1 + $0xd0] sm:$0xff]  }
   0x3   :  { %v1296_v2 = vld [vmem:[%s1714_s1] sm:$0xff]   ;;  %1186 = vmatprep.subr.bf16.mxu1 %v1295_v1  ;;  %v1300_v6 = vld [vmem:[%s1714_s1 + $0x8] sm:$0xff]   ;;  %v1304_v10 = vld [vmem:[%s1714_s1 + $0x10] sm:$0xff]  }
   0x4   :  { %v1297_v3 = vld [vmem:[%s1714_s1 + $0x80] sm:$0xff]   ;;  %1123 = vmatpush3.bf16.msra.mxu0 %v1296_v2  ;;  %v1301_v7 = vld [vmem:[%s1714_s1 + $0x88] sm:$0xff]   ;;  %v1305_v11 = vld [vmem:[%s1714_s1 + $0x90] sm:$0xff]  }
   0x5   :  { %1187 = vmatpush3.bf16.msra.mxu1 %v1297_v3  ;;  %1124 = vmatprep.subr.bf16.mxu0 %v1298_v4  ;;  %v1306_v12 = vld [vmem:[%s1714_s1 + $0x58] sm:$0xff]   ;;  %v1310_v16 = vld [vmem:[%s1714_s1 + $0x60] sm:$0xff]   ;;  %v1314_v20 = vld [vmem:[%s1714_s1 + $0x68] sm:$0xff]  }
   0x6   :  { %1188 = vmatprep.subr.bf16.mxu1 %v1299_v5  ;;  %v1307_v13 = vld [vmem:[%s1714_s1 + $0xd8] sm:$0xff]   ;;  %v1311_v17 = vld [vmem:[%s1714_s1 + $0xe0] sm:$0xff]   ;;  %v1315_v21 = vld [vmem:[%s1714_s1 + $0xe8] sm:$0xff]  }
   0x7   :  { %v1308_v14 = vld [vmem:[%s1714_s1 + $0x18] sm:$0xff]   ;;  %v1312_v18 = vld [vmem:[%s1714_s1 + $0x20] sm:$0xff]   ;;  %v1316_v22 = vld [vmem:[%s1714_s1 + $0x28] sm:$0xff]  }
   0x8   :  { %1125 = vmatpush3.bf16.msra.mxu0 %v1300_v6  ;;  %v1309_v15 = vld [vmem:[%s1714_s1 + $0x98] sm:$0xff]   ;;  %v1313_v19 = vld [vmem:[%s1714_s1 + $0xa0] sm:$0xff]   ;;  %v1317_v23 = vld [vmem:[%s1714_s1 + $0xa8] sm:$0xff]  }
   0x9   :  { %1189 = vmatpush3.bf16.msra.mxu1 %v1301_v7  ;;  %1126 = vmatprep.subr.bf16.mxu0 %v1302_v8  ;;  %v1318_v24 = vld [vmem:[%s1714_s1 + $0x70] sm:$0xff]   ;;  %v1322_v28 = vld [vmem:[%s1714_s1 + $0x78] sm:$0xff]   ;;  %v1331_v35 = vld [vmem:[%s1715_s0 + $0xc] ss:$20 sps:$4 sm:$0xff]  }
   0xa   :  { %1190 = vmatprep.subr.bf16.mxu1 %v1303_v9  ;;  %v1319_v25 = vld [vmem:[%s1714_s1 + $0xf0] sm:$0xff]   ;;  %v1323_v29 = vld [vmem:[%s1714_s1 + $0xf8] sm:$0xff]   ;;  %v1332_v36 = vld [vmem:[%s1714_s1 + $0x100] sm:$0xff]   ;;  %712 = vmatprep.mubr.bf16.mxu1 %v1331_v35 }
   0xb   :  { %v1320_v26 = vld [vmem:[%s1714_s1 + $0x30] sm:$0xff]   ;;  %v1324_v30 = vld [vmem:[%s1714_s1 + $0x38] sm:$0xff]   ;;  %v1333_v37 = vld [vmem:[%s1715_s0 + $0x2c] ss:$20 sps:$4 sm:$0xff]  }
   0xc   :  { %1127 = vmatpush3.bf16.msra.mxu0 %v1304_v10  ;;  %v1321_v27 = vld [vmem:[%s1714_s1 + $0xb0] sm:$0xff]   ;;  %v1325_v31 = vld [vmem:[%s1714_s1 + $0xb8] sm:$0xff]   ;;  %v1345_v42 = vld [vmem:[%s1714_s1 + $0x108] sm:$0xff]  }
   0xd   :  { %1191 = vmatpush3.bf16.msra.mxu1 %v1305_v11  ;;  %1128 = vmatprep.subr.bf16.mxu0 %v1306_v12  ;;  %v1326_v32 = vld [vmem:[%s1715_s0] ss:$20 sps:$4 sm:$0xff]   ;;  %v1328_v33 = vld [vmem:[%s1715_s0 + $0x4] ss:$20 sps:$4 sm:$0xff]   ;;  %v1329_v34 = vld [vmem:[%s1715_s0 + $0x8] ss:$20 sps:$4 sm:$0xff]  }
   0xe   :  { %1192 = vmatprep.subr.bf16.mxu1 %v1307_v13  ;;  %615 = vmatprep.mubr.bf16.mxu0 %v1328_v33  ;;  %v1335_v38 = vld [vmem:[%s1715_s0 + $0x34] ss:$20 sps:$4 sm:$0xff]   ;;  %v1338_v40 = vld [vmem:[%s1715_s0 + $0x30] ss:$20 sps:$4 sm:$0xff]   ;;  %v1344_v45 = vld [vmem:[%s1715_s0 + $0x58] ss:$20 sps:$4 sm:$0xff]  }
   0xf   :  { %v1337_v39 = vld [vmem:[%s1715_s0 + $0x28] ss:$20 sps:$4 sm:$0xff]   ;;  %v1343_v44 = vld [vmem:[%s1715_s0 + $0x50] ss:$20 sps:$4 sm:$0xff]   ;;  %v1350_v50 = vld [vmem:[%s1715_s0 + $0x78] ss:$20 sps:$4 sm:$0xff]  }
  0x10   :  { %1129 = vmatpush3.bf16.msra.mxu0 %v1308_v14  ;;  %v1339_v41 = vld [vmem:[%s1715_s0 + $0x54] ss:$20 sps:$4 sm:$0xff]   ;;  %v1341_v43 = vld [vmem:[%s1715_s0 + $0x5c] ss:$20 sps:$4 sm:$0xff]   ;;  %v1348_v48 = vld [vmem:[%s1715_s0 + $0x84] ss:$20 sps:$4 sm:$0xff]  }
  0x11   :  { %1193 = vmatpush3.bf16.msra.mxu1 %v1309_v15  ;;  %1130 = vmatprep.subr.bf16.mxu0 %v1310_v16  ;;  %v1358_v46 = vld [vmem:[%s1714_s1 + $0x110] sm:$0xff]   ;;  %v1371_v49 = vld [vmem:[%s1714_s1 + $0x118] sm:$0xff]   ;;  %v1354_v53 = vld [vmem:[%s1715_s0 + $0xac] ss:$20 sps:$4 sm:$0xff]  }
  0x12   :  { %1194 = vmatprep.subr.bf16.mxu1 %v1311_v17  ;;  %v1346_v47 = vld [vmem:[%s1715_s0 + $0x7c] ss:$20 sps:$4 sm:$0xff]   ;;  %v1351_v51 = vld [vmem:[%s1715_s0 + $0x80] ss:$20 sps:$4 sm:$0xff]   ;;  %v1352_v52 = vld [vmem:[%s1715_s0 + $0xa4] ss:$20 sps:$4 sm:$0xff]  }
  0x13   :  { %v1356_v54 = vld [vmem:[%s1715_s0 + $0xa0] ss:$20 sps:$4 sm:$0xff]   ;;  %v1357_v55 = vld [vmem:[%s1715_s0 + $0xa8] ss:$20 sps:$4 sm:$0xff]   ;;  %v1364_v59 = vld [vmem:[%s1715_s0 + $0xd0] ss:$20 sps:$4 sm:$0xff]  }
  0x14   :  { %1131 = vmatpush3.bf16.msra.mxu0 %v1312_v18  ;;  %v1359_v56 = vld [vmem:[%s1715_s0 + $0xcc] ss:$20 sps:$4 sm:$0xff]   ;;  %v1361_v57 = vld [vmem:[%s1715_s0 + $0xd4] ss:$20 sps:$4 sm:$0xff]   ;;  %v1367_v61 = vld [vmem:[%s1715_s0 + $0xfc] ss:$20 sps:$4 sm:$0xff]  }
  0x15   :  { %1195 = vmatpush3.bf16.msra.mxu1 %v1313_v19  ;;  %1132 = vmatprep.subr.bf16.mxu0 %v1314_v20  ;;  %v1363_v58 = vld [vmem:[%s1715_s0 + $0xc8] ss:$20 sps:$4 sm:$0xff]   ;;  %v1369_v62 = vld [vmem:[%s1715_s0 + $0xf0] ss:$20 sps:$4 sm:$0xff]   ;;  %v1370_v63 = vld [vmem:[%s1715_s0 + $0xf8] ss:$20 sps:$4 sm:$0xff]  }
  0x16   :  { %1196 = vmatprep.subr.bf16.mxu1 %v1315_v21  ;;  %v1365_v60 = vld [vmem:[%s1715_s0 + $0xf4] ss:$20 sps:$4 sm:$0xff]   ;;  %v1372_v0 = vld [vmem:[%s1715_s0 + $0x11c] ss:$20 sps:$4 sm:$0xff]   ;;  %v1374_v1 = vld [vmem:[%s1715_s0 + $0x124] ss:$20 sps:$4 sm:$0xff]  }
  0x17   :  { %v1376_v2 = vld [vmem:[%s1715_s0 + $0x118] ss:$20 sps:$4 sm:$0xff]   ;;  %v1377_v3 = vld [vmem:[%s1715_s0 + $0x120] ss:$20 sps:$4 sm:$0xff]   ;;  %v1378_v4 = vld [vmem:[%s1715_s0 + $0x10] ss:$20 sps:$4 sm:$0xff]  }
  0x18   :  { %1133 = vmatpush3.bf16.msra.mxu0 %v1316_v22  ;;  %v1379_v5 = vld [vmem:[%s1715_s0 + $0xb0] ss:$20 sps:$4 sm:$0xff]   ;;  %v1380_v6 = vld [vmem:[%s1715_s0 + $0x38] ss:$20 sps:$4 sm:$0xff]   ;;  %v1382_v8 = vld [vmem:[%s1715_s0 + $0x60] ss:$20 sps:$4 sm:$0xff]  }
  0x19   :  { %1197 = vmatpush3.bf16.msra.mxu1 %v1317_v23  ;;  %1134 = vmatprep.subr.bf16.mxu0 %v1318_v24  ;;  %v1381_v7 = vld [vmem:[%s1715_s0 + $0xd8] ss:$20 sps:$4 sm:$0xff]   ;;  %v1383_v9 = vld [vmem:[%s1715_s0 + $0x100] ss:$20 sps:$4 sm:$0xff]   ;;  %v1384_v10 = vld [vmem:[%s1715_s0 + $0x88] ss:$20 sps:$4 sm:$0xff]  }
  0x1a   :  { %1198 = vmatprep.subr.bf16.mxu1 %v1319_v25  ;;  %v1385_v11 = vld [vmem:[%s1715_s0 + $0x128] ss:$20 sps:$4 sm:$0xff]   ;;  %v1645_v14 = vld [vmem:[%s1716_s2] ss:$0 sm:$0xff] }
  0x1c   :  { %1135 = vmatpush3.bf16.msra.mxu0 %v1320_v26 }
  0x1d   :  { %1199 = vmatpush3.bf16.msra.mxu1 %v1321_v27  ;;  %1136 = vmatprep.subr.bf16.mxu0 %v1322_v28 }
  0x1e   :  { %1200 = vmatprep.subr.bf16.mxu1 %v1323_v29 }
  0x20   :  { %1137 = vmatpush3.bf16.msra.mxu0 %v1324_v30 }
  0x21   :  { %1201 = vmatpush3.bf16.msra.mxu1 %v1325_v31  ;;  %1262 = vmatprep.subr.bf16.mxu0 %v1332_v36 }
  0x22   :  { %1286 = vmatprep.subr.bf16.mxu1 %v1332_v36 }
  0x23   :  { %616 = vmatmul.mubr.bf16.vlgmr.msra.gmra.mrb[0].mxu0 %v1326_v32 }
  0x24   :  { %713 = vmatmul.mubr.bf16.vlgmr.msra.gmra.mrb[0].mxu1 %v1329_v34  ;;  %1263 = vmatpush3.bf16.msra.mxu0 %v1332_v36 }
  0x25   :  { %1290 = vmatpush3.bf16.msra.mxu1 %v1332_v36  ;;  %623 = vmatprep.mubr.bf16.mxu0 %v1333_v37 }
  0x26   :  { %720 = vmatprep.mubr.bf16.mxu1 %v1335_v38  ;;  %1264 = vmatprep.subr.bf16.mxu0 %v1345_v42 }
  0x27   :  { %1287 = vmatprep.subr.bf16.mxu1 %v1345_v42 }
  0x28   :  { %1265 = vmatpush3.bf16.msra.mxu0 %v1345_v42 }
  0x29   :  { %1291 = vmatpush3.bf16.msra.mxu1 %v1345_v42  ;;  %1266 = vmatprep.subr.bf16.mxu0 %v1358_v46 }
  0x2a   :  { %1288 = vmatprep.subr.bf16.mxu1 %v1358_v46 }
  0x2b   :  { %624 = vmatmul.mubr.bf16.gmra.mrb[4].mxu0 %v1337_v39 }
  0x2c   :  { %721 = vmatmul.mubr.bf16.gmra.mrb[4].mxu1 %v1338_v40  ;;  %631 = vmatprep.mubr.bf16.mxu0 %v1339_v41 }
  0x2d   :  { %728 = vmatprep.mubr.bf16.mxu1 %v1341_v43  ;;  %1267 = vmatpush3.bf16.msra.mxu0 %v1358_v46 }
  0x2e   :  { %1292 = vmatpush3.bf16.msra.mxu1 %v1358_v46  ;;  %1268 = vmatprep.subr.bf16.mxu0 %v1371_v49 }
  0x2f   :  { %1289 = vmatprep.subr.bf16.mxu1 %v1371_v49 }
  0x31   :  { %1269 = vmatpush3.bf16.msra.mxu0 %v1371_v49 }
  0x32   :  { %1293 = vmatpush3.bf16.msra.mxu1 %v1371_v49 }
  0x33   :  { %632 = vmatmul.mubr.bf16.gmra.mrb[8].mxu0 %v1343_v44 }
  0x34   :  { %729 = vmatmul.mubr.bf16.gmra.mrb[8].mxu1 %v1344_v45  ;;  %639 = vmatprep.mubr.bf16.mxu0 %v1346_v47 }
  0x35   :  { %736 = vmatprep.mubr.bf16.mxu1 %v1348_v48 }
  0x3b   :  { %640 = vmatmul.mubr.bf16.gmra.mrb[12].mxu0 %v1350_v50 }
  0x3c   :  { %737 = vmatmul.mubr.bf16.gmra.mrb[12].mxu1 %v1351_v51  ;;  %647 = vmatprep.mubr.bf16.mxu0 %v1352_v52 }
  0x3d   :  { %744 = vmatprep.mubr.bf16.mxu1 %v1354_v53 }
  0x43   :  { %648 = vmatmul.mubr.bf16.gmra.mrb[16].mxu0 %v1356_v54 }
  0x44   :  { %745 = vmatmul.mubr.bf16.gmra.mrb[16].mxu1 %v1357_v55  ;;  %655 = vmatprep.mubr.bf16.mxu0 %v1359_v56 }
  0x45   :  { %752 = vmatprep.mubr.bf16.mxu1 %v1361_v57 }
  0x4b   :  { %656 = vmatmul.mubr.bf16.gmra.mrb[20].mxu0 %v1363_v58 }
  0x4c   :  { %753 = vmatmul.mubr.bf16.gmra.mrb[20].mxu1 %v1364_v59  ;;  %663 = vmatprep.mubr.bf16.mxu0 %v1365_v60 }
  0x4d   :  { %760 = vmatprep.mubr.bf16.mxu1 %v1367_v61 }
  0x53   :  { %664 = vmatmul.mubr.bf16.gmra.mrb[24].mxu0 %v1369_v62 }
  0x54   :  { %761 = vmatmul.mubr.bf16.gmra.mrb[24].mxu1 %v1370_v63  ;;  %671 = vmatprep.mubr.bf16.mxu0 %v1372_v0 }
  0x55   :  { %768 = vmatprep.mubr.bf16.mxu1 %v1374_v1 }
  0x5b   :  { %672 = vmatmul.mubr.bf16.gmra.mrb[28].mxu0 %v1376_v2 }
  0x5c   :  { %769 = vmatmul.mubr.bf16.gmra.mrb[28].mxu1 %v1377_v3  ;;  %1270 = vmatprep.mubr.msk.bf16.mxu0 %vm558_vm0, %v1378_v4 }
  0x5d   :  { %1278 = vmatprep.mubr.msk.bf16.mxu1 %vm558_vm0, %v1379_v5 }
  0x63   :  { %1271 = vmatmul.mubr.msk.bf16.vlgmr.msra.gmra.mrb[32].mxu0 %vm558_vm0, %v1380_v6 }
  0x64   :  { %1279 = vmatmul.mubr.msk.bf16.vlgmr.msra.gmra.mrb[32].mxu1 %vm558_vm0, %v1381_v7  ;;  %1274 = vmatprep.mubr.msk.bf16.mxu0 %vm558_vm0, %v1382_v8 }
  0x65   :  { %1282 = vmatprep.mubr.msk.bf16.mxu1 %vm558_vm0, %v1383_v9 }
  0x6b   :  { %1275 = vmatmul.mubr.msk.bf16.gmra.mrb[36].mxu0 %vm558_vm0, %v1384_v10 }
  0x6c   :  { %1283 = vmatmul.mubr.msk.bf16.gmra.mrb[36].mxu1 %vm558_vm0, %v1385_v11 }
  0xf6   :  { %v1138_v12 = vpop.f32.mrb[0].mxu0 }
  0xf7   :  { %v1202_v13 = vpop.f32.mrb[0].mxu1  ;;  %v1139_v15 = vpop.f32.mrb[1].mxu0 }
  0xf8   :  { %v1140_v16 = vadd.f32 %v1139_v15, %v1138_v12  ;;  %v1203_v17 = vpop.f32.mrb[1].mxu1  ;;  %v1141_v18 = vpop.f32.mrb[2].mxu0 }
  0xf9   :  { %v1204_v19 = vadd.f32 %v1203_v17, %v1202_v13  ;;  %v1205_v20 = vpop.f32.mrb[2].mxu1  ;;  %v1142_v21 = vpop.f32.mrb[3].mxu0 }
  0xfa   :  { %v618_v22 = vadd.f32 %v1140_v16, %v1645_v14  ;;  %v1143_v23 = vadd.f32 %v1142_v21, %v1141_v18  ;;  %v1206_v24 = vpop.f32.mrb[3].mxu1 }
  0xfb   :  { %v1207_v25 = vadd.f32 %v1206_v24, %v1205_v20 }
  0xfc   :  { %v621_v26 = vadd.f32 %v1143_v23, %v1645_v14  ;;  %v1649_v27 = vadd.f32 %v1204_v19, %v618_v22 }
  0xfe   :  { %v1144_v28 = vpop.f32.mrb[4].mxu0  ;;  %v1651_v29 = vadd.f32 %v1207_v25, %v621_v26 }
  0xff   :  { %v1208_v30 = vpop.f32.mrb[4].mxu1  ;;  %v1145_v31 = vpop.f32.mrb[5].mxu0 }
 0x100   :  { %v1146_v32 = vadd.f32 %v1145_v31, %v1144_v28  ;;  %v1209_v33 = vpop.f32.mrb[5].mxu1  ;;  %v1147_v34 = vpop.f32.mrb[6].mxu0 }
 0x101   :  { %v1210_v35 = vadd.f32 %v1209_v33, %v1208_v30  ;;  %v1211_v36 = vpop.f32.mrb[6].mxu1  ;;  %v1148_v37 = vpop.f32.mrb[7].mxu0 }
 0x102   :  { %v626_v38 = vadd.f32 %v1146_v32, %v1645_v14  ;;  %v1149_v39 = vadd.f32 %v1148_v37, %v1147_v34  ;;  %v1212_v40 = vpop.f32.mrb[7].mxu1 }
 0x103   :  { %v1213_v41 = vadd.f32 %v1212_v40, %v1211_v36 }
 0x104   :  { %v629_v42 = vadd.f32 %v1149_v39, %v1645_v14  ;;  %v1655_v43 = vadd.f32 %v1210_v35, %v626_v38 }
 0x106   :  { %v1150_v44 = vpop.f32.mrb[8].mxu0  ;;  %v1657_v45 = vadd.f32 %v1213_v41, %v629_v42 }
 0x107   :  { %v1214_v46 = vpop.f32.mrb[8].mxu1  ;;  %v1151_v47 = vpop.f32.mrb[9].mxu0 }
 0x108   :  { %v1152_v48 = vadd.f32 %v1151_v47, %v1150_v44  ;;  %v1215_v49 = vpop.f32.mrb[9].mxu1  ;;  %v1153_v50 = vpop.f32.mrb[10].mxu0 }
 0x109   :  { %v1216_v51 = vadd.f32 %v1215_v49, %v1214_v46  ;;  %v1217_v52 = vpop.f32.mrb[10].mxu1  ;;  %v1154_v53 = vpop.f32.mrb[11].mxu0 }
 0x10a   :  { %v634_v54 = vadd.f32 %v1152_v48, %v1645_v14  ;;  %v1155_v55 = vadd.f32 %v1154_v53, %v1153_v50  ;;  %v1218_v56 = vpop.f32.mrb[11].mxu1 }
 0x10b   :  { %v1219_v57 = vadd.f32 %v1218_v56, %v1217_v52 }
 0x10c   :  { %v637_v58 = vadd.f32 %v1155_v55, %v1645_v14  ;;  %v1661_v59 = vadd.f32 %v1216_v51, %v634_v54 }
 0x10e   :  { %v1156_v60 = vpop.f32.mrb[12].mxu0  ;;  %v1663_v61 = vadd.f32 %v1219_v57, %v637_v58 }
 0x10f   :  { %v1220_v62 = vpop.f32.mrb[12].mxu1  ;;  %v1157_v63 = vpop.f32.mrb[13].mxu0 }
 0x110   :  { %v1158_v0 = vadd.f32 %v1157_v63, %v1156_v60  ;;  %v1221_v1 = vpop.f32.mrb[13].mxu1  ;;  %v1159_v2 = vpop.f32.mrb[14].mxu0 }
 0x111   :  { %v1222_v3 = vadd.f32 %v1221_v1, %v1220_v62  ;;  %v1223_v4 = vpop.f32.mrb[14].mxu1  ;;  %v1160_v5 = vpop.f32.mrb[15].mxu0 }
 0x112   :  { %v642_v6 = vadd.f32 %v1158_v0, %v1645_v14  ;;  %v1161_v7 = vadd.f32 %v1160_v5, %v1159_v2  ;;  %v1224_v8 = vpop.f32.mrb[15].mxu1 }
 0x113   :  { %v1225_v9 = vadd.f32 %v1224_v8, %v1223_v4 }
 0x114   :  { %v645_v10 = vadd.f32 %v1161_v7, %v1645_v14  ;;  %v1667_v11 = vadd.f32 %v1222_v3, %v642_v6 }
 0x116   :  { %v1162_v12 = vpop.f32.mrb[16].mxu0  ;;  %v1669_v13 = vadd.f32 %v1225_v9, %v645_v10 }
 0x117   :  { %v1226_v15 = vpop.f32.mrb[16].mxu1  ;;  %v1163_v16 = vpop.f32.mrb[17].mxu0 }
 0x118   :  { %v1164_v17 = vadd.f32 %v1163_v16, %v1162_v12  ;;  %v1227_v18 = vpop.f32.mrb[17].mxu1  ;;  %v1165_v19 = vpop.f32.mrb[18].mxu0 }
 0x119   :  { %v1228_v20 = vadd.f32 %v1227_v18, %v1226_v15  ;;  %v1229_v21 = vpop.f32.mrb[18].mxu1  ;;  %v1166_v22 = vpop.f32.mrb[19].mxu0 }
 0x11a   :  { %v650_v23 = vadd.f32 %v1164_v17, %v1645_v14  ;;  %v1167_v24 = vadd.f32 %v1166_v22, %v1165_v19  ;;  %v1230_v25 = vpop.f32.mrb[19].mxu1 }
 0x11b   :  { %v1231_v26 = vadd.f32 %v1230_v25, %v1229_v21 }
 0x11c   :  { %v653_v28 = vadd.f32 %v1167_v24, %v1645_v14  ;;  %v747_v30 = vadd.f32 %v1228_v20, %v650_v23 }
 0x11e   :  { %v1168_v31 = vpop.f32.mrb[20].mxu0  ;;  %v1673_v32 = vadd.f32 %v1231_v26, %v653_v28 }
 0x11f   :  { %v1232_v33 = vpop.f32.mrb[20].mxu1  ;;  %v1169_v34 = vpop.f32.mrb[21].mxu0 }
 0x120   :  { %v1170_v35 = vadd.f32 %v1169_v34, %v1168_v31  ;;  %v1233_v36 = vpop.f32.mrb[21].mxu1  ;;  %v1171_v37 = vpop.f32.mrb[22].mxu0 }
 0x121   :  { %v1234_v38 = vadd.f32 %v1233_v36, %v1232_v33  ;;  %v1235_v39 = vpop.f32.mrb[22].mxu1  ;;  %v1172_v40 = vpop.f32.mrb[23].mxu0 }
 0x122   :  { %v658_v41 = vadd.f32 %v1170_v35, %v1645_v14  ;;  %v1173_v42 = vadd.f32 %v1172_v40, %v1171_v37  ;;  %v1236_v44 = vpop.f32.mrb[23].mxu1 }
 0x123   :  { %v1237_v46 = vadd.f32 %v1236_v44, %v1235_v39 }
 0x124   :  { %v661_v47 = vadd.f32 %v1173_v42, %v1645_v14  ;;  %v755_v48 = vadd.f32 %v1234_v38, %v658_v41 }
 0x126   :  { %v1174_v49 = vpop.f32.mrb[24].mxu0  ;;  %v758_v50 = vadd.f32 %v1237_v46, %v661_v47 }
 0x127   :  { %v1238_v51 = vpop.f32.mrb[24].mxu1  ;;  %v1175_v52 = vpop.f32.mrb[25].mxu0 }
 0x128   :  { %v1176_v53 = vadd.f32 %v1175_v52, %v1174_v49  ;;  %v1239_v54 = vpop.f32.mrb[25].mxu1  ;;  %v1177_v55 = vpop.f32.mrb[26].mxu0 }
 0x129   :  { %v1240_v56 = vadd.f32 %v1239_v54, %v1238_v51  ;;  %v1241_v57 = vpop.f32.mrb[26].mxu1  ;;  %v1178_v58 = vpop.f32.mrb[27].mxu0 }
 0x12a   :  { %v666_v60 = vadd.f32 %v1176_v53, %v1645_v14  ;;  %v1179_v62 = vadd.f32 %v1178_v58, %v1177_v55  ;;  %v1242_v63 = vpop.f32.mrb[27].mxu1 }
 0x12b   :  { %v1243_v0 = vadd.f32 %v1242_v63, %v1241_v57 }
 0x12c   :  { %v669_v1 = vadd.f32 %v1179_v62, %v1645_v14  ;;  %v763_v2 = vadd.f32 %v1240_v56, %v666_v60 }
 0x12e   :  { %v1180_v3 = vpop.f32.mrb[28].mxu0  ;;  %v766_v4 = vadd.f32 %v1243_v0, %v669_v1 }
 0x12f   :  { %v1244_v5 = vpop.f32.mrb[28].mxu1  ;;  %v1181_v6 = vpop.f32.mrb[29].mxu0 }
 0x130   :  { %v1182_v7 = vadd.f32 %v1181_v6, %v1180_v3  ;;  %v1245_v8 = vpop.f32.mrb[29].mxu1  ;;  %v1183_v9 = vpop.f32.mrb[30].mxu0 }
 0x131   :  { %v1246_v10 = vadd.f32 %v1245_v8, %v1244_v5  ;;  %v1247_v12 = vpop.f32.mrb[30].mxu1  ;;  %v1184_v15 = vpop.f32.mrb[31].mxu0 }
 0x132   :  { %v674_v16 = vadd.f32 %v1182_v7, %v1645_v14  ;;  %v1185_v17 = vadd.f32 %v1184_v15, %v1183_v9  ;;  %v1248_v18 = vpop.f32.mrb[31].mxu1 }
 0x133   :  { %v1249_v19 = vadd.f32 %v1248_v18, %v1247_v12 }
 0x134   :  { %v677_v20 = vadd.f32 %v1185_v17, %v1645_v14  ;;  %v771_v21 = vadd.f32 %v1246_v10, %v674_v16 }
 0x136   :  { %v1272_v22 = vpop.f32.mrb[32].mxu0  ;;  %v774_v23 = vadd.f32 %v1249_v19, %v677_v20 }
 0x137   :  { %v820_v24 = vadd.f32 %v1272_v22, %v1655_v43  ;;  %v1280_v25 = vpop.f32.mrb[32].mxu1  ;;  %v811_v26 = vpop.f32.mrb[33].mxu0 }
 0x138   :  { %v852_v28 = vadd.f32 %v1280_v25, %v755_v48  ;;  %v812_v31 = vadd.f32 %v811_v26, %v1649_v27  ;;  %v843_v33 = vpop.f32.mrb[33].mxu1  ;;  %v1273_v34 = vpop.f32.mrb[34].mxu0 }
 0x139   :  { %v844_v35 = vadd.f32 %v843_v33, %v747_v30  ;;  %v823_v36 = vadd.f32 %v1273_v34, %v1657_v45  ;;  %v1281_v37 = vpop.f32.mrb[34].mxu1  ;;  %v814_v38 = vpop.f32.mrb[35].mxu0 }
 0x13a   :  { %v855_v39 = vadd.f32 %v1281_v37, %v758_v50  ;;  %v815_v14 = vadd.f32 %v814_v38, %v1651_v29  ;;  %v846_v40 = vpop.f32.mrb[35].mxu1 }
 0x13b   :  { %v1083_v41 = vpack.c.bf16 %v823_v36, %v820_v24  ;;  %v847_v42 = vadd.f32 %v846_v40, %v1673_v32 }
 0x13c   :  { %v1103_v43 = vpack.c.bf16 %v855_v39, %v852_v28  ;;  %v1078_v44 = vpack.c.bf16 %v815_v14, %v812_v31 }
 0x13d   :  { %1115 = vst [vmem:[%s1717_s3 + $0x8] sm:$0xff] %v1083_v41   ;;  %v1098_v27 = vpack.c.bf16 %v847_v42, %v844_v35 }
 0x13e   :  { %1119 = vst [vmem:[%s1717_s3 + $0x28] sm:$0xff] %v1103_v43   ;;  %1079 = vst [vmem:[%s1717_s3] sm:$0xff] %v1078_v44   ;;  %v1276_v29 = vpop.f32.mrb[36].mxu0 }
 0x13f   :  { %1118 = vst [vmem:[%s1717_s3 + $0x20] sm:$0xff] %v1098_v27   ;;  %v836_v45 = vadd.f32 %v1276_v29, %v1667_v11  ;;  %v1284_v30 = vpop.f32.mrb[36].mxu1  ;;  %v827_v32 = vpop.f32.mrb[37].mxu0 }
 0x140   :  { %v868_v46 = vadd.f32 %v1284_v30, %v771_v21  ;;  %v828_v47 = vadd.f32 %v827_v32, %v1661_v59  ;;  %v859_v48 = vpop.f32.mrb[37].mxu1  ;;  %v1277_v49 = vpop.f32.mrb[38].mxu0 }
 0x141   :  { %v860_v50 = vadd.f32 %v859_v48, %v763_v2  ;;  %v839_v51 = vadd.f32 %v1277_v49, %v1669_v13  ;;  %v1285_v52 = vpop.f32.mrb[38].mxu1  ;;  %v830_v53 = vpop.f32.mrb[39].mxu0 }
 0x142   :  { %v871_v54 = vadd.f32 %v1285_v52, %v774_v23  ;;  %v831_v55 = vadd.f32 %v830_v53, %v1663_v61  ;;  %v862_v56 = vpop.f32.mrb[39].mxu1 }
 0x143   :  { %v1093_v57 = vpack.c.bf16 %v839_v51, %v836_v45  ;;  %v863_v58 = vadd.f32 %v862_v56, %v766_v4 }
 0x144   :  { %v1113_v60 = vpack.c.bf16 %v871_v54, %v868_v46  ;;  %v1088_v11 = vpack.c.bf16 %v831_v55, %v828_v47 }
 0x145   :  { %1117 = vst [vmem:[%s1717_s3 + $0x18] sm:$0xff] %v1093_v57   ;;  %v1108_v59 = vpack.c.bf16 %v863_v58, %v860_v50 }
 0x146   :  { %1121 = vst [vmem:[%s1717_s3 + $0x38] sm:$0xff] %v1113_v60   ;;  %1116 = vst [vmem:[%s1717_s3 + $0x10] sm:$0xff] %v1088_v11  }
 0x147   :  { %1120 = vst [vmem:[%s1717_s3 + $0x30] sm:$0xff] %v1108_v59  }

// kernel: unet_forward.14
= control target key start
LH: loop header
LB: loop body
LE: loop exit
PB: predicated region body
PF: predicated region fallthrough
CT: control target
= control target key end

     0   :  { %s2926_s1 = inlined_call_operand.vmem [shape: bf16[1152,128], index: 1, kind: input, shape index: {}]   ;;  %s2927_s0 = inlined_call_operand.vmem [shape: bf16[128,1152], index: 0, kind: input, shape index: {}]   ;;  %s2928_s2 = inlined_call_operand.vmem [shape: f32[1,128], index: 2, kind: input, shape index: {}]   ;;  %s2929_s3 = inlined_call_operand.vmem [shape: bf16[128,128], index: 3, kind: output, shape index: {}]  }
   0x1   :  { %v2175_v0 = vld [vmem:[%s2926_s1 + $0x40] sm:$0xff]   ;;  %v2179_v4 = vld [vmem:[%s2926_s1 + $0x48] sm:$0xff]   ;;  %v2183_v8 = vld [vmem:[%s2926_s1 + $0x50] sm:$0xff]  }
   0x2   :  { %v2176_v1 = vld [vmem:[%s2926_s1 + $0xc0] sm:$0xff]   ;;  %1855 = vmatprep.subr.bf16.mxu0 %v2175_v0  ;;  %v2180_v5 = vld [vmem:[%s2926_s1 + $0xc8] sm:$0xff]   ;;  %v2184_v9 = vld [vmem:[%s2926_s1 + $0xd0] sm:$0xff]  }
   0x3   :  { %v2177_v2 = vld [vmem:[%s2926_s1] sm:$0xff]   ;;  %1919 = vmatprep.subr.bf16.mxu1 %v2176_v1  ;;  %v2181_v6 = vld [vmem:[%s2926_s1 + $0x8] sm:$0xff]   ;;  %v2185_v10 = vld [vmem:[%s2926_s1 + $0x10] sm:$0xff]  }
   0x4   :  { %v2178_v3 = vld [vmem:[%s2926_s1 + $0x80] sm:$0xff]   ;;  %1856 = vmatpush3.bf16.msra.mxu0 %v2177_v2  ;;  %v2182_v7 = vld [vmem:[%s2926_s1 + $0x88] sm:$0xff]   ;;  %v2186_v11 = vld [vmem:[%s2926_s1 + $0x90] sm:$0xff]  }
   0x5   :  { %1920 = vmatpush3.bf16.msra.mxu1 %v2178_v3  ;;  %1857 = vmatprep.subr.bf16.mxu0 %v2179_v4  ;;  %v2187_v12 = vld [vmem:[%s2926_s1 + $0x58] sm:$0xff]   ;;  %v2191_v16 = vld [vmem:[%s2926_s1 + $0x60] sm:$0xff]   ;;  %v2195_v20 = vld [vmem:[%s2926_s1 + $0x68] sm:$0xff]  }
   0x6   :  { %1921 = vmatprep.subr.bf16.mxu1 %v2180_v5  ;;  %v2188_v13 = vld [vmem:[%s2926_s1 + $0xd8] sm:$0xff]   ;;  %v2192_v17 = vld [vmem:[%s2926_s1 + $0xe0] sm:$0xff]   ;;  %v2196_v21 = vld [vmem:[%s2926_s1 + $0xe8] sm:$0xff]  }
   0x7   :  { %v2189_v14 = vld [vmem:[%s2926_s1 + $0x18] sm:$0xff]   ;;  %v2193_v18 = vld [vmem:[%s2926_s1 + $0x20] sm:$0xff]   ;;  %v2197_v22 = vld [vmem:[%s2926_s1 + $0x28] sm:$0xff]  }
   0x8   :  { %1858 = vmatpush3.bf16.msra.mxu0 %v2181_v6  ;;  %v2190_v15 = vld [vmem:[%s2926_s1 + $0x98] sm:$0xff]   ;;  %v2194_v19 = vld [vmem:[%s2926_s1 + $0xa0] sm:$0xff]   ;;  %v2198_v23 = vld [vmem:[%s2926_s1 + $0xa8] sm:$0xff]  }
   0x9   :  { %1922 = vmatpush3.bf16.msra.mxu1 %v2182_v7  ;;  %1859 = vmatprep.subr.bf16.mxu0 %v2183_v8  ;;  %v2199_v24 = vld [vmem:[%s2926_s1 + $0x70] sm:$0xff]   ;;  %v2203_v28 = vld [vmem:[%s2926_s1 + $0x78] sm:$0xff]   ;;  %v2207_v32 = vld [vmem:[%s2927_s0] ss:$36 sps:$4 sm:$0xff]  }
   0xa   :  { %1923 = vmatprep.subr.bf16.mxu1 %v2184_v9  ;;  %v2200_v25 = vld [vmem:[%s2926_s1 + $0xf0] sm:$0xff]   ;;  %v2204_v29 = vld [vmem:[%s2926_s1 + $0xf8] sm:$0xff]   ;;  %v2209_v33 = vld [vmem:[%s2927_s0 + $0x4] ss:$36 sps:$4 sm:$0xff]  }
   0xb   :  { %v2201_v26 = vld [vmem:[%s2926_s1 + $0x30] sm:$0xff]   ;;  %v2205_v30 = vld [vmem:[%s2926_s1 + $0x38] sm:$0xff]   ;;  %v2210_v34 = vld [vmem:[%s2927_s0 + $0x8] ss:$36 sps:$4 sm:$0xff]   ;;  %1078 = vmatprep.mubr.bf16.mxu0 %v2209_v33 }
   0xc   :  { %1860 = vmatpush3.bf16.msra.mxu0 %v2185_v10  ;;  %v2202_v27 = vld [vmem:[%s2926_s1 + $0xb0] sm:$0xff]   ;;  %v2206_v31 = vld [vmem:[%s2926_s1 + $0xb8] sm:$0xff]   ;;  %v2213_v36 = vld [vmem:[%s2926_s1 + $0x140] sm:$0xff]  }
   0xd   :  { %1924 = vmatpush3.bf16.msra.mxu1 %v2186_v11  ;;  %1861 = vmatprep.subr.bf16.mxu0 %v2187_v12  ;;  %v2212_v35 = vld [vmem:[%s2927_s0 + $0xc] ss:$36 sps:$4 sm:$0xff]   ;;  %v2214_v37 = vld [vmem:[%s2926_s1 + $0x1c0] sm:$0xff]   ;;  %v2219_v41 = vld [vmem:[%s2927_s0 + $0x54] ss:$36 sps:$4 sm:$0xff]  }
   0xe   :  { %1925 = vmatprep.subr.bf16.mxu1 %v2188_v13  ;;  %1175 = vmatprep.mubr.bf16.mxu1 %v2212_v35  ;;  %v2215_v38 = vld [vmem:[%s2926_s1 + $0x100] sm:$0xff]   ;;  %v2217_v40 = vld [vmem:[%s2927_s0 + $0x4c] ss:$36 sps:$4 sm:$0xff]   ;;  %v2227_v48 = vld [vmem:[%s2927_s0 + $0x94] ss:$36 sps:$4 sm:$0xff]  }
   0xf   :  { %v2216_v39 = vld [vmem:[%s2926_s1 + $0x180] sm:$0xff]   ;;  %v2221_v42 = vld [vmem:[%s2927_s0 + $0x48] ss:$36 sps:$4 sm:$0xff]   ;;  %v2222_v43 = vld [vmem:[%s2927_s0 + $0x50] ss:$36 sps:$4 sm:$0xff]  }
  0x10   :  { %1862 = vmatpush3.bf16.msra.mxu0 %v2189_v14  ;;  %v2223_v44 = vld [vmem:[%s2926_s1 + $0x148] sm:$0xff]   ;;  %v2229_v49 = vld [vmem:[%s2927_s0 + $0x9c] ss:$36 sps:$4 sm:$0xff]   ;;  %v2231_v50 = vld [vmem:[%s2927_s0 + $0x90] ss:$36 sps:$4 sm:$0xff]  }
  0x11   :  { %1926 = vmatpush3.bf16.msra.mxu1 %v2190_v15  ;;  %1863 = vmatprep.subr.bf16.mxu0 %v2191_v16  ;;  %v2224_v45 = vld [vmem:[%s2926_s1 + $0x1c8] sm:$0xff]   ;;  %v2232_v51 = vld [vmem:[%s2927_s0 + $0x98] ss:$36 sps:$4 sm:$0xff]   ;;  %v2233_v52 = vld [vmem:[%s2926_s1 + $0x150] sm:$0xff]  }
  0x12   :  { %1927 = vmatprep.subr.bf16.mxu1 %v2192_v17  ;;  %v2225_v46 = vld [vmem:[%s2926_s1 + $0x108] sm:$0xff]   ;;  %v2234_v53 = vld [vmem:[%s2926_s1 + $0x1d0] sm:$0xff]   ;;  %v2237_v56 = vld [vmem:[%s2927_s0 + $0xdc] ss:$36 sps:$4 sm:$0xff]  }
  0x13   :  { %v2226_v47 = vld [vmem:[%s2926_s1 + $0x188] sm:$0xff]   ;;  %v2235_v54 = vld [vmem:[%s2926_s1 + $0x110] sm:$0xff]   ;;  %v2241_v58 = vld [vmem:[%s2927_s0 + $0xd8] ss:$36 sps:$4 sm:$0xff]  }
  0x14   :  { %1864 = vmatpush3.bf16.msra.mxu0 %v2193_v18  ;;  %v2236_v55 = vld [vmem:[%s2926_s1 + $0x190] sm:$0xff]   ;;  %v2239_v57 = vld [vmem:[%s2927_s0 + $0xe4] ss:$36 sps:$4 sm:$0xff]   ;;  %v2243_v60 = vld [vmem:[%s2926_s1 + $0x158] sm:$0xff]  }
  0x15   :  { %1928 = vmatpush3.bf16.msra.mxu1 %v2194_v19  ;;  %1865 = vmatprep.subr.bf16.mxu0 %v2195_v20  ;;  %v2242_v59 = vld [vmem:[%s2927_s0 + $0xe0] ss:$36 sps:$4 sm:$0xff]   ;;  %v2244_v61 = vld [vmem:[%s2926_s1 + $0x1d8] sm:$0xff]   ;;  %v2249_v1 = vld [vmem:[%s2927_s0 + $0x12c] ss:$36 sps:$4 sm:$0xff]  }
  0x16   :  { %1929 = vmatprep.subr.bf16.mxu1 %v2196_v21  ;;  %v2245_v62 = vld [vmem:[%s2926_s1 + $0x118] sm:$0xff]   ;;  %v2247_v0 = vld [vmem:[%s2927_s0 + $0x124] ss:$36 sps:$4 sm:$0xff]   ;;  %v2257_v8 = vld [vmem:[%s2927_s0 + $0x16c] ss:$36 sps:$4 sm:$0xff]  }
  0x17   :  { %v2246_v63 = vld [vmem:[%s2926_s1 + $0x198] sm:$0xff]   ;;  %v2251_v2 = vld [vmem:[%s2927_s0 + $0x120] ss:$36 sps:$4 sm:$0xff]   ;;  %v2252_v4 = vld [vmem:[%s2927_s0 + $0x128] ss:$36 sps:$4 sm:$0xff]  }
  0x18   :  { %1866 = vmatpush3.bf16.msra.mxu0 %v2197_v22  ;;  %v2253_v3 = vld [vmem:[%s2926_s1 + $0x160] sm:$0xff]   ;;  %v2259_v9 = vld [vmem:[%s2927_s0 + $0x174] ss:$36 sps:$4 sm:$0xff]   ;;  %v2263_v10 = vld [vmem:[%s2926_s1 + $0x168] sm:$0xff]  }
  0x19   :  { %1930 = vmatpush3.bf16.msra.mxu1 %v2198_v23  ;;  %1867 = vmatprep.subr.bf16.mxu0 %v2199_v24  ;;  %v2254_v5 = vld [vmem:[%s2926_s1 + $0x1e0] sm:$0xff]   ;;  %v2264_v11 = vld [vmem:[%s2926_s1 + $0x1e8] sm:$0xff]   ;;  %v2262_v15 = vld [vmem:[%s2927_s0 + $0x170] ss:$36 sps:$4 sm:$0xff]  }
  0x1a   :  { %1931 = vmatprep.subr.bf16.mxu1 %v2200_v25  ;;  %v2255_v6 = vld [vmem:[%s2926_s1 + $0x120] sm:$0xff]   ;;  %v2261_v12 = vld [vmem:[%s2927_s0 + $0x168] ss:$36 sps:$4 sm:$0xff]   ;;  %v2267_v16 = vld [vmem:[%s2927_s0 + $0x1b4] ss:$36 sps:$4 sm:$0xff]  }
  0x1b   :  { %v2256_v7 = vld [vmem:[%s2926_s1 + $0x1a0] sm:$0xff]   ;;  %v2265_v13 = vld [vmem:[%s2926_s1 + $0x128] sm:$0xff]   ;;  %v2273_v18 = vld [vmem:[%s2926_s1 + $0x170] sm:$0xff]  }
  0x1c   :  { %1868 = vmatpush3.bf16.msra.mxu0 %v2201_v26  ;;  %v2266_v14 = vld [vmem:[%s2926_s1 + $0x1a8] sm:$0xff]   ;;  %v2269_v17 = vld [vmem:[%s2927_s0 + $0x1bc] ss:$36 sps:$4 sm:$0xff]   ;;  %v2274_v19 = vld [vmem:[%s2926_s1 + $0x1f0] sm:$0xff]  }
  0x1d   :  { %1932 = vmatpush3.bf16.msra.mxu1 %v2202_v27  ;;  %1869 = vmatprep.subr.bf16.mxu0 %v2203_v28  ;;  %v2275_v20 = vld [vmem:[%s2926_s1 + $0x130] sm:$0xff]   ;;  %v2272_v23 = vld [vmem:[%s2927_s0 + $0x1b8] ss:$36 sps:$4 sm:$0xff]   ;;  %v2279_v25 = vld [vmem:[%s2927_s0 + $0x204] ss:$36 sps:$4 sm:$0xff]  }
  0x1e   :  { %1933 = vmatprep.subr.bf16.mxu1 %v2204_v29  ;;  %v2276_v21 = vld [vmem:[%s2926_s1 + $0x1b0] sm:$0xff]   ;;  %v2277_v24 = vld [vmem:[%s2927_s0 + $0x1fc] ss:$36 sps:$4 sm:$0xff]  }
  0x1f   :  { %v2271_v22 = vld [vmem:[%s2927_s0 + $0x1b0] ss:$36 sps:$4 sm:$0xff]   ;;  %v2283_v26 = vld [vmem:[%s2926_s1 + $0x178] sm:$0xff]  }
  0x20   :  { %1870 = vmatpush3.bf16.msra.mxu0 %v2205_v30  ;;  %v2284_v27 = vld [vmem:[%s2926_s1 + $0x1f8] sm:$0xff]   ;;  %v2287_v35 = vld [vmem:[%s2927_s0 + $0x10] ss:$36 sps:$4 sm:$0xff]  }
  0x21   :  { %1934 = vmatpush3.bf16.msra.mxu1 %v2206_v31  ;;  %1983 = vmatprep.subr.bf16.mxu0 %v2213_v36  ;;  %v2285_v28 = vld [vmem:[%s2926_s1 + $0x138] sm:$0xff]   ;;  %v2282_v31 = vld [vmem:[%s2927_s0 + $0x200] ss:$36 sps:$4 sm:$0xff]  }
  0x22   :  { %2047 = vmatprep.subr.bf16.mxu1 %v2214_v37  ;;  %v2286_v29 = vld [vmem:[%s2926_s1 + $0x1b8] sm:$0xff]  }
  0x23   :  { %1079 = vmatmul.mubr.bf16.vlgmr.msra.gmra.mrb[0].mxu0 %v2207_v32  ;;  %v2281_v30 = vld [vmem:[%s2927_s0 + $0x1f8] ss:$36 sps:$4 sm:$0xff]   ;;  %v2293_v32 = vld [vmem:[%s2926_s1 + $0x200] sm:$0xff]  }
  0x24   :  { %1176 = vmatmul.mubr.bf16.vlgmr.msra.gmra.mrb[0].mxu1 %v2210_v34  ;;  %1984 = vmatpush3.bf16.msra.mxu0 %v2215_v38  ;;  %v2289_v33 = vld [vmem:[%s2927_s0 + $0x14] ss:$36 sps:$4 sm:$0xff]   ;;  %v2292_v34 = vld [vmem:[%s2927_s0 + $0x1c] ss:$36 sps:$4 sm:$0xff]   ;;  %v2296_v38 = vld [vmem:[%s2927_s0 + $0x64] ss:$36 sps:$4 sm:$0xff]  }
  0x25   :  { %2048 = vmatpush3.bf16.msra.mxu1 %v2216_v39  ;;  %1086 = vmatprep.mubr.bf16.mxu0 %v2217_v40  ;;  %v2290_v36 = vld [vmem:[%s2927_s0 + $0x18] ss:$36 sps:$4 sm:$0xff]   ;;  %v2300_v39 = vld [vmem:[%s2926_s1 + $0x208] sm:$0xff]   ;;  %v2307_v40 = vld [vmem:[%s2926_s1 + $0x210] sm:$0xff]  }
  0x26   :  { %1183 = vmatprep.mubr.bf16.mxu1 %v2219_v41  ;;  %1985 = vmatprep.subr.bf16.mxu0 %v2223_v44  ;;  %v2294_v37 = vld [vmem:[%s2927_s0 + $0x5c] ss:$36 sps:$4 sm:$0xff]   ;;  %v2303_v44 = vld [vmem:[%s2927_s0 + $0xac] ss:$36 sps:$4 sm:$0xff]  }
  0x27   :  { %2049 = vmatprep.subr.bf16.mxu1 %v2224_v45  ;;  %v2298_v41 = vld [vmem:[%s2927_s0 + $0x58] ss:$36 sps:$4 sm:$0xff]  }
  0x28   :  { %1986 = vmatpush3.bf16.msra.mxu0 %v2225_v46  ;;  %v2314_v45 = vld [vmem:[%s2926_s1 + $0x218] sm:$0xff]   ;;  %v2321_v46 = vld [vmem:[%s2926_s1 + $0x220] sm:$0xff]  }
  0x29   :  { %2050 = vmatpush3.bf16.msra.mxu1 %v2226_v47  ;;  %1987 = vmatprep.subr.bf16.mxu0 %v2233_v52  ;;  %v2305_v47 = vld [vmem:[%s2927_s0 + $0xa0] ss:$36 sps:$4 sm:$0xff]   ;;  %v2312_v52 = vld [vmem:[%s2927_s0 + $0xe8] ss:$36 sps:$4 sm:$0xff]  }
  0x2a   :  { %2051 = vmatprep.subr.bf16.mxu1 %v2234_v53  ;;  %v2335_v53 = vld [vmem:[%s2926_s1 + $0x230] sm:$0xff]  }
  0x2b   :  { %1087 = vmatmul.mubr.bf16.gmra.mrb[4].mxu0 %v2221_v42  ;;  %v2299_v42 = vld [vmem:[%s2927_s0 + $0x60] ss:$36 sps:$4 sm:$0xff]  }
  0x2c   :  { %1184 = vmatmul.mubr.bf16.gmra.mrb[4].mxu1 %v2222_v43  ;;  %1094 = vmatprep.mubr.bf16.mxu0 %v2227_v48  ;;  %v2301_v43 = vld [vmem:[%s2927_s0 + $0xa4] ss:$36 sps:$4 sm:$0xff]  }
  0x2d   :  { %1191 = vmatprep.mubr.bf16.mxu1 %v2229_v49  ;;  %1988 = vmatpush3.bf16.msra.mxu0 %v2235_v54  ;;  %v2306_v48 = vld [vmem:[%s2927_s0 + $0xa8] ss:$36 sps:$4 sm:$0xff]   ;;  %v2313_v54 = vld [vmem:[%s2927_s0 + $0xf0] ss:$36 sps:$4 sm:$0xff]  }
  0x2e   :  { %2052 = vmatpush3.bf16.msra.mxu1 %v2236_v55  ;;  %1989 = vmatprep.subr.bf16.mxu0 %v2243_v60  ;;  %v2308_v49 = vld [vmem:[%s2927_s0 + $0xec] ss:$36 sps:$4 sm:$0xff]   ;;  %v2315_v55 = vld [vmem:[%s2927_s0 + $0x134] ss:$36 sps:$4 sm:$0xff]   ;;  %v2322_v60 = vld [vmem:[%s2927_s0 + $0x17c] ss:$36 sps:$4 sm:$0xff]  }
  0x2f   :  { %2053 = vmatprep.subr.bf16.mxu1 %v2244_v61  ;;  %v2324_v61 = vld [vmem:[%s2927_s0 + $0x184] ss:$36 sps:$4 sm:$0xff]  }
  0x31   :  { %1990 = vmatpush3.bf16.msra.mxu0 %v2245_v62  ;;  %v2326_v62 = vld [vmem:[%s2927_s0 + $0x178] ss:$36 sps:$4 sm:$0xff]  }
  0x32   :  { %2054 = vmatpush3.bf16.msra.mxu1 %v2246_v63  ;;  %1991 = vmatprep.subr.bf16.mxu0 %v2253_v3  ;;  %v2327_v63 = vld [vmem:[%s2927_s0 + $0x180] ss:$36 sps:$4 sm:$0xff]   ;;  %v2334_v3 = vld [vmem:[%s2927_s0 + $0x1c8] ss:$36 sps:$4 sm:$0xff]  }
  0x33   :  { %1095 = vmatmul.mubr.bf16.gmra.mrb[8].mxu0 %v2231_v50  ;;  %2055 = vmatprep.subr.bf16.mxu1 %v2254_v5  ;;  %v2310_v50 = vld [vmem:[%s2927_s0 + $0xf4] ss:$36 sps:$4 sm:$0xff]  }
  0x34   :  { %1192 = vmatmul.mubr.bf16.gmra.mrb[8].mxu1 %v2232_v51  ;;  %1102 = vmatprep.mubr.bf16.mxu0 %v2237_v56  ;;  %v2328_v51 = vld [vmem:[%s2926_s1 + $0x228] sm:$0xff]   ;;  %v2317_v56 = vld [vmem:[%s2927_s0 + $0x13c] ss:$36 sps:$4 sm:$0xff]   ;;  %v2338_v5 = vld [vmem:[%s2927_s0 + $0x214] ss:$36 sps:$4 sm:$0xff]  }
  0x35   :  { %1199 = vmatprep.mubr.bf16.mxu1 %v2239_v57  ;;  %1992 = vmatpush3.bf16.msra.mxu0 %v2255_v6  ;;  %v2342_v57 = vld [vmem:[%s2926_s1 + $0x238] sm:$0xff]   ;;  %v2340_v6 = vld [vmem:[%s2927_s0 + $0x208] ss:$36 sps:$4 sm:$0xff]  }
  0x36   :  { %2056 = vmatpush3.bf16.msra.mxu1 %v2256_v7  ;;  %1993 = vmatprep.subr.bf16.mxu0 %v2263_v10  ;;  %v2341_v7 = vld [vmem:[%s2927_s0 + $0x210] ss:$36 sps:$4 sm:$0xff]   ;;  %v2345_v10 = vld [vmem:[%s2927_s0 + $0x68] ss:$36 sps:$4 sm:$0xff]  }
  0x37   :  { %2057 = vmatprep.subr.bf16.mxu1 %v2264_v11  ;;  %v2346_v11 = vld [vmem:[%s2927_s0 + $0x188] ss:$36 sps:$4 sm:$0xff]  }
  0x39   :  { %1994 = vmatpush3.bf16.msra.mxu0 %v2265_v13  ;;  %v2348_v13 = vld [vmem:[%s2927_s0 + $0x1d0] ss:$36 sps:$4 sm:$0xff]  }
  0x3a   :  { %2058 = vmatpush3.bf16.msra.mxu1 %v2266_v14  ;;  %1995 = vmatprep.subr.bf16.mxu0 %v2273_v18  ;;  %v2349_v14 = vld [vmem:[%s2927_s0 + $0xf8] ss:$36 sps:$4 sm:$0xff]   ;;  %v2806_v18 = vld [vmem:[%s2928_s2] ss:$0 sm:$0xff] }
  0x3b   :  { %1103 = vmatmul.mubr.bf16.gmra.mrb[12].mxu0 %v2241_v58  ;;  %2059 = vmatprep.subr.bf16.mxu1 %v2274_v19  ;;  %v2319_v58 = vld [vmem:[%s2927_s0 + $0x130] ss:$36 sps:$4 sm:$0xff]  }
  0x3c   :  { %1200 = vmatmul.mubr.bf16.gmra.mrb[12].mxu1 %v2242_v59  ;;  %1110 = vmatprep.mubr.bf16.mxu0 %v2247_v0  ;;  %v2320_v59 = vld [vmem:[%s2927_s0 + $0x138] ss:$36 sps:$4 sm:$0xff]   ;;  %v2329_v0 = vld [vmem:[%s2927_s0 + $0x1c4] ss:$36 sps:$4 sm:$0xff]  }
  0x3d   :  { %1207 = vmatprep.mubr.bf16.mxu1 %v2249_v1  ;;  %1996 = vmatpush3.bf16.msra.mxu0 %v2275_v20  ;;  %v2331_v1 = vld [vmem:[%s2927_s0 + $0x1cc] ss:$36 sps:$4 sm:$0xff]  }
  0x3e   :  { %2060 = vmatpush3.bf16.msra.mxu1 %v2276_v21  ;;  %1997 = vmatprep.subr.bf16.mxu0 %v2283_v26 }
  0x3f   :  { %2061 = vmatprep.subr.bf16.mxu1 %v2284_v27 }
  0x41   :  { %1998 = vmatpush3.bf16.msra.mxu0 %v2285_v28 }
  0x42   :  { %2062 = vmatpush3.bf16.msra.mxu1 %v2286_v29  ;;  %2127 = vmatprep.subr.bf16.mxu0 %v2293_v32 }
  0x43   :  { %1111 = vmatmul.mubr.bf16.gmra.mrb[16].mxu0 %v2251_v2  ;;  %2159 = vmatprep.subr.bf16.mxu1 %v2293_v32  ;;  %v2333_v2 = vld [vmem:[%s2927_s0 + $0x1c0] ss:$36 sps:$4 sm:$0xff]  }
  0x44   :  { %1208 = vmatmul.mubr.bf16.gmra.mrb[16].mxu1 %v2252_v4  ;;  %1118 = vmatprep.mubr.bf16.mxu0 %v2257_v8  ;;  %v2336_v4 = vld [vmem:[%s2927_s0 + $0x20c] ss:$36 sps:$4 sm:$0xff]   ;;  %v2343_v8 = vld [vmem:[%s2927_s0 + $0x20] ss:$36 sps:$4 sm:$0xff]  }
  0x45   :  { %1215 = vmatprep.mubr.bf16.mxu1 %v2259_v9  ;;  %v2344_v9 = vld [vmem:[%s2927_s0 + $0x140] ss:$36 sps:$4 sm:$0xff]  }
  0x4b   :  { %1119 = vmatmul.mubr.bf16.gmra.mrb[20].mxu0 %v2261_v12  ;;  %v2347_v12 = vld [vmem:[%s2927_s0 + $0xb0] ss:$36 sps:$4 sm:$0xff]  }
  0x4c   :  { %1216 = vmatmul.mubr.bf16.gmra.mrb[20].mxu1 %v2262_v15  ;;  %1126 = vmatprep.mubr.bf16.mxu0 %v2267_v16  ;;  %v2350_v15 = vld [vmem:[%s2927_s0 + $0x218] ss:$36 sps:$4 sm:$0xff]  }
  0x4d   :  { %1223 = vmatprep.mubr.bf16.mxu1 %v2269_v17 }
  0x53   :  { %1127 = vmatmul.mubr.bf16.gmra.mrb[24].mxu0 %v2271_v22 }
  0x54   :  { %1224 = vmatmul.mubr.bf16.gmra.mrb[24].mxu1 %v2272_v23  ;;  %1134 = vmatprep.mubr.bf16.mxu0 %v2277_v24 }
  0x55   :  { %1231 = vmatprep.mubr.bf16.mxu1 %v2279_v25 }
  0x5b   :  { %1135 = vmatmul.mubr.bf16.gmra.mrb[28].mxu0 %v2281_v30 }
  0x5c   :  { %1232 = vmatmul.mubr.bf16.gmra.mrb[28].mxu1 %v2282_v31  ;;  %1272 = vmatprep.mubr.bf16.mxu0 %v2289_v33 }
  0x5d   :  { %1369 = vmatprep.mubr.bf16.mxu1 %v2292_v34 }
  0x63   :  { %1273 = vmatmul.mubr.bf16.vlgmr.msra.gmra.mrb[32].mxu0 %v2287_v35 }
  0x64   :  { %1370 = vmatmul.mubr.bf16.vlgmr.msra.gmra.mrb[32].mxu1 %v2290_v36  ;;  %2128 = vmatpush3.bf16.msra.mxu0 %v2293_v32 }
  0x65   :  { %2167 = vmatpush3.bf16.msra.mxu1 %v2293_v32  ;;  %1280 = vmatprep.mubr.bf16.mxu0 %v2294_v37 }
  0x66   :  { %1377 = vmatprep.mubr.bf16.mxu1 %v2296_v38  ;;  %2129 = vmatprep.subr.bf16.mxu0 %v2300_v39 }
  0x67   :  { %2160 = vmatprep.subr.bf16.mxu1 %v2300_v39 }
  0x68   :  { %2130 = vmatpush3.bf16.msra.mxu0 %v2300_v39 }
  0x69   :  { %2168 = vmatpush3.bf16.msra.mxu1 %v2300_v39  ;;  %2131 = vmatprep.subr.bf16.mxu0 %v2307_v40 }
  0x6a   :  { %2161 = vmatprep.subr.bf16.mxu1 %v2307_v40 }
  0x6b   :  { %1281 = vmatmul.mubr.bf16.gmra.mrb[36].mxu0 %v2298_v41 }
  0x6c   :  { %1378 = vmatmul.mubr.bf16.gmra.mrb[36].mxu1 %v2299_v42  ;;  %1288 = vmatprep.mubr.bf16.mxu0 %v2301_v43 }
  0x6d   :  { %1385 = vmatprep.mubr.bf16.mxu1 %v2303_v44  ;;  %2132 = vmatpush3.bf16.msra.mxu0 %v2307_v40 }
  0x6e   :  { %2169 = vmatpush3.bf16.msra.mxu1 %v2307_v40  ;;  %2133 = vmatprep.subr.bf16.mxu0 %v2314_v45 }
  0x6f   :  { %2162 = vmatprep.subr.bf16.mxu1 %v2314_v45 }
  0x71   :  { %2134 = vmatpush3.bf16.msra.mxu0 %v2314_v45 }
  0x72   :  { %2170 = vmatpush3.bf16.msra.mxu1 %v2314_v45  ;;  %2135 = vmatprep.subr.bf16.mxu0 %v2321_v46 }
  0x73   :  { %1289 = vmatmul.mubr.bf16.gmra.mrb[40].mxu0 %v2305_v47  ;;  %2163 = vmatprep.subr.bf16.mxu1 %v2321_v46 }
  0x74   :  { %1386 = vmatmul.mubr.bf16.gmra.mrb[40].mxu1 %v2306_v48  ;;  %1296 = vmatprep.mubr.bf16.mxu0 %v2308_v49 }
  0x75   :  { %1393 = vmatprep.mubr.bf16.mxu1 %v2310_v50  ;;  %2136 = vmatpush3.bf16.msra.mxu0 %v2321_v46 }
  0x76   :  { %2171 = vmatpush3.bf16.msra.mxu1 %v2321_v46  ;;  %2137 = vmatprep.subr.bf16.mxu0 %v2328_v51 }
  0x77   :  { %2164 = vmatprep.subr.bf16.mxu1 %v2328_v51 }
  0x79   :  { %2138 = vmatpush3.bf16.msra.mxu0 %v2328_v51 }
  0x7a   :  { %2172 = vmatpush3.bf16.msra.mxu1 %v2328_v51  ;;  %2139 = vmatprep.subr.bf16.mxu0 %v2335_v53 }
  0x7b   :  { %1297 = vmatmul.mubr.bf16.gmra.mrb[44].mxu0 %v2312_v52  ;;  %2165 = vmatprep.subr.bf16.mxu1 %v2335_v53 }
  0x7c   :  { %1394 = vmatmul.mubr.bf16.gmra.mrb[44].mxu1 %v2313_v54  ;;  %1304 = vmatprep.mubr.bf16.mxu0 %v2315_v55 }
  0x7d   :  { %1401 = vmatprep.mubr.bf16.mxu1 %v2317_v56  ;;  %2140 = vmatpush3.bf16.msra.mxu0 %v2335_v53 }
  0x7e   :  { %2173 = vmatpush3.bf16.msra.mxu1 %v2335_v53  ;;  %2141 = vmatprep.subr.bf16.mxu0 %v2342_v57 }
  0x7f   :  { %2166 = vmatprep.subr.bf16.mxu1 %v2342_v57 }
  0x81   :  { %2142 = vmatpush3.bf16.msra.mxu0 %v2342_v57 }
  0x82   :  { %2174 = vmatpush3.bf16.msra.mxu1 %v2342_v57 }
  0x83   :  { %1305 = vmatmul.mubr.bf16.gmra.mrb[48].mxu0 %v2319_v58 }
  0x84   :  { %1402 = vmatmul.mubr.bf16.gmra.mrb[48].mxu1 %v2320_v59  ;;  %1312 = vmatprep.mubr.bf16.mxu0 %v2322_v60 }
  0x85   :  { %1409 = vmatprep.mubr.bf16.mxu1 %v2324_v61 }
  0x8b   :  { %1313 = vmatmul.mubr.bf16.gmra.mrb[52].mxu0 %v2326_v62 }
  0x8c   :  { %1410 = vmatmul.mubr.bf16.gmra.mrb[52].mxu1 %v2327_v63  ;;  %1320 = vmatprep.mubr.bf16.mxu0 %v2329_v0 }
  0x8d   :  { %1417 = vmatprep.mubr.bf16.mxu1 %v2331_v1 }
  0x93   :  { %1321 = vmatmul.mubr.bf16.gmra.mrb[56].mxu0 %v2333_v2 }
  0x94   :  { %1418 = vmatmul.mubr.bf16.gmra.mrb[56].mxu1 %v2334_v3  ;;  %1328 = vmatprep.mubr.bf16.mxu0 %v2336_v4 }
  0x95   :  { %1425 = vmatprep.mubr.bf16.mxu1 %v2338_v5 }
  0x9b   :  { %1329 = vmatmul.mubr.bf16.gmra.mrb[60].mxu0 %v2340_v6 }
  0x9c   :  { %1426 = vmatmul.mubr.bf16.gmra.mrb[60].mxu1 %v2341_v7  ;;  %2143 = vmatprep.mubr.bf16.mxu0 %v2343_v8 }
  0x9d   :  { %2151 = vmatprep.mubr.bf16.mxu1 %v2344_v9 }
  0xa3   :  { %2144 = vmatmul.mubr.bf16.vlgmr.msra.gmra.mrb[64].mxu0 %v2345_v10 }
  0xa4   :  { %2152 = vmatmul.mubr.bf16.vlgmr.msra.gmra.mrb[64].mxu1 %v2346_v11  ;;  %2147 = vmatprep.mubr.bf16.mxu0 %v2347_v12 }
  0xa5   :  { %2155 = vmatprep.mubr.bf16.mxu1 %v2348_v13 }
  0xab   :  { %2148 = vmatmul.mubr.bf16.gmra.mrb[68].mxu0 %v2349_v14 }
  0xac   :  { %2156 = vmatmul.mubr.bf16.gmra.mrb[68].mxu1 %v2350_v15 }
  0xf6   :  { %v1871_v16 = vpop.f32.mrb[0].mxu0 }
  0xf7   :  { %v1935_v17 = vpop.f32.mrb[0].mxu1  ;;  %v1872_v19 = vpop.f32.mrb[1].mxu0 }
  0xf8   :  { %v1873_v20 = vadd.f32 %v1872_v19, %v1871_v16  ;;  %v1936_v21 = vpop.f32.mrb[1].mxu1  ;;  %v1874_v22 = vpop.f32.mrb[2].mxu0 }
  0xf9   :  { %v1937_v23 = vadd.f32 %v1936_v21, %v1935_v17  ;;  %v1938_v24 = vpop.f32.mrb[2].mxu1  ;;  %v1875_v25 = vpop.f32.mrb[3].mxu0 }
  0xfa   :  { %v1081_v26 = vadd.f32 %v1873_v20, %v2806_v18  ;;  %v1876_v27 = vadd.f32 %v1875_v25, %v1874_v22  ;;  %v1939_v28 = vpop.f32.mrb[3].mxu1 }
  0xfb   :  { %v1940_v29 = vadd.f32 %v1939_v28, %v1938_v24 }
  0xfc   :  { %v2809_v30 = vadd.f32 %v1937_v23, %v1081_v26  ;;  %v1084_v31 = vadd.f32 %v1876_v27, %v2806_v18 }
  0xfe   :  { %v2812_v32 = vadd.f32 %v1940_v29, %v1084_v31  ;;  %v1877_v33 = vpop.f32.mrb[4].mxu0 }
  0xff   :  { %v1941_v34 = vpop.f32.mrb[4].mxu1  ;;  %v1878_v35 = vpop.f32.mrb[5].mxu0 }
 0x100   :  { %v1879_v36 = vadd.f32 %v1878_v35, %v1877_v33  ;;  %v1942_v37 = vpop.f32.mrb[5].mxu1  ;;  %v1880_v38 = vpop.f32.mrb[6].mxu0 }
 0x101   :  { %v1943_v39 = vadd.f32 %v1942_v37, %v1941_v34  ;;  %v1944_v40 = vpop.f32.mrb[6].mxu1  ;;  %v1881_v41 = vpop.f32.mrb[7].mxu0 }
 0x102   :  { %v1089_v42 = vadd.f32 %v1879_v36, %v2806_v18  ;;  %v1882_v43 = vadd.f32 %v1881_v41, %v1880_v38  ;;  %v1945_v44 = vpop.f32.mrb[7].mxu1 }
 0x103   :  { %v1946_v45 = vadd.f32 %v1945_v44, %v1944_v40 }
 0x104   :  { %v2815_v46 = vadd.f32 %v1943_v39, %v1089_v42  ;;  %v1092_v47 = vadd.f32 %v1882_v43, %v2806_v18 }
 0x106   :  { %v2818_v48 = vadd.f32 %v1946_v45, %v1092_v47  ;;  %v1883_v49 = vpop.f32.mrb[8].mxu0 }
 0x107   :  { %v1947_v50 = vpop.f32.mrb[8].mxu1  ;;  %v1884_v51 = vpop.f32.mrb[9].mxu0 }
 0x108   :  { %v1885_v52 = vadd.f32 %v1884_v51, %v1883_v49  ;;  %v1948_v53 = vpop.f32.mrb[9].mxu1  ;;  %v1886_v54 = vpop.f32.mrb[10].mxu0 }
 0x109   :  { %v1949_v55 = vadd.f32 %v1948_v53, %v1947_v50  ;;  %v1950_v56 = vpop.f32.mrb[10].mxu1  ;;  %v1887_v57 = vpop.f32.mrb[11].mxu0 }
 0x10a   :  { %v1097_v58 = vadd.f32 %v1885_v52, %v2806_v18  ;;  %v1888_v59 = vadd.f32 %v1887_v57, %v1886_v54  ;;  %v1951_v60 = vpop.f32.mrb[11].mxu1 }
 0x10b   :  { %v1952_v61 = vadd.f32 %v1951_v60, %v1950_v56 }
 0x10c   :  { %v2821_v62 = vadd.f32 %v1949_v55, %v1097_v58  ;;  %v1100_v63 = vadd.f32 %v1888_v59, %v2806_v18 }
 0x10e   :  { %v2824_v0 = vadd.f32 %v1952_v61, %v1100_v63  ;;  %v1889_v1 = vpop.f32.mrb[12].mxu0 }
 0x10f   :  { %v1953_v2 = vpop.f32.mrb[12].mxu1  ;;  %v1890_v3 = vpop.f32.mrb[13].mxu0 }
 0x110   :  { %v1891_v4 = vadd.f32 %v1890_v3, %v1889_v1  ;;  %v1954_v5 = vpop.f32.mrb[13].mxu1  ;;  %v1892_v6 = vpop.f32.mrb[14].mxu0 }
 0x111   :  { %v1955_v7 = vadd.f32 %v1954_v5, %v1953_v2  ;;  %v1956_v8 = vpop.f32.mrb[14].mxu1  ;;  %v1893_v9 = vpop.f32.mrb[15].mxu0 }
 0x112   :  { %v1105_v10 = vadd.f32 %v1891_v4, %v2806_v18  ;;  %v1894_v11 = vadd.f32 %v1893_v9, %v1892_v6  ;;  %v1957_v12 = vpop.f32.mrb[15].mxu1 }
 0x113   :  { %v1958_v13 = vadd.f32 %v1957_v12, %v1956_v8 }
 0x114   :  { %v2827_v14 = vadd.f32 %v1955_v7, %v1105_v10  ;;  %v1108_v15 = vadd.f32 %v1894_v11, %v2806_v18 }
 0x116   :  { %v2830_v16 = vadd.f32 %v1958_v13, %v1108_v15  ;;  %v1895_v17 = vpop.f32.mrb[16].mxu0 }
 0x117   :  { %v1959_v19 = vpop.f32.mrb[16].mxu1  ;;  %v1896_v20 = vpop.f32.mrb[17].mxu0 }
 0x118   :  { %v1897_v21 = vadd.f32 %v1896_v20, %v1895_v17  ;;  %v1960_v22 = vpop.f32.mrb[17].mxu1  ;;  %v1898_v23 = vpop.f32.mrb[18].mxu0 }
 0x119   :  { %v1961_v24 = vadd.f32 %v1960_v22, %v1959_v19  ;;  %v1962_v25 = vpop.f32.mrb[18].mxu1  ;;  %v1899_v26 = vpop.f32.mrb[19].mxu0 }
 0x11a   :  { %v1113_v27 = vadd.f32 %v1897_v21, %v2806_v18  ;;  %v1900_v28 = vadd.f32 %v1899_v26, %v1898_v23  ;;  %v1963_v29 = vpop.f32.mrb[19].mxu1 }
 0x11b   :  { %v1964_v31 = vadd.f32 %v1963_v29, %v1962_v25 }
 0x11c   :  { %v2833_v33 = vadd.f32 %v1961_v24, %v1113_v27  ;;  %v1116_v34 = vadd.f32 %v1900_v28, %v2806_v18 }
 0x11e   :  { %v2836_v35 = vadd.f32 %v1964_v31, %v1116_v34  ;;  %v1901_v36 = vpop.f32.mrb[20].mxu0 }
 0x11f   :  { %v1965_v37 = vpop.f32.mrb[20].mxu1  ;;  %v1902_v38 = vpop.f32.mrb[21].mxu0 }
 0x120   :  { %v1903_v39 = vadd.f32 %v1902_v38, %v1901_v36  ;;  %v1966_v40 = vpop.f32.mrb[21].mxu1  ;;  %v1904_v41 = vpop.f32.mrb[22].mxu0 }
 0x121   :  { %v1967_v42 = vadd.f32 %v1966_v40, %v1965_v37  ;;  %v1968_v43 = vpop.f32.mrb[22].mxu1  ;;  %v1905_v44 = vpop.f32.mrb[23].mxu0 }
 0x122   :  { %v1121_v45 = vadd.f32 %v1903_v39, %v2806_v18  ;;  %v1906_v47 = vadd.f32 %v1905_v44, %v1904_v41  ;;  %v1969_v49 = vpop.f32.mrb[23].mxu1 }
 0x123   :  { %v1970_v50 = vadd.f32 %v1969_v49, %v1968_v43 }
 0x124   :  { %v2839_v51 = vadd.f32 %v1967_v42, %v1121_v45  ;;  %v1124_v52 = vadd.f32 %v1906_v47, %v2806_v18 }
 0x126   :  { %v2842_v53 = vadd.f32 %v1970_v50, %v1124_v52  ;;  %v1907_v54 = vpop.f32.mrb[24].mxu0 }
 0x127   :  { %v1971_v55 = vpop.f32.mrb[24].mxu1  ;;  %v1908_v56 = vpop.f32.mrb[25].mxu0 }
 0x128   :  { %v1909_v57 = vadd.f32 %v1908_v56, %v1907_v54  ;;  %v1972_v58 = vpop.f32.mrb[25].mxu1  ;;  %v1910_v59 = vpop.f32.mrb[26].mxu0 }
 0x129   :  { %v1973_v60 = vadd.f32 %v1972_v58, %v1971_v55  ;;  %v1974_v61 = vpop.f32.mrb[26].mxu1  ;;  %v1911_v63 = vpop.f32.mrb[27].mxu0 }
 0x12a   :  { %v1129_v1 = vadd.f32 %v1909_v57, %v2806_v18  ;;  %v1912_v2 = vadd.f32 %v1911_v63, %v1910_v59  ;;  %v1975_v3 = vpop.f32.mrb[27].mxu1 }
 0x12b   :  { %v1976_v4 = vadd.f32 %v1975_v3, %v1974_v61 }
 0x12c   :  { %v2845_v5 = vadd.f32 %v1973_v60, %v1129_v1  ;;  %v1132_v6 = vadd.f32 %v1912_v2, %v2806_v18 }
 0x12e   :  { %v2848_v7 = vadd.f32 %v1976_v4, %v1132_v6  ;;  %v1913_v8 = vpop.f32.mrb[28].mxu0 }
 0x12f   :  { %v1977_v9 = vpop.f32.mrb[28].mxu1  ;;  %v1914_v10 = vpop.f32.mrb[29].mxu0 }
 0x130   :  { %v1915_v11 = vadd.f32 %v1914_v10, %v1913_v8  ;;  %v1978_v12 = vpop.f32.mrb[29].mxu1  ;;  %v1916_v13 = vpop.f32.mrb[30].mxu0 }
 0x131   :  { %v1979_v15 = vadd.f32 %v1978_v12, %v1977_v9  ;;  %v1980_v17 = vpop.f32.mrb[30].mxu1  ;;  %v1917_v19 = vpop.f32.mrb[31].mxu0 }
 0x132   :  { %v1137_v20 = vadd.f32 %v1915_v11, %v2806_v18  ;;  %v1918_v21 = vadd.f32 %v1917_v19, %v1916_v13  ;;  %v1981_v22 = vpop.f32.mrb[31].mxu1 }
 0x133   :  { %v1982_v23 = vadd.f32 %v1981_v22, %v1980_v17 }
 0x134   :  { %v2851_v24 = vadd.f32 %v1979_v15, %v1137_v20  ;;  %v1140_v25 = vadd.f32 %v1918_v21, %v2806_v18 }
 0x136   :  { %v2854_v26 = vadd.f32 %v1982_v23, %v1140_v25  ;;  %v1999_v27 = vpop.f32.mrb[32].mxu0 }
 0x137   :  { %v2063_v28 = vpop.f32.mrb[32].mxu1  ;;  %v2000_v29 = vpop.f32.mrb[33].mxu0 }
 0x138   :  { %v2001_v31 = vadd.f32 %v2000_v29, %v1999_v27  ;;  %v2064_v34 = vpop.f32.mrb[33].mxu1  ;;  %v2002_v36 = vpop.f32.mrb[34].mxu0 }
 0x139   :  { %v2065_v37 = vadd.f32 %v2064_v34, %v2063_v28  ;;  %v2066_v38 = vpop.f32.mrb[34].mxu1  ;;  %v2003_v39 = vpop.f32.mrb[35].mxu0 }
 0x13a   :  { %v1275_v40 = vadd.f32 %v2001_v31, %v2809_v30  ;;  %v2004_v41 = vadd.f32 %v2003_v39, %v2002_v36  ;;  %v2067_v42 = vpop.f32.mrb[35].mxu1 }
 0x13b   :  { %v2068_v43 = vadd.f32 %v2067_v42, %v2066_v38 }
 0x13c   :  { %v1278_v44 = vadd.f32 %v2004_v41, %v2812_v32  ;;  %v2858_v45 = vadd.f32 %v2065_v37, %v1275_v40 }
 0x13e   :  { %v2005_v18 = vpop.f32.mrb[36].mxu0  ;;  %v2860_v47 = vadd.f32 %v2068_v43, %v1278_v44 }
 0x13f   :  { %v2069_v49 = vpop.f32.mrb[36].mxu1  ;;  %v2006_v50 = vpop.f32.mrb[37].mxu0 }
 0x140   :  { %v2007_v52 = vadd.f32 %v2006_v50, %v2005_v18  ;;  %v2070_v54 = vpop.f32.mrb[37].mxu1  ;;  %v2008_v55 = vpop.f32.mrb[38].mxu0 }
 0x141   :  { %v2071_v56 = vadd.f32 %v2070_v54, %v2069_v49  ;;  %v2072_v57 = vpop.f32.mrb[38].mxu1  ;;  %v2009_v58 = vpop.f32.mrb[39].mxu0 }
 0x142   :  { %v1283_v30 = vadd.f32 %v2007_v52, %v2815_v46  ;;  %v2010_v59 = vadd.f32 %v2009_v58, %v2008_v55  ;;  %v2073_v60 = vpop.f32.mrb[39].mxu1 }
 0x143   :  { %v2074_v61 = vadd.f32 %v2073_v60, %v2072_v57 }
 0x144   :  { %v1286_v32 = vadd.f32 %v2010_v59, %v2818_v48  ;;  %v2864_v63 = vadd.f32 %v2071_v56, %v1283_v30 }
 0x146   :  { %v2011_v1 = vpop.f32.mrb[40].mxu0  ;;  %v2866_v2 = vadd.f32 %v2074_v61, %v1286_v32 }
 0x147   :  { %v2075_v3 = vpop.f32.mrb[40].mxu1  ;;  %v2012_v4 = vpop.f32.mrb[41].mxu0 }
 0x148   :  { %v2013_v6 = vadd.f32 %v2012_v4, %v2011_v1  ;;  %v2076_v8 = vpop.f32.mrb[41].mxu1  ;;  %v2014_v9 = vpop.f32.mrb[42].mxu0 }
 0x149   :  { %v2077_v10 = vadd.f32 %v2076_v8, %v2075_v3  ;;  %v2078_v11 = vpop.f32.mrb[42].mxu1  ;;  %v2015_v12 = vpop.f32.mrb[43].mxu0 }
 0x14a   :  { %v1291_v46 = vadd.f32 %v2013_v6, %v2821_v62  ;;  %v2016_v13 = vadd.f32 %v2015_v12, %v2014_v9  ;;  %v2079_v15 = vpop.f32.mrb[43].mxu1 }
 0x14b   :  { %v2080_v17 = vadd.f32 %v2079_v15, %v2078_v11 }
 0x14c   :  { %v1294_v48 = vadd.f32 %v2016_v13, %v2824_v0  ;;  %v2870_v19 = vadd.f32 %v2077_v10, %v1291_v46 }
 0x14e   :  { %v2017_v20 = vpop.f32.mrb[44].mxu0  ;;  %v2872_v21 = vadd.f32 %v2080_v17, %v1294_v48 }
 0x14f   :  { %v2081_v22 = vpop.f32.mrb[44].mxu1  ;;  %v2018_v23 = vpop.f32.mrb[45].mxu0 }
 0x150   :  { %v2019_v25 = vadd.f32 %v2018_v23, %v2017_v20  ;;  %v2082_v27 = vpop.f32.mrb[45].mxu1  ;;  %v2020_v28 = vpop.f32.mrb[46].mxu0 }
 0x151   :  { %v2083_v29 = vadd.f32 %v2082_v27, %v2081_v22  ;;  %v2084_v31 = vpop.f32.mrb[46].mxu1  ;;  %v2021_v34 = vpop.f32.mrb[47].mxu0 }
 0x152   :  { %v1299_v62 = vadd.f32 %v2019_v25, %v2827_v14  ;;  %v2022_v36 = vadd.f32 %v2021_v34, %v2020_v28  ;;  %v2085_v37 = vpop.f32.mrb[47].mxu1 }
 0x153   :  { %v2086_v38 = vadd.f32 %v2085_v37, %v2084_v31 }
 0x154   :  { %v1302_v0 = vadd.f32 %v2022_v36, %v2830_v16  ;;  %v2876_v39 = vadd.f32 %v2083_v29, %v1299_v62 }
 0x156   :  { %v2023_v40 = vpop.f32.mrb[48].mxu0  ;;  %v2878_v41 = vadd.f32 %v2086_v38, %v1302_v0 }
 0x157   :  { %v2087_v42 = vpop.f32.mrb[48].mxu1  ;;  %v2024_v43 = vpop.f32.mrb[49].mxu0 }
 0x158   :  { %v2025_v44 = vadd.f32 %v2024_v43, %v2023_v40  ;;  %v2088_v18 = vpop.f32.mrb[49].mxu1  ;;  %v2026_v49 = vpop.f32.mrb[50].mxu0 }
 0x159   :  { %v2089_v50 = vadd.f32 %v2088_v18, %v2087_v42  ;;  %v2090_v52 = vpop.f32.mrb[50].mxu1  ;;  %v2027_v54 = vpop.f32.mrb[51].mxu0 }
 0x15a   :  { %v1307_v14 = vadd.f32 %v2025_v44, %v2833_v33  ;;  %v2028_v55 = vadd.f32 %v2027_v54, %v2026_v49  ;;  %v2091_v56 = vpop.f32.mrb[51].mxu1 }
 0x15b   :  { %v2092_v57 = vadd.f32 %v2091_v56, %v2090_v52 }
 0x15c   :  { %v1310_v16 = vadd.f32 %v2028_v55, %v2836_v35  ;;  %v1404_v58 = vadd.f32 %v2089_v50, %v1307_v14 }
 0x15e   :  { %v2029_v30 = vpop.f32.mrb[52].mxu0  ;;  %v2882_v59 = vadd.f32 %v2092_v57, %v1310_v16 }
 0x15f   :  { %v2093_v60 = vpop.f32.mrb[52].mxu1  ;;  %v2030_v61 = vpop.f32.mrb[53].mxu0 }
 0x160   :  { %v2031_v32 = vadd.f32 %v2030_v61, %v2029_v30  ;;  %v2094_v1 = vpop.f32.mrb[53].mxu1  ;;  %v2032_v3 = vpop.f32.mrb[54].mxu0 }
 0x161   :  { %v2095_v4 = vadd.f32 %v2094_v1, %v2093_v60  ;;  %v2096_v6 = vpop.f32.mrb[54].mxu1  ;;  %v2033_v8 = vpop.f32.mrb[55].mxu0 }
 0x162   :  { %v1315_v9 = vadd.f32 %v2031_v32, %v2839_v51  ;;  %v2034_v33 = vadd.f32 %v2033_v8, %v2032_v3  ;;  %v2097_v10 = vpop.f32.mrb[55].mxu1 }
 0x163   :  { %v2098_v11 = vadd.f32 %v2097_v10, %v2096_v6 }
 0x164   :  { %v1318_v12 = vadd.f32 %v2034_v33, %v2842_v53  ;;  %v1412_v35 = vadd.f32 %v2095_v4, %v1315_v9 }
 0x166   :  { %v2035_v46 = vpop.f32.mrb[56].mxu0  ;;  %v1415_v13 = vadd.f32 %v2098_v11, %v1318_v12 }
 0x167   :  { %v2099_v15 = vpop.f32.mrb[56].mxu1  ;;  %v2036_v17 = vpop.f32.mrb[57].mxu0 }
 0x168   :  { %v2037_v48 = vadd.f32 %v2036_v17, %v2035_v46  ;;  %v2100_v20 = vpop.f32.mrb[57].mxu1  ;;  %v2038_v22 = vpop.f32.mrb[58].mxu0 }
 0x169   :  { %v2101_v23 = vadd.f32 %v2100_v20, %v2099_v15  ;;  %v2102_v25 = vpop.f32.mrb[58].mxu1  ;;  %v2039_v27 = vpop.f32.mrb[59].mxu0 }
 0x16a   :  { %v1323_v28 = vadd.f32 %v2037_v48, %v2845_v5  ;;  %v2040_v29 = vadd.f32 %v2039_v27, %v2038_v22  ;;  %v2103_v51 = vpop.f32.mrb[59].mxu1 }
 0x16b   :  { %v2104_v31 = vadd.f32 %v2103_v51, %v2102_v25 }
 0x16c   :  { %v1326_v34 = vadd.f32 %v2040_v29, %v2848_v7  ;;  %v1420_v62 = vadd.f32 %v2101_v23, %v1323_v28 }
 0x16e   :  { %v2041_v53 = vpop.f32.mrb[60].mxu0  ;;  %v2888_v36 = vadd.f32 %v2104_v31, %v1326_v34 }
 0x16f   :  { %v2105_v37 = vpop.f32.mrb[60].mxu1  ;;  %v2042_v38 = vpop.f32.mrb[61].mxu0 }
 0x170   :  { %v2043_v0 = vadd.f32 %v2042_v38, %v2041_v53  ;;  %v2106_v40 = vpop.f32.mrb[61].mxu1  ;;  %v2044_v42 = vpop.f32.mrb[62].mxu0 }
 0x171   :  { %v2107_v43 = vadd.f32 %v2106_v40, %v2105_v37  ;;  %v2108_v44 = vpop.f32.mrb[62].mxu1  ;;  %v2045_v18 = vpop.f32.mrb[63].mxu0 }
 0x172   :  { %v1331_v49 = vadd.f32 %v2043_v0, %v2851_v24  ;;  %v2046_v5 = vadd.f32 %v2045_v18, %v2044_v42  ;;  %v2109_v50 = vpop.f32.mrb[63].mxu1 }
 0x173   :  { %v2110_v52 = vadd.f32 %v2109_v50, %v2108_v44 }
 0x174   :  { %v1334_v54 = vadd.f32 %v2046_v5, %v2854_v26  ;;  %v1428_v7 = vadd.f32 %v2107_v43, %v1331_v49 }
 0x176   :  { %v2145_v14 = vpop.f32.mrb[64].mxu0  ;;  %v1431_v55 = vadd.f32 %v2110_v52, %v1334_v54 }
 0x177   :  { %v1477_v56 = vadd.f32 %v2145_v14, %v2864_v63  ;;  %v2153_v57 = vpop.f32.mrb[64].mxu1  ;;  %v1468_v16 = vpop.f32.mrb[65].mxu0 }
 0x178   :  { %v1509_v30 = vadd.f32 %v2153_v57, %v1412_v35  ;;  %v1469_v60 = vadd.f32 %v1468_v16, %v2858_v45  ;;  %v1500_v61 = vpop.f32.mrb[65].mxu1  ;;  %v2146_v32 = vpop.f32.mrb[66].mxu0 }
 0x179   :  { %v1501_v1 = vadd.f32 %v1500_v61, %v1404_v58  ;;  %v1480_v24 = vadd.f32 %v2146_v32, %v2866_v2  ;;  %v2154_v3 = vpop.f32.mrb[66].mxu1  ;;  %v1471_v4 = vpop.f32.mrb[67].mxu0  ;;  %v1533_v9 = vmax.f32 %v1477_v56, 0.0 }
 0x17a   :  { %v1512_v6 = vadd.f32 %v2154_v3, %v1415_v13  ;;  %v1472_v26 = vadd.f32 %v1471_v4, %v2860_v47  ;;  %v1503_v8 = vpop.f32.mrb[67].mxu1  ;;  %v1541_v10 = vmax.f32 %v1509_v30, 0.0  ;;  %v1531_v11 = vmax.f32 %v1469_v60, 0.0 }
 0x17b   :  { %v1534_v33 = vmax.f32 %v1480_v24, 0.0  ;;  %v1504_v63 = vadd.f32 %v1503_v8, %v2882_v59  ;;  %v1539_v45 = vmax.f32 %v1501_v1, 0.0 }
 0x17c   :  { %v1542_v12 = vmax.f32 %v1512_v6, 0.0  ;;  %v1532_v35 = vmax.f32 %v1472_v26, 0.0 }
 0x17d   :  { %v1816_v46 = vpack.c.bf16 %v1534_v33, %v1533_v9  ;;  %v1540_v15 = vmax.f32 %v1504_v63, 0.0 }
 0x17e   :  { %v1836_v58 = vpack.c.bf16 %v1542_v12, %v1541_v10  ;;  %v1811_v17 = vpack.c.bf16 %v1532_v35, %v1531_v11  ;;  %v2149_v2 = vpop.f32.mrb[68].mxu0 }
 0x17f   :  { %1848 = vst [vmem:[%s2929_s3 + $0x8] sm:$0xff] %v1816_v46   ;;  %v1831_v47 = vpack.c.bf16 %v1540_v15, %v1539_v45  ;;  %v1493_v13 = vadd.f32 %v2149_v2, %v2876_v39  ;;  %v2157_v48 = vpop.f32.mrb[68].mxu1  ;;  %v1484_v20 = vpop.f32.mrb[69].mxu0 }
 0x180   :  { %1852 = vst [vmem:[%s2929_s3 + $0x28] sm:$0xff] %v1836_v58   ;;  %1812 = vst [vmem:[%s2929_s3] sm:$0xff] %v1811_v17   ;;  %v1525_v59 = vadd.f32 %v2157_v48, %v1428_v7  ;;  %v1485_v22 = vadd.f32 %v1484_v20, %v2870_v19  ;;  %v1516_v23 = vpop.f32.mrb[69].mxu1  ;;  %v2150_v25 = vpop.f32.mrb[70].mxu0 }
 0x181   :  { %1851 = vst [vmem:[%s2929_s3 + $0x20] sm:$0xff] %v1831_v47   ;;  %v1517_v39 = vadd.f32 %v1516_v23, %v1420_v62  ;;  %v1496_v27 = vadd.f32 %v2150_v25, %v2878_v41  ;;  %v2158_v28 = vpop.f32.mrb[70].mxu1  ;;  %v1487_v29 = vpop.f32.mrb[71].mxu0  ;;  %v1537_v53 = vmax.f32 %v1493_v13, 0.0 }
 0x182   :  { %v1528_v51 = vadd.f32 %v2158_v28, %v1431_v55  ;;  %v1488_v31 = vadd.f32 %v1487_v29, %v2872_v21  ;;  %v1519_v34 = vpop.f32.mrb[71].mxu1  ;;  %v1545_v19 = vmax.f32 %v1525_v59, 0.0  ;;  %v1535_v0 = vmax.f32 %v1485_v22, 0.0 }
 0x183   :  { %v1538_v37 = vmax.f32 %v1496_v27, 0.0  ;;  %v1520_v38 = vadd.f32 %v1519_v34, %v2888_v36  ;;  %v1543_v43 = vmax.f32 %v1517_v39, 0.0 }
 0x184   :  { %v1546_v40 = vmax.f32 %v1528_v51, 0.0  ;;  %v1536_v42 = vmax.f32 %v1488_v31, 0.0 }
 0x185   :  { %v1826_v44 = vpack.c.bf16 %v1538_v37, %v1537_v53  ;;  %v1544_v18 = vmax.f32 %v1520_v38, 0.0 }
 0x186   :  { %v1846_v62 = vpack.c.bf16 %v1546_v40, %v1545_v19  ;;  %v1821_v49 = vpack.c.bf16 %v1536_v42, %v1535_v0 }
 0x187   :  { %1850 = vst [vmem:[%s2929_s3 + $0x18] sm:$0xff] %v1826_v44   ;;  %v1841_v41 = vpack.c.bf16 %v1544_v18, %v1543_v43 }
 0x188   :  { %1854 = vst [vmem:[%s2929_s3 + $0x38] sm:$0xff] %v1846_v62   ;;  %1849 = vst [vmem:[%s2929_s3 + $0x10] sm:$0xff] %v1821_v49  }
 0x189   :  { %1853 = vst [vmem:[%s2929_s3 + $0x30] sm:$0xff] %v1841_v41  }

// kernel: unet_forward.15
= control target key start
LH: loop header
LB: loop body
LE: loop exit
PB: predicated region body
PF: predicated region fallthrough
CT: control target
= control target key end

     0   :  { %s2299_s1 = inlined_call_operand.vmem [shape: bf16[1152,256], index: 1, kind: input, shape index: {}]   ;;  %s2300_s0 = inlined_call_operand.vmem [shape: bf16[32,1152], index: 0, kind: input, shape index: {}]   ;;  %s2301_s2 = inlined_call_operand.vmem [shape: f32[1,256], index: 2, kind: input, shape index: {}]   ;;  %s2302_s3 = inlined_call_operand.vmem [shape: bf16[32,256], index: 3, kind: output, shape index: {}]  }
   0x1   :  { %v1535_v0 = vld [vmem:[%s2299_s1 + $0x4] ss:$8 sps:$4 sm:$0xff]   ;;  %v1539_v2 = vld [vmem:[%s2299_s1] ss:$8 sps:$4 sm:$0xff]   ;;  %v1541_v4 = vld [vmem:[%s2299_s1 + $0x14] ss:$8 sps:$4 sm:$0xff]  }
   0x2   :  { %v1537_v1 = vld [vmem:[%s2299_s1 + $0x204] ss:$8 sps:$4 sm:$0xff]   ;;  %1003 = vmatprep.subr.bf16.mxu1 %v1535_v0  ;;  %v1540_v3 = vld [vmem:[%s2299_s1 + $0x200] ss:$8 sps:$4 sm:$0xff]   ;;  %v1543_v5 = vld [vmem:[%s2299_s1 + $0x214] ss:$8 sps:$4 sm:$0xff]  }
   0x3   :  { %1109 = vmatprep.subr.bf16.mxu0 %v1537_v1  ;;  %1004 = vmatpush1.bf16.msra.mxu1 %v1539_v2  ;;  %v1545_v6 = vld [vmem:[%s2299_s1 + $0x10] ss:$8 sps:$4 sm:$0xff]   ;;  %v1547_v8 = vld [vmem:[%s2299_s1 + $0x24] ss:$8 sps:$4 sm:$0xff]   ;;  %v1551_v10 = vld [vmem:[%s2299_s1 + $0x20] ss:$8 sps:$4 sm:$0xff]  }
   0x4   :  { %1110 = vmatpush1.bf16.msra.mxu0 %v1540_v3  ;;  %1005 = vmatprep.subr.bf16.mxu1 %v1541_v4  ;;  %v1546_v7 = vld [vmem:[%s2299_s1 + $0x210] ss:$8 sps:$4 sm:$0xff]   ;;  %v1549_v9 = vld [vmem:[%s2299_s1 + $0x224] ss:$8 sps:$4 sm:$0xff]   ;;  %v1552_v11 = vld [vmem:[%s2299_s1 + $0x220] ss:$8 sps:$4 sm:$0xff]  }
   0x5   :  { %1111 = vmatprep.subr.bf16.mxu0 %v1543_v5  ;;  %v1553_v12 = vld [vmem:[%s2299_s1 + $0x34] ss:$8 sps:$4 sm:$0xff]   ;;  %v1557_v14 = vld [vmem:[%s2299_s1 + $0x30] ss:$8 sps:$4 sm:$0xff]   ;;  %v1559_v16 = vld [vmem:[%s2299_s1 + $0x44] ss:$8 sps:$4 sm:$0xff]  }
   0x6   :  { %v1555_v13 = vld [vmem:[%s2299_s1 + $0x234] ss:$8 sps:$4 sm:$0xff]   ;;  %v1558_v15 = vld [vmem:[%s2299_s1 + $0x230] ss:$8 sps:$4 sm:$0xff]   ;;  %v1561_v17 = vld [vmem:[%s2299_s1 + $0x244] ss:$8 sps:$4 sm:$0xff]  }
   0x7   :  { %1006 = vmatpush1.bf16.msra.mxu1 %v1545_v6  ;;  %v1563_v18 = vld [vmem:[%s2299_s1 + $0x40] ss:$8 sps:$4 sm:$0xff]   ;;  %v1565_v20 = vld [vmem:[%s2299_s1 + $0x54] ss:$8 sps:$4 sm:$0xff]   ;;  %v1569_v22 = vld [vmem:[%s2299_s1 + $0x50] ss:$8 sps:$4 sm:$0xff]  }
   0x8   :  { %1112 = vmatpush1.bf16.msra.mxu0 %v1546_v7  ;;  %1007 = vmatprep.subr.bf16.mxu1 %v1547_v8  ;;  %v1564_v19 = vld [vmem:[%s2299_s1 + $0x240] ss:$8 sps:$4 sm:$0xff]   ;;  %v1567_v21 = vld [vmem:[%s2299_s1 + $0x254] ss:$8 sps:$4 sm:$0xff]   ;;  %v1570_v23 = vld [vmem:[%s2299_s1 + $0x250] ss:$8 sps:$4 sm:$0xff]  }
   0x9   :  { %1113 = vmatprep.subr.bf16.mxu0 %v1549_v9  ;;  %v1571_v24 = vld [vmem:[%s2299_s1 + $0x64] ss:$8 sps:$4 sm:$0xff]   ;;  %v1575_v26 = vld [vmem:[%s2299_s1 + $0x60] ss:$8 sps:$4 sm:$0xff]   ;;  %v1577_v28 = vld [vmem:[%s2299_s1 + $0x74] ss:$8 sps:$4 sm:$0xff]  }
   0xa   :  { %v1573_v25 = vld [vmem:[%s2299_s1 + $0x264] ss:$8 sps:$4 sm:$0xff]   ;;  %v1576_v27 = vld [vmem:[%s2299_s1 + $0x260] ss:$8 sps:$4 sm:$0xff]   ;;  %v1579_v29 = vld [vmem:[%s2299_s1 + $0x274] ss:$8 sps:$4 sm:$0xff]  }
   0xb   :  { %1008 = vmatpush1.bf16.msra.mxu1 %v1551_v10  ;;  %v1581_v30 = vld [vmem:[%s2299_s1 + $0x70] ss:$8 sps:$4 sm:$0xff]   ;;  %v1583_v32 = vld [vmem:[%s2299_s1 + $0x84] ss:$8 sps:$4 sm:$0xff]   ;;  %v1587_v34 = vld [vmem:[%s2299_s1 + $0x80] ss:$8 sps:$4 sm:$0xff]  }
   0xc   :  { %1114 = vmatpush1.bf16.msra.mxu0 %v1552_v11  ;;  %1009 = vmatprep.subr.bf16.mxu1 %v1553_v12  ;;  %v1582_v31 = vld [vmem:[%s2299_s1 + $0x270] ss:$8 sps:$4 sm:$0xff]   ;;  %v1585_v33 = vld [vmem:[%s2299_s1 + $0x284] ss:$8 sps:$4 sm:$0xff]   ;;  %v1588_v35 = vld [vmem:[%s2299_s1 + $0x280] ss:$8 sps:$4 sm:$0xff]  }
   0xd   :  { %1115 = vmatprep.subr.bf16.mxu0 %v1555_v13  ;;  %v1589_v36 = vld [vmem:[%s2299_s1 + $0x94] ss:$8 sps:$4 sm:$0xff]   ;;  %v1593_v38 = vld [vmem:[%s2299_s1 + $0x90] ss:$8 sps:$4 sm:$0xff]   ;;  %v1595_v40 = vld [vmem:[%s2299_s1 + $0xa4] ss:$8 sps:$4 sm:$0xff]  }
   0xe   :  { %v1591_v37 = vld [vmem:[%s2299_s1 + $0x294] ss:$8 sps:$4 sm:$0xff]   ;;  %v1594_v39 = vld [vmem:[%s2299_s1 + $0x290] ss:$8 sps:$4 sm:$0xff]   ;;  %v1597_v41 = vld [vmem:[%s2299_s1 + $0x2a4] ss:$8 sps:$4 sm:$0xff]  }
   0xf   :  { %1010 = vmatpush1.bf16.msra.mxu1 %v1557_v14  ;;  %v1599_v42 = vld [vmem:[%s2299_s1 + $0xa0] ss:$8 sps:$4 sm:$0xff]   ;;  %v1601_v44 = vld [vmem:[%s2299_s1 + $0xb4] ss:$8 sps:$4 sm:$0xff]   ;;  %v1605_v46 = vld [vmem:[%s2299_s1 + $0xb0] ss:$8 sps:$4 sm:$0xff]  }
  0x10   :  { %1116 = vmatpush1.bf16.msra.mxu0 %v1558_v15  ;;  %1011 = vmatprep.subr.bf16.mxu1 %v1559_v16  ;;  %v1600_v43 = vld [vmem:[%s2299_s1 + $0x2a0] ss:$8 sps:$4 sm:$0xff]   ;;  %v1603_v45 = vld [vmem:[%s2299_s1 + $0x2b4] ss:$8 sps:$4 sm:$0xff]   ;;  %v1606_v47 = vld [vmem:[%s2299_s1 + $0x2b0] ss:$8 sps:$4 sm:$0xff]  }
  0x11   :  { %1117 = vmatprep.subr.bf16.mxu0 %v1561_v17  ;;  %v1633_v48 = vld [vmem:[%s2300_s0 + $0x4] ss:$36 sps:$4 sm:$0xff]   ;;  %v1639_v51 = vld [vmem:[%s2300_s0 + $0x14] ss:$36 sps:$4 sm:$0xff]  }
  0x12   :  { %v1607_v49 = vld [vmem:[%s2299_s1 + $0xc4] ss:$8 sps:$4 sm:$0xff]   ;;  %1035 = vmatprep.mubr.bf16.mxu1 %v1633_v48  ;;  %v1611_v52 = vld [vmem:[%s2299_s1 + $0xc0] ss:$8 sps:$4 sm:$0xff]   ;;  %v1613_v54 = vld [vmem:[%s2299_s1 + $0xd4] ss:$8 sps:$4 sm:$0xff]   ;;  %1141 = vmatprep.mubr.bf16.mxu0 %v1639_v51 }
  0x13   :  { %1012 = vmatpush1.bf16.msra.mxu1 %v1563_v18  ;;  %v1609_v50 = vld [vmem:[%s2299_s1 + $0x2c4] ss:$8 sps:$4 sm:$0xff]   ;;  %v1612_v53 = vld [vmem:[%s2299_s1 + $0x2c0] ss:$8 sps:$4 sm:$0xff]   ;;  %v1615_v55 = vld [vmem:[%s2299_s1 + $0x2d4] ss:$8 sps:$4 sm:$0xff]  }
  0x14   :  { %1118 = vmatpush1.bf16.msra.mxu0 %v1564_v19  ;;  %1013 = vmatprep.subr.bf16.mxu1 %v1565_v20  ;;  %v1617_v56 = vld [vmem:[%s2299_s1 + $0xd0] ss:$8 sps:$4 sm:$0xff]   ;;  %v1619_v58 = vld [vmem:[%s2299_s1 + $0xe4] ss:$8 sps:$4 sm:$0xff]   ;;  %v1623_v60 = vld [vmem:[%s2299_s1 + $0xe0] ss:$8 sps:$4 sm:$0xff]  }
  0x15   :  { %1119 = vmatprep.subr.bf16.mxu0 %v1567_v21  ;;  %v1618_v57 = vld [vmem:[%s2299_s1 + $0x2d0] ss:$8 sps:$4 sm:$0xff]   ;;  %v1621_v59 = vld [vmem:[%s2299_s1 + $0x2e4] ss:$8 sps:$4 sm:$0xff]   ;;  %v1624_v61 = vld [vmem:[%s2299_s1 + $0x2e0] ss:$8 sps:$4 sm:$0xff]  }
  0x16   :  { %v1625_v62 = vld [vmem:[%s2299_s1 + $0xf4] ss:$8 sps:$4 sm:$0xff]   ;;  %v1629_v0 = vld [vmem:[%s2299_s1 + $0xf0] ss:$8 sps:$4 sm:$0xff]   ;;  %v1636_v2 = vld [vmem:[%s2299_s1 + $0x104] ss:$8 sps:$4 sm:$0xff]  }
  0x17   :  { %1014 = vmatpush1.bf16.msra.mxu1 %v1569_v22  ;;  %v1627_v63 = vld [vmem:[%s2299_s1 + $0x2f4] ss:$8 sps:$4 sm:$0xff]   ;;  %v1630_v1 = vld [vmem:[%s2299_s1 + $0x2f0] ss:$8 sps:$4 sm:$0xff]   ;;  %v1642_v3 = vld [vmem:[%s2299_s1 + $0x304] ss:$8 sps:$4 sm:$0xff]  }
  0x18   :  { %1120 = vmatpush1.bf16.msra.mxu0 %v1570_v23  ;;  %1015 = vmatprep.subr.bf16.mxu1 %v1571_v24  ;;  %v1631_v4 = vld [vmem:[%s2300_s0] ss:$36 sps:$4 sm:$0xff]   ;;  %v1637_v6 = vld [vmem:[%s2300_s0 + $0x10] ss:$36 sps:$4 sm:$0xff]  }
  0x19   :  { %1121 = vmatprep.subr.bf16.mxu0 %v1573_v25  ;;  %v1634_v5 = vld [vmem:[%s2299_s1 + $0x100] ss:$8 sps:$4 sm:$0xff]   ;;  %v1645_v8 = vld [vmem:[%s2299_s1 + $0x114] ss:$8 sps:$4 sm:$0xff]   ;;  %v1643_v10 = vld [vmem:[%s2299_s1 + $0x110] ss:$8 sps:$4 sm:$0xff]  }
  0x1a   :  { %v1640_v7 = vld [vmem:[%s2299_s1 + $0x300] ss:$8 sps:$4 sm:$0xff]   ;;  %v1648_v9 = vld [vmem:[%s2299_s1 + $0x314] ss:$8 sps:$4 sm:$0xff]   ;;  %v1646_v11 = vld [vmem:[%s2299_s1 + $0x310] ss:$8 sps:$4 sm:$0xff]  }
  0x1b   :  { %1016 = vmatpush1.bf16.msra.mxu1 %v1575_v26  ;;  %v1651_v12 = vld [vmem:[%s2299_s1 + $0x124] ss:$8 sps:$4 sm:$0xff]   ;;  %v1649_v14 = vld [vmem:[%s2299_s1 + $0x120] ss:$8 sps:$4 sm:$0xff]   ;;  %v1657_v16 = vld [vmem:[%s2299_s1 + $0x134] ss:$8 sps:$4 sm:$0xff]  }
  0x1c   :  { %1122 = vmatpush1.bf16.msra.mxu0 %v1576_v27  ;;  %1017 = vmatprep.subr.bf16.mxu1 %v1577_v28  ;;  %v1654_v13 = vld [vmem:[%s2299_s1 + $0x324] ss:$8 sps:$4 sm:$0xff]   ;;  %v1652_v15 = vld [vmem:[%s2299_s1 + $0x320] ss:$8 sps:$4 sm:$0xff]   ;;  %v1660_v17 = vld [vmem:[%s2299_s1 + $0x334] ss:$8 sps:$4 sm:$0xff]  }
  0x1d   :  { %1123 = vmatprep.subr.bf16.mxu0 %v1579_v29  ;;  %v1655_v18 = vld [vmem:[%s2299_s1 + $0x130] ss:$8 sps:$4 sm:$0xff]   ;;  %v1663_v20 = vld [vmem:[%s2299_s1 + $0x144] ss:$8 sps:$4 sm:$0xff]   ;;  %v1661_v22 = vld [vmem:[%s2299_s1 + $0x140] ss:$8 sps:$4 sm:$0xff]  }
  0x1e   :  { %v1658_v19 = vld [vmem:[%s2299_s1 + $0x330] ss:$8 sps:$4 sm:$0xff]   ;;  %v1666_v21 = vld [vmem:[%s2299_s1 + $0x344] ss:$8 sps:$4 sm:$0xff]   ;;  %v1664_v23 = vld [vmem:[%s2299_s1 + $0x340] ss:$8 sps:$4 sm:$0xff]  }
  0x1f   :  { %1018 = vmatpush1.bf16.msra.mxu1 %v1581_v30  ;;  %v1669_v24 = vld [vmem:[%s2299_s1 + $0x154] ss:$8 sps:$4 sm:$0xff]   ;;  %v1667_v26 = vld [vmem:[%s2299_s1 + $0x150] ss:$8 sps:$4 sm:$0xff]   ;;  %v1675_v28 = vld [vmem:[%s2299_s1 + $0x164] ss:$8 sps:$4 sm:$0xff]  }
  0x20   :  { %1124 = vmatpush1.bf16.msra.mxu0 %v1582_v31  ;;  %1019 = vmatprep.subr.bf16.mxu1 %v1583_v32  ;;  %v1672_v25 = vld [vmem:[%s2299_s1 + $0x354] ss:$8 sps:$4 sm:$0xff]   ;;  %v1670_v27 = vld [vmem:[%s2299_s1 + $0x350] ss:$8 sps:$4 sm:$0xff]   ;;  %v1725_v31 = vld [vmem:[%s2300_s0 + $0x48] ss:$36 sps:$4 sm:$0xff]  }
  0x21   :  { %1125 = vmatprep.subr.bf16.mxu0 %v1585_v33  ;;  %v1721_v29 = vld [vmem:[%s2300_s0 + $0x4c] ss:$36 sps:$4 sm:$0xff]   ;;  %v1723_v30 = vld [vmem:[%s2300_s0 + $0x5c] ss:$36 sps:$4 sm:$0xff]  }
  0x22   :  { %v1678_v32 = vld [vmem:[%s2299_s1 + $0x364] ss:$8 sps:$4 sm:$0xff]   ;;  %v1729_v33 = vld [vmem:[%s2300_s0 + $0x58] ss:$36 sps:$4 sm:$0xff]  }
  0x23   :  { %1020 = vmatpush1.bf16.msra.mxu1 %v1587_v34  ;;  %v1673_v34 = vld [vmem:[%s2299_s1 + $0x160] ss:$8 sps:$4 sm:$0xff]   ;;  %v1691_v48 = vld [vmem:[%s2299_s1 + $0x190] ss:$8 sps:$4 sm:$0xff]   ;;  %v1702_v51 = vld [vmem:[%s2299_s1 + $0x3a4] ss:$8 sps:$4 sm:$0xff]  }
  0x24   :  { %1126 = vmatpush1.bf16.msra.mxu0 %v1588_v35  ;;  %1021 = vmatprep.subr.bf16.mxu1 %v1589_v36  ;;  %v1676_v35 = vld [vmem:[%s2299_s1 + $0x360] ss:$8 sps:$4 sm:$0xff]   ;;  %v1681_v36 = vld [vmem:[%s2299_s1 + $0x174] ss:$8 sps:$4 sm:$0xff]  }
  0x25   :  { %1127 = vmatprep.subr.bf16.mxu0 %v1591_v37  ;;  %v1684_v37 = vld [vmem:[%s2299_s1 + $0x374] ss:$8 sps:$4 sm:$0xff]  }
  0x27   :  { %1022 = vmatpush1.bf16.msra.mxu1 %v1593_v38  ;;  %v1679_v38 = vld [vmem:[%s2299_s1 + $0x170] ss:$8 sps:$4 sm:$0xff]  }
  0x28   :  { %1128 = vmatpush1.bf16.msra.mxu0 %v1594_v39  ;;  %1023 = vmatprep.subr.bf16.mxu1 %v1595_v40  ;;  %v1682_v39 = vld [vmem:[%s2299_s1 + $0x370] ss:$8 sps:$4 sm:$0xff]   ;;  %v1687_v40 = vld [vmem:[%s2299_s1 + $0x184] ss:$8 sps:$4 sm:$0xff]  }
  0x29   :  { %1129 = vmatprep.subr.bf16.mxu0 %v1597_v41  ;;  %v1741_v41 = vld [vmem:[%s2300_s0 + $0xc] ss:$36 sps:$4 sm:$0xff]  }
  0x2b   :  { %1024 = vmatpush1.bf16.msra.mxu1 %v1599_v42  ;;  %v1690_v42 = vld [vmem:[%s2299_s1 + $0x384] ss:$8 sps:$4 sm:$0xff]  }
  0x2c   :  { %1130 = vmatpush1.bf16.msra.mxu0 %v1600_v43  ;;  %1025 = vmatprep.subr.bf16.mxu1 %v1601_v44  ;;  %v1744_v43 = vld [vmem:[%s2300_s0 + $0x1c] ss:$36 sps:$4 sm:$0xff]  }
  0x2d   :  { %1131 = vmatprep.subr.bf16.mxu0 %v1603_v45  ;;  %v1685_v44 = vld [vmem:[%s2299_s1 + $0x180] ss:$8 sps:$4 sm:$0xff]  }
  0x2e   :  { %v1688_v45 = vld [vmem:[%s2299_s1 + $0x380] ss:$8 sps:$4 sm:$0xff]  }
  0x2f   :  { %1026 = vmatpush1.bf16.msra.mxu1 %v1605_v46  ;;  %v1693_v46 = vld [vmem:[%s2299_s1 + $0x194] ss:$8 sps:$4 sm:$0xff]  }
  0x30   :  { %1132 = vmatpush1.bf16.msra.mxu0 %v1606_v47  ;;  %1027 = vmatprep.subr.bf16.mxu1 %v1607_v49  ;;  %v1696_v47 = vld [vmem:[%s2299_s1 + $0x394] ss:$8 sps:$4 sm:$0xff]   ;;  %v1694_v49 = vld [vmem:[%s2299_s1 + $0x390] ss:$8 sps:$4 sm:$0xff]  }
  0x31   :  { %1133 = vmatprep.subr.bf16.mxu0 %v1609_v50  ;;  %v1699_v50 = vld [vmem:[%s2299_s1 + $0x1a4] ss:$8 sps:$4 sm:$0xff]  }
  0x33   :  { %1028 = vmatpush1.bf16.msra.mxu1 %v1611_v52  ;;  %v1697_v52 = vld [vmem:[%s2299_s1 + $0x1a0] ss:$8 sps:$4 sm:$0xff]  }
  0x34   :  { %1134 = vmatpush1.bf16.msra.mxu0 %v1612_v53  ;;  %1029 = vmatprep.subr.bf16.mxu1 %v1613_v54  ;;  %v1700_v53 = vld [vmem:[%s2299_s1 + $0x3a0] ss:$8 sps:$4 sm:$0xff]   ;;  %v1705_v54 = vld [vmem:[%s2299_s1 + $0x1b4] ss:$8 sps:$4 sm:$0xff]  }
  0x35   :  { %1135 = vmatprep.subr.bf16.mxu0 %v1615_v55  ;;  %v1708_v55 = vld [vmem:[%s2299_s1 + $0x3b4] ss:$8 sps:$4 sm:$0xff]  }
  0x37   :  { %1030 = vmatpush1.bf16.msra.mxu1 %v1617_v56  ;;  %v1703_v56 = vld [vmem:[%s2299_s1 + $0x1b0] ss:$8 sps:$4 sm:$0xff]  }
  0x38   :  { %1136 = vmatpush1.bf16.msra.mxu0 %v1618_v57  ;;  %1031 = vmatprep.subr.bf16.mxu1 %v1619_v58  ;;  %v1706_v57 = vld [vmem:[%s2299_s1 + $0x3b0] ss:$8 sps:$4 sm:$0xff]   ;;  %v1711_v58 = vld [vmem:[%s2299_s1 + $0x1c4] ss:$8 sps:$4 sm:$0xff]  }
  0x39   :  { %1137 = vmatprep.subr.bf16.mxu0 %v1621_v59  ;;  %v1714_v59 = vld [vmem:[%s2299_s1 + $0x3c4] ss:$8 sps:$4 sm:$0xff]  }
  0x3b   :  { %1032 = vmatpush1.bf16.msra.mxu1 %v1623_v60  ;;  %v1709_v60 = vld [vmem:[%s2299_s1 + $0x1c0] ss:$8 sps:$4 sm:$0xff]  }
  0x3c   :  { %1138 = vmatpush1.bf16.msra.mxu0 %v1624_v61  ;;  %1033 = vmatprep.subr.bf16.mxu1 %v1625_v62  ;;  %v1712_v61 = vld [vmem:[%s2299_s1 + $0x3c0] ss:$8 sps:$4 sm:$0xff]   ;;  %v1717_v62 = vld [vmem:[%s2299_s1 + $0x1d4] ss:$8 sps:$4 sm:$0xff]  }
  0x3d   :  { %1139 = vmatprep.subr.bf16.mxu0 %v1627_v63  ;;  %v1720_v63 = vld [vmem:[%s2299_s1 + $0x3d4] ss:$8 sps:$4 sm:$0xff]  }
  0x3f   :  { %1034 = vmatpush1.bf16.msra.mxu1 %v1629_v0  ;;  %v1715_v0 = vld [vmem:[%s2299_s1 + $0x1d0] ss:$8 sps:$4 sm:$0xff]  }
  0x40   :  { %1140 = vmatpush1.bf16.msra.mxu0 %v1630_v1  ;;  %1056 = vmatprep.subr.bf16.mxu1 %v1636_v2  ;;  %v1718_v1 = vld [vmem:[%s2299_s1 + $0x3d0] ss:$8 sps:$4 sm:$0xff]   ;;  %v1728_v2 = vld [vmem:[%s2299_s1 + $0x1e4] ss:$8 sps:$4 sm:$0xff]  }
  0x41   :  { %1162 = vmatprep.subr.bf16.mxu0 %v1642_v3  ;;  %v1732_v3 = vld [vmem:[%s2299_s1 + $0x3e4] ss:$8 sps:$4 sm:$0xff]  }
  0x42   :  { %1036 = vmatmul.mubr.bf16.vlgmr.msra.gmra.mrb[0].mxu1 %v1631_v4  ;;  %v1726_v4 = vld [vmem:[%s2299_s1 + $0x1e0] ss:$8 sps:$4 sm:$0xff]  }
  0x43   :  { %1142 = vmatmul.mubr.bf16.vlgmr.msra.gmra.mrb[0].mxu0 %v1637_v6  ;;  %1057 = vmatpush1.bf16.msra.mxu1 %v1634_v5  ;;  %v1730_v5 = vld [vmem:[%s2299_s1 + $0x3e0] ss:$8 sps:$4 sm:$0xff]   ;;  %v1735_v6 = vld [vmem:[%s2299_s1 + $0x1f4] ss:$8 sps:$4 sm:$0xff]  }
  0x44   :  { %1163 = vmatpush1.bf16.msra.mxu0 %v1640_v7  ;;  %1058 = vmatprep.subr.bf16.mxu1 %v1645_v8  ;;  %v1738_v7 = vld [vmem:[%s2299_s1 + $0x3f4] ss:$8 sps:$4 sm:$0xff]   ;;  %v1733_v8 = vld [vmem:[%s2299_s1 + $0x1f0] ss:$8 sps:$4 sm:$0xff]  }
  0x45   :  { %1164 = vmatprep.subr.bf16.mxu0 %v1648_v9  ;;  %1045 = vmatprep.mubr.bf16.mxu1 %v1721_v29  ;;  %v1736_v9 = vld [vmem:[%s2299_s1 + $0x3f0] ss:$8 sps:$4 sm:$0xff]   ;;  %v1771_v29 = vld [vmem:[%s2299_s1 + $0x464] ss:$8 sps:$4 sm:$0xff]  }
  0x46   :  { %1151 = vmatprep.mubr.bf16.mxu0 %v1723_v30  ;;  %v1769_v30 = vld [vmem:[%s2299_s1 + $0x460] ss:$8 sps:$4 sm:$0xff]  }
  0x47   :  { %1059 = vmatpush1.bf16.msra.mxu1 %v1643_v10  ;;  %v1747_v10 = vld [vmem:[%s2299_s1 + $0x404] ss:$8 sps:$4 sm:$0xff]  }
  0x48   :  { %1165 = vmatpush1.bf16.msra.mxu0 %v1646_v11  ;;  %1060 = vmatprep.subr.bf16.mxu1 %v1651_v12  ;;  %v1739_v11 = vld [vmem:[%s2300_s0 + $0x8] ss:$36 sps:$4 sm:$0xff]   ;;  %v1742_v12 = vld [vmem:[%s2300_s0 + $0x18] ss:$36 sps:$4 sm:$0xff]  }
  0x49   :  { %1166 = vmatprep.subr.bf16.mxu0 %v1654_v13  ;;  %v1745_v13 = vld [vmem:[%s2299_s1 + $0x400] ss:$8 sps:$4 sm:$0xff]  }
  0x4a   :  { %1046 = vmatmul.mubr.bf16.gmra.mrb[4].mxu1 %v1725_v31  ;;  %v1774_v31 = vld [vmem:[%s2299_s1 + $0x474] ss:$8 sps:$4 sm:$0xff]  }
  0x4b   :  { %1061 = vmatpush1.bf16.msra.mxu1 %v1649_v14  ;;  %1152 = vmatmul.mubr.bf16.gmra.mrb[4].mxu0 %v1729_v33  ;;  %v1750_v14 = vld [vmem:[%s2299_s1 + $0x414] ss:$8 sps:$4 sm:$0xff]   ;;  %v1775_v33 = vld [vmem:[%s2300_s0 + $0x20] ss:$36 sps:$4 sm:$0xff]  }
  0x4c   :  { %1167 = vmatpush1.bf16.msra.mxu0 %v1652_v15  ;;  %1062 = vmatprep.subr.bf16.mxu1 %v1657_v16  ;;  %v1751_v15 = vld [vmem:[%s2300_s0 + $0x54] ss:$36 sps:$4 sm:$0xff]   ;;  %v1753_v16 = vld [vmem:[%s2300_s0 + $0x64] ss:$36 sps:$4 sm:$0xff]  }
  0x4d   :  { %1168 = vmatprep.subr.bf16.mxu0 %v1660_v17  ;;  %1088 = vmatprep.mubr.bf16.mxu1 %v1741_v41  ;;  %v1748_v17 = vld [vmem:[%s2299_s1 + $0x410] ss:$8 sps:$4 sm:$0xff]  }
  0x4e   :  { %1194 = vmatprep.mubr.bf16.mxu0 %v1744_v43 }
  0x4f   :  { %1063 = vmatpush1.bf16.msra.mxu1 %v1655_v18  ;;  %v1759_v18 = vld [vmem:[%s2299_s1 + $0x424] ss:$8 sps:$4 sm:$0xff]  }
  0x50   :  { %1169 = vmatpush1.bf16.msra.mxu0 %v1658_v19  ;;  %1064 = vmatprep.subr.bf16.mxu1 %v1663_v20  ;;  %v1755_v19 = vld [vmem:[%s2300_s0 + $0x50] ss:$36 sps:$4 sm:$0xff]   ;;  %v1756_v20 = vld [vmem:[%s2300_s0 + $0x60] ss:$36 sps:$4 sm:$0xff]  }
  0x51   :  { %1170 = vmatprep.subr.bf16.mxu0 %v1666_v21  ;;  %v1757_v21 = vld [vmem:[%s2299_s1 + $0x420] ss:$8 sps:$4 sm:$0xff]  }
  0x53   :  { %1065 = vmatpush1.bf16.msra.mxu1 %v1661_v22  ;;  %v1762_v22 = vld [vmem:[%s2299_s1 + $0x434] ss:$8 sps:$4 sm:$0xff]  }
  0x54   :  { %1171 = vmatpush1.bf16.msra.mxu0 %v1664_v23  ;;  %1066 = vmatprep.subr.bf16.mxu1 %v1669_v24  ;;  %v1760_v23 = vld [vmem:[%s2299_s1 + $0x430] ss:$8 sps:$4 sm:$0xff]   ;;  %v1765_v24 = vld [vmem:[%s2299_s1 + $0x444] ss:$8 sps:$4 sm:$0xff]  }
  0x55   :  { %1172 = vmatprep.subr.bf16.mxu0 %v1672_v25  ;;  %v1777_v25 = vmov 0  }
  0x57   :  { %1067 = vmatpush1.bf16.msra.mxu1 %v1667_v26  ;;  %v1763_v26 = vld [vmem:[%s2299_s1 + $0x440] ss:$8 sps:$4 sm:$0xff]  }
  0x58   :  { %1173 = vmatpush1.bf16.msra.mxu0 %v1670_v27  ;;  %1068 = vmatprep.subr.bf16.mxu1 %v1675_v28  ;;  %v1768_v27 = vld [vmem:[%s2299_s1 + $0x454] ss:$8 sps:$4 sm:$0xff]   ;;  %v1766_v28 = vld [vmem:[%s2299_s1 + $0x450] ss:$8 sps:$4 sm:$0xff]  }
  0x59   :  { %1174 = vmatprep.subr.bf16.mxu0 %v1678_v32  ;;  %v1772_v32 = vld [vmem:[%s2299_s1 + $0x470] ss:$8 sps:$4 sm:$0xff]  }
  0x5b   :  { %1069 = vmatpush1.bf16.msra.mxu1 %v1673_v34  ;;  %v1776_v34 = vld [vmem:[%s2300_s0 + $0x68] ss:$36 sps:$4 sm:$0xff]  }
  0x5c   :  { %1175 = vmatpush1.bf16.msra.mxu0 %v1676_v35  ;;  %1070 = vmatprep.subr.bf16.mxu1 %v1681_v36  ;;  %v181_v35 = vlaneseq }
  0x5d   :  { %1176 = vmatprep.subr.bf16.mxu0 %v1684_v37 }
  0x5e   :  { %v182_v36 = vshrl.u32 %v181_v35, 7 }
  0x5f   :  { %1071 = vmatpush1.bf16.msra.mxu1 %v1679_v38 }
  0x60   :  { %1177 = vmatpush1.bf16.msra.mxu0 %v1682_v39  ;;  %1072 = vmatprep.subr.bf16.mxu1 %v1687_v40  ;;  %v183_v40 = vsub.s32 0, %v182_v36  ;;  %v187_v43 = vsub.s32 1, %v182_v36 }
  0x61   :  { %1178 = vmatprep.subr.bf16.mxu0 %v1690_v42  ;;  %v179_v42 = vld [vmem:[%s2301_s2] sm:$0x3] }
  0x63   :  { %1073 = vmatpush1.bf16.msra.mxu1 %v1685_v44  ;;  %v184_v44 = vrot.slane %v179_v42, %v183_v40 }
  0x64   :  { %1179 = vmatpush1.bf16.msra.mxu0 %v1688_v45  ;;  %1074 = vmatprep.subr.bf16.mxu1 %v1693_v46  ;;  %v188_v45 = vrot.slane %v179_v42, %v187_v43 }
  0x65   :  { %1180 = vmatprep.subr.bf16.mxu0 %v1696_v47 }
  0x67   :  { %1075 = vmatpush1.bf16.msra.mxu1 %v1691_v48 }
  0x68   :  { %1181 = vmatpush1.bf16.msra.mxu0 %v1694_v49  ;;  %1076 = vmatprep.subr.bf16.mxu1 %v1699_v50 }
  0x69   :  { %1182 = vmatprep.subr.bf16.mxu0 %v1702_v51 }
  0x6b   :  { %1077 = vmatpush1.bf16.msra.mxu1 %v1697_v52 }
  0x6c   :  { %1183 = vmatpush1.bf16.msra.mxu0 %v1700_v53  ;;  %1078 = vmatprep.subr.bf16.mxu1 %v1705_v54 }
  0x6d   :  { %1184 = vmatprep.subr.bf16.mxu0 %v1708_v55 }
  0x6f   :  { %1079 = vmatpush1.bf16.msra.mxu1 %v1703_v56 }
  0x70   :  { %1185 = vmatpush1.bf16.msra.mxu0 %v1706_v57  ;;  %1080 = vmatprep.subr.bf16.mxu1 %v1711_v58 }
  0x71   :  { %1186 = vmatprep.subr.bf16.mxu0 %v1714_v59 }
  0x73   :  { %1081 = vmatpush1.bf16.msra.mxu1 %v1709_v60 }
  0x74   :  { %1187 = vmatpush1.bf16.msra.mxu0 %v1712_v61  ;;  %1082 = vmatprep.subr.bf16.mxu1 %v1717_v62 }
  0x75   :  { %1188 = vmatprep.subr.bf16.mxu0 %v1720_v63 }
  0x77   :  { %1083 = vmatpush1.bf16.msra.mxu1 %v1715_v0 }
  0x78   :  { %1189 = vmatpush1.bf16.msra.mxu0 %v1718_v1  ;;  %1084 = vmatprep.subr.bf16.mxu1 %v1728_v2 }
  0x79   :  { %1190 = vmatprep.subr.bf16.mxu0 %v1732_v3 }
  0x7b   :  { %1085 = vmatpush1.bf16.msra.mxu1 %v1726_v4 }
  0x7c   :  { %1191 = vmatpush1.bf16.msra.mxu0 %v1730_v5  ;;  %1086 = vmatprep.subr.bf16.mxu1 %v1735_v6 }
  0x7d   :  { %1192 = vmatprep.subr.bf16.mxu0 %v1738_v7 }
  0x7f   :  { %1087 = vmatpush1.bf16.msra.mxu1 %v1733_v8 }
  0x80   :  { %1193 = vmatpush1.bf16.msra.mxu0 %v1736_v9  ;;  %1478 = vmatprep.subr.bf16.mxu1 %v1747_v10 }
  0x81   :  { %1215 = vmatprep.subr.bf16.mxu0 %v1747_v10 }
  0x82   :  { %1089 = vmatmul.mubr.bf16.vlgmr.msra.gmra.mrb[0].mxu1 %v1739_v11 }
  0x83   :  { %1195 = vmatmul.mubr.bf16.vlgmr.msra.gmra.mrb[0].mxu0 %v1742_v12  ;;  %1486 = vmatpush1.bf16.msra.mxu1 %v1745_v13 }
  0x84   :  { %1216 = vmatpush1.bf16.msra.mxu0 %v1745_v13  ;;  %1479 = vmatprep.subr.bf16.mxu1 %v1750_v14 }
  0x85   :  { %1217 = vmatprep.subr.bf16.mxu0 %v1750_v14  ;;  %1098 = vmatprep.mubr.bf16.mxu1 %v1751_v15 }
  0x86   :  { %1204 = vmatprep.mubr.bf16.mxu0 %v1753_v16 }
  0x87   :  { %1487 = vmatpush1.bf16.msra.mxu1 %v1748_v17 }
  0x88   :  { %1218 = vmatpush1.bf16.msra.mxu0 %v1748_v17  ;;  %1480 = vmatprep.subr.bf16.mxu1 %v1759_v18 }
  0x89   :  { %1219 = vmatprep.subr.bf16.mxu0 %v1759_v18 }
  0x8a   :  { %1099 = vmatmul.mubr.bf16.gmra.mrb[4].mxu1 %v1755_v19 }
  0x8b   :  { %1205 = vmatmul.mubr.bf16.gmra.mrb[4].mxu0 %v1756_v20  ;;  %1488 = vmatpush1.bf16.msra.mxu1 %v1757_v21 }
  0x8c   :  { %1220 = vmatpush1.bf16.msra.mxu0 %v1757_v21  ;;  %1481 = vmatprep.subr.bf16.mxu1 %v1762_v22 }
  0x8d   :  { %1221 = vmatprep.subr.bf16.mxu0 %v1762_v22  ;;  %1247 = vmatprep.mubr.bf16.mxu0 %v1777_v25 }
  0x8e   :  { %1257 = vmatprep.mubr.bf16.mxu1 %v1777_v25 }
  0x8f   :  { %1489 = vmatpush1.bf16.msra.mxu1 %v1760_v23 }
  0x90   :  { %1222 = vmatpush1.bf16.msra.mxu0 %v1760_v23  ;;  %1482 = vmatprep.subr.bf16.mxu1 %v1765_v24 }
  0x91   :  { %1223 = vmatprep.subr.bf16.mxu0 %v1765_v24 }
  0x93   :  { %1490 = vmatpush1.bf16.msra.mxu1 %v1763_v26 }
  0x94   :  { %1224 = vmatpush1.bf16.msra.mxu0 %v1763_v26  ;;  %1483 = vmatprep.subr.bf16.mxu1 %v1768_v27 }
  0x95   :  { %1225 = vmatprep.subr.bf16.mxu0 %v1768_v27 }
  0x97   :  { %1491 = vmatpush1.bf16.msra.mxu1 %v1766_v28 }
  0x98   :  { %1226 = vmatpush1.bf16.msra.mxu0 %v1766_v28  ;;  %1484 = vmatprep.subr.bf16.mxu1 %v1771_v29 }
  0x99   :  { %1227 = vmatprep.subr.bf16.mxu0 %v1771_v29 }
  0x9b   :  { %1492 = vmatpush1.bf16.msra.mxu1 %v1769_v30 }
  0x9c   :  { %1228 = vmatpush1.bf16.msra.mxu0 %v1769_v30  ;;  %1485 = vmatprep.subr.bf16.mxu1 %v1774_v31 }
  0x9d   :  { %1229 = vmatprep.subr.bf16.mxu0 %v1774_v31 }
  0x9f   :  { %1493 = vmatpush1.bf16.msra.mxu1 %v1772_v32 }
  0xa0   :  { %1230 = vmatpush1.bf16.msra.mxu0 %v1772_v32 }
  0xa2   :  { %1258 = vmatmul.mubr.bf16.vlgmr.msra.gmra.mrb[8].mxu1 %v1776_v34 }
  0xa3   :  { %1248 = vmatmul.mubr.bf16.vlgmr.msra.gmra.mrb[0].mxu0 %v1775_v33 }
 0x155   :  { %v1090_v37 = vpop.f32.mrb[0].mxu1 }
 0x156   :  { %v1092_v38 = vpop.f32.mrb[1].mxu1  ;;  %v1494_v62 = vadd.f32 %v1090_v37, %v184_v44 }
 0x157   :  { %v1094_v39 = vpop.f32.mrb[2].mxu1  ;;  %v1496_v63 = vadd.f32 %v1092_v38, %v188_v45 }
 0x158   :  { %v1096_v41 = vpop.f32.mrb[3].mxu1  ;;  %v1498_v2 = vadd.f32 %v1094_v39, %v184_v44 }
 0x159   :  { %v1500_v7 = vadd.f32 %v1096_v41, %v188_v45 }
 0x15d   :  { %v1100_v46 = vpop.f32.mrb[4].mxu1 }
 0x15e   :  { %v1206_v47 = vpop.f32.mrb[4].mxu0  ;;  %v1502_v48 = vadd.f32 %v1100_v46, %v184_v44  ;;  %v1102_v49 = vpop.f32.mrb[5].mxu1 }
 0x15f   :  { %v1208_v50 = vpop.f32.mrb[5].mxu0  ;;  %v1505_v51 = vadd.f32 %v1102_v49, %v188_v45  ;;  %v1104_v52 = vpop.f32.mrb[6].mxu1 }
 0x160   :  { %v1210_v53 = vpop.f32.mrb[6].mxu0  ;;  %v1503_v54 = vadd.f32 %v1502_v48, %v1206_v47  ;;  %v1508_v55 = vadd.f32 %v1104_v52, %v184_v44  ;;  %v1106_v56 = vpop.f32.mrb[7].mxu1 }
 0x161   :  { %v1212_v57 = vpop.f32.mrb[7].mxu0  ;;  %v1506_v58 = vadd.f32 %v1505_v51, %v1208_v50  ;;  %v1511_v59 = vadd.f32 %v1106_v56, %v188_v45 }
 0x162   :  { %v1509_v60 = vadd.f32 %v1508_v55, %v1210_v53 }
 0x163   :  { %v1512_v61 = vadd.f32 %v1511_v59, %v1212_v57 }
 0x175   :  { %v1259_v1 = vpop.f32.mrb[8].mxu1 }
 0x176   :  { %v1249_v0 = vpop.f32.mrb[0].mxu0  ;;  %v1504_v4 = vadd.f32 %v1503_v54, %v1259_v1  ;;  %v1261_v6 = vpop.f32.mrb[9].mxu1 }
 0x177   :  { %v1495_v3 = vadd.f32 %v1494_v62, %v1249_v0  ;;  %v1251_v5 = vpop.f32.mrb[1].mxu0  ;;  %v1507_v9 = vadd.f32 %v1506_v58, %v1261_v6  ;;  %v1263_v11 = vpop.f32.mrb[10].mxu1 }
 0x178   :  { %v1497_v8 = vadd.f32 %v1496_v63, %v1251_v5  ;;  %v1253_v10 = vpop.f32.mrb[2].mxu0  ;;  %v1272_v13 = vmax.f32 %v1504_v4, 0.0  ;;  %v1510_v15 = vadd.f32 %v1509_v60, %v1263_v11  ;;  %v1265_v17 = vpop.f32.mrb[11].mxu1 }
 0x179   :  { %v1268_v12 = vmax.f32 %v1495_v3, 0.0  ;;  %v1499_v14 = vadd.f32 %v1498_v2, %v1253_v10  ;;  %v1255_v16 = vpop.f32.mrb[3].mxu0  ;;  %v1273_v19 = vmax.f32 %v1507_v9, 0.0  ;;  %v1513_v21 = vadd.f32 %v1512_v61, %v1265_v17 }
 0x17a   :  { %v1269_v18 = vmax.f32 %v1497_v8, 0.0  ;;  %v1501_v20 = vadd.f32 %v1500_v7, %v1255_v16  ;;  %v1274_v23 = vmax.f32 %v1510_v15, 0.0 }
 0x17b   :  { %v1270_v22 = vmax.f32 %v1499_v14, 0.0  ;;  %v1476_v25 = vpack.c.bf16 %v1273_v19, %v1272_v13  ;;  %v1275_v27 = vmax.f32 %v1513_v21, 0.0 }
 0x17c   :  { %v1474_v24 = vpack.c.bf16 %v1269_v18, %v1268_v12  ;;  %v1271_v26 = vmax.f32 %v1501_v20, 0.0 }
 0x17d   :  { %1302 = vst [vmem:[%s2302_s3 + $0x10] sm:$0xff] %v1476_v25  ;;  %v1477_v29 = vpack.c.bf16 %v1275_v27, %v1274_v23 }
 0x17e   :  { %1300 = vst [vmem:[%s2302_s3] sm:$0xff] %v1474_v24  ;;  %v1475_v28 = vpack.c.bf16 %v1271_v26, %v1270_v22 }
 0x17f   :  { %1303 = vst [vmem:[%s2302_s3 + $0x18] sm:$0xff] %v1477_v29 }
 0x180   :  { %1301 = vst [vmem:[%s2302_s3 + $0x8] sm:$0xff] %v1475_v28 }

// kernel: tile.18
= control target key start
LH: loop header
LB: loop body
LE: loop exit
PB: predicated region body
PF: predicated region fallthrough
CT: control target
= control target key end

     0   :  { %s22_s0 = inlined_call_operand.vmem [shape: f32[128], index: 0, kind: input, shape index: {}]   ;;  %s23_s1 = inlined_call_operand.vmem [shape: f32[4,128], index: 1, kind: output, shape index: {}]  }
   0x1   :  { %v4_v0 = vld [vmem:[%s22_s0] ss:$0 sm:$0xff] }
   0x2   :  { %5 = vst [vmem:[%s23_s1] sm:$0xf] %v4_v0 }

// kernel: unet_forward.16
= control target key start
LH: loop header
LB: loop body
LE: loop exit
PB: predicated region body
PF: predicated region fallthrough
CT: control target
= control target key end

     0   :  { %s924_s1 = inlined_call_operand.vmem [shape: bf16[256,512], index: 1, kind: input, shape index: {}]   ;;  %s925_s0 = inlined_call_operand.vmem [shape: bf16[8,256], index: 0, kind: input, shape index: {}]   ;;  %s926_s2 = inlined_call_operand.vmem [shape: f32[1,512], index: 2, kind: input, shape index: {}]   ;;  %s927_s3 = inlined_call_operand.vmem [shape: bf16[8,512], index: 3, kind: output, shape index: {}]  }
   0x1   :  { %v602_v0 = vld [vmem:[%s924_s1 + $0x4] ss:$16 sps:$4 sm:$0xff]   ;;  %v604_v1 = vld [vmem:[%s924_s1 + $0xc] ss:$16 sps:$4 sm:$0xff]   ;;  %v606_v2 = vld [vmem:[%s924_s1] ss:$16 sps:$4 sm:$0xff]  }
   0x2   :  { %428 = vmatprep.subr.bf16.mxu0 %v602_v0  ;;  %v607_v3 = vld [vmem:[%s924_s1 + $0x8] ss:$16 sps:$4 sm:$0xff]   ;;  %469 = vmatprep.subr.bf16.mxu1 %v604_v1  ;;  %v608_v4 = vld [vmem:[%s924_s1 + $0x24] ss:$16 sps:$4 sm:$0xff]   ;;  %v610_v5 = vld [vmem:[%s924_s1 + $0x2c] ss:$16 sps:$4 sm:$0xff]  }
   0x3   :  { %429 = vmatpush1.bf16.msra.mxu0 %v606_v2  ;;  %470 = vmatpush1.bf16.msra.mxu1 %v607_v3  ;;  %v612_v6 = vld [vmem:[%s924_s1 + $0x20] ss:$16 sps:$4 sm:$0xff]   ;;  %v613_v7 = vld [vmem:[%s924_s1 + $0x28] ss:$16 sps:$4 sm:$0xff]   ;;  %v614_v8 = vld [vmem:[%s924_s1 + $0x44] ss:$16 sps:$4 sm:$0xff]   ;;  %v81_v3 = vlaneseq }
   0x4   :  { %430 = vmatprep.subr.bf16.mxu0 %v608_v4  ;;  %471 = vmatprep.subr.bf16.mxu1 %v610_v5  ;;  %v616_v9 = vld [vmem:[%s924_s1 + $0x4c] ss:$16 sps:$4 sm:$0xff]   ;;  %v618_v10 = vld [vmem:[%s924_s1 + $0x40] ss:$16 sps:$4 sm:$0xff]   ;;  %v619_v11 = vld [vmem:[%s924_s1 + $0x48] ss:$16 sps:$4 sm:$0xff]  }
   0x5   :  { %v620_v12 = vld [vmem:[%s924_s1 + $0x64] ss:$16 sps:$4 sm:$0xff]   ;;  %v622_v13 = vld [vmem:[%s924_s1 + $0x6c] ss:$16 sps:$4 sm:$0xff]   ;;  %v624_v14 = vld [vmem:[%s924_s1 + $0x60] ss:$16 sps:$4 sm:$0xff]  }
   0x6   :  { %v625_v15 = vld [vmem:[%s924_s1 + $0x68] ss:$16 sps:$4 sm:$0xff]   ;;  %v626_v16 = vld [vmem:[%s924_s1 + $0x84] ss:$16 sps:$4 sm:$0xff]   ;;  %v628_v17 = vld [vmem:[%s924_s1 + $0x8c] ss:$16 sps:$4 sm:$0xff]  }
   0x7   :  { %431 = vmatpush1.bf16.msra.mxu0 %v612_v6  ;;  %472 = vmatpush1.bf16.msra.mxu1 %v613_v7  ;;  %v630_v18 = vld [vmem:[%s924_s1 + $0x80] ss:$16 sps:$4 sm:$0xff]   ;;  %v631_v19 = vld [vmem:[%s924_s1 + $0x88] ss:$16 sps:$4 sm:$0xff]   ;;  %v632_v20 = vld [vmem:[%s924_s1 + $0xa4] ss:$16 sps:$4 sm:$0xff]  }
   0x8   :  { %432 = vmatprep.subr.bf16.mxu0 %v614_v8  ;;  %473 = vmatprep.subr.bf16.mxu1 %v616_v9  ;;  %v634_v21 = vld [vmem:[%s924_s1 + $0xac] ss:$16 sps:$4 sm:$0xff]   ;;  %v636_v22 = vld [vmem:[%s924_s1 + $0xa0] ss:$16 sps:$4 sm:$0xff]   ;;  %v637_v23 = vld [vmem:[%s924_s1 + $0xa8] ss:$16 sps:$4 sm:$0xff]  }
   0x9   :  { %v638_v24 = vld [vmem:[%s924_s1 + $0xc4] ss:$16 sps:$4 sm:$0xff]   ;;  %v640_v25 = vld [vmem:[%s924_s1 + $0xcc] ss:$16 sps:$4 sm:$0xff]   ;;  %v642_v26 = vld [vmem:[%s924_s1 + $0xc0] ss:$16 sps:$4 sm:$0xff]  }
   0xa   :  { %v643_v27 = vld [vmem:[%s924_s1 + $0xc8] ss:$16 sps:$4 sm:$0xff]   ;;  %v644_v28 = vld [vmem:[%s924_s1 + $0xe4] ss:$16 sps:$4 sm:$0xff]   ;;  %v646_v29 = vld [vmem:[%s924_s1 + $0xec] ss:$16 sps:$4 sm:$0xff]  }
   0xb   :  { %433 = vmatpush1.bf16.msra.mxu0 %v618_v10  ;;  %474 = vmatpush1.bf16.msra.mxu1 %v619_v11  ;;  %v648_v30 = vld [vmem:[%s924_s1 + $0xe0] ss:$16 sps:$4 sm:$0xff]   ;;  %v649_v31 = vld [vmem:[%s924_s1 + $0xe8] ss:$16 sps:$4 sm:$0xff]   ;;  %v650_v32 = vld [vmem:[%s924_s1 + $0x104] ss:$16 sps:$4 sm:$0xff]  }
   0xc   :  { %434 = vmatprep.subr.bf16.mxu0 %v620_v12  ;;  %475 = vmatprep.subr.bf16.mxu1 %v622_v13  ;;  %v652_v33 = vld [vmem:[%s924_s1 + $0x10c] ss:$16 sps:$4 sm:$0xff]   ;;  %v654_v34 = vld [vmem:[%s924_s1 + $0x100] ss:$16 sps:$4 sm:$0xff]   ;;  %v655_v35 = vld [vmem:[%s924_s1 + $0x108] ss:$16 sps:$4 sm:$0xff]  }
   0xd   :  { %v656_v36 = vld [vmem:[%s924_s1 + $0x124] ss:$16 sps:$4 sm:$0xff]   ;;  %v658_v37 = vld [vmem:[%s924_s1 + $0x12c] ss:$16 sps:$4 sm:$0xff]   ;;  %v660_v38 = vld [vmem:[%s924_s1 + $0x120] ss:$16 sps:$4 sm:$0xff]  }
   0xe   :  { %v661_v39 = vld [vmem:[%s924_s1 + $0x128] ss:$16 sps:$4 sm:$0xff]   ;;  %v662_v40 = vld [vmem:[%s924_s1 + $0x144] ss:$16 sps:$4 sm:$0xff]   ;;  %v664_v41 = vld [vmem:[%s924_s1 + $0x14c] ss:$16 sps:$4 sm:$0xff]  }
   0xf   :  { %435 = vmatpush1.bf16.msra.mxu0 %v624_v14  ;;  %476 = vmatpush1.bf16.msra.mxu1 %v625_v15  ;;  %v666_v42 = vld [vmem:[%s924_s1 + $0x140] ss:$16 sps:$4 sm:$0xff]   ;;  %v667_v43 = vld [vmem:[%s924_s1 + $0x148] ss:$16 sps:$4 sm:$0xff]   ;;  %v668_v44 = vld [vmem:[%s924_s1 + $0x164] ss:$16 sps:$4 sm:$0xff]  }
  0x10   :  { %436 = vmatprep.subr.bf16.mxu0 %v626_v16  ;;  %477 = vmatprep.subr.bf16.mxu1 %v628_v17  ;;  %v670_v45 = vld [vmem:[%s924_s1 + $0x16c] ss:$16 sps:$4 sm:$0xff]   ;;  %v14_v46 = vld [vmem:[%s925_s0] sm:$0xff]  ;;  %v673_v49 = vld [vmem:[%s924_s1 + $0x168] ss:$16 sps:$4 sm:$0xff]   ;;  %v82_v4 = vshrl.u32 %v81_v3, 7 }
  0x11   :  { %v533_v47 = vcombine.high %v14_v46, %v14_v46  ;;  %v672_v48 = vld [vmem:[%s924_s1 + $0x160] ss:$16 sps:$4 sm:$0xff]   ;;  %v674_v50 = vld [vmem:[%s924_s1 + $0x184] ss:$16 sps:$4 sm:$0xff]   ;;  %v676_v51 = vld [vmem:[%s924_s1 + $0x18c] ss:$16 sps:$4 sm:$0xff]   ;;  %v532_v2 = vcombine.low %v14_v46, %v14_v46 }
  0x12   :  { %v678_v52 = vld [vmem:[%s924_s1 + $0x180] ss:$16 sps:$4 sm:$0xff]   ;;  %v679_v53 = vld [vmem:[%s924_s1 + $0x188] ss:$16 sps:$4 sm:$0xff]   ;;  %v680_v54 = vld [vmem:[%s924_s1 + $0x1a4] ss:$16 sps:$4 sm:$0xff]  }
  0x13   :  { %437 = vmatpush1.bf16.msra.mxu0 %v630_v18  ;;  %478 = vmatpush1.bf16.msra.mxu1 %v631_v19  ;;  %v682_v55 = vld [vmem:[%s924_s1 + $0x1ac] ss:$16 sps:$4 sm:$0xff]   ;;  %v684_v56 = vld [vmem:[%s924_s1 + $0x1a0] ss:$16 sps:$4 sm:$0xff]   ;;  %v685_v57 = vld [vmem:[%s924_s1 + $0x1a8] ss:$16 sps:$4 sm:$0xff]  }
  0x14   :  { %438 = vmatprep.subr.bf16.mxu0 %v632_v20  ;;  %479 = vmatprep.subr.bf16.mxu1 %v634_v21  ;;  %v686_v58 = vld [vmem:[%s924_s1 + $0x1c4] ss:$16 sps:$4 sm:$0xff]   ;;  %v688_v59 = vld [vmem:[%s924_s1 + $0x1cc] ss:$16 sps:$4 sm:$0xff]   ;;  %v690_v60 = vld [vmem:[%s924_s1 + $0x1c0] ss:$16 sps:$4 sm:$0xff]  }
  0x15   :  { %460 = vmatprep.mubr.bf16.mxu0 %v533_v47  ;;  %501 = vmatprep.mubr.bf16.mxu1 %v533_v47  ;;  %v691_v61 = vld [vmem:[%s924_s1 + $0x1c8] ss:$16 sps:$4 sm:$0xff]   ;;  %v692_v62 = vld [vmem:[%s924_s1 + $0x1e4] ss:$16 sps:$4 sm:$0xff]   ;;  %v694_v63 = vld [vmem:[%s924_s1 + $0x1ec] ss:$16 sps:$4 sm:$0xff]  }
  0x16   :  { %v696_v0 = vld [vmem:[%s924_s1 + $0x1e0] ss:$16 sps:$4 sm:$0xff]   ;;  %v697_v1 = vld [vmem:[%s924_s1 + $0x1e8] ss:$16 sps:$4 sm:$0xff]   ;;  %v83_v5 = vsub.s32 0, %v82_v4  ;;  %v91_v6 = vsub.s32 2, %v82_v4 }
  0x17   :  { %439 = vmatpush1.bf16.msra.mxu0 %v636_v22  ;;  %480 = vmatpush1.bf16.msra.mxu1 %v637_v23  ;;  %v79_v7 = vld [vmem:[%s926_s2] sm:$0xf]  ;;  %v87_v8 = vsub.s32 1, %v82_v4  ;;  %v95_v9 = vsub.s32 3, %v82_v4 }
  0x18   :  { %440 = vmatprep.subr.bf16.mxu0 %v638_v24  ;;  %481 = vmatprep.subr.bf16.mxu1 %v640_v25  ;;  %v84_v10 = vrot.slane %v79_v7, %v83_v5  ;;  %v92_v11 = vrot.slane %v79_v7, %v91_v6 }
  0x19   :  { %v88_v12 = vrot.slane %v79_v7, %v87_v8  ;;  %v96_v13 = vrot.slane %v79_v7, %v95_v9 }
  0x1b   :  { %441 = vmatpush1.bf16.msra.mxu0 %v642_v26  ;;  %482 = vmatpush1.bf16.msra.mxu1 %v643_v27 }
  0x1c   :  { %442 = vmatprep.subr.bf16.mxu0 %v644_v28  ;;  %483 = vmatprep.subr.bf16.mxu1 %v646_v29 }
  0x1f   :  { %443 = vmatpush1.bf16.msra.mxu0 %v648_v30  ;;  %484 = vmatpush1.bf16.msra.mxu1 %v649_v31 }
  0x20   :  { %444 = vmatprep.subr.bf16.mxu0 %v650_v32  ;;  %485 = vmatprep.subr.bf16.mxu1 %v652_v33 }
  0x23   :  { %445 = vmatpush1.bf16.msra.mxu0 %v654_v34  ;;  %486 = vmatpush1.bf16.msra.mxu1 %v655_v35 }
  0x24   :  { %446 = vmatprep.subr.bf16.mxu0 %v656_v36  ;;  %487 = vmatprep.subr.bf16.mxu1 %v658_v37 }
  0x27   :  { %447 = vmatpush1.bf16.msra.mxu0 %v660_v38  ;;  %488 = vmatpush1.bf16.msra.mxu1 %v661_v39 }
  0x28   :  { %448 = vmatprep.subr.bf16.mxu0 %v662_v40  ;;  %489 = vmatprep.subr.bf16.mxu1 %v664_v41 }
  0x2b   :  { %449 = vmatpush1.bf16.msra.mxu0 %v666_v42  ;;  %490 = vmatpush1.bf16.msra.mxu1 %v667_v43 }
  0x2c   :  { %450 = vmatprep.subr.bf16.mxu0 %v668_v44  ;;  %491 = vmatprep.subr.bf16.mxu1 %v670_v45 }
  0x2f   :  { %451 = vmatpush1.bf16.msra.mxu0 %v672_v48  ;;  %492 = vmatpush1.bf16.msra.mxu1 %v673_v49 }
  0x30   :  { %452 = vmatprep.subr.bf16.mxu0 %v674_v50  ;;  %493 = vmatprep.subr.bf16.mxu1 %v676_v51 }
  0x33   :  { %453 = vmatpush1.bf16.msra.mxu0 %v678_v52  ;;  %494 = vmatpush1.bf16.msra.mxu1 %v679_v53 }
  0x34   :  { %454 = vmatprep.subr.bf16.mxu0 %v680_v54  ;;  %495 = vmatprep.subr.bf16.mxu1 %v682_v55 }
  0x37   :  { %455 = vmatpush1.bf16.msra.mxu0 %v684_v56  ;;  %496 = vmatpush1.bf16.msra.mxu1 %v685_v57 }
  0x38   :  { %456 = vmatprep.subr.bf16.mxu0 %v686_v58  ;;  %497 = vmatprep.subr.bf16.mxu1 %v688_v59 }
  0x3b   :  { %457 = vmatpush1.bf16.msra.mxu0 %v690_v60  ;;  %498 = vmatpush1.bf16.msra.mxu1 %v691_v61 }
  0x3c   :  { %458 = vmatprep.subr.bf16.mxu0 %v692_v62  ;;  %499 = vmatprep.subr.bf16.mxu1 %v694_v63 }
  0x3f   :  { %459 = vmatpush1.bf16.msra.mxu0 %v696_v0  ;;  %500 = vmatpush1.bf16.msra.mxu1 %v697_v1 }
  0x42   :  { %461 = vmatmul.mubr.bf16.vlgmr.msra.gmra.mrb[0].mxu0 %v532_v2  ;;  %502 = vmatmul.mubr.bf16.vlgmr.msra.gmra.mrb[0].mxu1 %v532_v2 }
 0x115   :  { %v462_v14 = vpop.f32.mrb[0].mxu0  ;;  %v503_v15 = vpop.f32.mrb[0].mxu1 }
 0x116   :  { %v463_v16 = vadd.f32 %v462_v14, %v84_v10  ;;  %v504_v17 = vadd.f32 %v503_v15, %v92_v11  ;;  %v464_v18 = vpop.f32.mrb[1].mxu0  ;;  %v505_v19 = vpop.f32.mrb[1].mxu1 }
 0x117   :  { %v465_v20 = vadd.f32 %v464_v18, %v88_v12  ;;  %v506_v21 = vadd.f32 %v505_v19, %v96_v13  ;;  %v466_v22 = vpop.f32.mrb[2].mxu0  ;;  %v507_v23 = vpop.f32.mrb[2].mxu1 }
 0x118   :  { %v467_v24 = vpop.f32.mrb[3].mxu0  ;;  %v508_v25 = vpop.f32.mrb[3].mxu1 }
 0x119   :  { %v600_v26 = vpack.c.bf16 %v465_v20, %v463_v16  ;;  %v601_v27 = vpack.c.bf16 %v506_v21, %v504_v17 }
 0x11b   :  { %526 = vst [vmem:[%s927_s3] sm:$0xff] %v600_v26  ;;  %527 = vst [vmem:[%s927_s3 + $0x8] sm:$0xff] %v601_v27 }

// kernel: tile.23
= control target key start
LH: loop header
LB: loop body
LE: loop exit
PB: predicated region body
PF: predicated region fallthrough
CT: control target
= control target key end

     0   :  { %s22_s0 = inlined_call_operand.vmem [shape: f32[64], index: 0, kind: input, shape index: {}]   ;;  %s23_s1 = inlined_call_operand.vmem [shape: f32[4,64], index: 1, kind: output, shape index: {}]  }
   0x1   :  { %v4_v0 = vld [vmem:[%s22_s0] ss:$0 sm:$0xff] }
   0x2   :  { %5 = vst [vmem:[%s23_s1] sm:$0xf] %v4_v0 }

// kernel: tile.24
= control target key start
LH: loop header
LB: loop body
LE: loop exit
PB: predicated region body
PF: predicated region fallthrough
CT: control target
= control target key end

     0   :  { %s6_s8 = smov 3  ;;  %vm8_vm0 = vcmask 523264   ;;  %s30_s9 = smov 64   ;;  %vm15_vm1 = vcmask 1048064   ;;  %s50_s0 = inlined_call_operand.vmem [shape: f32[4,64], index: 0, kind: input, shape index: {}]   ;;  %s51_s1 = inlined_call_operand.vmem [shape: f32[1,256], index: 1, kind: output, shape index: {}]  }
   0x1   :  { %v4_v0 = vld [vmem:[%s50_s0] sm:$0xf]  ;;  %s11_s0 = smov 3 }
   0x2   :  { %5 = vst [vmem:[#allocation1] sm:$0xf] %v4_v0 }
   0x9   :  { %v12_v1 = vld [vmem:[#allocation1 + $0x1] ss:$2 sm:%s11_s0]   ;;  %v7_v2 = vld [vmem:[#allocation1] ss:$2 sm:%s6_s8]  }
   0xa   :  { %13 = vrot.lane.b32.xlu0 %v12_v1, %s30_s9  ;;  %9 = vst.msk [vmem:[#allocation0] ss:$8 sm:$0x3] %vm8_vm0, %v7_v2  }
  0x7c   :  { %v14_v3 = vpop.permute.xlu0 %13  }
  0x7d   :  { %16 = vst.msk [vmem:[#allocation0] ss:$8 sm:$0x3] %vm15_vm1, %v14_v3  }
  0x84   :  { %v20_v4 = vld [vmem:[#allocation0] sm:$0x1]  ;;  %v24_v5 = vld [vmem:[#allocation0 + $0x8] sm:$0x1] }
  0x85   :  { %22 = vst [vmem:[%s51_s1] sm:$0x1] %v20_v4  ;;  %28 = vst [vmem:[%s51_s1 + $0x1] sm:$0x1] %v24_v5 }

// kernel: unet_forward.18
= control target key start
LH: loop header
LB: loop body
LE: loop exit
PB: predicated region body
PF: predicated region fallthrough
CT: control target
= control target key end

     0   :  { %v293_v1 = vmov 0   ;;  %v37_v19 = vlaneseq  ;;  %s383_s1 = inlined_call_operand.vmem [shape: bf16[128,256], index: 1, kind: input, shape index: {}]   ;;  %s384_s0 = inlined_call_operand.vmem [shape: bf16[32,128], index: 0, kind: input, shape index: {}]   ;;  %s385_s2 = inlined_call_operand.vmem [shape: f32[1,256], index: 2, kind: input, shape index: {}]   ;;  %s386_s3 = inlined_call_operand.vmem [shape: bf16[32,256], index: 3, kind: output, shape index: {}]  }
   0x1   :  { %v267_v0 = vld [vmem:[%s383_s1 + $0x4] ss:$8 sps:$4 sm:$0xff]   ;;  %171 = vmatprep.mubr.bf16.mxu0 %v293_v1  ;;  %181 = vmatprep.mubr.bf16.mxu1 %v293_v1  ;;  %v269_v2 = vld [vmem:[%s383_s1] ss:$8 sps:$4 sm:$0xff]   ;;  %v270_v3 = vld [vmem:[%s383_s1 + $0x14] ss:$8 sps:$4 sm:$0xff]  }
   0x2   :  { %139 = vmatprep.subr.bf16.mxu0 %v267_v0  ;;  %250 = vmatprep.subr.bf16.mxu1 %v267_v0  ;;  %v272_v4 = vld [vmem:[%s383_s1 + $0x10] ss:$8 sps:$4 sm:$0xff]   ;;  %v273_v5 = vld [vmem:[%s383_s1 + $0x24] ss:$8 sps:$4 sm:$0xff]   ;;  %v275_v6 = vld [vmem:[%s383_s1 + $0x20] ss:$8 sps:$4 sm:$0xff]  }
   0x3   :  { %140 = vmatpush1.bf16.msra.mxu0 %v269_v2  ;;  %258 = vmatpush1.bf16.msra.mxu1 %v269_v2  ;;  %v276_v7 = vld [vmem:[%s383_s1 + $0x34] ss:$8 sps:$4 sm:$0xff]   ;;  %v278_v8 = vld [vmem:[%s383_s1 + $0x30] ss:$8 sps:$4 sm:$0xff]   ;;  %v279_v9 = vld [vmem:[%s383_s1 + $0x44] ss:$8 sps:$4 sm:$0xff]  }
   0x4   :  { %141 = vmatprep.subr.bf16.mxu0 %v270_v3  ;;  %251 = vmatprep.subr.bf16.mxu1 %v270_v3  ;;  %v281_v10 = vld [vmem:[%s383_s1 + $0x40] ss:$8 sps:$4 sm:$0xff]   ;;  %v282_v11 = vld [vmem:[%s383_s1 + $0x54] ss:$8 sps:$4 sm:$0xff]   ;;  %v284_v12 = vld [vmem:[%s383_s1 + $0x50] ss:$8 sps:$4 sm:$0xff]  }
   0x5   :  { %v285_v13 = vld [vmem:[%s383_s1 + $0x64] ss:$8 sps:$4 sm:$0xff]   ;;  %v287_v14 = vld [vmem:[%s383_s1 + $0x60] ss:$8 sps:$4 sm:$0xff]   ;;  %v288_v15 = vld [vmem:[%s383_s1 + $0x74] ss:$8 sps:$4 sm:$0xff]  }
   0x6   :  { %v290_v16 = vld [vmem:[%s383_s1 + $0x70] ss:$8 sps:$4 sm:$0xff]   ;;  %v291_v17 = vld [vmem:[%s384_s0] sm:$0xff]   ;;  %v292_v18 = vld [vmem:[%s384_s0 + $0x8] sm:$0xff]   ;;  %v38_v20 = vshrl.u32 %v37_v19, 7 }
   0x7   :  { %142 = vmatpush1.bf16.msra.mxu0 %v272_v4  ;;  %259 = vmatpush1.bf16.msra.mxu1 %v272_v4  ;;  %v35_v22 = vld [vmem:[%s385_s2] sm:$0x3] }
   0x8   :  { %143 = vmatprep.subr.bf16.mxu0 %v273_v5  ;;  %252 = vmatprep.subr.bf16.mxu1 %v273_v5  ;;  %v39_v21 = vsub.s32 0, %v38_v20  ;;  %v43_v23 = vsub.s32 1, %v38_v20 }
   0xa   :  { %v40_v24 = vrot.slane %v35_v22, %v39_v21  ;;  %v44_v25 = vrot.slane %v35_v22, %v43_v23 }
   0xb   :  { %144 = vmatpush1.bf16.msra.mxu0 %v275_v6  ;;  %260 = vmatpush1.bf16.msra.mxu1 %v275_v6 }
   0xc   :  { %145 = vmatprep.subr.bf16.mxu0 %v276_v7  ;;  %253 = vmatprep.subr.bf16.mxu1 %v276_v7 }
   0xf   :  { %146 = vmatpush1.bf16.msra.mxu0 %v278_v8  ;;  %261 = vmatpush1.bf16.msra.mxu1 %v278_v8 }
  0x10   :  { %147 = vmatprep.subr.bf16.mxu0 %v279_v9  ;;  %254 = vmatprep.subr.bf16.mxu1 %v279_v9 }
  0x13   :  { %148 = vmatpush1.bf16.msra.mxu0 %v281_v10  ;;  %262 = vmatpush1.bf16.msra.mxu1 %v281_v10 }
  0x14   :  { %149 = vmatprep.subr.bf16.mxu0 %v282_v11  ;;  %255 = vmatprep.subr.bf16.mxu1 %v282_v11 }
  0x17   :  { %150 = vmatpush1.bf16.msra.mxu0 %v284_v12  ;;  %263 = vmatpush1.bf16.msra.mxu1 %v284_v12 }
  0x18   :  { %151 = vmatprep.subr.bf16.mxu0 %v285_v13  ;;  %256 = vmatprep.subr.bf16.mxu1 %v285_v13 }
  0x1b   :  { %152 = vmatpush1.bf16.msra.mxu0 %v287_v14  ;;  %264 = vmatpush1.bf16.msra.mxu1 %v287_v14 }
  0x1c   :  { %153 = vmatprep.subr.bf16.mxu0 %v288_v15  ;;  %257 = vmatprep.subr.bf16.mxu1 %v288_v15 }
  0x1f   :  { %154 = vmatpush1.bf16.msra.mxu0 %v290_v16  ;;  %265 = vmatpush1.bf16.msra.mxu1 %v290_v16 }
  0x22   :  { %172 = vmatmul.mubr.bf16.vlgmr.msra.gmra.mrb[0].mxu0 %v291_v17  ;;  %182 = vmatmul.mubr.bf16.vlgmr.msra.gmra.mrb[0].mxu1 %v292_v18 }
  0xf5   :  { %v173_v26 = vpop.f32.mrb[0].mxu0  ;;  %v183_v27 = vpop.f32.mrb[0].mxu1 }
  0xf6   :  { %v174_v28 = vadd.f32 %v173_v26, %v40_v24  ;;  %v184_v29 = vadd.f32 %v183_v27, %v40_v24  ;;  %v175_v30 = vpop.f32.mrb[1].mxu0  ;;  %v185_v31 = vpop.f32.mrb[1].mxu1 }
  0xf7   :  { %v176_v32 = vadd.f32 %v175_v30, %v44_v25  ;;  %v186_v33 = vadd.f32 %v185_v31, %v44_v25  ;;  %v177_v34 = vpop.f32.mrb[2].mxu0  ;;  %v187_v35 = vpop.f32.mrb[2].mxu1 }
  0xf8   :  { %v178_v36 = vadd.f32 %v177_v34, %v40_v24  ;;  %v188_v37 = vadd.f32 %v187_v35, %v40_v24  ;;  %v179_v38 = vpop.f32.mrb[3].mxu0  ;;  %v189_v39 = vpop.f32.mrb[3].mxu1 }
  0xf9   :  { %v246_v40 = vpack.c.bf16 %v176_v32, %v174_v28  ;;  %v248_v41 = vpack.c.bf16 %v186_v33, %v184_v29  ;;  %v180_v42 = vadd.f32 %v179_v38, %v44_v25  ;;  %v190_v43 = vadd.f32 %v189_v39, %v44_v25 }
  0xfb   :  { %216 = vst [vmem:[%s386_s3] sm:$0xff] %v246_v40  ;;  %218 = vst [vmem:[%s386_s3 + $0x10] sm:$0xff] %v248_v41  ;;  %v247_v44 = vpack.c.bf16 %v180_v42, %v178_v36  ;;  %v249_v45 = vpack.c.bf16 %v190_v43, %v188_v37 }
  0xfd   :  { %217 = vst [vmem:[%s386_s3 + $0x8] sm:$0xff] %v247_v44  ;;  %219 = vst [vmem:[%s386_s3 + $0x18] sm:$0xff] %v249_v45 }

// kernel: unet_forward.17
= control target key start
LH: loop header
LB: loop body
LE: loop exit
PB: predicated region body
PF: predicated region fallthrough
CT: control target
= control target key end

     0   :  { %s4631_s3 = inlined_call_operand.vmem [shape: bf16[2304,128], index: 3, kind: input, shape index: {}]   ;;  %s4632_s1 = inlined_call_operand.vmem [shape: bf16[32,2304], index: 1, kind: input, shape index: {}]   ;;  %s4633_s2 = inlined_call_operand.vmem [shape: bf16[1152,128], index: 2, kind: input, shape index: {}]   ;;  %s4634_s0 = inlined_call_operand.vmem [shape: bf16[32,1152], index: 0, kind: input, shape index: {}]   ;;  %s4635_s4 = inlined_call_operand.vmem [shape: f32[1,128], index: 4, kind: input, shape index: {}]   ;;  %s4636_s5 = inlined_call_operand.vmem [shape: bf16[32,128], index: 5, kind: output, shape index: {}]  }
   0x1   :  { %v3486_v0 = vld [vmem:[%s4631_s3 + $0x40] sm:$0xff]   ;;  %v3490_v4 = vld [vmem:[%s4631_s3 + $0x48] sm:$0xff]   ;;  %v3494_v8 = vld [vmem:[%s4631_s3 + $0x50] sm:$0xff]  }
   0x2   :  { %v3487_v1 = vld [vmem:[%s4631_s3 + $0xc0] sm:$0xff]   ;;  %3092 = vmatprep.subr.bf16.mxu0 %v3486_v0  ;;  %v3491_v5 = vld [vmem:[%s4631_s3 + $0xc8] sm:$0xff]   ;;  %v3495_v9 = vld [vmem:[%s4631_s3 + $0xd0] sm:$0xff]  }
   0x3   :  { %v3488_v2 = vld [vmem:[%s4631_s3] sm:$0xff]   ;;  %3120 = vmatprep.subr.bf16.mxu1 %v3487_v1  ;;  %v3492_v6 = vld [vmem:[%s4631_s3 + $0x8] sm:$0xff]   ;;  %v3496_v10 = vld [vmem:[%s4631_s3 + $0x10] sm:$0xff]  }
   0x4   :  { %v3489_v3 = vld [vmem:[%s4631_s3 + $0x80] sm:$0xff]   ;;  %3093 = vmatpush3.bf16.msra.mxu0 %v3488_v2  ;;  %v3493_v7 = vld [vmem:[%s4631_s3 + $0x88] sm:$0xff]   ;;  %v3497_v11 = vld [vmem:[%s4631_s3 + $0x90] sm:$0xff]  }
   0x5   :  { %3121 = vmatpush3.bf16.msra.mxu1 %v3489_v3  ;;  %3094 = vmatprep.subr.bf16.mxu0 %v3490_v4  ;;  %v3498_v12 = vld [vmem:[%s4631_s3 + $0x58] sm:$0xff]   ;;  %v3502_v16 = vld [vmem:[%s4631_s3 + $0x60] sm:$0xff]   ;;  %v3506_v20 = vld [vmem:[%s4631_s3 + $0x68] sm:$0xff]  }
   0x6   :  { %3122 = vmatprep.subr.bf16.mxu1 %v3491_v5  ;;  %v3499_v13 = vld [vmem:[%s4631_s3 + $0xd8] sm:$0xff]   ;;  %v3503_v17 = vld [vmem:[%s4631_s3 + $0xe0] sm:$0xff]   ;;  %v3507_v21 = vld [vmem:[%s4631_s3 + $0xe8] sm:$0xff]  }
   0x7   :  { %v3500_v14 = vld [vmem:[%s4631_s3 + $0x18] sm:$0xff]   ;;  %v3504_v18 = vld [vmem:[%s4631_s3 + $0x20] sm:$0xff]   ;;  %v3508_v22 = vld [vmem:[%s4631_s3 + $0x28] sm:$0xff]  }
   0x8   :  { %3095 = vmatpush3.bf16.msra.mxu0 %v3492_v6  ;;  %v3501_v15 = vld [vmem:[%s4631_s3 + $0x98] sm:$0xff]   ;;  %v3505_v19 = vld [vmem:[%s4631_s3 + $0xa0] sm:$0xff]   ;;  %v3509_v23 = vld [vmem:[%s4631_s3 + $0xa8] sm:$0xff]  }
   0x9   :  { %3123 = vmatpush3.bf16.msra.mxu1 %v3493_v7  ;;  %3096 = vmatprep.subr.bf16.mxu0 %v3494_v8  ;;  %v3510_v24 = vld [vmem:[%s4631_s3 + $0x70] sm:$0xff]   ;;  %v3514_v28 = vld [vmem:[%s4631_s3 + $0x78] sm:$0xff]   ;;  %v3518_v32 = vld [vmem:[%s4632_s1] ss:$72 sps:$4 sm:$0xff]  }
   0xa   :  { %3124 = vmatprep.subr.bf16.mxu1 %v3495_v9  ;;  %v3511_v25 = vld [vmem:[%s4631_s3 + $0xf0] sm:$0xff]   ;;  %v3515_v29 = vld [vmem:[%s4631_s3 + $0xf8] sm:$0xff]   ;;  %v3520_v33 = vld [vmem:[%s4632_s1 + $0x4] ss:$72 sps:$4 sm:$0xff]  }
   0xb   :  { %v3512_v26 = vld [vmem:[%s4631_s3 + $0x30] sm:$0xff]   ;;  %v3516_v30 = vld [vmem:[%s4631_s3 + $0x38] sm:$0xff]   ;;  %1585 = vmatprep.mubr.bf16.mxu0 %v3520_v33  ;;  %v3524_v36 = vld [vmem:[%s4631_s3 + $0x140] sm:$0xff]  }
   0xc   :  { %3097 = vmatpush3.bf16.msra.mxu0 %v3496_v10  ;;  %v3513_v27 = vld [vmem:[%s4631_s3 + $0xb0] sm:$0xff]   ;;  %v3517_v31 = vld [vmem:[%s4631_s3 + $0xb8] sm:$0xff]   ;;  %v3525_v37 = vld [vmem:[%s4631_s3 + $0x100] sm:$0xff]  }
   0xd   :  { %3125 = vmatpush3.bf16.msra.mxu1 %v3497_v11  ;;  %3098 = vmatprep.subr.bf16.mxu0 %v3498_v12  ;;  %v3521_v34 = vld [vmem:[%s4632_s1 + $0x8] ss:$72 sps:$4 sm:$0xff]   ;;  %v3523_v35 = vld [vmem:[%s4632_s1 + $0xc] ss:$72 sps:$4 sm:$0xff]   ;;  %v3526_v38 = vld [vmem:[%s4631_s3 + $0x1c0] sm:$0xff]  }
   0xe   :  { %3126 = vmatprep.subr.bf16.mxu1 %v3499_v13  ;;  %1634 = vmatprep.mubr.bf16.mxu1 %v3523_v35  ;;  %v3527_v39 = vld [vmem:[%s4631_s3 + $0x180] sm:$0xff]   ;;  %v3528_v40 = vld [vmem:[%s4631_s3 + $0x148] sm:$0xff]   ;;  %v3532_v44 = vld [vmem:[%s4631_s3 + $0x150] sm:$0xff]  }
   0xf   :  { %v3529_v41 = vld [vmem:[%s4631_s3 + $0x108] sm:$0xff]   ;;  %v3533_v45 = vld [vmem:[%s4631_s3 + $0x110] sm:$0xff]   ;;  %v3536_v48 = vld [vmem:[%s4631_s3 + $0x158] sm:$0xff]  }
  0x10   :  { %3099 = vmatpush3.bf16.msra.mxu0 %v3500_v14  ;;  %v3530_v42 = vld [vmem:[%s4631_s3 + $0x1c8] sm:$0xff]   ;;  %v3534_v46 = vld [vmem:[%s4631_s3 + $0x1d0] sm:$0xff]   ;;  %v3537_v49 = vld [vmem:[%s4631_s3 + $0x118] sm:$0xff]  }
  0x11   :  { %3127 = vmatpush3.bf16.msra.mxu1 %v3501_v15  ;;  %3100 = vmatprep.subr.bf16.mxu0 %v3502_v16  ;;  %v3531_v43 = vld [vmem:[%s4631_s3 + $0x188] sm:$0xff]   ;;  %v3535_v47 = vld [vmem:[%s4631_s3 + $0x190] sm:$0xff]   ;;  %v3538_v50 = vld [vmem:[%s4631_s3 + $0x1d8] sm:$0xff]  }
  0x12   :  { %3128 = vmatprep.subr.bf16.mxu1 %v3503_v17  ;;  %v3539_v51 = vld [vmem:[%s4631_s3 + $0x198] sm:$0xff]   ;;  %v3540_v52 = vld [vmem:[%s4631_s3 + $0x160] sm:$0xff]   ;;  %v3544_v56 = vld [vmem:[%s4631_s3 + $0x168] sm:$0xff]  }
  0x13   :  { %v3541_v53 = vld [vmem:[%s4631_s3 + $0x120] sm:$0xff]   ;;  %v3545_v57 = vld [vmem:[%s4632_s1 + $0x94] ss:$72 sps:$4 sm:$0xff]   ;;  %v3549_v59 = vld [vmem:[%s4631_s3 + $0x128] sm:$0xff]  }
  0x14   :  { %3101 = vmatpush3.bf16.msra.mxu0 %v3504_v18  ;;  %v3542_v54 = vld [vmem:[%s4631_s3 + $0x1e0] sm:$0xff]   ;;  %v3550_v60 = vld [vmem:[%s4632_s1 + $0x90] ss:$72 sps:$4 sm:$0xff]   ;;  %v3552_v62 = vld [vmem:[%s4631_s3 + $0x1e8] sm:$0xff]  }
  0x15   :  { %3129 = vmatpush3.bf16.msra.mxu1 %v3505_v19  ;;  %3102 = vmatprep.subr.bf16.mxu0 %v3506_v20  ;;  %v3543_v55 = vld [vmem:[%s4631_s3 + $0x1a0] sm:$0xff]   ;;  %v3553_v63 = vld [vmem:[%s4631_s3 + $0x1a8] sm:$0xff]   ;;  %v3554_v0 = vld [vmem:[%s4631_s3 + $0x170] sm:$0xff]  }
  0x16   :  { %3130 = vmatprep.subr.bf16.mxu1 %v3507_v21  ;;  %v3547_v58 = vld [vmem:[%s4632_s1 + $0x9c] ss:$72 sps:$4 sm:$0xff]   ;;  %v3551_v61 = vld [vmem:[%s4632_s1 + $0x98] ss:$72 sps:$4 sm:$0xff]   ;;  %v3555_v1 = vld [vmem:[%s4631_s3 + $0x130] sm:$0xff]  }
  0x17   :  { %v3556_v2 = vld [vmem:[%s4631_s3 + $0x1f0] sm:$0xff]   ;;  %v3558_v4 = vld [vmem:[%s4631_s3 + $0x178] sm:$0xff]   ;;  %v3565_v10 = vld [vmem:[%s4631_s3 + $0x240] sm:$0xff]  }
  0x18   :  { %3103 = vmatpush3.bf16.msra.mxu0 %v3508_v22  ;;  %v3557_v3 = vld [vmem:[%s4631_s3 + $0x1b0] sm:$0xff]   ;;  %v3559_v5 = vld [vmem:[%s4631_s3 + $0x138] sm:$0xff]   ;;  %v3569_v13 = vld [vmem:[%s4631_s3 + $0x200] sm:$0xff]  }
  0x19   :  { %3131 = vmatpush3.bf16.msra.mxu1 %v3509_v23  ;;  %3104 = vmatprep.subr.bf16.mxu0 %v3510_v24  ;;  %v3560_v6 = vld [vmem:[%s4631_s3 + $0x1f8] sm:$0xff]   ;;  %v3570_v14 = vld [vmem:[%s4631_s3 + $0x2c0] sm:$0xff]   ;;  %v3572_v16 = vld [vmem:[%s4631_s3 + $0x248] sm:$0xff]  }
  0x1a   :  { %3132 = vmatprep.subr.bf16.mxu1 %v3511_v25  ;;  %v3561_v7 = vld [vmem:[%s4632_s1 + $0x10] ss:$72 sps:$4 sm:$0xff]   ;;  %v3563_v8 = vld [vmem:[%s4632_s1 + $0x14] ss:$72 sps:$4 sm:$0xff]   ;;  %v3571_v15 = vld [vmem:[%s4631_s3 + $0x280] sm:$0xff]  }
  0x1b   :  { %v3564_v9 = vld [vmem:[%s4631_s3 + $0x1b8] sm:$0xff]   ;;  %v3573_v17 = vld [vmem:[%s4631_s3 + $0x208] sm:$0xff]   ;;  %v3579_v22 = vld [vmem:[%s4631_s3 + $0x250] sm:$0xff]  }
  0x1c   :  { %3105 = vmatpush3.bf16.msra.mxu0 %v3512_v26  ;;  %v3566_v11 = vld [vmem:[%s4632_s1 + $0x18] ss:$72 sps:$4 sm:$0xff]   ;;  %v3568_v12 = vld [vmem:[%s4632_s1 + $0x1c] ss:$72 sps:$4 sm:$0xff]   ;;  %v3574_v18 = vld [vmem:[%s4631_s3 + $0x2c8] sm:$0xff]  }
  0x1d   :  { %3133 = vmatpush3.bf16.msra.mxu1 %v3513_v27  ;;  %3106 = vmatprep.subr.bf16.mxu0 %v3514_v28  ;;  %v3575_v19 = vld [vmem:[%s4632_s1 + $0xa4] ss:$72 sps:$4 sm:$0xff]   ;;  %v3578_v21 = vld [vmem:[%s4632_s1 + $0xa0] ss:$72 sps:$4 sm:$0xff]   ;;  %v3582_v24 = vld [vmem:[%s4631_s3 + $0x210] sm:$0xff]  }
  0x1e   :  { %3134 = vmatprep.subr.bf16.mxu1 %v3515_v29  ;;  %v3577_v20 = vld [vmem:[%s4631_s3 + $0x288] sm:$0xff]   ;;  %v3584_v26 = vld [vmem:[%s4631_s3 + $0x2d0] sm:$0xff]   ;;  %v3586_v28 = vld [vmem:[%s4631_s3 + $0x258] sm:$0xff]  }
  0x1f   :  { %v3580_v23 = vld [vmem:[%s4632_s1 + $0xac] ss:$72 sps:$4 sm:$0xff]   ;;  %v3583_v25 = vld [vmem:[%s4632_s1 + $0xa8] ss:$72 sps:$4 sm:$0xff]   ;;  %v3587_v29 = vld [vmem:[%s4631_s3 + $0x218] sm:$0xff]  }
  0x20   :  { %3107 = vmatpush3.bf16.msra.mxu0 %v3516_v30  ;;  %v3585_v27 = vld [vmem:[%s4631_s3 + $0x290] sm:$0xff]   ;;  %v3588_v30 = vld [vmem:[%s4631_s3 + $0x2d8] sm:$0xff]   ;;  %v3591_v33 = vld [vmem:[%s4631_s3 + $0x220] sm:$0xff]  }
  0x21   :  { %3135 = vmatpush3.bf16.msra.mxu1 %v3517_v31  ;;  %3148 = vmatprep.subr.bf16.mxu0 %v3524_v36  ;;  %v3589_v31 = vld [vmem:[%s4631_s3 + $0x298] sm:$0xff]   ;;  %v3593_v35 = vld [vmem:[%s4631_s3 + $0x2a0] sm:$0xff]   ;;  %v3594_v36 = vld [vmem:[%s4631_s3 + $0x268] sm:$0xff]  }
  0x22   :  { %3176 = vmatprep.subr.bf16.mxu1 %v3526_v38  ;;  %v3596_v38 = vld [vmem:[%s4631_s3 + $0x2e8] sm:$0xff]  }
  0x23   :  { %1586 = vmatmul.mubr.bf16.vlgmr.msra.gmra.mrb[0].mxu0 %v3518_v32  ;;  %v3590_v32 = vld [vmem:[%s4631_s3 + $0x260] sm:$0xff]  }
  0x24   :  { %1635 = vmatmul.mubr.bf16.vlgmr.msra.gmra.mrb[0].mxu1 %v3521_v34  ;;  %3149 = vmatpush3.bf16.msra.mxu0 %v3525_v37  ;;  %v3592_v34 = vld [vmem:[%s4631_s3 + $0x2e0] sm:$0xff]   ;;  %v3595_v37 = vld [vmem:[%s4631_s3 + $0x228] sm:$0xff]  }
  0x25   :  { %3177 = vmatpush3.bf16.msra.mxu1 %v3527_v39  ;;  %3150 = vmatprep.subr.bf16.mxu0 %v3528_v40  ;;  %v3597_v39 = vld [vmem:[%s4631_s3 + $0x2a8] sm:$0xff]   ;;  %v3598_v40 = vld [vmem:[%s4631_s3 + $0x270] sm:$0xff]  }
  0x26   :  { %3178 = vmatprep.subr.bf16.mxu1 %v3530_v42  ;;  %1593 = vmatprep.mubr.bf16.mxu0 %v3545_v57  ;;  %v3600_v42 = vld [vmem:[%s4631_s3 + $0x2f0] sm:$0xff]   ;;  %v3617_v57 = vld [vmem:[%s4631_s3 + $0x308] sm:$0xff]  }
  0x27   :  { %1642 = vmatprep.mubr.bf16.mxu1 %v3547_v58  ;;  %v3618_v58 = vld [vmem:[%s4631_s3 + $0x3c8] sm:$0xff]  }
  0x28   :  { %3151 = vmatpush3.bf16.msra.mxu0 %v3529_v41  ;;  %v3599_v41 = vld [vmem:[%s4631_s3 + $0x230] sm:$0xff]  }
  0x29   :  { %3179 = vmatpush3.bf16.msra.mxu1 %v3531_v43  ;;  %3152 = vmatprep.subr.bf16.mxu0 %v3532_v44  ;;  %v3601_v43 = vld [vmem:[%s4631_s3 + $0x2b0] sm:$0xff]   ;;  %v3602_v44 = vld [vmem:[%s4631_s3 + $0x278] sm:$0xff]  }
  0x2a   :  { %3180 = vmatprep.subr.bf16.mxu1 %v3534_v46  ;;  %v3604_v46 = vld [vmem:[%s4631_s3 + $0x2f8] sm:$0xff]  }
  0x2b   :  { %1594 = vmatmul.mubr.bf16.gmra.mrb[4].mxu0 %v3550_v60  ;;  %v3621_v60 = vld [vmem:[%s4631_s3 + $0x388] sm:$0xff]  }
  0x2c   :  { %3153 = vmatpush3.bf16.msra.mxu0 %v3533_v45  ;;  %1643 = vmatmul.mubr.bf16.gmra.mrb[4].mxu1 %v3551_v61  ;;  %v3603_v45 = vld [vmem:[%s4631_s3 + $0x238] sm:$0xff]  }
  0x2d   :  { %3181 = vmatpush3.bf16.msra.mxu1 %v3535_v47  ;;  %3154 = vmatprep.subr.bf16.mxu0 %v3536_v48  ;;  %v3605_v47 = vld [vmem:[%s4632_s1 + $0x20] ss:$72 sps:$4 sm:$0xff]   ;;  %v3607_v48 = vld [vmem:[%s4632_s1 + $0x24] ss:$72 sps:$4 sm:$0xff]   ;;  %v3622_v61 = vld [vmem:[%s4632_s1 + $0xb0] ss:$72 sps:$4 sm:$0xff]  }
  0x2e   :  { %3182 = vmatprep.subr.bf16.mxu1 %v3538_v50  ;;  %1683 = vmatprep.mubr.bf16.mxu0 %v3563_v8  ;;  %v3609_v50 = vld [vmem:[%s4631_s3 + $0x340] sm:$0xff]  }
  0x2f   :  { %1732 = vmatprep.mubr.bf16.mxu1 %v3568_v12  ;;  %v3634_v8 = vld [vmem:[%s4631_s3 + $0x360] sm:$0xff]   ;;  %v3638_v12 = vld [vmem:[%s4631_s3 + $0x368] sm:$0xff]  }
  0x30   :  { %3155 = vmatpush3.bf16.msra.mxu0 %v3537_v49  ;;  %v3608_v49 = vld [vmem:[%s4631_s3 + $0x2b8] sm:$0xff]  }
  0x31   :  { %3183 = vmatpush3.bf16.msra.mxu1 %v3539_v51  ;;  %3156 = vmatprep.subr.bf16.mxu0 %v3540_v52  ;;  %v3610_v51 = vld [vmem:[%s4632_s1 + $0x28] ss:$72 sps:$4 sm:$0xff]   ;;  %v3612_v52 = vld [vmem:[%s4632_s1 + $0x2c] ss:$72 sps:$4 sm:$0xff]  }
  0x32   :  { %3184 = vmatprep.subr.bf16.mxu1 %v3542_v54  ;;  %v3614_v54 = vld [vmem:[%s4631_s3 + $0x3c0] sm:$0xff]  }
  0x34   :  { %3157 = vmatpush3.bf16.msra.mxu0 %v3541_v53  ;;  %v3613_v53 = vld [vmem:[%s4631_s3 + $0x300] sm:$0xff]  }
  0x35   :  { %3185 = vmatpush3.bf16.msra.mxu1 %v3543_v55  ;;  %3158 = vmatprep.subr.bf16.mxu0 %v3544_v56  ;;  %v3615_v55 = vld [vmem:[%s4631_s3 + $0x380] sm:$0xff]   ;;  %v3616_v56 = vld [vmem:[%s4631_s3 + $0x348] sm:$0xff]  }
  0x36   :  { %3186 = vmatprep.subr.bf16.mxu1 %v3552_v62  ;;  %v3623_v62 = vld [vmem:[%s4631_s3 + $0x350] sm:$0xff]  }
  0x38   :  { %3159 = vmatpush3.bf16.msra.mxu0 %v3549_v59  ;;  %v3619_v59 = vld [vmem:[%s4632_s1 + $0xb4] ss:$72 sps:$4 sm:$0xff]  }
  0x39   :  { %3187 = vmatpush3.bf16.msra.mxu1 %v3553_v63  ;;  %3160 = vmatprep.subr.bf16.mxu0 %v3554_v0  ;;  %v3624_v63 = vld [vmem:[%s4632_s1 + $0xbc] ss:$72 sps:$4 sm:$0xff]   ;;  %v3626_v0 = vld [vmem:[%s4631_s3 + $0x310] sm:$0xff]  }
  0x3a   :  { %3188 = vmatprep.subr.bf16.mxu1 %v3556_v2  ;;  %v3628_v2 = vld [vmem:[%s4631_s3 + $0x3d0] sm:$0xff]  }
  0x3c   :  { %3161 = vmatpush3.bf16.msra.mxu0 %v3555_v1  ;;  %v3627_v1 = vld [vmem:[%s4632_s1 + $0xb8] ss:$72 sps:$4 sm:$0xff]  }
  0x3d   :  { %3189 = vmatpush3.bf16.msra.mxu1 %v3557_v3  ;;  %3162 = vmatprep.subr.bf16.mxu0 %v3558_v4  ;;  %v3629_v3 = vld [vmem:[%s4631_s3 + $0x390] sm:$0xff]   ;;  %v3630_v4 = vld [vmem:[%s4631_s3 + $0x358] sm:$0xff]  }
  0x3e   :  { %3190 = vmatprep.subr.bf16.mxu1 %v3560_v6  ;;  %v3632_v6 = vld [vmem:[%s4631_s3 + $0x3d8] sm:$0xff]  }
  0x40   :  { %3163 = vmatpush3.bf16.msra.mxu0 %v3559_v5  ;;  %v3631_v5 = vld [vmem:[%s4631_s3 + $0x318] sm:$0xff]  }
  0x41   :  { %3191 = vmatpush3.bf16.msra.mxu1 %v3564_v9  ;;  %3204 = vmatprep.subr.bf16.mxu0 %v3565_v10  ;;  %v3635_v9 = vld [vmem:[%s4631_s3 + $0x320] sm:$0xff]  }
  0x42   :  { %3232 = vmatprep.subr.bf16.mxu1 %v3570_v14  ;;  %v3636_v10 = vld [vmem:[%s4631_s3 + $0x3e0] sm:$0xff]   ;;  %v3640_v14 = vld [vmem:[%s4631_s3 + $0x3e8] sm:$0xff]  }
  0x43   :  { %1684 = vmatmul.mubr.bf16.vlgmr.msra.gmra.mrb[8].mxu0 %v3561_v7  ;;  %v3633_v7 = vld [vmem:[%s4631_s3 + $0x398] sm:$0xff]  }
  0x44   :  { %3205 = vmatpush3.bf16.msra.mxu0 %v3569_v13  ;;  %1733 = vmatmul.mubr.bf16.vlgmr.msra.gmra.mrb[8].mxu1 %v3566_v11  ;;  %v3637_v11 = vld [vmem:[%s4631_s3 + $0x3a0] sm:$0xff]   ;;  %v3639_v13 = vld [vmem:[%s4631_s3 + $0x328] sm:$0xff]  }
  0x45   :  { %3233 = vmatpush3.bf16.msra.mxu1 %v3571_v15  ;;  %3206 = vmatprep.subr.bf16.mxu0 %v3572_v16  ;;  %v3641_v15 = vld [vmem:[%s4631_s3 + $0x3a8] sm:$0xff]   ;;  %v3642_v16 = vld [vmem:[%s4631_s3 + $0x370] sm:$0xff]  }
  0x46   :  { %3234 = vmatprep.subr.bf16.mxu1 %v3574_v18  ;;  %1691 = vmatprep.mubr.bf16.mxu0 %v3575_v19  ;;  %v3644_v18 = vld [vmem:[%s4631_s3 + $0x3f0] sm:$0xff]  }
  0x47   :  { %1740 = vmatprep.mubr.bf16.mxu1 %v3580_v23  ;;  %v3645_v19 = vld [vmem:[%s4631_s3 + $0x3b0] sm:$0xff]  }
  0x48   :  { %3207 = vmatpush3.bf16.msra.mxu0 %v3573_v17  ;;  %v3643_v17 = vld [vmem:[%s4631_s3 + $0x330] sm:$0xff]  }
  0x49   :  { %3235 = vmatpush3.bf16.msra.mxu1 %v3577_v20  ;;  %3208 = vmatprep.subr.bf16.mxu0 %v3579_v22  ;;  %v3646_v20 = vld [vmem:[%s4631_s3 + $0x378] sm:$0xff]  }
  0x4a   :  { %3236 = vmatprep.subr.bf16.mxu1 %v3584_v26  ;;  %v3648_v22 = vld [vmem:[%s4631_s3 + $0x3f8] sm:$0xff]   ;;  %v3653_v26 = vld [vmem:[%s4631_s3 + $0x440] sm:$0xff]  }
  0x4b   :  { %1692 = vmatmul.mubr.bf16.gmra.mrb[12].mxu0 %v3578_v21  ;;  %v3647_v21 = vld [vmem:[%s4631_s3 + $0x338] sm:$0xff]  }
  0x4c   :  { %3209 = vmatpush3.bf16.msra.mxu0 %v3582_v24  ;;  %1741 = vmatmul.mubr.bf16.gmra.mrb[12].mxu1 %v3583_v25  ;;  %v3649_v23 = vld [vmem:[%s4632_s1 + $0x30] ss:$72 sps:$4 sm:$0xff]   ;;  %v3651_v24 = vld [vmem:[%s4632_s1 + $0x34] ss:$72 sps:$4 sm:$0xff]  }
  0x4d   :  { %3237 = vmatpush3.bf16.msra.mxu1 %v3585_v27  ;;  %3210 = vmatprep.subr.bf16.mxu0 %v3586_v28  ;;  %v3652_v25 = vld [vmem:[%s4631_s3 + $0x3b8] sm:$0xff]  }
  0x4e   :  { %3238 = vmatprep.subr.bf16.mxu1 %v3588_v30  ;;  %1781 = vmatprep.mubr.bf16.mxu0 %v3607_v48  ;;  %v3654_v27 = vld [vmem:[%s4632_s1 + $0x38] ss:$72 sps:$4 sm:$0xff]   ;;  %v3656_v28 = vld [vmem:[%s4632_s1 + $0x3c] ss:$72 sps:$4 sm:$0xff]  }
  0x4f   :  { %1830 = vmatprep.mubr.bf16.mxu1 %v3612_v52  ;;  %v3658_v30 = vld [vmem:[%s4633_s2 + $0x40] sm:$0xff]   ;;  %v3682_v52 = vld [vmem:[%s4631_s3 + $0x468] sm:$0xff]  }
  0x50   :  { %3211 = vmatpush3.bf16.msra.mxu0 %v3587_v29  ;;  %v3657_v29 = vld [vmem:[%s4631_s3 + $0x400] sm:$0xff]  }
  0x51   :  { %3239 = vmatpush3.bf16.msra.mxu1 %v3589_v31  ;;  %3212 = vmatprep.subr.bf16.mxu0 %v3590_v32  ;;  %v3659_v31 = vld [vmem:[%s4633_s2] sm:$0xff]   ;;  %v3660_v32 = vld [vmem:[%s4631_s3 + $0x448] sm:$0xff]  }
  0x52   :  { %3240 = vmatprep.subr.bf16.mxu1 %v3592_v34  ;;  %v3662_v34 = vld [vmem:[%s4633_s2 + $0x48] sm:$0xff]   ;;  %v3678_v48 = vld [vmem:[%s4631_s3 + $0x460] sm:$0xff]  }
  0x54   :  { %3213 = vmatpush3.bf16.msra.mxu0 %v3591_v33  ;;  %v3661_v33 = vld [vmem:[%s4631_s3 + $0x408] sm:$0xff]  }
  0x55   :  { %3241 = vmatpush3.bf16.msra.mxu1 %v3593_v35  ;;  %3214 = vmatprep.subr.bf16.mxu0 %v3594_v36  ;;  %v3663_v35 = vld [vmem:[%s4632_s1 + $0xc4] ss:$72 sps:$4 sm:$0xff]  }
  0x56   :  { %3242 = vmatprep.subr.bf16.mxu1 %v3596_v38  ;;  %v3665_v36 = vld [vmem:[%s4633_s2 + $0x8] sm:$0xff]   ;;  %v3667_v38 = vld [vmem:[%s4631_s3 + $0x450] sm:$0xff]  }
  0x58   :  { %3215 = vmatpush3.bf16.msra.mxu0 %v3595_v37  ;;  %v3666_v37 = vld [vmem:[%s4632_s1 + $0xc0] ss:$72 sps:$4 sm:$0xff]  }
  0x59   :  { %3243 = vmatpush3.bf16.msra.mxu1 %v3597_v39  ;;  %3216 = vmatprep.subr.bf16.mxu0 %v3598_v40  ;;  %v3668_v39 = vld [vmem:[%s4632_s1 + $0xcc] ss:$72 sps:$4 sm:$0xff]  }
  0x5a   :  { %3244 = vmatprep.subr.bf16.mxu1 %v3600_v42  ;;  %v3670_v40 = vld [vmem:[%s4631_s3 + $0x410] sm:$0xff]  }
  0x5b   :  { %v3672_v42 = vld [vmem:[%s4633_s2 + $0x50] sm:$0xff]  }
  0x5c   :  { %3217 = vmatpush3.bf16.msra.mxu0 %v3599_v41  ;;  %v3671_v41 = vld [vmem:[%s4632_s1 + $0xc8] ss:$72 sps:$4 sm:$0xff]  }
  0x5d   :  { %3245 = vmatpush3.bf16.msra.mxu1 %v3601_v43  ;;  %3218 = vmatprep.subr.bf16.mxu0 %v3602_v44  ;;  %v3673_v43 = vld [vmem:[%s4633_s2 + $0x10] sm:$0xff]   ;;  %v3674_v44 = vld [vmem:[%s4631_s3 + $0x458] sm:$0xff]  }
  0x5e   :  { %3246 = vmatprep.subr.bf16.mxu1 %v3604_v46  ;;  %v3676_v46 = vld [vmem:[%s4633_s2 + $0x58] sm:$0xff]  }
  0x60   :  { %3219 = vmatpush3.bf16.msra.mxu0 %v3603_v45  ;;  %v3675_v45 = vld [vmem:[%s4631_s3 + $0x418] sm:$0xff]  }
  0x61   :  { %3247 = vmatpush3.bf16.msra.mxu1 %v3608_v49  ;;  %3260 = vmatprep.subr.bf16.mxu0 %v3609_v50  ;;  %v3679_v49 = vld [vmem:[%s4631_s3 + $0x420] sm:$0xff]  }
  0x62   :  { %3288 = vmatprep.subr.bf16.mxu1 %v3614_v54  ;;  %v3680_v50 = vld [vmem:[%s4633_s2 + $0x60] sm:$0xff]   ;;  %v3684_v54 = vld [vmem:[%s4633_s2 + $0x68] sm:$0xff]  }
  0x63   :  { %1782 = vmatmul.mubr.bf16.vlgmr.msra.gmra.mrb[16].mxu0 %v3605_v47  ;;  %v3677_v47 = vld [vmem:[%s4633_s2 + $0x18] sm:$0xff]  }
  0x64   :  { %3261 = vmatpush3.bf16.msra.mxu0 %v3613_v53  ;;  %1831 = vmatmul.mubr.bf16.vlgmr.msra.gmra.mrb[16].mxu1 %v3610_v51  ;;  %v3681_v51 = vld [vmem:[%s4633_s2 + $0x20] sm:$0xff]   ;;  %v3683_v53 = vld [vmem:[%s4631_s3 + $0x428] sm:$0xff]  }
  0x65   :  { %3289 = vmatpush3.bf16.msra.mxu1 %v3615_v55  ;;  %3262 = vmatprep.subr.bf16.mxu0 %v3616_v56  ;;  %v3685_v55 = vld [vmem:[%s4633_s2 + $0x28] sm:$0xff]   ;;  %v3686_v56 = vld [vmem:[%s4631_s3 + $0x470] sm:$0xff]  }
  0x66   :  { %3290 = vmatprep.subr.bf16.mxu1 %v3618_v58  ;;  %1789 = vmatprep.mubr.bf16.mxu0 %v3619_v59  ;;  %v3688_v58 = vld [vmem:[%s4633_s2 + $0x70] sm:$0xff]  }
  0x67   :  { %1838 = vmatprep.mubr.bf16.mxu1 %v3624_v63  ;;  %v3689_v59 = vld [vmem:[%s4633_s2 + $0x30] sm:$0xff]   ;;  %v3693_v63 = vld [vmem:[%s4632_s1 + $0x40] ss:$72 sps:$4 sm:$0xff]  }
  0x68   :  { %3263 = vmatpush3.bf16.msra.mxu0 %v3617_v57  ;;  %v3687_v57 = vld [vmem:[%s4631_s3 + $0x430] sm:$0xff]  }
  0x69   :  { %3291 = vmatpush3.bf16.msra.mxu1 %v3621_v60  ;;  %3264 = vmatprep.subr.bf16.mxu0 %v3623_v62  ;;  %v3690_v60 = vld [vmem:[%s4631_s3 + $0x478] sm:$0xff]  }
  0x6a   :  { %3292 = vmatprep.subr.bf16.mxu1 %v3628_v2  ;;  %v3692_v62 = vld [vmem:[%s4633_s2 + $0x78] sm:$0xff]   ;;  %v3697_v2 = vld [vmem:[%s4633_s2 + $0xc0] sm:$0xff]  }
  0x6b   :  { %1790 = vmatmul.mubr.bf16.gmra.mrb[20].mxu0 %v3622_v61  ;;  %v3691_v61 = vld [vmem:[%s4631_s3 + $0x438] sm:$0xff]  }
  0x6c   :  { %3265 = vmatpush3.bf16.msra.mxu0 %v3626_v0  ;;  %1839 = vmatmul.mubr.bf16.gmra.mrb[20].mxu1 %v3627_v1  ;;  %v3695_v0 = vld [vmem:[%s4632_s1 + $0x44] ss:$72 sps:$4 sm:$0xff]   ;;  %v3696_v1 = vld [vmem:[%s4633_s2 + $0x38] sm:$0xff]  }
  0x6d   :  { %3293 = vmatpush3.bf16.msra.mxu1 %v3629_v3  ;;  %3266 = vmatprep.subr.bf16.mxu0 %v3630_v4  ;;  %v3698_v3 = vld [vmem:[%s4634_s0] ss:$36 sps:$4 sm:$0xff]  }
  0x6e   :  { %3294 = vmatprep.subr.bf16.mxu1 %v3632_v6  ;;  %1879 = vmatprep.mubr.bf16.mxu0 %v3651_v24  ;;  %v3700_v4 = vld [vmem:[%s4634_s0 + $0x4] ss:$36 sps:$4 sm:$0xff]  }
  0x6f   :  { %1928 = vmatprep.mubr.bf16.mxu1 %v3656_v28  ;;  %v3702_v6 = vld [vmem:[%s4633_s2 + $0x140] sm:$0xff]   ;;  %v3726_v28 = vld [vmem:[%s4633_s2 + $0xe8] sm:$0xff]  }
  0x70   :  { %3267 = vmatpush3.bf16.msra.mxu0 %v3631_v5  ;;  %v3701_v5 = vld [vmem:[%s4633_s2 + $0x80] sm:$0xff]  }
  0x71   :  { %3295 = vmatpush3.bf16.msra.mxu1 %v3633_v7  ;;  %3268 = vmatprep.subr.bf16.mxu0 %v3634_v8  ;;  %v3703_v7 = vld [vmem:[%s4633_s2 + $0x100] sm:$0xff]   ;;  %v3704_v8 = vld [vmem:[%s4633_s2 + $0xc8] sm:$0xff]  }
  0x72   :  { %3296 = vmatprep.subr.bf16.mxu1 %v3636_v10  ;;  %v3706_v10 = vld [vmem:[%s4633_s2 + $0x148] sm:$0xff]   ;;  %v3722_v24 = vld [vmem:[%s4633_s2 + $0xe0] sm:$0xff]  }
  0x74   :  { %3269 = vmatpush3.bf16.msra.mxu0 %v3635_v9  ;;  %v3705_v9 = vld [vmem:[%s4633_s2 + $0x88] sm:$0xff]  }
  0x75   :  { %3297 = vmatpush3.bf16.msra.mxu1 %v3637_v11  ;;  %3270 = vmatprep.subr.bf16.mxu0 %v3638_v12  ;;  %v3707_v11 = vld [vmem:[%s4632_s1 + $0xd4] ss:$72 sps:$4 sm:$0xff]   ;;  %v3709_v12 = vld [vmem:[%s4633_s2 + $0x108] sm:$0xff]  }
  0x76   :  { %3298 = vmatprep.subr.bf16.mxu1 %v3640_v14  ;;  %v3711_v14 = vld [vmem:[%s4633_s2 + $0xd0] sm:$0xff]  }
  0x78   :  { %3271 = vmatpush3.bf16.msra.mxu0 %v3639_v13  ;;  %v3710_v13 = vld [vmem:[%s4632_s1 + $0xd0] ss:$72 sps:$4 sm:$0xff]  }
  0x79   :  { %3299 = vmatpush3.bf16.msra.mxu1 %v3641_v15  ;;  %3272 = vmatprep.subr.bf16.mxu0 %v3642_v16  ;;  %v3712_v15 = vld [vmem:[%s4634_s0 + $0x4c] ss:$36 sps:$4 sm:$0xff]  }
  0x7a   :  { %3300 = vmatprep.subr.bf16.mxu1 %v3644_v18  ;;  %v3714_v16 = vld [vmem:[%s4633_s2 + $0x90] sm:$0xff]  }
  0x7b   :  { %v3716_v18 = vld [vmem:[%s4633_s2 + $0x150] sm:$0xff]  }
  0x7c   :  { %3273 = vmatpush3.bf16.msra.mxu0 %v3643_v17  ;;  %v3715_v17 = vld [vmem:[%s4634_s0 + $0x48] ss:$36 sps:$4 sm:$0xff]  }
  0x7d   :  { %3301 = vmatpush3.bf16.msra.mxu1 %v3645_v19  ;;  %3274 = vmatprep.subr.bf16.mxu0 %v3646_v20  ;;  %v3717_v19 = vld [vmem:[%s4633_s2 + $0x110] sm:$0xff]   ;;  %v3718_v20 = vld [vmem:[%s4633_s2 + $0xd8] sm:$0xff]  }
  0x7e   :  { %3302 = vmatprep.subr.bf16.mxu1 %v3648_v22  ;;  %v3720_v22 = vld [vmem:[%s4633_s2 + $0x158] sm:$0xff]  }
  0x80   :  { %3275 = vmatpush3.bf16.msra.mxu0 %v3647_v21  ;;  %v3719_v21 = vld [vmem:[%s4633_s2 + $0x98] sm:$0xff]  }
  0x81   :  { %3303 = vmatpush3.bf16.msra.mxu1 %v3652_v25  ;;  %3316 = vmatprep.subr.bf16.mxu0 %v3653_v26  ;;  %v3723_v25 = vld [vmem:[%s4633_s2 + $0xa0] sm:$0xff]  }
  0x82   :  { %3344 = vmatprep.subr.bf16.mxu1 %v3658_v30  ;;  %v3724_v26 = vld [vmem:[%s4633_s2 + $0x160] sm:$0xff]   ;;  %v3728_v30 = vld [vmem:[%s4633_s2 + $0x168] sm:$0xff]  }
  0x83   :  { %1880 = vmatmul.mubr.bf16.vlgmr.msra.gmra.mrb[24].mxu0 %v3649_v23  ;;  %v3721_v23 = vld [vmem:[%s4633_s2 + $0x118] sm:$0xff]  }
  0x84   :  { %3317 = vmatpush3.bf16.msra.mxu0 %v3657_v29  ;;  %1929 = vmatmul.mubr.bf16.vlgmr.msra.gmra.mrb[24].mxu1 %v3654_v27  ;;  %v3725_v27 = vld [vmem:[%s4633_s2 + $0x120] sm:$0xff]   ;;  %v3727_v29 = vld [vmem:[%s4633_s2 + $0xa8] sm:$0xff]  }
  0x85   :  { %3345 = vmatpush3.bf16.msra.mxu1 %v3659_v31  ;;  %3318 = vmatprep.subr.bf16.mxu0 %v3660_v32  ;;  %v3729_v31 = vld [vmem:[%s4633_s2 + $0x128] sm:$0xff]   ;;  %v3730_v32 = vld [vmem:[%s4633_s2 + $0xf0] sm:$0xff]  }
  0x86   :  { %3346 = vmatprep.subr.bf16.mxu1 %v3662_v34  ;;  %1887 = vmatprep.mubr.bf16.mxu0 %v3663_v35  ;;  %v3732_v34 = vld [vmem:[%s4633_s2 + $0x170] sm:$0xff]  }
  0x87   :  { %1936 = vmatprep.mubr.bf16.mxu1 %v3668_v39  ;;  %v3733_v35 = vld [vmem:[%s4633_s2 + $0x130] sm:$0xff]   ;;  %v3737_v39 = vld [vmem:[%s4634_s0 + $0x8] ss:$36 sps:$4 sm:$0xff]  }
  0x88   :  { %3319 = vmatpush3.bf16.msra.mxu0 %v3661_v33  ;;  %v3731_v33 = vld [vmem:[%s4633_s2 + $0xb0] sm:$0xff]  }
  0x89   :  { %3347 = vmatpush3.bf16.msra.mxu1 %v3665_v36  ;;  %3320 = vmatprep.subr.bf16.mxu0 %v3667_v38  ;;  %v3734_v36 = vld [vmem:[%s4633_s2 + $0xf8] sm:$0xff]  }
  0x8a   :  { %3348 = vmatprep.subr.bf16.mxu1 %v3672_v42  ;;  %v3736_v38 = vld [vmem:[%s4633_s2 + $0x178] sm:$0xff]   ;;  %v3741_v42 = vld [vmem:[%s4633_s2 + $0x1c0] sm:$0xff]  }
  0x8b   :  { %1888 = vmatmul.mubr.bf16.gmra.mrb[28].mxu0 %v3666_v37  ;;  %v3735_v37 = vld [vmem:[%s4633_s2 + $0xb8] sm:$0xff]  }
  0x8c   :  { %3321 = vmatpush3.bf16.msra.mxu0 %v3670_v40  ;;  %1937 = vmatmul.mubr.bf16.gmra.mrb[28].mxu1 %v3671_v41  ;;  %v3739_v40 = vld [vmem:[%s4634_s0 + $0xc] ss:$36 sps:$4 sm:$0xff]   ;;  %v3740_v41 = vld [vmem:[%s4633_s2 + $0x138] sm:$0xff]  }
  0x8d   :  { %3349 = vmatpush3.bf16.msra.mxu1 %v3673_v43  ;;  %3322 = vmatprep.subr.bf16.mxu0 %v3674_v44  ;;  %v3742_v43 = vld [vmem:[%s4634_s0 + $0x10] ss:$36 sps:$4 sm:$0xff]  }
  0x8e   :  { %3350 = vmatprep.subr.bf16.mxu1 %v3676_v46  ;;  %1977 = vmatprep.mubr.bf16.mxu0 %v3695_v0  ;;  %v3744_v44 = vld [vmem:[%s4634_s0 + $0x14] ss:$36 sps:$4 sm:$0xff]   ;;  %v3746_v46 = vld [vmem:[%s4633_s2 + $0x1c8] sm:$0xff]  }
  0x8f   :  { %2550 = vmatprep.mubr.bf16.mxu1 %v3700_v4  ;;  %v3766_v0 = vld [vmem:[%s4633_s2 + $0x1a8] sm:$0xff]   ;;  %v3771_v4 = vld [vmem:[%s4633_s2 + $0x230] sm:$0xff]  }
  0x90   :  { %3323 = vmatpush3.bf16.msra.mxu0 %v3675_v45  ;;  %v3745_v45 = vld [vmem:[%s4633_s2 + $0x180] sm:$0xff]  }
  0x91   :  { %3351 = vmatpush3.bf16.msra.mxu1 %v3677_v47  ;;  %3324 = vmatprep.subr.bf16.mxu0 %v3678_v48  ;;  %v3747_v47 = vld [vmem:[%s4633_s2 + $0x200] sm:$0xff]   ;;  %v3748_v48 = vld [vmem:[%s4633_s2 + $0x188] sm:$0xff]  }
  0x92   :  { %3352 = vmatprep.subr.bf16.mxu1 %v3680_v50  ;;  %v3751_v50 = vld [vmem:[%s4634_s0 + $0x50] ss:$36 sps:$4 sm:$0xff]  }
  0x94   :  { %3325 = vmatpush3.bf16.msra.mxu0 %v3679_v49  ;;  %v3749_v49 = vld [vmem:[%s4634_s0 + $0x54] ss:$36 sps:$4 sm:$0xff]  }
  0x95   :  { %3353 = vmatpush3.bf16.msra.mxu1 %v3681_v51  ;;  %3326 = vmatprep.subr.bf16.mxu0 %v3682_v52  ;;  %v3752_v51 = vld [vmem:[%s4633_s2 + $0x1d0] sm:$0xff]   ;;  %v3753_v52 = vld [vmem:[%s4633_s2 + $0x208] sm:$0xff]  }
  0x96   :  { %3354 = vmatprep.subr.bf16.mxu1 %v3684_v54  ;;  %v3756_v54 = vld [vmem:[%s4633_s2 + $0x190] sm:$0xff]  }
  0x98   :  { %3327 = vmatpush3.bf16.msra.mxu0 %v3683_v53  ;;  %v3754_v53 = vld [vmem:[%s4634_s0 + $0x5c] ss:$36 sps:$4 sm:$0xff]  }
  0x99   :  { %3355 = vmatpush3.bf16.msra.mxu1 %v3685_v55  ;;  %3328 = vmatprep.subr.bf16.mxu0 %v3686_v56  ;;  %v3757_v55 = vld [vmem:[%s4634_s0 + $0x58] ss:$36 sps:$4 sm:$0xff]  }
  0x9a   :  { %3356 = vmatprep.subr.bf16.mxu1 %v3688_v58  ;;  %v3758_v56 = vld [vmem:[%s4633_s2 + $0x1d8] sm:$0xff]  }
  0x9b   :  { %v3760_v58 = vld [vmem:[%s4633_s2 + $0x198] sm:$0xff]  }
  0x9c   :  { %3329 = vmatpush3.bf16.msra.mxu0 %v3687_v57  ;;  %v3759_v57 = vld [vmem:[%s4633_s2 + $0x210] sm:$0xff]  }
  0x9d   :  { %3357 = vmatpush3.bf16.msra.mxu1 %v3689_v59  ;;  %3330 = vmatprep.subr.bf16.mxu0 %v3690_v60  ;;  %v3761_v59 = vld [vmem:[%s4633_s2 + $0x1e0] sm:$0xff]   ;;  %v3762_v60 = vld [vmem:[%s4633_s2 + $0x218] sm:$0xff]  }
  0x9e   :  { %3358 = vmatprep.subr.bf16.mxu1 %v3692_v62  ;;  %v3764_v62 = vld [vmem:[%s4633_s2 + $0x1e8] sm:$0xff]  }
  0xa0   :  { %3331 = vmatpush3.bf16.msra.mxu0 %v3691_v61  ;;  %v3763_v61 = vld [vmem:[%s4633_s2 + $0x1a0] sm:$0xff]  }
  0xa1   :  { %3359 = vmatpush3.bf16.msra.mxu1 %v3696_v1  ;;  %3372 = vmatprep.subr.bf16.mxu0 %v3697_v2  ;;  %v3767_v1 = vld [vmem:[%s4633_s2 + $0x1f0] sm:$0xff]   ;;  %v3768_v2 = vld [vmem:[%s4633_s2 + $0x228] sm:$0xff]  }
  0xa2   :  { %3400 = vmatprep.subr.bf16.mxu1 %v3702_v6  ;;  %v3772_v6 = vld [vmem:[%s4633_s2 + $0x1b8] sm:$0xff]  }
  0xa3   :  { %1978 = vmatmul.mubr.bf16.vlgmr.msra.gmra.mrb[32].mxu0 %v3693_v63  ;;  %v3765_v63 = vld [vmem:[%s4633_s2 + $0x220] sm:$0xff]  }
  0xa4   :  { %3373 = vmatpush3.bf16.msra.mxu0 %v3701_v5  ;;  %2551 = vmatmul.mubr.bf16.vlgmr.msra.gmra.mrb[32].mxu1 %v3698_v3  ;;  %v3769_v3 = vld [vmem:[%s4633_s2 + $0x1b0] sm:$0xff]   ;;  %v3770_v5 = vld [vmem:[%s4633_s2 + $0x1f8] sm:$0xff]  }
  0xa5   :  { %3401 = vmatpush3.bf16.msra.mxu1 %v3703_v7  ;;  %3374 = vmatprep.subr.bf16.mxu0 %v3704_v8  ;;  %v3775_v8 = vld [vmem:[%s4634_s0 + $0x1c] ss:$36 sps:$4 sm:$0xff]  }
  0xa6   :  { %3402 = vmatprep.subr.bf16.mxu1 %v3706_v10  ;;  %1985 = vmatprep.mubr.bf16.mxu0 %v3707_v11  ;;  %v3777_v11 = vld [vmem:[%s4634_s0 + $0x20] ss:$36 sps:$4 sm:$0xff]  }
  0xa7   :  { %2558 = vmatprep.mubr.bf16.mxu1 %v3712_v15 }
  0xa8   :  { %3375 = vmatpush3.bf16.msra.mxu0 %v3705_v9  ;;  %v3776_v9 = vld [vmem:[%s4633_s2 + $0x238] sm:$0xff]  }
  0xa9   :  { %3403 = vmatpush3.bf16.msra.mxu1 %v3709_v12  ;;  %3376 = vmatprep.subr.bf16.mxu0 %v3711_v14  ;;  %v3773_v14 = vld [vmem:[%s4634_s0 + $0x18] ss:$36 sps:$4 sm:$0xff]  }
  0xaa   :  { %3404 = vmatprep.subr.bf16.mxu1 %v3716_v18 }
  0xab   :  { %1986 = vmatmul.mubr.bf16.gmra.mrb[36].mxu0 %v3710_v13 }
  0xac   :  { %3377 = vmatpush3.bf16.msra.mxu0 %v3714_v16  ;;  %2559 = vmatmul.mubr.bf16.gmra.mrb[36].mxu1 %v3715_v17 }
  0xad   :  { %3405 = vmatpush3.bf16.msra.mxu1 %v3717_v19  ;;  %3378 = vmatprep.subr.bf16.mxu0 %v3718_v20  ;;  %v3779_v19 = vld [vmem:[%s4634_s0 + $0x64] ss:$36 sps:$4 sm:$0xff]  }
  0xae   :  { %3406 = vmatprep.subr.bf16.mxu1 %v3720_v22  ;;  %2599 = vmatprep.mubr.bf16.mxu0 %v3739_v40 }
  0xaf   :  { %2648 = vmatprep.mubr.bf16.mxu1 %v3744_v44 }
  0xb0   :  { %3379 = vmatpush3.bf16.msra.mxu0 %v3719_v21 }
  0xb1   :  { %3407 = vmatpush3.bf16.msra.mxu1 %v3721_v23  ;;  %3380 = vmatprep.subr.bf16.mxu0 %v3722_v24 }
  0xb2   :  { %3408 = vmatprep.subr.bf16.mxu1 %v3724_v26 }
  0xb4   :  { %3381 = vmatpush3.bf16.msra.mxu0 %v3723_v25  ;;  %v3778_v25 = vld [vmem:[%s4634_s0 + $0x68] ss:$36 sps:$4 sm:$0xff]  }
  0xb5   :  { %3409 = vmatpush3.bf16.msra.mxu1 %v3725_v27  ;;  %3382 = vmatprep.subr.bf16.mxu0 %v3726_v28  ;;  %v3781_v27 = vld [vmem:[%s4634_s0 + $0x60] ss:$36 sps:$4 sm:$0xff]  }
  0xb6   :  { %3410 = vmatprep.subr.bf16.mxu1 %v3728_v30 }
  0xb8   :  { %3383 = vmatpush3.bf16.msra.mxu0 %v3727_v29 }
  0xb9   :  { %3411 = vmatpush3.bf16.msra.mxu1 %v3729_v31  ;;  %3384 = vmatprep.subr.bf16.mxu0 %v3730_v32 }
  0xba   :  { %3412 = vmatprep.subr.bf16.mxu1 %v3732_v34 }
  0xbc   :  { %3385 = vmatpush3.bf16.msra.mxu0 %v3731_v33 }
  0xbd   :  { %3413 = vmatpush3.bf16.msra.mxu1 %v3733_v35  ;;  %3386 = vmatprep.subr.bf16.mxu0 %v3734_v36 }
  0xbe   :  { %3414 = vmatprep.subr.bf16.mxu1 %v3736_v38 }
  0xc0   :  { %3387 = vmatpush3.bf16.msra.mxu0 %v3735_v37 }
  0xc1   :  { %3415 = vmatpush3.bf16.msra.mxu1 %v3740_v41  ;;  %3428 = vmatprep.subr.bf16.mxu0 %v3741_v42 }
  0xc2   :  { %3466 = vmatprep.subr.bf16.mxu1 %v3747_v47 }
  0xc3   :  { %2600 = vmatmul.mubr.bf16.vlgmr.msra.gmra.mrb[40].mxu0 %v3737_v39 }
  0xc4   :  { %3429 = vmatpush3.bf16.msra.mxu0 %v3745_v45  ;;  %2649 = vmatmul.mubr.bf16.vlgmr.msra.gmra.mrb[40].mxu1 %v3742_v43 }
  0xc5   :  { %3430 = vmatprep.subr.bf16.mxu0 %v3746_v46  ;;  %3467 = vmatpush3.bf16.msra.mxu1 %v3747_v47 }
  0xc6   :  { %2607 = vmatprep.mubr.bf16.mxu0 %v3749_v49  ;;  %3468 = vmatprep.subr.bf16.mxu1 %v3753_v52 }
  0xc7   :  { %2656 = vmatprep.mubr.bf16.mxu1 %v3754_v53 }
  0xc8   :  { %3431 = vmatpush3.bf16.msra.mxu0 %v3748_v48 }
  0xc9   :  { %3432 = vmatprep.subr.bf16.mxu0 %v3752_v51  ;;  %3469 = vmatpush3.bf16.msra.mxu1 %v3753_v52 }
  0xca   :  { %3470 = vmatprep.subr.bf16.mxu1 %v3759_v57 }
  0xcb   :  { %2608 = vmatmul.mubr.bf16.gmra.mrb[44].mxu0 %v3751_v50 }
  0xcc   :  { %3433 = vmatpush3.bf16.msra.mxu0 %v3756_v54  ;;  %2657 = vmatmul.mubr.bf16.gmra.mrb[44].mxu1 %v3757_v55 }
  0xcd   :  { %3434 = vmatprep.subr.bf16.mxu0 %v3758_v56  ;;  %3471 = vmatpush3.bf16.msra.mxu1 %v3759_v57 }
  0xce   :  { %3472 = vmatprep.subr.bf16.mxu1 %v3762_v60  ;;  %2697 = vmatprep.mubr.bf16.mxu0 %v3775_v8 }
  0xcf   :  { %3482 = vmatprep.mubr.bf16.mxu1 %v3777_v11 }
  0xd0   :  { %3435 = vmatpush3.bf16.msra.mxu0 %v3760_v58 }
  0xd1   :  { %3436 = vmatprep.subr.bf16.mxu0 %v3761_v59  ;;  %3473 = vmatpush3.bf16.msra.mxu1 %v3762_v60 }
  0xd2   :  { %3474 = vmatprep.subr.bf16.mxu1 %v3765_v63 }
  0xd4   :  { %3437 = vmatpush3.bf16.msra.mxu0 %v3763_v61 }
  0xd5   :  { %3438 = vmatprep.subr.bf16.mxu0 %v3764_v62  ;;  %3475 = vmatpush3.bf16.msra.mxu1 %v3765_v63 }
  0xd6   :  { %3476 = vmatprep.subr.bf16.mxu1 %v3768_v2 }
  0xd8   :  { %3439 = vmatpush3.bf16.msra.mxu0 %v3766_v0 }
  0xd9   :  { %3440 = vmatprep.subr.bf16.mxu0 %v3767_v1  ;;  %3477 = vmatpush3.bf16.msra.mxu1 %v3768_v2 }
  0xda   :  { %3478 = vmatprep.subr.bf16.mxu1 %v3771_v4 }
  0xdc   :  { %3441 = vmatpush3.bf16.msra.mxu0 %v3769_v3 }
  0xdd   :  { %3442 = vmatprep.subr.bf16.mxu0 %v3770_v5  ;;  %3479 = vmatpush3.bf16.msra.mxu1 %v3771_v4 }
  0xde   :  { %3480 = vmatprep.subr.bf16.mxu1 %v3776_v9 }
  0xe0   :  { %3443 = vmatpush3.bf16.msra.mxu0 %v3772_v6 }
  0xe1   :  { %3481 = vmatpush3.bf16.msra.mxu1 %v3776_v9 }
  0xe3   :  { %2698 = vmatmul.mubr.bf16.vlgmr.msra.gmra.mrb[48].mxu0 %v3773_v14 }
  0xe4   :  { %2705 = vmatprep.mubr.bf16.mxu0 %v3779_v19  ;;  %3483 = vmatmul.mubr.bf16.vlgmr.msra.gmra.mrb[48].mxu1 %v3778_v25 }
  0xeb   :  { %2706 = vmatmul.mubr.bf16.gmra.mrb[52].mxu0 %v3781_v27 }
  0xf6   :  { %v3108_v7 = vpop.f32.mrb[0].mxu0 }
  0xf7   :  { %v3136_v10 = vpop.f32.mrb[0].mxu1  ;;  %v3109_v12 = vpop.f32.mrb[1].mxu0 }
  0xf8   :  { %v3137_v13 = vpop.f32.mrb[1].mxu1  ;;  %v3110_v15 = vadd.f32 %v3109_v12, %v3108_v7  ;;  %v3111_v17 = vpop.f32.mrb[2].mxu0 }
  0xf9   :  { %v3138_v16 = vadd.f32 %v3137_v13, %v3136_v10  ;;  %v3139_v18 = vpop.f32.mrb[2].mxu1  ;;  %v3112_v20 = vpop.f32.mrb[3].mxu0 }
  0xfa   :  { %v3140_v21 = vpop.f32.mrb[3].mxu1  ;;  %v3113_v23 = vadd.f32 %v3112_v20, %v3111_v17 }
  0xfb   :  { %v1637_v22 = vadd.f32 %v3138_v16, %v3110_v15  ;;  %v3141_v24 = vadd.f32 %v3140_v21, %v3139_v18 }
  0xfd   :  { %v1640_v26 = vadd.f32 %v3141_v24, %v3113_v23 }
  0xfe   :  { %v3114_v28 = vpop.f32.mrb[4].mxu0 }
  0xff   :  { %v3142_v29 = vpop.f32.mrb[4].mxu1  ;;  %v3115_v30 = vpop.f32.mrb[5].mxu0 }
 0x100   :  { %v3143_v31 = vpop.f32.mrb[5].mxu1  ;;  %v3116_v32 = vadd.f32 %v3115_v30, %v3114_v28  ;;  %v3117_v34 = vpop.f32.mrb[6].mxu0 }
 0x101   :  { %v3144_v33 = vadd.f32 %v3143_v31, %v3142_v29  ;;  %v3145_v35 = vpop.f32.mrb[6].mxu1  ;;  %v3118_v36 = vpop.f32.mrb[7].mxu0 }
 0x102   :  { %v3146_v37 = vpop.f32.mrb[7].mxu1  ;;  %v3119_v39 = vadd.f32 %v3118_v36, %v3117_v34 }
 0x103   :  { %v1645_v38 = vadd.f32 %v3144_v33, %v3116_v32  ;;  %v3147_v40 = vadd.f32 %v3146_v37, %v3145_v35 }
 0x105   :  { %v1648_v41 = vadd.f32 %v3147_v40, %v3119_v39 }
 0x116   :  { %v3164_v42 = vpop.f32.mrb[8].mxu0 }
 0x117   :  { %v3165_v43 = vpop.f32.mrb[9].mxu0  ;;  %v3192_v46 = vpop.f32.mrb[8].mxu1 }
 0x118   :  { %v3166_v44 = vadd.f32 %v3165_v43, %v3164_v42  ;;  %v3167_v45 = vpop.f32.mrb[10].mxu0  ;;  %v3193_v50 = vpop.f32.mrb[9].mxu1 }
 0x119   :  { %v3168_v47 = vpop.f32.mrb[11].mxu0  ;;  %v3194_v51 = vadd.f32 %v3193_v50, %v3192_v46  ;;  %v3195_v52 = vpop.f32.mrb[10].mxu1 }
 0x11a   :  { %v1686_v48 = vadd.f32 %v3166_v44, %v1637_v22  ;;  %v3169_v49 = vadd.f32 %v3168_v47, %v3167_v45  ;;  %v3196_v54 = vpop.f32.mrb[11].mxu1 }
 0x11b   :  { %v3197_v56 = vadd.f32 %v3196_v54, %v3195_v52 }
 0x11c   :  { %v1689_v53 = vadd.f32 %v3169_v49, %v1640_v26  ;;  %v1735_v55 = vadd.f32 %v3194_v51, %v1686_v48 }
 0x11e   :  { %v1738_v57 = vadd.f32 %v3197_v56, %v1689_v53  ;;  %v3170_v58 = vpop.f32.mrb[12].mxu0 }
 0x11f   :  { %v3171_v59 = vpop.f32.mrb[13].mxu0  ;;  %v3198_v62 = vpop.f32.mrb[12].mxu1 }
 0x120   :  { %v3172_v60 = vadd.f32 %v3171_v59, %v3170_v58  ;;  %v3173_v61 = vpop.f32.mrb[14].mxu0  ;;  %v3199_v2 = vpop.f32.mrb[13].mxu1 }
 0x121   :  { %v3174_v63 = vpop.f32.mrb[15].mxu0  ;;  %v3200_v3 = vadd.f32 %v3199_v2, %v3198_v62  ;;  %v3201_v4 = vpop.f32.mrb[14].mxu1 }
 0x122   :  { %v1694_v0 = vadd.f32 %v3172_v60, %v1645_v38  ;;  %v3175_v1 = vadd.f32 %v3174_v63, %v3173_v61  ;;  %v3202_v6 = vpop.f32.mrb[15].mxu1 }
 0x123   :  { %v3203_v8 = vadd.f32 %v3202_v6, %v3201_v4 }
 0x124   :  { %v1697_v5 = vadd.f32 %v3175_v1, %v1648_v41  ;;  %v1743_v7 = vadd.f32 %v3200_v3, %v1694_v0 }
 0x126   :  { %v1746_v9 = vadd.f32 %v3203_v8, %v1697_v5 }
 0x136   :  { %v3220_v10 = vpop.f32.mrb[16].mxu0 }
 0x137   :  { %v3221_v11 = vpop.f32.mrb[17].mxu0  ;;  %v3248_v16 = vpop.f32.mrb[16].mxu1 }
 0x138   :  { %v3222_v12 = vadd.f32 %v3221_v11, %v3220_v10  ;;  %v3223_v13 = vpop.f32.mrb[18].mxu0  ;;  %v3249_v18 = vpop.f32.mrb[17].mxu1 }
 0x139   :  { %v3224_v14 = vpop.f32.mrb[19].mxu0  ;;  %v3250_v20 = vadd.f32 %v3249_v18, %v3248_v16  ;;  %v3251_v21 = vpop.f32.mrb[18].mxu1 }
 0x13a   :  { %v1784_v15 = vadd.f32 %v3222_v12, %v1735_v55  ;;  %v3225_v17 = vadd.f32 %v3224_v14, %v3223_v13  ;;  %v3252_v22 = vpop.f32.mrb[19].mxu1 }
 0x13b   :  { %v3253_v24 = vadd.f32 %v3252_v22, %v3251_v21 }
 0x13c   :  { %v1787_v19 = vadd.f32 %v3225_v17, %v1738_v57  ;;  %v1833_v23 = vadd.f32 %v3250_v20, %v1784_v15 }
 0x13e   :  { %v1836_v25 = vadd.f32 %v3253_v24, %v1787_v19  ;;  %v3226_v26 = vpop.f32.mrb[20].mxu0 }
 0x13f   :  { %v3227_v27 = vpop.f32.mrb[21].mxu0  ;;  %v3254_v30 = vpop.f32.mrb[20].mxu1 }
 0x140   :  { %v3228_v28 = vadd.f32 %v3227_v27, %v3226_v26  ;;  %v3229_v29 = vpop.f32.mrb[22].mxu0  ;;  %v3255_v34 = vpop.f32.mrb[21].mxu1 }
 0x141   :  { %v3230_v31 = vpop.f32.mrb[23].mxu0  ;;  %v3256_v35 = vadd.f32 %v3255_v34, %v3254_v30  ;;  %v3257_v36 = vpop.f32.mrb[22].mxu1 }
 0x142   :  { %v1792_v32 = vadd.f32 %v3228_v28, %v1743_v7  ;;  %v3231_v33 = vadd.f32 %v3230_v31, %v3229_v29  ;;  %v3258_v38 = vpop.f32.mrb[23].mxu1 }
 0x143   :  { %v3259_v40 = vadd.f32 %v3258_v38, %v3257_v36 }
 0x144   :  { %v1795_v37 = vadd.f32 %v3231_v33, %v1746_v9  ;;  %v1841_v39 = vadd.f32 %v3256_v35, %v1792_v32 }
 0x146   :  { %v1844_v41 = vadd.f32 %v3259_v40, %v1795_v37 }
 0x156   :  { %v3276_v42 = vpop.f32.mrb[24].mxu0 }
 0x157   :  { %v3277_v43 = vpop.f32.mrb[25].mxu0  ;;  %v3304_v46 = vpop.f32.mrb[24].mxu1 }
 0x158   :  { %v3278_v44 = vadd.f32 %v3277_v43, %v3276_v42  ;;  %v3279_v45 = vpop.f32.mrb[26].mxu0  ;;  %v3305_v50 = vpop.f32.mrb[25].mxu1 }
 0x159   :  { %v3280_v47 = vpop.f32.mrb[27].mxu0  ;;  %v3306_v51 = vadd.f32 %v3305_v50, %v3304_v46  ;;  %v3307_v52 = vpop.f32.mrb[26].mxu1 }
 0x15a   :  { %v1882_v48 = vadd.f32 %v3278_v44, %v1833_v23  ;;  %v3281_v49 = vadd.f32 %v3280_v47, %v3279_v45  ;;  %v3308_v54 = vpop.f32.mrb[27].mxu1 }
 0x15b   :  { %v3309_v56 = vadd.f32 %v3308_v54, %v3307_v52 }
 0x15c   :  { %v1885_v53 = vadd.f32 %v3281_v49, %v1836_v25  ;;  %v1931_v55 = vadd.f32 %v3306_v51, %v1882_v48 }
 0x15e   :  { %v1934_v57 = vadd.f32 %v3309_v56, %v1885_v53  ;;  %v3282_v58 = vpop.f32.mrb[28].mxu0 }
 0x15f   :  { %v3283_v59 = vpop.f32.mrb[29].mxu0  ;;  %v3310_v0 = vpop.f32.mrb[28].mxu1 }
 0x160   :  { %v3284_v60 = vadd.f32 %v3283_v59, %v3282_v58  ;;  %v3285_v61 = vpop.f32.mrb[30].mxu0  ;;  %v3311_v2 = vpop.f32.mrb[29].mxu1 }
 0x161   :  { %v3286_v62 = vpop.f32.mrb[31].mxu0  ;;  %v3312_v4 = vadd.f32 %v3311_v2, %v3310_v0  ;;  %v3313_v5 = vpop.f32.mrb[30].mxu1 }
 0x162   :  { %v1890_v63 = vadd.f32 %v3284_v60, %v1841_v39  ;;  %v3287_v1 = vadd.f32 %v3286_v62, %v3285_v61  ;;  %v3314_v6 = vpop.f32.mrb[31].mxu1 }
 0x163   :  { %v3315_v8 = vadd.f32 %v3314_v6, %v3313_v5 }
 0x164   :  { %v1893_v3 = vadd.f32 %v3287_v1, %v1844_v41  ;;  %v1939_v7 = vadd.f32 %v3312_v4, %v1890_v63 }
 0x166   :  { %v1942_v9 = vadd.f32 %v3315_v8, %v1893_v3 }
 0x176   :  { %v3332_v10 = vpop.f32.mrb[32].mxu0 }
 0x177   :  { %v3333_v11 = vpop.f32.mrb[33].mxu0  ;;  %v3360_v14 = vpop.f32.mrb[32].mxu1 }
 0x178   :  { %v3334_v12 = vadd.f32 %v3333_v11, %v3332_v10  ;;  %v3335_v13 = vpop.f32.mrb[34].mxu0  ;;  %v3361_v18 = vpop.f32.mrb[33].mxu1 }
 0x179   :  { %v3336_v15 = vpop.f32.mrb[35].mxu0  ;;  %v3362_v19 = vadd.f32 %v3361_v18, %v3360_v14  ;;  %v3363_v20 = vpop.f32.mrb[34].mxu1 }
 0x17a   :  { %v1980_v16 = vadd.f32 %v3334_v12, %v1931_v55  ;;  %v3337_v17 = vadd.f32 %v3336_v15, %v3335_v13  ;;  %v3364_v22 = vpop.f32.mrb[35].mxu1 }
 0x17b   :  { %v3365_v24 = vadd.f32 %v3364_v22, %v3363_v20 }
 0x17c   :  { %v1983_v21 = vadd.f32 %v3337_v17, %v1934_v57  ;;  %v2553_v23 = vadd.f32 %v3362_v19, %v1980_v16  ;;  %v3072_v19 = vld [vmem:[%s4635_s4] ss:$0 sm:$0xff] }
 0x17e   :  { %v2556_v25 = vadd.f32 %v3365_v24, %v1983_v21  ;;  %v3338_v26 = vpop.f32.mrb[36].mxu0 }
 0x17f   :  { %v3339_v27 = vpop.f32.mrb[37].mxu0  ;;  %v3366_v30 = vpop.f32.mrb[36].mxu1 }
 0x180   :  { %v3340_v28 = vadd.f32 %v3339_v27, %v3338_v26  ;;  %v3341_v29 = vpop.f32.mrb[38].mxu0  ;;  %v3367_v34 = vpop.f32.mrb[37].mxu1 }
 0x181   :  { %v3342_v31 = vpop.f32.mrb[39].mxu0  ;;  %v3368_v35 = vadd.f32 %v3367_v34, %v3366_v30  ;;  %v3369_v36 = vpop.f32.mrb[38].mxu1 }
 0x182   :  { %v1988_v32 = vadd.f32 %v3340_v28, %v1939_v7  ;;  %v3343_v33 = vadd.f32 %v3342_v31, %v3341_v29  ;;  %v3370_v38 = vpop.f32.mrb[39].mxu1 }
 0x183   :  { %v3371_v40 = vadd.f32 %v3370_v38, %v3369_v36 }
 0x184   :  { %v1991_v37 = vadd.f32 %v3343_v33, %v1942_v9  ;;  %v2561_v39 = vadd.f32 %v3368_v35, %v1988_v32 }
 0x186   :  { %v2564_v41 = vadd.f32 %v3371_v40, %v1991_v37 }
 0x196   :  { %v3388_v42 = vpop.f32.mrb[40].mxu0 }
 0x197   :  { %v3389_v43 = vpop.f32.mrb[41].mxu0  ;;  %v3416_v48 = vpop.f32.mrb[40].mxu1 }
 0x198   :  { %v3390_v44 = vadd.f32 %v3389_v43, %v3388_v42  ;;  %v3391_v45 = vpop.f32.mrb[42].mxu0  ;;  %v3417_v50 = vpop.f32.mrb[41].mxu1 }
 0x199   :  { %v3392_v46 = vpop.f32.mrb[43].mxu0  ;;  %v3418_v52 = vadd.f32 %v3417_v50, %v3416_v48  ;;  %v3419_v53 = vpop.f32.mrb[42].mxu1 }
 0x19a   :  { %v2602_v47 = vadd.f32 %v3390_v44, %v2553_v23  ;;  %v3393_v49 = vadd.f32 %v3392_v46, %v3391_v45  ;;  %v3420_v54 = vpop.f32.mrb[43].mxu1 }
 0x19b   :  { %v3421_v56 = vadd.f32 %v3420_v54, %v3419_v53 }
 0x19c   :  { %v2605_v51 = vadd.f32 %v3393_v49, %v2556_v25  ;;  %v2651_v55 = vadd.f32 %v3418_v52, %v2602_v47 }
 0x19e   :  { %v3394_v57 = vpop.f32.mrb[44].mxu0  ;;  %v2654_v58 = vadd.f32 %v3421_v56, %v2605_v51 }
 0x19f   :  { %v3395_v59 = vpop.f32.mrb[45].mxu0  ;;  %v3422_v62 = vpop.f32.mrb[44].mxu1 }
 0x1a0   :  { %v3396_v60 = vadd.f32 %v3395_v59, %v3394_v57  ;;  %v3397_v61 = vpop.f32.mrb[46].mxu0  ;;  %v3423_v2 = vpop.f32.mrb[45].mxu1 }
 0x1a1   :  { %v3398_v63 = vpop.f32.mrb[47].mxu0  ;;  %v3424_v3 = vadd.f32 %v3423_v2, %v3422_v62  ;;  %v3425_v4 = vpop.f32.mrb[46].mxu1 }
 0x1a2   :  { %v2610_v0 = vadd.f32 %v3396_v60, %v2561_v39  ;;  %v3399_v1 = vadd.f32 %v3398_v63, %v3397_v61  ;;  %v3426_v6 = vpop.f32.mrb[47].mxu1 }
 0x1a3   :  { %v3427_v8 = vadd.f32 %v3426_v6, %v3425_v4 }
 0x1a4   :  { %v2613_v5 = vadd.f32 %v3399_v1, %v2564_v41  ;;  %v2659_v7 = vadd.f32 %v3424_v3, %v2610_v0 }
 0x1a6   :  { %v2662_v9 = vadd.f32 %v3427_v8, %v2613_v5 }
 0x1b6   :  { %v3444_v10 = vpop.f32.mrb[48].mxu0 }
 0x1b7   :  { %v3445_v11 = vpop.f32.mrb[49].mxu0  ;;  %v3484_v15 = vpop.f32.mrb[48].mxu1 }
 0x1b8   :  { %v3446_v12 = vadd.f32 %v3445_v11, %v3444_v10  ;;  %v3447_v13 = vpop.f32.mrb[50].mxu0  ;;  %v2748_v18 = vpop.f32.mrb[49].mxu1 }
 0x1b9   :  { %v3448_v14 = vpop.f32.mrb[51].mxu0  ;;  %v3485_v20 = vpop.f32.mrb[50].mxu1 }
 0x1ba   :  { %v3449_v16 = vadd.f32 %v3448_v14, %v3447_v13  ;;  %v2700_v17 = vadd.f32 %v3446_v12, %v2651_v55  ;;  %v2751_v23 = vpop.f32.mrb[51].mxu1 }
 0x1bc   :  { %v2749_v21 = vadd.f32 %v2748_v18, %v2700_v17  ;;  %v2703_v22 = vadd.f32 %v3449_v16, %v2654_v58 }
 0x1be   :  { %v2770_v24 = vadd.f32 %v3072_v19, %v2749_v21  ;;  %v2752_v25 = vadd.f32 %v2751_v23, %v2703_v22  ;;  %v3450_v26 = vpop.f32.mrb[52].mxu0 }
 0x1bf   :  { %v3451_v27 = vpop.f32.mrb[53].mxu0 }
 0x1c0   :  { %v2771_v28 = vadd.f32 %v3072_v19, %v2752_v25  ;;  %v3452_v29 = vadd.f32 %v3451_v27, %v3450_v26  ;;  %v3453_v30 = vpop.f32.mrb[54].mxu0  ;;  %v2774_v32 = vmax.f32 %v2770_v24, 0.0 }
 0x1c1   :  { %v3454_v31 = vpop.f32.mrb[55].mxu0 }
 0x1c2   :  { %v2775_v33 = vmax.f32 %v2771_v28, 0.0  ;;  %v2708_v34 = vadd.f32 %v3452_v29, %v2659_v7  ;;  %v3455_v35 = vadd.f32 %v3454_v31, %v3453_v30 }
 0x1c4   :  { %v3084_v36 = vpack.c.bf16 %v2775_v33, %v2774_v32  ;;  %v2757_v37 = vadd.f32 %v3484_v15, %v2708_v34  ;;  %v2711_v38 = vadd.f32 %v3455_v35, %v2662_v9 }
 0x1c6   :  { %3085 = vst [vmem:[%s4636_s5] sm:$0xff] %v3084_v36   ;;  %v2772_v39 = vadd.f32 %v3072_v19, %v2757_v37  ;;  %v2760_v40 = vadd.f32 %v3485_v20, %v2711_v38 }
 0x1c8   :  { %v2773_v41 = vadd.f32 %v3072_v19, %v2760_v40  ;;  %v2776_v42 = vmax.f32 %v2772_v39, 0.0 }
 0x1ca   :  { %v2777_v43 = vmax.f32 %v2773_v41, 0.0 }
 0x1cc   :  { %v3089_v44 = vpack.c.bf16 %v2777_v43, %v2776_v42 }
 0x1ce   :  { %3091 = vst [vmem:[%s4636_s5 + $0x8] sm:$0xff] %v3089_v44  }

// kernel: tile.28
= control target key start
LH: loop header
LB: loop body
LE: loop exit
PB: predicated region body
PF: predicated region fallthrough
CT: control target
= control target key end

     0   :  { %s22_s0 = inlined_call_operand.vmem [shape: f32[32], index: 0, kind: input, shape index: {}]   ;;  %s23_s1 = inlined_call_operand.vmem [shape: f32[4,32], index: 1, kind: output, shape index: {}]  }
   0x1   :  { %v4_v0 = vld [vmem:[%s22_s0] ss:$0 sm:$0xff] }
   0x2   :  { %5 = vst [vmem:[%s23_s1] sm:$0xf] %v4_v0 }

// kernel: tile.29
= control target key start
LH: loop header
LB: loop body
LE: loop exit
PB: predicated region body
PF: predicated region fallthrough
CT: control target
= control target key end

     0   :  { %vm7_vm0 = vcmask 261120   ;;  %s37_s8 = smov 32   ;;  %s38_s9 = smov 64   ;;  %vm13_vm1 = vcmask 1048320   ;;  %vm19_vm2 = vcmask 785920   ;;  %vm25_vm3 = vcmask 523520   ;;  %s55_s0 = inlined_call_operand.vmem [shape: f32[4,32], index: 0, kind: input, shape index: {}]   ;;  %s56_s1 = inlined_call_operand.vmem [shape: f32[1,128], index: 1, kind: output, shape index: {}]  }
   0x1   :  { %v4_v0 = vld [vmem:[%s55_s0] sm:$0xf]  ;;  %s36_s0 = smov 96  }
   0x2   :  { %5 = vst [vmem:[#allocation1] sm:$0xf] %v4_v0 }
   0x9   :  { %v10_v1 = vld [vmem:[#allocation1 + $0x3] sm:$0x1]   ;;  %v22_v2 = vld [vmem:[#allocation1 + $0x1] sm:$0x1]   ;;  %v6_v3 = vld [vmem:[#allocation1] sm:$0x1]  }
   0xa   :  { %11 = vrot.lane.b32.xlu0 %v10_v1, %s36_s0  ;;  %23 = vrot.lane.b32.xlu1 %v22_v2, %s37_s8  ;;  %v16_v4 = vld [vmem:[#allocation1 + $0x2] sm:$0x1]   ;;  %8 = vst.msk [vmem:[#allocation0] sm:$0x1] %vm7_vm0, %v6_v3  }
   0xe   :  { %17 = vrot.lane.b32.xlu0 %v16_v4, %s38_s9 }
  0x7c   :  { %v12_v5 = vpop.permute.xlu0 %11   ;;  %v24_v6 = vpop.permute.xlu1 %23  }
  0x7d   :  { %14 = vst.msk [vmem:[#allocation0] sm:$0x1] %vm13_vm1, %v12_v5  }
  0x80   :  { %v18_v7 = vpop.permute.xlu0 %17  }
  0x81   :  { %20 = vst.msk [vmem:[#allocation0] sm:$0x1] %vm19_vm2, %v18_v7  }
  0x82   :  { %26 = vst.msk [vmem:[#allocation0] sm:$0x1] %vm25_vm3, %v24_v6  }
  0x89   :  { %v30_v8 = vld [vmem:[#allocation0] sm:$0x1] }
  0x8a   :  { %32 = vst [vmem:[%s56_s1] sm:$0x1] %v30_v8 }

// kernel: unet_forward.20
= control target key start
LH: loop header
LB: loop body
LE: loop exit
PB: predicated region body
PF: predicated region fallthrough
CT: control target
= control target key end

     0   :  { %vm110_vm0 = vcmask 523264   ;;  %s563_s1 = inlined_call_operand.vmem [shape: bf16[64,128], index: 1, kind: input, shape index: {}]   ;;  %s564_s0 = inlined_call_operand.vmem [shape: bf16[128,64], index: 0, kind: input, shape index: {}]   ;;  %s565_s2 = inlined_call_operand.vmem [shape: f32[1,128], index: 2, kind: input, shape index: {}]   ;;  %s566_s3 = inlined_call_operand.vmem [shape: bf16[128,128], index: 3, kind: output, shape index: {}]  }
   0x1   :  { %v460_v0 = vld [vmem:[%s563_s1] sm:$0xff]   ;;  %v461_v1 = vld [vmem:[%s563_s1 + $0x8] sm:$0xff]   ;;  %v462_v2 = vld [vmem:[%s563_s1 + $0x10] sm:$0xff]  }
   0x2   :  { %428 = vmatprep.subr.bf16.mxu0 %v460_v0  ;;  %452 = vmatprep.subr.bf16.mxu1 %v460_v0  ;;  %v464_v3 = vld [vmem:[%s564_s0] sm:$0xff]   ;;  %v463_v5 = vld [vmem:[%s563_s1 + $0x18] sm:$0xff]   ;;  %v466_v6 = vld [vmem:[%s564_s0 + $0x8] sm:$0xff]  }
   0x3   :  { %429 = vmatpush3.bf16.msra.mxu0 %v460_v0  ;;  %456 = vmatpush3.bf16.msra.mxu1 %v460_v0  ;;  %v465_v4 = vld [vmem:[%s564_s0 + $0x20] sm:$0xff]   ;;  %v467_v7 = vld [vmem:[%s564_s0 + $0x28] sm:$0xff]   ;;  %v468_v8 = vld [vmem:[%s564_s0 + $0x10] sm:$0xff]  }
   0x4   :  { %430 = vmatprep.subr.bf16.mxu0 %v461_v1  ;;  %453 = vmatprep.subr.bf16.mxu1 %v461_v1  ;;  %v469_v9 = vld [vmem:[%s564_s0 + $0x30] sm:$0xff]   ;;  %v470_v10 = vld [vmem:[%s564_s0 + $0x18] sm:$0xff]   ;;  %v316_v13 = vld [vmem:[%s565_s2] ss:$0 sm:$0xff] }
   0x5   :  { %436 = vmatprep.mubr.msk.bf16.mxu0 %vm110_vm0, %v464_v3  ;;  %444 = vmatprep.mubr.msk.bf16.mxu1 %vm110_vm0, %v465_v4  ;;  %v471_v11 = vld [vmem:[%s564_s0 + $0x38] sm:$0xff]  }
   0x7   :  { %431 = vmatpush3.bf16.msra.mxu0 %v461_v1  ;;  %457 = vmatpush3.bf16.msra.mxu1 %v461_v1 }
   0x8   :  { %432 = vmatprep.subr.bf16.mxu0 %v462_v2  ;;  %454 = vmatprep.subr.bf16.mxu1 %v462_v2 }
   0xb   :  { %433 = vmatpush3.bf16.msra.mxu0 %v462_v2  ;;  %458 = vmatpush3.bf16.msra.mxu1 %v462_v2 }
   0xc   :  { %434 = vmatprep.subr.bf16.mxu0 %v463_v5  ;;  %455 = vmatprep.subr.bf16.mxu1 %v463_v5 }
   0xf   :  { %435 = vmatpush3.bf16.msra.mxu0 %v463_v5  ;;  %459 = vmatpush3.bf16.msra.mxu1 %v463_v5 }
  0x12   :  { %437 = vmatmul.mubr.msk.bf16.vlgmr.msra.gmra.mrb[0].mxu0 %vm110_vm0, %v466_v6  ;;  %445 = vmatmul.mubr.msk.bf16.vlgmr.msra.gmra.mrb[0].mxu1 %vm110_vm0, %v467_v7 }
  0x13   :  { %440 = vmatprep.mubr.msk.bf16.mxu0 %vm110_vm0, %v468_v8  ;;  %448 = vmatprep.mubr.msk.bf16.mxu1 %vm110_vm0, %v469_v9 }
  0x1a   :  { %441 = vmatmul.mubr.msk.bf16.gmra.mrb[4].mxu0 %vm110_vm0, %v470_v10  ;;  %449 = vmatmul.mubr.msk.bf16.gmra.mrb[4].mxu1 %vm110_vm0, %v471_v11 }
  0xe5   :  { %v438_v12 = vpop.f32.mrb[0].mxu0  ;;  %v446_v14 = vpop.f32.mrb[0].mxu1 }
  0xe6   :  { %v169_v15 = vpop.f32.mrb[1].mxu0  ;;  %v201_v16 = vpop.f32.mrb[1].mxu1  ;;  %v178_v19 = vadd.f32 %v438_v12, %v316_v13  ;;  %v210_v20 = vadd.f32 %v446_v14, %v316_v13 }
  0xe7   :  { %v439_v17 = vpop.f32.mrb[2].mxu0  ;;  %v447_v18 = vpop.f32.mrb[2].mxu1  ;;  %v170_v25 = vadd.f32 %v316_v13, %v169_v15  ;;  %v202_v26 = vadd.f32 %v316_v13, %v201_v16 }
  0xe8   :  { %v181_v21 = vadd.f32 %v439_v17, %v316_v13  ;;  %v213_v22 = vadd.f32 %v447_v18, %v316_v13  ;;  %v172_v23 = vpop.f32.mrb[3].mxu0  ;;  %v204_v24 = vpop.f32.mrb[3].mxu1 }
  0xe9   :  { %v173_v27 = vadd.f32 %v316_v13, %v172_v23  ;;  %v205_v28 = vadd.f32 %v316_v13, %v204_v24 }
  0xea   :  { %v377_v29 = vpack.c.bf16 %v181_v21, %v178_v19  ;;  %v397_v30 = vpack.c.bf16 %v213_v22, %v210_v20 }
  0xeb   :  { %v372_v31 = vpack.c.bf16 %v173_v27, %v170_v25  ;;  %v392_v32 = vpack.c.bf16 %v205_v28, %v202_v26 }
  0xec   :  { %409 = vst [vmem:[%s566_s3 + $0x8] sm:$0xff] %v377_v29   ;;  %413 = vst [vmem:[%s566_s3 + $0x28] sm:$0xff] %v397_v30  }
  0xed   :  { %373 = vst [vmem:[%s566_s3] sm:$0xff] %v372_v31   ;;  %412 = vst [vmem:[%s566_s3 + $0x20] sm:$0xff] %v392_v32   ;;  %v442_v33 = vpop.f32.mrb[4].mxu0  ;;  %v450_v34 = vpop.f32.mrb[4].mxu1 }
  0xee   :  { %v185_v35 = vpop.f32.mrb[5].mxu0  ;;  %v217_v36 = vpop.f32.mrb[5].mxu1  ;;  %v194_v39 = vadd.f32 %v442_v33, %v316_v13  ;;  %v226_v40 = vadd.f32 %v450_v34, %v316_v13 }
  0xef   :  { %v443_v37 = vpop.f32.mrb[6].mxu0  ;;  %v451_v38 = vpop.f32.mrb[6].mxu1  ;;  %v186_v45 = vadd.f32 %v316_v13, %v185_v35  ;;  %v218_v46 = vadd.f32 %v316_v13, %v217_v36 }
  0xf0   :  { %v197_v41 = vadd.f32 %v443_v37, %v316_v13  ;;  %v229_v42 = vadd.f32 %v451_v38, %v316_v13  ;;  %v188_v43 = vpop.f32.mrb[7].mxu0  ;;  %v220_v44 = vpop.f32.mrb[7].mxu1 }
  0xf1   :  { %v189_v47 = vadd.f32 %v316_v13, %v188_v43  ;;  %v221_v48 = vadd.f32 %v316_v13, %v220_v44 }
  0xf2   :  { %v387_v49 = vpack.c.bf16 %v197_v41, %v194_v39  ;;  %v407_v50 = vpack.c.bf16 %v229_v42, %v226_v40 }
  0xf3   :  { %v382_v51 = vpack.c.bf16 %v189_v47, %v186_v45  ;;  %v402_v52 = vpack.c.bf16 %v221_v48, %v218_v46 }
  0xf4   :  { %411 = vst [vmem:[%s566_s3 + $0x18] sm:$0xff] %v387_v49   ;;  %415 = vst [vmem:[%s566_s3 + $0x38] sm:$0xff] %v407_v50  }
  0xf5   :  { %410 = vst [vmem:[%s566_s3 + $0x10] sm:$0xff] %v382_v51   ;;  %414 = vst [vmem:[%s566_s3 + $0x30] sm:$0xff] %v402_v52  }

// kernel: unet_forward.19
= control target key start
LH: loop header
LB: loop body
LE: loop exit
PB: predicated region body
PF: predicated region fallthrough
CT: control target
= control target key end

     0   :  { %vm2066_vm0 = vcmask 523264   ;;  %vm2485_vm1 = vcmask 519168   ;;  %s4540_s3 = inlined_call_operand.vmem [shape: bf16[1152,64], index: 3, kind: input, shape index: {}]   ;;  %s4541_s1 = inlined_call_operand.vmem [shape: bf16[128,1152], index: 1, kind: input, shape index: {}]   ;;  %s4542_s2 = inlined_call_operand.vmem [shape: bf16[576,64], index: 2, kind: input, shape index: {}]   ;;  %s4543_s0 = inlined_call_operand.vmem [shape: bf16[128,576], index: 0, kind: input, shape index: {}]   ;;  %s4544_s4 = inlined_call_operand.vmem [shape: f32[1,64], index: 4, kind: input, shape index: {}]   ;;  %s4545_s5 = inlined_call_operand.vmem [shape: bf16[128,64], index: 5, kind: output, shape index: {}]  }
   0x1   :  { %v3315_v0 = vld [vmem:[%s4540_s3 + $0x40] sm:$0xff]   ;;  %v3317_v2 = vld [vmem:[%s4540_s3 + $0x48] sm:$0xff]   ;;  %v3319_v4 = vld [vmem:[%s4540_s3 + $0x50] sm:$0xff]  }
   0x2   :  { %v3316_v1 = vld [vmem:[%s4540_s3] sm:$0xff]   ;;  %2767 = vmatprep.subr.bf16.mxu0 %v3315_v0  ;;  %3235 = vmatprep.subr.bf16.mxu1 %v3315_v0  ;;  %v3318_v3 = vld [vmem:[%s4540_s3 + $0x8] sm:$0xff]   ;;  %v3320_v5 = vld [vmem:[%s4540_s3 + $0x10] sm:$0xff]  }
   0x3   :  { %2768 = vmatpush3.bf16.msra.mxu0 %v3316_v1  ;;  %3243 = vmatpush3.bf16.msra.mxu1 %v3316_v1  ;;  %v3321_v6 = vld [vmem:[%s4540_s3 + $0x58] sm:$0xff]   ;;  %v3323_v8 = vld [vmem:[%s4540_s3 + $0x60] sm:$0xff]   ;;  %v3325_v10 = vld [vmem:[%s4540_s3 + $0x68] sm:$0xff]  }
   0x4   :  { %2769 = vmatprep.subr.bf16.mxu0 %v3317_v2  ;;  %3236 = vmatprep.subr.bf16.mxu1 %v3317_v2  ;;  %v3322_v7 = vld [vmem:[%s4540_s3 + $0x18] sm:$0xff]   ;;  %v3324_v9 = vld [vmem:[%s4540_s3 + $0x20] sm:$0xff]   ;;  %v3326_v13 = vld [vmem:[%s4540_s3 + $0x28] sm:$0xff]  }
   0x5   :  { %v3333_v11 = vld [vmem:[%s4541_s1 + $0x4] ss:$36 sps:$4 sm:$0xff]   ;;  %v3327_v14 = vld [vmem:[%s4540_s3 + $0x70] sm:$0xff]   ;;  %v3329_v16 = vld [vmem:[%s4540_s3 + $0x78] sm:$0xff]  }
   0x6   :  { %v3336_v12 = vld [vmem:[%s4541_s1 + $0x124] ss:$36 sps:$4 sm:$0xff]   ;;  %1197 = vmatprep.mubr.bf16.mxu0 %v3333_v11  ;;  %v3328_v15 = vld [vmem:[%s4540_s3 + $0x30] sm:$0xff]   ;;  %v3330_v17 = vld [vmem:[%s4540_s3 + $0x38] sm:$0xff]  }
   0x7   :  { %2770 = vmatpush3.bf16.msra.mxu0 %v3318_v3  ;;  %3244 = vmatpush3.bf16.msra.mxu1 %v3318_v3  ;;  %v3331_v18 = vld [vmem:[%s4541_s1] ss:$36 sps:$4 sm:$0xff]   ;;  %v3341_v24 = vld [vmem:[%s4540_s3 + $0xc8] sm:$0xff]   ;;  %v3351_v30 = vld [vmem:[%s4540_s3 + $0xd0] sm:$0xff]  }
   0x8   :  { %2771 = vmatprep.subr.bf16.mxu0 %v3319_v4  ;;  %3237 = vmatprep.subr.bf16.mxu1 %v3319_v4  ;;  %v3334_v19 = vld [vmem:[%s4541_s1 + $0x120] ss:$36 sps:$4 sm:$0xff]   ;;  %v3342_v25 = vld [vmem:[%s4540_s3 + $0x148] sm:$0xff]   ;;  %v3352_v32 = vld [vmem:[%s4540_s3 + $0x150] sm:$0xff]  }
   0x9   :  { %1229 = vmatprep.mubr.bf16.mxu1 %v3336_v12  ;;  %v3337_v20 = vld [vmem:[%s4540_s3 + $0xc0] sm:$0xff]   ;;  %v3345_v26 = vld [vmem:[%s4541_s1 + $0x4c] ss:$36 sps:$4 sm:$0xff]   ;;  %v3355_v36 = vld [vmem:[%s4540_s3 + $0xd8] sm:$0xff]  }
   0xa   :  { %v3338_v21 = vld [vmem:[%s4540_s3 + $0x140] sm:$0xff]   ;;  %v3343_v27 = vld [vmem:[%s4540_s3 + $0x88] sm:$0xff]   ;;  %v3353_v34 = vld [vmem:[%s4540_s3 + $0x90] sm:$0xff]  }
   0xb   :  { %2772 = vmatpush3.bf16.msra.mxu0 %v3320_v5  ;;  %3245 = vmatpush3.bf16.msra.mxu1 %v3320_v5  ;;  %v3339_v22 = vld [vmem:[%s4540_s3 + $0x80] sm:$0xff]   ;;  %v3347_v28 = vld [vmem:[%s4541_s1 + $0x16c] ss:$36 sps:$4 sm:$0xff]   ;;  %v3356_v37 = vld [vmem:[%s4540_s3 + $0x158] sm:$0xff]  }
   0xc   :  { %2773 = vmatprep.subr.bf16.mxu0 %v3321_v6  ;;  %3238 = vmatprep.subr.bf16.mxu1 %v3321_v6  ;;  %v3340_v23 = vld [vmem:[%s4540_s3 + $0x100] sm:$0xff]   ;;  %v3344_v29 = vld [vmem:[%s4540_s3 + $0x108] sm:$0xff]   ;;  %v3354_v35 = vld [vmem:[%s4540_s3 + $0x110] sm:$0xff]  }
   0xd   :  { %v3349_v31 = vld [vmem:[%s4541_s1 + $0x48] ss:$36 sps:$4 sm:$0xff]   ;;  %v3359_v38 = vld [vmem:[%s4541_s1 + $0x94] ss:$36 sps:$4 sm:$0xff]   ;;  %v3365_v42 = vld [vmem:[%s4540_s3 + $0xe0] sm:$0xff]  }
   0xe   :  { %v3350_v33 = vld [vmem:[%s4541_s1 + $0x168] ss:$36 sps:$4 sm:$0xff]   ;;  %v3357_v39 = vld [vmem:[%s4540_s3 + $0x98] sm:$0xff]   ;;  %v3363_v43 = vld [vmem:[%s4541_s1 + $0x90] ss:$36 sps:$4 sm:$0xff]  }
   0xf   :  { %2774 = vmatpush3.bf16.msra.mxu0 %v3322_v7  ;;  %3246 = vmatpush3.bf16.msra.mxu1 %v3322_v7  ;;  %v3361_v40 = vld [vmem:[%s4541_s1 + $0x1b4] ss:$36 sps:$4 sm:$0xff]   ;;  %v3366_v45 = vld [vmem:[%s4540_s3 + $0x160] sm:$0xff]   ;;  %v3369_v48 = vld [vmem:[%s4540_s3 + $0xe8] sm:$0xff]  }
  0x10   :  { %2775 = vmatprep.subr.bf16.mxu0 %v3323_v8  ;;  %3239 = vmatprep.subr.bf16.mxu1 %v3323_v8  ;;  %v3358_v41 = vld [vmem:[%s4540_s3 + $0x118] sm:$0xff]   ;;  %v3364_v44 = vld [vmem:[%s4541_s1 + $0x1b0] ss:$36 sps:$4 sm:$0xff]   ;;  %v3367_v46 = vld [vmem:[%s4540_s3 + $0xa0] sm:$0xff]  }
  0x11   :  { %v3368_v47 = vld [vmem:[%s4540_s3 + $0x120] sm:$0xff]   ;;  %v3370_v49 = vld [vmem:[%s4540_s3 + $0x168] sm:$0xff]   ;;  %v3379_v54 = vld [vmem:[%s4540_s3 + $0xf0] sm:$0xff]  }
  0x12   :  { %v3373_v50 = vld [vmem:[%s4541_s1 + $0xdc] ss:$36 sps:$4 sm:$0xff]   ;;  %v3371_v52 = vld [vmem:[%s4540_s3 + $0xa8] sm:$0xff]   ;;  %v3380_v57 = vld [vmem:[%s4540_s3 + $0x170] sm:$0xff]  }
  0x13   :  { %2776 = vmatpush3.bf16.msra.mxu0 %v3324_v9  ;;  %3247 = vmatpush3.bf16.msra.mxu1 %v3324_v9  ;;  %v3375_v51 = vld [vmem:[%s4541_s1 + $0x1fc] ss:$36 sps:$4 sm:$0xff]   ;;  %v3372_v53 = vld [vmem:[%s4540_s3 + $0x128] sm:$0xff]   ;;  %v3381_v58 = vld [vmem:[%s4540_s3 + $0xb0] sm:$0xff]  }
  0x14   :  { %2777 = vmatprep.subr.bf16.mxu0 %v3325_v10  ;;  %3240 = vmatprep.subr.bf16.mxu1 %v3325_v10  ;;  %v3377_v55 = vld [vmem:[%s4541_s1 + $0xd8] ss:$36 sps:$4 sm:$0xff]   ;;  %v3382_v59 = vld [vmem:[%s4540_s3 + $0x130] sm:$0xff]   ;;  %v3387_v1 = vld [vmem:[%s4541_s1 + $0x8] ss:$36 sps:$4 sm:$0xff]  }
  0x15   :  { %v3378_v56 = vld [vmem:[%s4541_s1 + $0x1f8] ss:$36 sps:$4 sm:$0xff]   ;;  %v3389_v0 = vld [vmem:[%s4541_s1 + $0xc] ss:$36 sps:$4 sm:$0xff]   ;;  %v3393_v4 = vld [vmem:[%s4540_s3 + $0x1c0] sm:$0xff]  }
  0x16   :  { %v3383_v60 = vld [vmem:[%s4540_s3 + $0xf8] sm:$0xff]   ;;  %v3390_v2 = vld [vmem:[%s4541_s1 + $0x10] ss:$36 sps:$4 sm:$0xff]   ;;  %v3394_v5 = vld [vmem:[%s4540_s3 + $0x180] sm:$0xff]  }
  0x17   :  { %2778 = vmatpush3.bf16.msra.mxu0 %v3326_v13  ;;  %3248 = vmatpush3.bf16.msra.mxu1 %v3326_v13  ;;  %v3384_v61 = vld [vmem:[%s4540_s3 + $0x178] sm:$0xff]   ;;  %v3395_v6 = vld [vmem:[%s4540_s3 + $0x200] sm:$0xff]   ;;  %v3402_v9 = vld [vmem:[%s4540_s3 + $0x1c8] sm:$0xff]  }
  0x18   :  { %2779 = vmatprep.subr.bf16.mxu0 %v3327_v14  ;;  %3241 = vmatprep.subr.bf16.mxu1 %v3327_v14  ;;  %v3385_v62 = vld [vmem:[%s4540_s3 + $0xb8] sm:$0xff]   ;;  %v3400_v10 = vld [vmem:[%s4541_s1 + $0x50] ss:$36 sps:$4 sm:$0xff]   ;;  %v3403_v12 = vld [vmem:[%s4540_s3 + $0x188] sm:$0xff]  }
  0x19   :  { %v3386_v63 = vld [vmem:[%s4540_s3 + $0x138] sm:$0xff]   ;;  %v3404_v13 = vld [vmem:[%s4540_s3 + $0x208] sm:$0xff]  }
  0x1a   :  { %v3392_v3 = vld [vmem:[%s4541_s1 + $0x14] ss:$36 sps:$4 sm:$0xff]   ;;  %v3398_v8 = vld [vmem:[%s4541_s1 + $0x5c] ss:$36 sps:$4 sm:$0xff]  }
  0x1b   :  { %2780 = vmatpush3.bf16.msra.mxu0 %v3328_v15  ;;  %3249 = vmatpush3.bf16.msra.mxu1 %v3328_v15  ;;  %v3396_v7 = vld [vmem:[%s4541_s1 + $0x54] ss:$36 sps:$4 sm:$0xff]   ;;  %v3405_v14 = vld [vmem:[%s4541_s1 + $0x9c] ss:$36 sps:$4 sm:$0xff]   ;;  %v3407_v15 = vld [vmem:[%s4541_s1 + $0xa4] ss:$36 sps:$4 sm:$0xff]  }
  0x1c   :  { %2781 = vmatprep.subr.bf16.mxu0 %v3329_v16  ;;  %3242 = vmatprep.subr.bf16.mxu1 %v3329_v16  ;;  %v3401_v11 = vld [vmem:[%s4541_s1 + $0x58] ss:$36 sps:$4 sm:$0xff]   ;;  %v3411_v16 = vld [vmem:[%s4540_s3 + $0x1d0] sm:$0xff]  }
  0x1f   :  { %2782 = vmatpush3.bf16.msra.mxu0 %v3330_v17  ;;  %3250 = vmatpush3.bf16.msra.mxu1 %v3330_v17  ;;  %v3412_v17 = vld [vmem:[%s4540_s3 + $0x190] sm:$0xff]  }
  0x20   :  { %2831 = vmatprep.subr.bf16.mxu1 %v3337_v20  ;;  %2895 = vmatprep.subr.bf16.mxu0 %v3338_v21  ;;  %v3410_v20 = vld [vmem:[%s4541_s1 + $0xa0] ss:$36 sps:$4 sm:$0xff]  }
  0x21   :  { %v3414_v21 = vld [vmem:[%s4541_s1 + $0xe4] ss:$36 sps:$4 sm:$0xff]  }
  0x22   :  { %1198 = vmatmul.mubr.bf16.vlgmr.msra.gmra.mrb[0].mxu0 %v3331_v18  ;;  %1230 = vmatmul.mubr.bf16.vlgmr.msra.gmra.mrb[0].mxu1 %v3334_v19  ;;  %v3413_v18 = vld [vmem:[%s4540_s3 + $0x210] sm:$0xff]   ;;  %v3409_v19 = vld [vmem:[%s4541_s1 + $0x98] ss:$36 sps:$4 sm:$0xff]  }
  0x23   :  { %2832 = vmatpush3.bf16.msra.mxu1 %v3339_v22  ;;  %2896 = vmatpush3.bf16.msra.mxu0 %v3340_v23  ;;  %v3416_v22 = vld [vmem:[%s4541_s1 + $0xec] ss:$36 sps:$4 sm:$0xff]   ;;  %v3420_v23 = vld [vmem:[%s4540_s3 + $0x1d8] sm:$0xff]  }
  0x24   :  { %2833 = vmatprep.subr.bf16.mxu1 %v3341_v24  ;;  %2897 = vmatprep.subr.bf16.mxu0 %v3342_v25  ;;  %v3421_v24 = vld [vmem:[%s4540_s3 + $0x198] sm:$0xff]  }
  0x25   :  { %1205 = vmatprep.mubr.bf16.mxu0 %v3345_v26  ;;  %1237 = vmatprep.mubr.bf16.mxu1 %v3347_v28  ;;  %v3422_v25 = vld [vmem:[%s4540_s3 + $0x218] sm:$0xff]   ;;  %v3418_v26 = vld [vmem:[%s4541_s1 + $0xe0] ss:$36 sps:$4 sm:$0xff]  }
  0x26   :  { %v3429_v28 = vld [vmem:[%s4540_s3 + $0x1e0] sm:$0xff]  }
  0x27   :  { %2834 = vmatpush3.bf16.msra.mxu1 %v3343_v27  ;;  %2898 = vmatpush3.bf16.msra.mxu0 %v3344_v29  ;;  %v3419_v27 = vld [vmem:[%s4541_s1 + $0xe8] ss:$36 sps:$4 sm:$0xff]  }
  0x28   :  { %2835 = vmatprep.subr.bf16.mxu1 %v3351_v30  ;;  %2899 = vmatprep.subr.bf16.mxu0 %v3352_v32  ;;  %v3423_v29 = vld [vmem:[%s4541_s1 + $0x12c] ss:$36 sps:$4 sm:$0xff]   ;;  %v3430_v30 = vld [vmem:[%s4540_s3 + $0x1a0] sm:$0xff]   ;;  %v3425_v32 = vld [vmem:[%s4541_s1 + $0x134] ss:$36 sps:$4 sm:$0xff]  }
  0x2a   :  { %1206 = vmatmul.mubr.bf16.gmra.mrb[4].mxu0 %v3349_v31  ;;  %1238 = vmatmul.mubr.bf16.gmra.mrb[4].mxu1 %v3350_v33  ;;  %v3431_v31 = vld [vmem:[%s4540_s3 + $0x220] sm:$0xff]   ;;  %v3438_v33 = vld [vmem:[%s4540_s3 + $0x1e8] sm:$0xff]  }
  0x2b   :  { %2836 = vmatpush3.bf16.msra.mxu1 %v3353_v34  ;;  %2900 = vmatpush3.bf16.msra.mxu0 %v3354_v35  ;;  %v3439_v34 = vld [vmem:[%s4540_s3 + $0x1a8] sm:$0xff]  }
  0x2c   :  { %2837 = vmatprep.subr.bf16.mxu1 %v3355_v36  ;;  %2901 = vmatprep.subr.bf16.mxu0 %v3356_v37  ;;  %v3440_v35 = vld [vmem:[%s4540_s3 + $0x228] sm:$0xff]   ;;  %v3428_v37 = vld [vmem:[%s4541_s1 + $0x130] ss:$36 sps:$4 sm:$0xff]  }
  0x2d   :  { %1213 = vmatprep.mubr.bf16.mxu0 %v3359_v38  ;;  %1245 = vmatprep.mubr.bf16.mxu1 %v3361_v40  ;;  %v3427_v36 = vld [vmem:[%s4541_s1 + $0x128] ss:$36 sps:$4 sm:$0xff]   ;;  %v3432_v38 = vld [vmem:[%s4541_s1 + $0x174] ss:$36 sps:$4 sm:$0xff]  }
  0x2e   :  { %v3447_v40 = vld [vmem:[%s4540_s3 + $0x1f0] sm:$0xff]  }
  0x2f   :  { %2838 = vmatpush3.bf16.msra.mxu1 %v3357_v39  ;;  %2902 = vmatpush3.bf16.msra.mxu0 %v3358_v41  ;;  %v3434_v39 = vld [vmem:[%s4541_s1 + $0x17c] ss:$36 sps:$4 sm:$0xff]   ;;  %v3448_v41 = vld [vmem:[%s4540_s3 + $0x1b0] sm:$0xff]  }
  0x30   :  { %2839 = vmatprep.subr.bf16.mxu1 %v3365_v42  ;;  %2903 = vmatprep.subr.bf16.mxu0 %v3366_v45  ;;  %v3449_v42 = vld [vmem:[%s4540_s3 + $0x230] sm:$0xff]   ;;  %v3441_v45 = vld [vmem:[%s4541_s1 + $0x1bc] ss:$36 sps:$4 sm:$0xff]  }
  0x32   :  { %1214 = vmatmul.mubr.bf16.gmra.mrb[8].mxu0 %v3363_v43  ;;  %1246 = vmatmul.mubr.bf16.gmra.mrb[8].mxu1 %v3364_v44  ;;  %v3436_v43 = vld [vmem:[%s4541_s1 + $0x170] ss:$36 sps:$4 sm:$0xff]   ;;  %v3437_v44 = vld [vmem:[%s4541_s1 + $0x178] ss:$36 sps:$4 sm:$0xff]  }
  0x33   :  { %2840 = vmatpush3.bf16.msra.mxu1 %v3367_v46  ;;  %2904 = vmatpush3.bf16.msra.mxu0 %v3368_v47  ;;  %v3443_v46 = vld [vmem:[%s4541_s1 + $0x1c4] ss:$36 sps:$4 sm:$0xff]   ;;  %v3456_v47 = vld [vmem:[%s4540_s3 + $0x1f8] sm:$0xff]  }
  0x34   :  { %2841 = vmatprep.subr.bf16.mxu1 %v3369_v48  ;;  %2905 = vmatprep.subr.bf16.mxu0 %v3370_v49  ;;  %v3457_v48 = vld [vmem:[%s4540_s3 + $0x1b8] sm:$0xff]  }
  0x35   :  { %1221 = vmatprep.mubr.bf16.mxu0 %v3373_v50  ;;  %1253 = vmatprep.mubr.bf16.mxu1 %v3375_v51  ;;  %v3458_v49 = vld [vmem:[%s4540_s3 + $0x238] sm:$0xff]   ;;  %v3446_v51 = vld [vmem:[%s4541_s1 + $0x1c0] ss:$36 sps:$4 sm:$0xff]  }
  0x36   :  { %v3445_v50 = vld [vmem:[%s4541_s1 + $0x1b8] ss:$36 sps:$4 sm:$0xff]  }
  0x37   :  { %2842 = vmatpush3.bf16.msra.mxu1 %v3371_v52  ;;  %2906 = vmatpush3.bf16.msra.mxu0 %v3372_v53  ;;  %v3464_v52 = vld [vmem:[%s4542_s2 + $0x40] sm:$0xff]  }
  0x38   :  { %2843 = vmatprep.subr.bf16.mxu1 %v3379_v54  ;;  %2907 = vmatprep.subr.bf16.mxu0 %v3380_v57  ;;  %v3465_v53 = vld [vmem:[%s4542_s2 + $0xc0] sm:$0xff]   ;;  %v3455_v57 = vld [vmem:[%s4541_s1 + $0x208] ss:$36 sps:$4 sm:$0xff]  }
  0x39   :  { %v3450_v54 = vld [vmem:[%s4541_s1 + $0x204] ss:$36 sps:$4 sm:$0xff]  }
  0x3a   :  { %1222 = vmatmul.mubr.bf16.gmra.mrb[12].mxu0 %v3377_v55  ;;  %1254 = vmatmul.mubr.bf16.gmra.mrb[12].mxu1 %v3378_v56  ;;  %v3452_v55 = vld [vmem:[%s4541_s1 + $0x20c] ss:$36 sps:$4 sm:$0xff]   ;;  %v3454_v56 = vld [vmem:[%s4541_s1 + $0x200] ss:$36 sps:$4 sm:$0xff]  }
  0x3b   :  { %2844 = vmatpush3.bf16.msra.mxu1 %v3381_v58  ;;  %2908 = vmatpush3.bf16.msra.mxu0 %v3382_v59  ;;  %v3461_v58 = vld [vmem:[%s4541_s1 + $0x1c] ss:$36 sps:$4 sm:$0xff]  }
  0x3c   :  { %2845 = vmatprep.subr.bf16.mxu1 %v3383_v60  ;;  %2909 = vmatprep.subr.bf16.mxu0 %v3384_v61  ;;  %v3462_v59 = vld [vmem:[%s4541_s1 + $0x20] ss:$36 sps:$4 sm:$0xff]   ;;  %v3459_v60 = vld [vmem:[%s4541_s1 + $0x18] ss:$36 sps:$4 sm:$0xff]   ;;  %v3463_v61 = vld [vmem:[%s4541_s1 + $0x68] ss:$36 sps:$4 sm:$0xff]  }
  0x3d   :  { %1294 = vmatprep.mubr.bf16.mxu1 %v3389_v0  ;;  %1391 = vmatprep.mubr.bf16.mxu0 %v3392_v3  ;;  %v3468_v0 = vld [vmem:[%s4542_s2 + $0xc8] sm:$0xff]  }
  0x3e   :  { %v3469_v3 = vld [vmem:[%s4542_s2 + $0x88] sm:$0xff]  }
  0x3f   :  { %2846 = vmatpush3.bf16.msra.mxu1 %v3385_v62  ;;  %2910 = vmatpush3.bf16.msra.mxu0 %v3386_v63  ;;  %v3466_v62 = vld [vmem:[%s4542_s2] sm:$0xff]  }
  0x40   :  { %2959 = vmatprep.subr.bf16.mxu1 %v3393_v4  ;;  %3179 = vmatprep.subr.bf16.mxu0 %v3395_v6  ;;  %v3467_v63 = vld [vmem:[%s4542_s2 + $0x80] sm:$0xff]   ;;  %v3475_v4 = vld [vmem:[%s4542_s2 + $0x48] sm:$0xff]  }
  0x42   :  { %1295 = vmatmul.mubr.bf16.vlgmr.msra.gmra.mrb[16].mxu1 %v3387_v1  ;;  %1392 = vmatmul.mubr.bf16.vlgmr.msra.gmra.mrb[16].mxu0 %v3390_v2  ;;  %v3470_v1 = vld [vmem:[%s4541_s1 + $0x64] ss:$36 sps:$4 sm:$0xff]   ;;  %v3472_v2 = vld [vmem:[%s4541_s1 + $0xb0] ss:$36 sps:$4 sm:$0xff]  }
  0x43   :  { %2960 = vmatpush3.bf16.msra.mxu1 %v3394_v5  ;;  %1302 = vmatprep.mubr.bf16.mxu1 %v3396_v7  ;;  %v3476_v5 = vld [vmem:[%s4542_s2 + $0xd0] sm:$0xff]   ;;  %v3473_v7 = vld [vmem:[%s4541_s1 + $0x60] ss:$36 sps:$4 sm:$0xff]  }
  0x44   :  { %1399 = vmatprep.mubr.bf16.mxu0 %v3398_v8  ;;  %3180 = vmatpush3.bf16.msra.mxu0 %v3395_v6  ;;  %v3477_v6 = vld [vmem:[%s4542_s2 + $0x8] sm:$0xff]   ;;  %v3474_v8 = vld [vmem:[%s4541_s1 + $0xf8] ss:$36 sps:$4 sm:$0xff]  }
  0x45   :  { %2961 = vmatprep.subr.bf16.mxu1 %v3402_v9  ;;  %3181 = vmatprep.subr.bf16.mxu0 %v3404_v13  ;;  %v3486_v9 = vld [vmem:[%s4542_s2 + $0x50] sm:$0xff]  }
  0x47   :  { %2962 = vmatpush3.bf16.msra.mxu1 %v3403_v12  ;;  %v3481_v12 = vld [vmem:[%s4541_s1 + $0xac] ss:$36 sps:$4 sm:$0xff]  }
  0x48   :  { %3182 = vmatpush3.bf16.msra.mxu0 %v3404_v13  ;;  %2963 = vmatprep.subr.bf16.mxu1 %v3411_v16  ;;  %v3483_v13 = vld [vmem:[%s4541_s1 + $0x140] ss:$36 sps:$4 sm:$0xff]   ;;  %v3480_v16 = vld [vmem:[%s4542_s2 + $0x98] sm:$0xff]  }
  0x49   :  { %3183 = vmatprep.subr.bf16.mxu0 %v3413_v18 }
  0x4a   :  { %1303 = vmatmul.mubr.bf16.gmra.mrb[20].mxu1 %v3400_v10  ;;  %1400 = vmatmul.mubr.bf16.gmra.mrb[20].mxu0 %v3401_v11  ;;  %v3478_v10 = vld [vmem:[%s4542_s2 + $0x90] sm:$0xff]   ;;  %v3479_v11 = vld [vmem:[%s4542_s2 + $0xd8] sm:$0xff]  }
  0x4b   :  { %1310 = vmatprep.mubr.bf16.mxu1 %v3405_v14  ;;  %1407 = vmatprep.mubr.bf16.mxu0 %v3407_v15  ;;  %v3488_v14 = vld [vmem:[%s4542_s2 + $0x10] sm:$0xff]   ;;  %v3497_v15 = vld [vmem:[%s4542_s2 + $0x58] sm:$0xff]  }
  0x4c   :  { %2964 = vmatpush3.bf16.msra.mxu1 %v3412_v17  ;;  %3184 = vmatpush3.bf16.msra.mxu0 %v3413_v18  ;;  %v3484_v17 = vld [vmem:[%s4541_s1 + $0xa8] ss:$36 sps:$4 sm:$0xff]   ;;  %v3487_v18 = vld [vmem:[%s4542_s2 + $0xe0] sm:$0xff]  }
  0x4d   :  { %2965 = vmatprep.subr.bf16.mxu1 %v3420_v23  ;;  %3185 = vmatprep.subr.bf16.mxu0 %v3422_v25  ;;  %v3492_v23 = vld [vmem:[%s4541_s1 + $0xf4] ss:$36 sps:$4 sm:$0xff]  }
  0x50   :  { %2966 = vmatpush3.bf16.msra.mxu1 %v3421_v24  ;;  %3186 = vmatpush3.bf16.msra.mxu0 %v3422_v25  ;;  %v3494_v24 = vld [vmem:[%s4541_s1 + $0x1d0] ss:$36 sps:$4 sm:$0xff]   ;;  %v3509_v25 = vld [vmem:[%s4542_s2 + $0x60] sm:$0xff]  }
  0x51   :  { %2967 = vmatprep.subr.bf16.mxu1 %v3429_v28  ;;  %3187 = vmatprep.subr.bf16.mxu0 %v3431_v31  ;;  %v3495_v28 = vld [vmem:[%s4541_s1 + $0xf0] ss:$36 sps:$4 sm:$0xff]  }
  0x52   :  { %1311 = vmatmul.mubr.bf16.gmra.mrb[24].mxu1 %v3409_v19  ;;  %1408 = vmatmul.mubr.bf16.gmra.mrb[24].mxu0 %v3410_v20  ;;  %v3499_v19 = vld [vmem:[%s4542_s2 + $0x18] sm:$0xff]   ;;  %v3485_v20 = vld [vmem:[%s4541_s1 + $0x188] ss:$36 sps:$4 sm:$0xff]  }
  0x53   :  { %1318 = vmatprep.mubr.bf16.mxu1 %v3414_v21  ;;  %1415 = vmatprep.mubr.bf16.mxu0 %v3416_v22  ;;  %v3489_v21 = vld [vmem:[%s4542_s2 + $0xa0] sm:$0xff]   ;;  %v3490_v22 = vld [vmem:[%s4542_s2 + $0xe8] sm:$0xff]  }
  0x54   :  { %2968 = vmatpush3.bf16.msra.mxu1 %v3430_v30  ;;  %3188 = vmatpush3.bf16.msra.mxu0 %v3431_v31  ;;  %v3498_v30 = vld [vmem:[%s4542_s2 + $0xf0] sm:$0xff]  }
  0x55   :  { %2969 = vmatprep.subr.bf16.mxu1 %v3438_v33  ;;  %3189 = vmatprep.subr.bf16.mxu0 %v3440_v35  ;;  %v3500_v31 = vld [vmem:[%s4542_s2 + $0xb0] sm:$0xff]   ;;  %v3517_v33 = vld [vmem:[%s4542_s2 + $0x68] sm:$0xff]  }
  0x58   :  { %2970 = vmatpush3.bf16.msra.mxu1 %v3439_v34  ;;  %3190 = vmatpush3.bf16.msra.mxu0 %v3440_v35  ;;  %v3503_v34 = vld [vmem:[%s4541_s1 + $0x13c] ss:$36 sps:$4 sm:$0xff]  }
  0x59   :  { %2971 = vmatprep.subr.bf16.mxu1 %v3447_v40  ;;  %3191 = vmatprep.subr.bf16.mxu0 %v3449_v42  ;;  %v3507_v35 = vld [vmem:[%s4543_s0 + $0xc] ss:$20 sps:$4 sm:$0xff]  }
  0x5a   :  { %1319 = vmatmul.mubr.bf16.gmra.mrb[28].mxu1 %v3418_v26  ;;  %1416 = vmatmul.mubr.bf16.gmra.mrb[28].mxu0 %v3419_v27  ;;  %v3510_v26 = vld [vmem:[%s4542_s2 + $0x20] sm:$0xff]   ;;  %v3491_v27 = vld [vmem:[%s4542_s2 + $0xa8] sm:$0xff]  }
  0x5b   :  { %1326 = vmatprep.mubr.bf16.mxu1 %v3423_v29  ;;  %1423 = vmatprep.mubr.bf16.mxu0 %v3425_v32  ;;  %v3496_v29 = vld [vmem:[%s4541_s1 + $0x218] ss:$36 sps:$4 sm:$0xff]   ;;  %v3511_v40 = vld [vmem:[%s4542_s2 + $0x100] sm:$0xff]  }
  0x5c   :  { %2972 = vmatpush3.bf16.msra.mxu1 %v3448_v41  ;;  %3192 = vmatpush3.bf16.msra.mxu0 %v3449_v42  ;;  %v3501_v32 = vld [vmem:[%s4542_s2 + $0xf8] sm:$0xff]   ;;  %v3527_v41 = vld [vmem:[%s4542_s2 + $0x30] sm:$0xff]  }
  0x5d   :  { %2973 = vmatprep.subr.bf16.mxu1 %v3456_v47  ;;  %3193 = vmatprep.subr.bf16.mxu0 %v3458_v49  ;;  %v3508_v42 = vld [vmem:[%s4541_s1 + $0x138] ss:$36 sps:$4 sm:$0xff]  }
  0x5e   :  { %v3536_v47 = vld [vmem:[%s4542_s2 + $0x38] sm:$0xff]  }
  0x60   :  { %2974 = vmatpush3.bf16.msra.mxu1 %v3457_v48  ;;  %3194 = vmatpush3.bf16.msra.mxu0 %v3458_v49  ;;  %v3516_v48 = vld [vmem:[%s4541_s1 + $0x180] ss:$36 sps:$4 sm:$0xff]   ;;  %v3543_v49 = vld [vmem:[%s4542_s2 + $0x110] sm:$0xff]  }
  0x61   :  { %3039 = vmatprep.subr.bf16.mxu1 %v3464_v52  ;;  %3103 = vmatprep.subr.bf16.mxu0 %v3465_v53  ;;  %v3522_v52 = vld [vmem:[%s4543_s0 + $0x5c] ss:$20 sps:$4 sm:$0xff]  }
  0x62   :  { %1327 = vmatmul.mubr.bf16.gmra.mrb[32].mxu1 %v3427_v36  ;;  %1424 = vmatmul.mubr.bf16.gmra.mrb[32].mxu0 %v3428_v37  ;;  %v3519_v36 = vld [vmem:[%s4542_s2 + $0x28] sm:$0xff]   ;;  %v3525_v37 = vld [vmem:[%s4542_s2 + $0x70] sm:$0xff]   ;;  %v3556_v53 = vld [vmem:[%s4542_s2 + $0x118] sm:$0xff]  }
  0x63   :  { %1334 = vmatprep.mubr.bf16.mxu1 %v3432_v38  ;;  %1431 = vmatprep.mubr.bf16.mxu0 %v3434_v39  ;;  %v3502_v38 = vld [vmem:[%s4542_s2 + $0xb8] sm:$0xff]  }
  0x64   :  { %v3505_v39 = vld [vmem:[%s4543_s0 + $0x8] ss:$20 sps:$4 sm:$0xff]  }
  0x6a   :  { %1335 = vmatmul.mubr.bf16.gmra.mrb[36].mxu1 %v3436_v43  ;;  %1432 = vmatmul.mubr.bf16.gmra.mrb[36].mxu0 %v3437_v44  ;;  %v3512_v43 = vld [vmem:[%s4541_s1 + $0x184] ss:$36 sps:$4 sm:$0xff]  }
  0x6b   :  { %1342 = vmatprep.mubr.bf16.mxu1 %v3441_v45  ;;  %1439 = vmatprep.mubr.bf16.mxu0 %v3443_v46  ;;  %v3514_v44 = vld [vmem:[%s4543_s0 + $0x34] ss:$20 sps:$4 sm:$0xff]   ;;  %v3534_v46 = vld [vmem:[%s4542_s2 + $0x78] sm:$0xff]  }
  0x6c   :  { %v3528_v45 = vld [vmem:[%s4542_s2 + $0x108] sm:$0xff]  }
  0x72   :  { %1343 = vmatmul.mubr.bf16.gmra.mrb[40].mxu1 %v3445_v50  ;;  %1440 = vmatmul.mubr.bf16.gmra.mrb[40].mxu0 %v3446_v51  ;;  %v3518_v50 = vld [vmem:[%s4543_s0 + $0x30] ss:$20 sps:$4 sm:$0xff]  }
  0x73   :  { %1350 = vmatprep.mubr.bf16.mxu1 %v3450_v54  ;;  %1447 = vmatprep.mubr.bf16.mxu0 %v3452_v55  ;;  %v3520_v51 = vld [vmem:[%s4541_s1 + $0x1cc] ss:$36 sps:$4 sm:$0xff]  }
  0x74   :  { %v3524_v54 = vld [vmem:[%s4541_s1 + $0x1c8] ss:$36 sps:$4 sm:$0xff]  }
  0x75   :  { %v3526_v55 = vld [vmem:[%s4543_s0 + $0x58] ss:$20 sps:$4 sm:$0xff]  }
  0x7a   :  { %1351 = vmatmul.mubr.bf16.gmra.mrb[44].mxu1 %v3454_v56  ;;  %1448 = vmatmul.mubr.bf16.gmra.mrb[44].mxu0 %v3455_v57  ;;  %v3529_v56 = vld [vmem:[%s4541_s1 + $0x214] ss:$36 sps:$4 sm:$0xff]  }
  0x7b   :  { %1488 = vmatprep.mubr.bf16.mxu1 %v3461_v58  ;;  %3195 = vmatprep.mubr.bf16.mxu0 %v3462_v59  ;;  %v3531_v57 = vld [vmem:[%s4543_s0 + $0x84] ss:$20 sps:$4 sm:$0xff]   ;;  %v3533_v58 = vld [vmem:[%s4541_s1 + $0x210] ss:$36 sps:$4 sm:$0xff]  }
  0x7c   :  { %v3535_v59 = vld [vmem:[%s4543_s0 + $0x80] ss:$20 sps:$4 sm:$0xff]  }
  0x82   :  { %1489 = vmatmul.mubr.bf16.vlgmr.msra.gmra.mrb[48].mxu1 %v3459_v60  ;;  %3196 = vmatmul.mubr.bf16.vlgmr.msra.gmra.mrb[48].mxu0 %v3463_v61  ;;  %v3539_v60 = vld [vmem:[%s4543_s0 + $0x4] ss:$20 sps:$4 sm:$0xff]   ;;  %v3540_v61 = vld [vmem:[%s4543_s0 + $0xac] ss:$20 sps:$4 sm:$0xff]  }
  0x83   :  { %3040 = vmatpush3.bf16.msra.mxu1 %v3466_v62  ;;  %3104 = vmatpush3.bf16.msra.mxu0 %v3467_v63  ;;  %v3537_v62 = vld [vmem:[%s4543_s0] ss:$20 sps:$4 sm:$0xff]   ;;  %v3542_v63 = vld [vmem:[%s4543_s0 + $0xa8] ss:$20 sps:$4 sm:$0xff]  }
  0x84   :  { %3105 = vmatprep.subr.bf16.mxu0 %v3468_v0  ;;  %1496 = vmatprep.mubr.bf16.mxu1 %v3470_v1  ;;  %v3544_v0 = vld [vmem:[%s4543_s0 + $0x2c] ss:$20 sps:$4 sm:$0xff]   ;;  %v3546_v1 = vld [vmem:[%s4543_s0 + $0xd4] ss:$20 sps:$4 sm:$0xff]  }
  0x85   :  { %3199 = vmatprep.mubr.bf16.mxu0 %v3472_v2  ;;  %3041 = vmatprep.subr.bf16.mxu1 %v3475_v4  ;;  %v3548_v2 = vld [vmem:[%s4543_s0 + $0x28] ss:$20 sps:$4 sm:$0xff]  }
  0x86   :  { %v3550_v4 = vld [vmem:[%s4543_s0 + $0x54] ss:$20 sps:$4 sm:$0xff]  }
  0x87   :  { %3106 = vmatpush3.bf16.msra.mxu0 %v3469_v3  ;;  %3042 = vmatpush3.bf16.msra.mxu1 %v3477_v6  ;;  %v3549_v3 = vld [vmem:[%s4543_s0 + $0xd0] ss:$20 sps:$4 sm:$0xff]  }
  0x88   :  { %3107 = vmatprep.subr.bf16.mxu0 %v3476_v5  ;;  %3043 = vmatprep.subr.bf16.mxu1 %v3486_v9  ;;  %v3552_v5 = vld [vmem:[%s4543_s0 + $0xfc] ss:$20 sps:$4 sm:$0xff]   ;;  %v3559_v9 = vld [vmem:[%s4543_s0 + $0x124] ss:$20 sps:$4 sm:$0xff]  }
  0x89   :  { %v3554_v6 = vld [vmem:[%s4543_s0 + $0x50] ss:$20 sps:$4 sm:$0xff]  }
  0x8a   :  { %1497 = vmatmul.mubr.bf16.gmra.mrb[52].mxu1 %v3473_v7  ;;  %3200 = vmatmul.mubr.bf16.gmra.mrb[52].mxu0 %v3474_v8  ;;  %v3555_v7 = vld [vmem:[%s4543_s0 + $0xf8] ss:$20 sps:$4 sm:$0xff]   ;;  %v3557_v8 = vld [vmem:[%s4543_s0 + $0x7c] ss:$20 sps:$4 sm:$0xff]  }
  0x8b   :  { %3108 = vmatpush3.bf16.msra.mxu0 %v3478_v10  ;;  %1504 = vmatprep.mubr.bf16.mxu1 %v3481_v12  ;;  %v3561_v10 = vld [vmem:[%s4543_s0 + $0x78] ss:$20 sps:$4 sm:$0xff]  }
  0x8c   :  { %3109 = vmatprep.subr.bf16.mxu0 %v3479_v11  ;;  %3203 = vmatprep.mubr.bf16.mxu0 %v3483_v13  ;;  %v3562_v11 = vld [vmem:[%s4543_s0 + $0x120] ss:$20 sps:$4 sm:$0xff]   ;;  %v3563_v12 = vld [vmem:[%s4543_s0 + $0xa4] ss:$20 sps:$4 sm:$0xff]  }
  0x8d   :  { %3044 = vmatpush3.bf16.msra.mxu1 %v3488_v14  ;;  %v3565_v13 = vld [vmem:[%s4543_s0 + $0x10] ss:$20 sps:$4 sm:$0xff]   ;;  %v3566_v14 = vld [vmem:[%s4543_s0 + $0xa0] ss:$20 sps:$4 sm:$0xff]  }
  0x8e   :  { %3045 = vmatprep.subr.bf16.mxu1 %v3497_v15  ;;  %v3567_v15 = vld [vmem:[%s4543_s0 + $0x38] ss:$20 sps:$4 sm:$0xff]  }
  0x8f   :  { %3110 = vmatpush3.bf16.msra.mxu0 %v3480_v16  ;;  %v3568_v16 = vld [vmem:[%s4543_s0 + $0xcc] ss:$20 sps:$4 sm:$0xff]  }
  0x90   :  { %3111 = vmatprep.subr.bf16.mxu0 %v3487_v18  ;;  %v3571_v18 = vld [vmem:[%s4543_s0 + $0xc8] ss:$20 sps:$4 sm:$0xff]  }
  0x91   :  { %3046 = vmatpush3.bf16.msra.mxu1 %v3499_v19  ;;  %v3572_v19 = vld [vmem:[%s4543_s0 + $0x88] ss:$20 sps:$4 sm:$0xff]  }
  0x92   :  { %1505 = vmatmul.mubr.bf16.gmra.mrb[56].mxu1 %v3484_v17  ;;  %3204 = vmatmul.mubr.bf16.gmra.mrb[56].mxu0 %v3485_v20  ;;  %v3570_v17 = vld [vmem:[%s4543_s0 + $0x60] ss:$20 sps:$4 sm:$0xff]  }
  0x93   :  { %3112 = vmatpush3.bf16.msra.mxu0 %v3489_v21  ;;  %1512 = vmatprep.mubr.bf16.mxu1 %v3492_v23  ;;  %v3573_v20 = vld [vmem:[%s4543_s0 + $0xf4] ss:$20 sps:$4 sm:$0xff]   ;;  %v3575_v21 = vld [vmem:[%s4543_s0 + $0xb0] ss:$20 sps:$4 sm:$0xff]   ;;  %v3577_v23 = vld [vmem:[%s4543_s0 + $0xd8] ss:$20 sps:$4 sm:$0xff]  }
  0x94   :  { %3113 = vmatprep.subr.bf16.mxu0 %v3490_v22  ;;  %3207 = vmatprep.mubr.bf16.mxu0 %v3494_v24  ;;  %v3576_v22 = vld [vmem:[%s4543_s0 + $0xf0] ss:$20 sps:$4 sm:$0xff]  }
  0x95   :  { %3047 = vmatprep.subr.bf16.mxu1 %v3509_v25  ;;  %v3578_v24 = vld [vmem:[%s4543_s0 + $0x11c] ss:$20 sps:$4 sm:$0xff]   ;;  %v3580_v25 = vld [vmem:[%s4543_s0 + $0x100] ss:$20 sps:$4 sm:$0xff]  }
  0x96   :  { %3048 = vmatpush3.bf16.msra.mxu1 %v3510_v26 }
  0x97   :  { %3114 = vmatpush3.bf16.msra.mxu0 %v3491_v27  ;;  %3049 = vmatprep.subr.bf16.mxu1 %v3517_v33 }
  0x98   :  { %3115 = vmatprep.subr.bf16.mxu0 %v3498_v30  ;;  %v3581_v30 = vld [vmem:[%s4543_s0 + $0x118] ss:$20 sps:$4 sm:$0xff]  }
  0x9a   :  { %1513 = vmatmul.mubr.bf16.gmra.mrb[60].mxu1 %v3495_v28  ;;  %3208 = vmatmul.mubr.bf16.gmra.mrb[60].mxu0 %v3496_v29 }
  0x9b   :  { %3116 = vmatpush3.bf16.msra.mxu0 %v3500_v31  ;;  %1520 = vmatprep.mubr.bf16.mxu1 %v3503_v34  ;;  %v3582_v31 = vld [vmem:[%s4543_s0 + $0x128] ss:$20 sps:$4 sm:$0xff]  }
  0x9c   :  { %3117 = vmatprep.subr.bf16.mxu0 %v3501_v32  ;;  %2220 = vmatprep.mubr.bf16.mxu0 %v3507_v35 }
  0x9d   :  { %3050 = vmatpush3.bf16.msra.mxu1 %v3519_v36 }
  0x9e   :  { %3051 = vmatprep.subr.bf16.mxu1 %v3525_v37 }
  0x9f   :  { %3118 = vmatpush3.bf16.msra.mxu0 %v3502_v38 }
  0xa0   :  { %3211 = vmatprep.subr.bf16.mxu0 %v3511_v40 }
  0xa1   :  { %3052 = vmatpush3.bf16.msra.mxu1 %v3527_v41 }
  0xa2   :  { %1521 = vmatmul.mubr.bf16.gmra.mrb[64].mxu1 %v3508_v42  ;;  %2221 = vmatmul.mubr.bf16.vlgmr.msra.gmra.mrb[64].mxu0 %v3505_v39 }
  0xa3   :  { %1528 = vmatprep.mubr.bf16.mxu1 %v3512_v43  ;;  %2228 = vmatprep.mubr.bf16.mxu0 %v3514_v44 }
  0xa4   :  { %3212 = vmatpush3.bf16.msra.mxu0 %v3511_v40  ;;  %3053 = vmatprep.subr.bf16.mxu1 %v3534_v46 }
  0xa5   :  { %3213 = vmatprep.subr.bf16.mxu0 %v3528_v45  ;;  %3054 = vmatpush3.bf16.msra.mxu1 %v3536_v47 }
  0xa8   :  { %3214 = vmatpush3.bf16.msra.mxu0 %v3528_v45 }
  0xa9   :  { %3215 = vmatprep.subr.bf16.mxu0 %v3543_v49 }
  0xaa   :  { %1529 = vmatmul.mubr.bf16.gmra.mrb[68].mxu1 %v3516_v48  ;;  %2229 = vmatmul.mubr.bf16.gmra.mrb[68].mxu0 %v3518_v50 }
  0xab   :  { %1536 = vmatprep.mubr.bf16.mxu1 %v3520_v51  ;;  %2236 = vmatprep.mubr.bf16.mxu0 %v3522_v52 }
  0xac   :  { %3216 = vmatpush3.bf16.msra.mxu0 %v3543_v49 }
  0xad   :  { %3217 = vmatprep.subr.bf16.mxu0 %v3556_v53 }
  0xb0   :  { %3218 = vmatpush3.bf16.msra.mxu0 %v3556_v53 }
  0xb2   :  { %1537 = vmatmul.mubr.bf16.gmra.mrb[72].mxu1 %v3524_v54  ;;  %2237 = vmatmul.mubr.bf16.gmra.mrb[72].mxu0 %v3526_v55 }
  0xb3   :  { %1544 = vmatprep.mubr.bf16.mxu1 %v3529_v56  ;;  %2244 = vmatprep.mubr.bf16.mxu0 %v3531_v57 }
  0xba   :  { %1545 = vmatmul.mubr.bf16.gmra.mrb[76].mxu1 %v3533_v58  ;;  %2245 = vmatmul.mubr.bf16.gmra.mrb[76].mxu0 %v3535_v59 }
  0xbb   :  { %2123 = vmatprep.mubr.bf16.mxu1 %v3539_v60  ;;  %2252 = vmatprep.mubr.bf16.mxu0 %v3540_v61 }
  0xc2   :  { %2124 = vmatmul.mubr.bf16.vlgmr.msra.gmra.mrb[80].mxu1 %v3537_v62  ;;  %2253 = vmatmul.mubr.bf16.gmra.mrb[80].mxu0 %v3542_v63 }
  0xc3   :  { %2131 = vmatprep.mubr.bf16.mxu1 %v3544_v0  ;;  %2260 = vmatprep.mubr.bf16.mxu0 %v3546_v1 }
  0xca   :  { %2132 = vmatmul.mubr.bf16.gmra.mrb[84].mxu1 %v3548_v2  ;;  %2261 = vmatmul.mubr.bf16.gmra.mrb[84].mxu0 %v3549_v3 }
  0xcb   :  { %2139 = vmatprep.mubr.bf16.mxu1 %v3550_v4  ;;  %2268 = vmatprep.mubr.bf16.mxu0 %v3552_v5 }
  0xd2   :  { %2140 = vmatmul.mubr.bf16.gmra.mrb[88].mxu1 %v3554_v6  ;;  %2269 = vmatmul.mubr.bf16.gmra.mrb[88].mxu0 %v3555_v7 }
  0xd3   :  { %2147 = vmatprep.mubr.bf16.mxu1 %v3557_v8  ;;  %2276 = vmatprep.mubr.bf16.mxu0 %v3559_v9 }
  0xda   :  { %2148 = vmatmul.mubr.bf16.gmra.mrb[92].mxu1 %v3561_v10  ;;  %2277 = vmatmul.mubr.bf16.gmra.mrb[92].mxu0 %v3562_v11 }
  0xdb   :  { %2155 = vmatprep.mubr.bf16.mxu1 %v3563_v12  ;;  %3219 = vmatprep.mubr.msk.bf16.mxu0 %vm2066_vm0, %v3565_v13 }
  0xe2   :  { %2156 = vmatmul.mubr.bf16.gmra.mrb[96].mxu1 %v3566_v14  ;;  %3220 = vmatmul.mubr.msk.bf16.vlgmr.msra.gmra.mrb[48].mxu0 %vm2066_vm0, %v3567_v15 }
  0xe3   :  { %2163 = vmatprep.mubr.bf16.mxu1 %v3568_v16  ;;  %3223 = vmatprep.mubr.msk.bf16.mxu0 %vm2066_vm0, %v3570_v17 }
  0xea   :  { %2164 = vmatmul.mubr.bf16.gmra.mrb[100].mxu1 %v3571_v18  ;;  %3224 = vmatmul.mubr.msk.bf16.gmra.mrb[52].mxu0 %vm2066_vm0, %v3572_v19 }
  0xeb   :  { %2171 = vmatprep.mubr.bf16.mxu1 %v3573_v20  ;;  %3227 = vmatprep.mubr.msk.bf16.mxu0 %vm2066_vm0, %v3575_v21 }
  0xf2   :  { %2172 = vmatmul.mubr.bf16.gmra.mrb[104].mxu1 %v3576_v22  ;;  %3228 = vmatmul.mubr.msk.bf16.gmra.mrb[56].mxu0 %vm2066_vm0, %v3577_v23 }
  0xf3   :  { %2179 = vmatprep.mubr.bf16.mxu1 %v3578_v24  ;;  %3231 = vmatprep.mubr.msk.bf16.mxu0 %vm2066_vm0, %v3580_v25 }
  0xf5   :  { %v2807_v26 = vpop.f32.mrb[0].mxu1  ;;  %v2783_v27 = vpop.f32.mrb[0].mxu0 }
  0xf6   :  { %v2808_v28 = vpop.f32.mrb[1].mxu1  ;;  %v2784_v29 = vpop.f32.mrb[1].mxu0 }
  0xf7   :  { %v4280_v32 = vadd.f32 %v2808_v28, %v2807_v26  ;;  %v2810_v33 = vpop.f32.mrb[2].mxu1  ;;  %v2785_v34 = vadd.f32 %v2784_v29, %v2783_v27  ;;  %v2786_v35 = vpop.f32.mrb[2].mxu0 }
  0xf8   :  { %v2811_v36 = vpop.f32.mrb[3].mxu1  ;;  %v2787_v37 = vpop.f32.mrb[3].mxu0 }
  0xf9   :  { %v4282_v38 = vadd.f32 %v2811_v36, %v2810_v33  ;;  %v2788_v39 = vadd.f32 %v2787_v37, %v2786_v35 }
  0xfa   :  { %2180 = vmatmul.mubr.bf16.gmra.mrb[108].mxu1 %v3581_v30  ;;  %3232 = vmatmul.mubr.msk.bf16.gmra.mrb[60].mxu0 %vm2066_vm0, %v3582_v31 }
  0xfd   :  { %v2813_v40 = vpop.f32.mrb[4].mxu1  ;;  %v2789_v41 = vpop.f32.mrb[4].mxu0 }
  0xfe   :  { %v2814_v42 = vpop.f32.mrb[5].mxu1  ;;  %v2790_v43 = vpop.f32.mrb[5].mxu0 }
  0xff   :  { %v4285_v44 = vadd.f32 %v2814_v42, %v2813_v40  ;;  %v2816_v45 = vpop.f32.mrb[6].mxu1  ;;  %v2791_v46 = vadd.f32 %v2790_v43, %v2789_v41  ;;  %v2792_v47 = vpop.f32.mrb[6].mxu0 }
 0x100   :  { %v2817_v48 = vpop.f32.mrb[7].mxu1  ;;  %v2793_v49 = vpop.f32.mrb[7].mxu0 }
 0x101   :  { %v4287_v50 = vadd.f32 %v2817_v48, %v2816_v45  ;;  %v2794_v51 = vadd.f32 %v2793_v49, %v2792_v47 }
 0x105   :  { %v2819_v52 = vpop.f32.mrb[8].mxu1  ;;  %v2795_v53 = vpop.f32.mrb[8].mxu0 }
 0x106   :  { %v2820_v54 = vpop.f32.mrb[9].mxu1  ;;  %v2796_v55 = vpop.f32.mrb[9].mxu0 }
 0x107   :  { %v4289_v56 = vadd.f32 %v2820_v54, %v2819_v52  ;;  %v2822_v57 = vpop.f32.mrb[10].mxu1  ;;  %v2797_v58 = vadd.f32 %v2796_v55, %v2795_v53  ;;  %v2798_v59 = vpop.f32.mrb[10].mxu0 }
 0x108   :  { %v2823_v60 = vpop.f32.mrb[11].mxu1  ;;  %v2799_v61 = vpop.f32.mrb[11].mxu0 }
 0x109   :  { %v4291_v62 = vadd.f32 %v2823_v60, %v2822_v57  ;;  %v2800_v63 = vadd.f32 %v2799_v61, %v2798_v59 }
 0x10d   :  { %v2825_v0 = vpop.f32.mrb[12].mxu1  ;;  %v2801_v1 = vpop.f32.mrb[12].mxu0 }
 0x10e   :  { %v2826_v2 = vpop.f32.mrb[13].mxu1  ;;  %v2802_v3 = vpop.f32.mrb[13].mxu0 }
 0x10f   :  { %v4293_v4 = vadd.f32 %v2826_v2, %v2825_v0  ;;  %v2828_v5 = vpop.f32.mrb[14].mxu1  ;;  %v4295_v6 = vadd.f32 %v2802_v3, %v2801_v1  ;;  %v2804_v7 = vpop.f32.mrb[14].mxu0 }
 0x110   :  { %v2829_v8 = vpop.f32.mrb[15].mxu1  ;;  %v2805_v9 = vpop.f32.mrb[15].mxu0 }
 0x111   :  { %v4297_v10 = vadd.f32 %v2829_v8, %v2828_v5  ;;  %v2806_v11 = vadd.f32 %v2805_v9, %v2804_v7 }
 0x115   :  { %v2847_v12 = vpop.f32.mrb[16].mxu1  ;;  %v2911_v13 = vpop.f32.mrb[16].mxu0 }
 0x116   :  { %v2848_v14 = vpop.f32.mrb[17].mxu1  ;;  %v2912_v15 = vpop.f32.mrb[17].mxu0 }
 0x117   :  { %v2849_v16 = vadd.f32 %v2848_v14, %v2847_v12  ;;  %v2850_v17 = vpop.f32.mrb[18].mxu1  ;;  %v2913_v18 = vadd.f32 %v2912_v15, %v2911_v13  ;;  %v2914_v19 = vpop.f32.mrb[18].mxu0 }
 0x118   :  { %v2851_v20 = vpop.f32.mrb[19].mxu1  ;;  %v2915_v21 = vpop.f32.mrb[19].mxu0 }
 0x119   :  { %v1297_v22 = vadd.f32 %v2849_v16, %v2785_v34  ;;  %v2852_v23 = vadd.f32 %v2851_v20, %v2850_v17  ;;  %v2916_v24 = vadd.f32 %v2915_v21, %v2914_v19 }
 0x11b   :  { %v1300_v25 = vadd.f32 %v2852_v23, %v2788_v39  ;;  %v4299_v26 = vadd.f32 %v2913_v18, %v1297_v22 }
 0x11d   :  { %v4301_v27 = vadd.f32 %v2916_v24, %v1300_v25  ;;  %v2853_v28 = vpop.f32.mrb[20].mxu1  ;;  %v2917_v29 = vpop.f32.mrb[20].mxu0 }
 0x11e   :  { %v2854_v30 = vpop.f32.mrb[21].mxu1  ;;  %v2918_v31 = vpop.f32.mrb[21].mxu0 }
 0x11f   :  { %v2855_v33 = vadd.f32 %v2854_v30, %v2853_v28  ;;  %v2856_v35 = vpop.f32.mrb[22].mxu1  ;;  %v2919_v36 = vadd.f32 %v2918_v31, %v2917_v29  ;;  %v2920_v37 = vpop.f32.mrb[22].mxu0 }
 0x120   :  { %v2857_v40 = vpop.f32.mrb[23].mxu1  ;;  %v2921_v41 = vpop.f32.mrb[23].mxu0 }
 0x121   :  { %v1305_v42 = vadd.f32 %v2855_v33, %v2791_v46  ;;  %v2858_v43 = vadd.f32 %v2857_v40, %v2856_v35  ;;  %v2922_v34 = vadd.f32 %v2921_v41, %v2920_v37 }
 0x123   :  { %v1308_v45 = vadd.f32 %v2858_v43, %v2794_v51  ;;  %v4303_v47 = vadd.f32 %v2919_v36, %v1305_v42 }
 0x125   :  { %v4305_v39 = vadd.f32 %v2922_v34, %v1308_v45  ;;  %v2859_v48 = vpop.f32.mrb[24].mxu1  ;;  %v2923_v49 = vpop.f32.mrb[24].mxu0 }
 0x126   :  { %v2860_v52 = vpop.f32.mrb[25].mxu1  ;;  %v2924_v53 = vpop.f32.mrb[25].mxu0 }
 0x127   :  { %v2861_v54 = vadd.f32 %v2860_v52, %v2859_v48  ;;  %v2862_v55 = vpop.f32.mrb[26].mxu1  ;;  %v2925_v57 = vadd.f32 %v2924_v53, %v2923_v49  ;;  %v2926_v59 = vpop.f32.mrb[26].mxu0 }
 0x128   :  { %v2863_v60 = vpop.f32.mrb[27].mxu1  ;;  %v2927_v61 = vpop.f32.mrb[27].mxu0 }
 0x129   :  { %v1313_v0 = vadd.f32 %v2861_v54, %v2797_v58  ;;  %v2864_v1 = vadd.f32 %v2863_v60, %v2862_v55  ;;  %v2928_v46 = vadd.f32 %v2927_v61, %v2926_v59 }
 0x12b   :  { %v1316_v2 = vadd.f32 %v2864_v1, %v2800_v63  ;;  %v4307_v3 = vadd.f32 %v2925_v57, %v1313_v0 }
 0x12d   :  { %v4309_v51 = vadd.f32 %v2928_v46, %v1316_v2  ;;  %v2865_v5 = vpop.f32.mrb[28].mxu1  ;;  %v2929_v7 = vpop.f32.mrb[28].mxu0 }
 0x12e   :  { %v2866_v8 = vpop.f32.mrb[29].mxu1  ;;  %v2930_v9 = vpop.f32.mrb[29].mxu0 }
 0x12f   :  { %v2867_v12 = vadd.f32 %v2866_v8, %v2865_v5  ;;  %v2868_v13 = vpop.f32.mrb[30].mxu1  ;;  %v2931_v14 = vadd.f32 %v2930_v9, %v2929_v7  ;;  %v2932_v15 = vpop.f32.mrb[30].mxu0 }
 0x130   :  { %v2869_v16 = vpop.f32.mrb[31].mxu1  ;;  %v2933_v17 = vpop.f32.mrb[31].mxu0 }
 0x131   :  { %v1321_v18 = vadd.f32 %v2867_v12, %v4295_v6  ;;  %v2870_v58 = vadd.f32 %v2869_v16, %v2868_v13  ;;  %v2934_v19 = vadd.f32 %v2933_v17, %v2932_v15 }
 0x133   :  { %v1324_v20 = vadd.f32 %v2870_v58, %v2806_v11  ;;  %v4312_v63 = vadd.f32 %v2931_v14, %v1321_v18 }
 0x135   :  { %v4314_v21 = vadd.f32 %v2934_v19, %v1324_v20  ;;  %v2871_v22 = vpop.f32.mrb[32].mxu1  ;;  %v2935_v23 = vpop.f32.mrb[32].mxu0 }
 0x136   :  { %v2872_v24 = vpop.f32.mrb[33].mxu1  ;;  %v2936_v25 = vpop.f32.mrb[33].mxu0 }
 0x137   :  { %v2873_v28 = vadd.f32 %v2872_v24, %v2871_v22  ;;  %v2874_v29 = vpop.f32.mrb[34].mxu1  ;;  %v2937_v30 = vadd.f32 %v2936_v25, %v2935_v23  ;;  %v2938_v31 = vpop.f32.mrb[34].mxu0 }
 0x138   :  { %v2875_v33 = vpop.f32.mrb[35].mxu1  ;;  %v2939_v35 = vpop.f32.mrb[35].mxu0 }
 0x139   :  { %v1329_v36 = vadd.f32 %v2873_v28, %v4280_v32  ;;  %v2876_v6 = vadd.f32 %v2875_v33, %v2874_v29  ;;  %v2940_v37 = vadd.f32 %v2939_v35, %v2938_v31 }
 0x13b   :  { %v1332_v11 = vadd.f32 %v2876_v6, %v4282_v38  ;;  %v4318_v40 = vadd.f32 %v2937_v30, %v1329_v36 }
 0x13d   :  { %v4320_v41 = vadd.f32 %v2940_v37, %v1332_v11  ;;  %v2877_v42 = vpop.f32.mrb[36].mxu1  ;;  %v2941_v43 = vpop.f32.mrb[36].mxu0 }
 0x13e   :  { %v2878_v34 = vpop.f32.mrb[37].mxu1  ;;  %v2942_v45 = vpop.f32.mrb[37].mxu0 }
 0x13f   :  { %v2879_v48 = vadd.f32 %v2878_v34, %v2877_v42  ;;  %v2880_v49 = vpop.f32.mrb[38].mxu1  ;;  %v2943_v52 = vadd.f32 %v2942_v45, %v2941_v43  ;;  %v2944_v53 = vpop.f32.mrb[38].mxu0 }
 0x140   :  { %v2881_v54 = vpop.f32.mrb[39].mxu1  ;;  %v2945_v55 = vpop.f32.mrb[39].mxu0 }
 0x141   :  { %v1337_v32 = vadd.f32 %v2879_v48, %v4285_v44  ;;  %v2882_v57 = vadd.f32 %v2881_v54, %v2880_v49  ;;  %v2946_v59 = vadd.f32 %v2945_v55, %v2944_v53 }
 0x143   :  { %v1340_v38 = vadd.f32 %v2882_v57, %v4287_v50  ;;  %v4324_v60 = vadd.f32 %v2943_v52, %v1337_v32 }
 0x145   :  { %v4326_v61 = vadd.f32 %v2946_v59, %v1340_v38  ;;  %v2883_v0 = vpop.f32.mrb[40].mxu1  ;;  %v2947_v1 = vpop.f32.mrb[40].mxu0 }
 0x146   :  { %v2884_v46 = vpop.f32.mrb[41].mxu1  ;;  %v2948_v2 = vpop.f32.mrb[41].mxu0 }
 0x147   :  { %v2885_v5 = vadd.f32 %v2884_v46, %v2883_v0  ;;  %v2886_v7 = vpop.f32.mrb[42].mxu1  ;;  %v2949_v8 = vadd.f32 %v2948_v2, %v2947_v1  ;;  %v2950_v9 = vpop.f32.mrb[42].mxu0 }
 0x148   :  { %v2887_v12 = vpop.f32.mrb[43].mxu1  ;;  %v2951_v13 = vpop.f32.mrb[43].mxu0 }
 0x149   :  { %v1345_v44 = vadd.f32 %v2885_v5, %v4289_v56  ;;  %v2888_v14 = vadd.f32 %v2887_v12, %v2886_v7  ;;  %v2952_v15 = vadd.f32 %v2951_v13, %v2950_v9 }
 0x14b   :  { %v1348_v50 = vadd.f32 %v2888_v14, %v4291_v62  ;;  %v4330_v16 = vadd.f32 %v2949_v8, %v1345_v44 }
 0x14d   :  { %v4332_v17 = vadd.f32 %v2952_v15, %v1348_v50  ;;  %v2889_v18 = vpop.f32.mrb[44].mxu1  ;;  %v2953_v58 = vpop.f32.mrb[44].mxu0 }
 0x14e   :  { %v2890_v19 = vpop.f32.mrb[45].mxu1  ;;  %v2954_v20 = vpop.f32.mrb[45].mxu0 }
 0x14f   :  { %v2891_v22 = vadd.f32 %v2890_v19, %v2889_v18  ;;  %v2892_v23 = vpop.f32.mrb[46].mxu1  ;;  %v2955_v24 = vadd.f32 %v2954_v20, %v2953_v58  ;;  %v2956_v25 = vpop.f32.mrb[46].mxu0 }
 0x150   :  { %v2893_v28 = vpop.f32.mrb[47].mxu1  ;;  %v2957_v29 = vpop.f32.mrb[47].mxu0 }
 0x151   :  { %v1353_v56 = vadd.f32 %v2891_v22, %v4293_v4  ;;  %v2894_v30 = vadd.f32 %v2893_v28, %v2892_v23  ;;  %v2958_v31 = vadd.f32 %v2957_v29, %v2956_v25 }
 0x153   :  { %v1356_v62 = vadd.f32 %v2894_v30, %v4297_v10  ;;  %v4336_v33 = vadd.f32 %v2955_v24, %v1353_v56 }
 0x155   :  { %v4338_v35 = vadd.f32 %v2958_v31, %v1356_v62  ;;  %v2975_v36 = vpop.f32.mrb[48].mxu1 }
 0x156   :  { %v2976_v6 = vpop.f32.mrb[49].mxu1 }
 0x157   :  { %v2977_v37 = vadd.f32 %v2976_v6, %v2975_v36  ;;  %v2978_v11 = vpop.f32.mrb[50].mxu1 }
 0x158   :  { %v2979_v42 = vpop.f32.mrb[51].mxu1 }
 0x159   :  { %v4341_v43 = vadd.f32 %v2977_v37, %v4299_v26  ;;  %v2980_v34 = vadd.f32 %v2979_v42, %v2978_v11 }
 0x15b   :  { %v4344_v45 = vadd.f32 %v2980_v34, %v4301_v27 }
 0x15d   :  { %v2981_v4 = vpop.f32.mrb[52].mxu1 }
 0x15e   :  { %v2982_v48 = vpop.f32.mrb[53].mxu1 }
 0x15f   :  { %v2983_v49 = vadd.f32 %v2982_v48, %v2981_v4  ;;  %v2984_v10 = vpop.f32.mrb[54].mxu1 }
 0x160   :  { %v2985_v52 = vpop.f32.mrb[55].mxu1 }
 0x161   :  { %v4347_v53 = vadd.f32 %v2983_v49, %v4303_v47  ;;  %v2986_v54 = vadd.f32 %v2985_v52, %v2984_v10 }
 0x163   :  { %v4350_v55 = vadd.f32 %v2986_v54, %v4305_v39 }
 0x165   :  { %v2987_v32 = vpop.f32.mrb[56].mxu1 }
 0x166   :  { %v2988_v57 = vpop.f32.mrb[57].mxu1 }
 0x167   :  { %v2989_v26 = vadd.f32 %v2988_v57, %v2987_v32  ;;  %v2990_v59 = vpop.f32.mrb[58].mxu1 }
 0x168   :  { %v2991_v38 = vpop.f32.mrb[59].mxu1 }
 0x169   :  { %v4353_v27 = vadd.f32 %v2989_v26, %v4307_v3  ;;  %v2992_v0 = vadd.f32 %v2991_v38, %v2990_v59 }
 0x16b   :  { %v4356_v1 = vadd.f32 %v2992_v0, %v4309_v51 }
 0x16d   :  { %v2993_v46 = vpop.f32.mrb[60].mxu1 }
 0x16e   :  { %v2994_v2 = vpop.f32.mrb[61].mxu1 }
 0x16f   :  { %v2995_v47 = vadd.f32 %v2994_v2, %v2993_v46  ;;  %v2996_v5 = vpop.f32.mrb[62].mxu1 }
 0x170   :  { %v2997_v7 = vpop.f32.mrb[63].mxu1 }
 0x171   :  { %v4359_v39 = vadd.f32 %v2995_v47, %v4312_v63  ;;  %v2998_v8 = vadd.f32 %v2997_v7, %v2996_v5 }
 0x173   :  { %v4362_v9 = vadd.f32 %v2998_v8, %v4314_v21 }
 0x175   :  { %v2999_v12 = vpop.f32.mrb[64].mxu1  ;;  %v3119_v13 = vpop.f32.mrb[64].mxu0 }
 0x176   :  { %v3000_v3 = vpop.f32.mrb[65].mxu1  ;;  %v3120_v44 = vpop.f32.mrb[65].mxu0 }
 0x177   :  { %v3001_v14 = vadd.f32 %v3000_v3, %v2999_v12  ;;  %v3002_v15 = vpop.f32.mrb[66].mxu1  ;;  %v4364_v51 = vadd.f32 %v3120_v44, %v3119_v13  ;;  %v3122_v50 = vpop.f32.mrb[66].mxu0 }
 0x178   :  { %v3003_v18 = vpop.f32.mrb[67].mxu1  ;;  %v3123_v58 = vpop.f32.mrb[67].mxu0 }
 0x179   :  { %v4367_v19 = vadd.f32 %v3001_v14, %v4318_v40  ;;  %v3004_v63 = vadd.f32 %v3003_v18, %v3002_v15  ;;  %v3124_v20 = vadd.f32 %v3123_v58, %v3122_v50 }
 0x17b   :  { %v4370_v22 = vadd.f32 %v3004_v63, %v4320_v41 }
 0x17d   :  { %v3005_v21 = vpop.f32.mrb[68].mxu1  ;;  %v3125_v23 = vpop.f32.mrb[68].mxu0 }
 0x17e   :  { %v3006_v24 = vpop.f32.mrb[69].mxu1  ;;  %v3126_v25 = vpop.f32.mrb[69].mxu0 }
 0x17f   :  { %v3007_v28 = vadd.f32 %v3006_v24, %v3005_v21  ;;  %v3008_v29 = vpop.f32.mrb[70].mxu1  ;;  %v4372_v56 = vadd.f32 %v3126_v25, %v3125_v23  ;;  %v3128_v30 = vpop.f32.mrb[70].mxu0 }
 0x180   :  { %v3009_v31 = vpop.f32.mrb[71].mxu1  ;;  %v3129_v62 = vpop.f32.mrb[71].mxu0 }
 0x181   :  { %v4375_v36 = vadd.f32 %v3007_v28, %v4324_v60  ;;  %v3010_v40 = vadd.f32 %v3009_v31, %v3008_v29  ;;  %v4377_v6 = vadd.f32 %v3129_v62, %v3128_v30 }
 0x183   :  { %v4380_v41 = vadd.f32 %v3010_v40, %v4326_v61 }
 0x185   :  { %v3011_v37 = vpop.f32.mrb[72].mxu1  ;;  %v3131_v11 = vpop.f32.mrb[72].mxu0 }
 0x186   :  { %v3012_v42 = vpop.f32.mrb[73].mxu1  ;;  %v3132_v34 = vpop.f32.mrb[73].mxu0 }
 0x187   :  { %v3013_v4 = vadd.f32 %v3012_v42, %v3011_v37  ;;  %v3014_v48 = vpop.f32.mrb[74].mxu1  ;;  %v4382_v49 = vadd.f32 %v3132_v34, %v3131_v11  ;;  %v3134_v10 = vpop.f32.mrb[74].mxu0 }
 0x188   :  { %v3015_v52 = vpop.f32.mrb[75].mxu1  ;;  %v3135_v54 = vpop.f32.mrb[75].mxu0 }
 0x189   :  { %v4385_v60 = vadd.f32 %v3013_v4, %v4330_v16  ;;  %v3016_v32 = vadd.f32 %v3015_v52, %v3014_v48  ;;  %v4387_v57 = vadd.f32 %v3135_v54, %v3134_v10 }
 0x18b   :  { %v4390_v61 = vadd.f32 %v3016_v32, %v4332_v17 }
 0x18d   :  { %v3017_v26 = vpop.f32.mrb[76].mxu1  ;;  %v3137_v59 = vpop.f32.mrb[76].mxu0 }
 0x18e   :  { %v3018_v38 = vpop.f32.mrb[77].mxu1  ;;  %v3138_v0 = vpop.f32.mrb[77].mxu0 }
 0x18f   :  { %v3019_v46 = vadd.f32 %v3018_v38, %v3017_v26  ;;  %v3020_v2 = vpop.f32.mrb[78].mxu1  ;;  %v4392_v47 = vadd.f32 %v3138_v0, %v3137_v59  ;;  %v3140_v5 = vpop.f32.mrb[78].mxu0 }
 0x190   :  { %v3021_v7 = vpop.f32.mrb[79].mxu1  ;;  %v3141_v8 = vpop.f32.mrb[79].mxu0 }
 0x191   :  { %v4395_v16 = vadd.f32 %v3019_v46, %v4336_v33  ;;  %v3022_v12 = vadd.f32 %v3021_v7, %v3020_v2  ;;  %v4397_v13 = vadd.f32 %v3141_v8, %v3140_v5 }
 0x193   :  { %v4400_v17 = vadd.f32 %v3022_v12, %v4338_v35 }
 0x195   :  { %v3055_v3 = vpop.f32.mrb[80].mxu1  ;;  %v3143_v44 = vpop.f32.mrb[80].mxu0 }
 0x196   :  { %v3056_v14 = vpop.f32.mrb[81].mxu1  ;;  %v3144_v15 = vpop.f32.mrb[81].mxu0 }
 0x197   :  { %v3057_v50 = vadd.f32 %v3056_v14, %v3055_v3  ;;  %v3058_v18 = vpop.f32.mrb[82].mxu1  ;;  %v4402_v58 = vadd.f32 %v3144_v15, %v3143_v44  ;;  %v3146_v63 = vpop.f32.mrb[82].mxu0 }
 0x198   :  { %v3059_v21 = vpop.f32.mrb[83].mxu1  ;;  %v3147_v23 = vpop.f32.mrb[83].mxu0 }
 0x199   :  { %v3254_v33 = vadd.f32 %v3057_v50, %v4341_v43  ;;  %v3060_v24 = vadd.f32 %v3059_v21, %v3058_v18  ;;  %v4405_v25 = vadd.f32 %v3147_v23, %v3146_v63 }
 0x19b   :  { %v3260_v28 = vadd.f32 %v3060_v24, %v4344_v45  ;;  %v3255_v35 = vadd.f32 %v3254_v33, %v4364_v51 }
 0x19d   :  { %v3061_v29 = vpop.f32.mrb[84].mxu1  ;;  %v3149_v30 = vpop.f32.mrb[84].mxu0  ;;  %v4409_v31 = vadd.f32 %v3260_v28, %v3124_v20 }
 0x19e   :  { %v3062_v62 = vpop.f32.mrb[85].mxu1  ;;  %v3150_v40 = vpop.f32.mrb[85].mxu0 }
 0x19f   :  { %v3063_v37 = vadd.f32 %v3062_v62, %v3061_v29  ;;  %v3064_v11 = vpop.f32.mrb[86].mxu1  ;;  %v4411_v42 = vadd.f32 %v3150_v40, %v3149_v30  ;;  %v3152_v34 = vpop.f32.mrb[86].mxu0  ;;  %v4439_v30 = vld [vmem:[%s4544_s4] ss:$0 sm:$0xff] }
 0x1a0   :  { %v3065_v4 = vpop.f32.mrb[87].mxu1  ;;  %v3153_v43 = vpop.f32.mrb[87].mxu0 }
 0x1a1   :  { %v3251_v48 = vadd.f32 %v3063_v37, %v4347_v53  ;;  %v3066_v10 = vadd.f32 %v3065_v4, %v3064_v11  ;;  %v4414_v52 = vadd.f32 %v3153_v43, %v3152_v34 }
 0x1a3   :  { %v3257_v45 = vadd.f32 %v3066_v10, %v4350_v55  ;;  %v3252_v51 = vadd.f32 %v3251_v48, %v4372_v56 }
 0x1a5   :  { %v3067_v20 = vpop.f32.mrb[88].mxu1  ;;  %v3155_v54 = vpop.f32.mrb[88].mxu0  ;;  %v3258_v32 = vadd.f32 %v3257_v45, %v4377_v6 }
 0x1a6   :  { %v3068_v26 = vpop.f32.mrb[89].mxu1  ;;  %v3156_v59 = vpop.f32.mrb[89].mxu0 }
 0x1a7   :  { %v3069_v38 = vadd.f32 %v3068_v26, %v3067_v20  ;;  %v3070_v0 = vpop.f32.mrb[90].mxu1  ;;  %v4419_v46 = vadd.f32 %v3156_v59, %v3155_v54  ;;  %v3158_v2 = vpop.f32.mrb[90].mxu0 }
 0x1a8   :  { %v3071_v5 = vpop.f32.mrb[91].mxu1  ;;  %v3159_v53 = vpop.f32.mrb[91].mxu0 }
 0x1a9   :  { %v3266_v7 = vadd.f32 %v3069_v38, %v4353_v27  ;;  %v3072_v8 = vadd.f32 %v3071_v5, %v3070_v0  ;;  %v4422_v12 = vadd.f32 %v3159_v53, %v3158_v2 }
 0x1ab   :  { %v3272_v55 = vadd.f32 %v3072_v8, %v4356_v1  ;;  %v3267_v56 = vadd.f32 %v3266_v7, %v4382_v49 }
 0x1ad   :  { %v3073_v3 = vpop.f32.mrb[92].mxu1  ;;  %v3161_v6 = vpop.f32.mrb[92].mxu0  ;;  %v4427_v44 = vadd.f32 %v3272_v55, %v4387_v57 }
 0x1ae   :  { %v3074_v14 = vpop.f32.mrb[93].mxu1  ;;  %v3162_v15 = vpop.f32.mrb[93].mxu0 }
 0x1af   :  { %v3075_v50 = vadd.f32 %v3074_v14, %v3073_v3  ;;  %v3076_v18 = vpop.f32.mrb[94].mxu1  ;;  %v4429_v63 = vadd.f32 %v3162_v15, %v3161_v6  ;;  %v3164_v21 = vpop.f32.mrb[94].mxu0 }
 0x1b0   :  { %v3077_v27 = vpop.f32.mrb[95].mxu1  ;;  %v3165_v23 = vpop.f32.mrb[95].mxu0 }
 0x1b1   :  { %v3263_v33 = vadd.f32 %v3075_v50, %v4359_v39  ;;  %v3078_v24 = vadd.f32 %v3077_v27, %v3076_v18  ;;  %v4432_v1 = vadd.f32 %v3165_v23, %v3164_v21 }
 0x1b3   :  { %v3269_v49 = vadd.f32 %v3078_v24, %v4362_v9  ;;  %v3264_v28 = vadd.f32 %v3263_v33, %v4392_v47 }
 0x1b5   :  { %v3079_v57 = vpop.f32.mrb[96].mxu1  ;;  %v3221_v29 = vpop.f32.mrb[48].mxu0  ;;  %v3270_v62 = vadd.f32 %v3269_v49, %v4397_v13 }
 0x1b6   :  { %v3253_v40 = vadd.f32 %v3252_v51, %v3221_v29  ;;  %v3080_v37 = vpop.f32.mrb[97].mxu1  ;;  %v2319_v11 = vpop.f32.mrb[49].mxu0 }
 0x1b7   :  { %v3081_v39 = vadd.f32 %v3080_v37, %v3079_v57  ;;  %v3256_v34 = vadd.f32 %v3255_v35, %v2319_v11  ;;  %v3082_v4 = vpop.f32.mrb[98].mxu1  ;;  %v3222_v43 = vpop.f32.mrb[50].mxu0 }
 0x1b8   :  { %v2391_v9 = vadd.f32 %v3253_v40, %v4439_v30  ;;  %v3259_v48 = vadd.f32 %v3258_v32, %v3222_v43  ;;  %v3083_v47 = vpop.f32.mrb[99].mxu1  ;;  %v2322_v10 = vpop.f32.mrb[51].mxu0 }
 0x1b9   :  { %v3278_v45 = vadd.f32 %v3081_v39, %v4367_v19  ;;  %v2389_v20 = vadd.f32 %v3256_v34, %v4439_v30  ;;  %v3084_v54 = vadd.f32 %v3083_v47, %v3082_v4  ;;  %v3262_v26 = vadd.f32 %v4409_v31, %v2322_v10 }
 0x1ba   :  { %v2407_v13 = vmax.f32 %v2391_v9, 0.0  ;;  %v2392_v51 = vadd.f32 %v3259_v48, %v4439_v30 }
 0x1bb   :  { %v2405_v59 = vmax.f32 %v2389_v20, 0.0  ;;  %v3284_v35 = vadd.f32 %v3084_v54, %v4370_v22  ;;  %v2390_v38 = vadd.f32 %v3262_v26, %v4439_v30  ;;  %v3279_v32 = vadd.f32 %v3278_v45, %v4402_v58 }
 0x1bc   :  { %v2753_v0 = vpack.c.bf16 %v2407_v13, %v2407_v13  ;;  %v2408_v2 = vmax.f32 %v2392_v51, 0.0 }
 0x1bd   :  { %v2751_v5 = vpack.c.bf16 %v2405_v59, %v2405_v59  ;;  %v2406_v19 = vmax.f32 %v2390_v38, 0.0  ;;  %v3085_v53 = vpop.f32.mrb[100].mxu1  ;;  %v3225_v7 = vpop.f32.mrb[52].mxu0  ;;  %v3285_v8 = vadd.f32 %v3284_v35, %v4405_v25 }
 0x1be   :  { %2488 = vst.msk [vmem:[%s4545_s5 + $0x8] sm:$0xf] %vm2485_vm1, %v2753_v0  ;;  %v2754_v31 = vpack.c.bf16 %v2408_v2, %v2408_v2  ;;  %v3265_v55 = vadd.f32 %v3264_v28, %v3225_v7  ;;  %v3086_v22 = vpop.f32.mrb[101].mxu1  ;;  %v2335_v3 = vpop.f32.mrb[53].mxu0 }
 0x1bf   :  { %2486 = vst.msk [vmem:[%s4545_s5] sm:$0xf] %vm2485_vm1, %v2751_v5  ;;  %v2752_v58 = vpack.c.bf16 %v2406_v19, %v2406_v19  ;;  %v3087_v6 = vadd.f32 %v3086_v22, %v3085_v53  ;;  %v3268_v14 = vadd.f32 %v3267_v56, %v2335_v3  ;;  %v3088_v15 = vpop.f32.mrb[102].mxu1  ;;  %v3226_v50 = vpop.f32.mrb[54].mxu0 }
 0x1c0   :  { %2489 = vst.msk [vmem:[%s4545_s5 + $0xc] sm:$0xf] %vm2485_vm1, %v2754_v31  ;;  %v2395_v25 = vadd.f32 %v3265_v55, %v4439_v30  ;;  %v3271_v18 = vadd.f32 %v3270_v62, %v3226_v50  ;;  %v3089_v21 = vpop.f32.mrb[103].mxu1  ;;  %v2338_v27 = vpop.f32.mrb[55].mxu0 }
 0x1c1   :  { %2487 = vst.msk [vmem:[%s4545_s5 + $0x4] sm:$0xf] %vm2485_vm1, %v2752_v58  ;;  %v3275_v23 = vadd.f32 %v3087_v6, %v4375_v36  ;;  %v2393_v56 = vadd.f32 %v3268_v14, %v4439_v30  ;;  %v3090_v33 = vadd.f32 %v3089_v21, %v3088_v15  ;;  %v3274_v24 = vadd.f32 %v4427_v44, %v2338_v27 }
 0x1c2   :  { %v2411_v49 = vmax.f32 %v2395_v25, 0.0  ;;  %v2396_v28 = vadd.f32 %v3271_v18, %v4439_v30 }
 0x1c3   :  { %v2409_v57 = vmax.f32 %v2393_v56, 0.0  ;;  %v3281_v29 = vadd.f32 %v3090_v33, %v4380_v41  ;;  %v2394_v62 = vadd.f32 %v3274_v24, %v4439_v30  ;;  %v3276_v40 = vadd.f32 %v3275_v23, %v4411_v42 }
 0x1c4   :  { %v2757_v37 = vpack.c.bf16 %v2411_v49, %v2411_v49  ;;  %v2412_v11 = vmax.f32 %v2396_v28, 0.0 }
 0x1c5   :  { %v2755_v39 = vpack.c.bf16 %v2409_v57, %v2409_v57  ;;  %v2410_v34 = vmax.f32 %v2394_v62, 0.0  ;;  %v3091_v36 = vpop.f32.mrb[104].mxu1  ;;  %v3229_v4 = vpop.f32.mrb[56].mxu0  ;;  %v3282_v43 = vadd.f32 %v3281_v29, %v4414_v52 }
 0x1c6   :  { %2492 = vst.msk [vmem:[%s4545_s5 + $0x18] sm:$0xf] %vm2485_vm1, %v2757_v37  ;;  %v2758_v44 = vpack.c.bf16 %v2412_v11, %v2412_v11  ;;  %v3277_v9 = vadd.f32 %v3276_v40, %v3229_v4  ;;  %v3092_v41 = vpop.f32.mrb[105].mxu1  ;;  %v2351_v48 = vpop.f32.mrb[57].mxu0 }
 0x1c7   :  { %2490 = vst.msk [vmem:[%s4545_s5 + $0x10] sm:$0xf] %vm2485_vm1, %v2755_v39  ;;  %v2756_v42 = vpack.c.bf16 %v2410_v34, %v2410_v34  ;;  %v3093_v47 = vadd.f32 %v3092_v41, %v3091_v36  ;;  %v3280_v10 = vadd.f32 %v3279_v32, %v2351_v48  ;;  %v3094_v45 = vpop.f32.mrb[106].mxu1  ;;  %v3230_v20 = vpop.f32.mrb[58].mxu0 }
 0x1c8   :  { %2493 = vst.msk [vmem:[%s4545_s5 + $0x1c] sm:$0xf] %vm2485_vm1, %v2758_v44  ;;  %v2399_v52 = vadd.f32 %v3277_v9, %v4439_v30  ;;  %v3283_v54 = vadd.f32 %v3282_v43, %v3230_v20  ;;  %v3095_v26 = vpop.f32.mrb[107].mxu1  ;;  %v2354_v13 = vpop.f32.mrb[59].mxu0 }
 0x1c9   :  { %2491 = vst.msk [vmem:[%s4545_s5 + $0x14] sm:$0xf] %vm2485_vm1, %v2756_v42  ;;  %v3290_v51 = vadd.f32 %v3093_v47, %v4385_v60  ;;  %v2397_v59 = vadd.f32 %v3280_v10, %v4439_v30  ;;  %v3096_v35 = vadd.f32 %v3095_v26, %v3094_v45  ;;  %v3286_v38 = vadd.f32 %v3285_v8, %v2354_v13 }
 0x1ca   :  { %v2415_v32 = vmax.f32 %v2399_v52, 0.0  ;;  %v2400_v0 = vadd.f32 %v3283_v54, %v4439_v30 }
 0x1cb   :  { %v2413_v2 = vmax.f32 %v2397_v59, 0.0  ;;  %v3296_v5 = vadd.f32 %v3096_v35, %v4390_v61  ;;  %v2398_v19 = vadd.f32 %v3286_v38, %v4439_v30  ;;  %v3291_v53 = vadd.f32 %v3290_v51, %v4419_v46 }
 0x1cc   :  { %v2761_v7 = vpack.c.bf16 %v2415_v32, %v2415_v32  ;;  %v2416_v31 = vmax.f32 %v2400_v0, 0.0 }
 0x1cd   :  { %v2759_v55 = vpack.c.bf16 %v2413_v2, %v2413_v2  ;;  %v2414_v22 = vmax.f32 %v2398_v19, 0.0  ;;  %v3097_v3 = vpop.f32.mrb[108].mxu1  ;;  %v3233_v60 = vpop.f32.mrb[60].mxu0  ;;  %v3297_v58 = vadd.f32 %v3296_v5, %v4422_v12 }
 0x1ce   :  { %2496 = vst.msk [vmem:[%s4545_s5 + $0x28] sm:$0xf] %vm2485_vm1, %v2761_v7  ;;  %v2762_v8 = vpack.c.bf16 %v2416_v31, %v2416_v31  ;;  %v3098_v6 = vpop.f32.mrb[109].mxu1  ;;  %v2367_v61 = vpop.f32.mrb[61].mxu0 }
 0x1cf   :  { %2494 = vst.msk [vmem:[%s4545_s5 + $0x20] sm:$0xf] %vm2485_vm1, %v2759_v55  ;;  %v2760_v46 = vpack.c.bf16 %v2414_v22, %v2414_v22  ;;  %v3099_v14 = vadd.f32 %v3098_v6, %v3097_v3  ;;  %v3292_v15 = vadd.f32 %v3291_v53, %v2367_v61  ;;  %v3100_v50 = vpop.f32.mrb[110].mxu1  ;;  %v3234_v25 = vpop.f32.mrb[62].mxu0 }
 0x1d0   :  { %2497 = vst.msk [vmem:[%s4545_s5 + $0x2c] sm:$0xf] %vm2485_vm1, %v2762_v8  ;;  %v3101_v12 = vpop.f32.mrb[111].mxu1  ;;  %v2370_v18 = vpop.f32.mrb[63].mxu0 }
 0x1d1   :  { %2495 = vst.msk [vmem:[%s4545_s5 + $0x24] sm:$0xf] %vm2485_vm1, %v2760_v46  ;;  %v3287_v21 = vadd.f32 %v3099_v14, %v4395_v16  ;;  %v2401_v27 = vadd.f32 %v3292_v15, %v4439_v30  ;;  %v3102_v23 = vadd.f32 %v3101_v12, %v3100_v50  ;;  %v3298_v56 = vadd.f32 %v3297_v58, %v2370_v18 }
 0x1d3   :  { %v3288_v33 = vadd.f32 %v3287_v21, %v4429_v63  ;;  %v2417_v24 = vmax.f32 %v2401_v27, 0.0  ;;  %v3293_v49 = vadd.f32 %v3102_v23, %v4400_v17  ;;  %v2402_v28 = vadd.f32 %v3298_v56, %v4439_v30 }
 0x1d5   :  { %v3289_v57 = vadd.f32 %v3288_v33, %v3233_v60  ;;  %v2763_v29 = vpack.c.bf16 %v2417_v24, %v2417_v24  ;;  %v3294_v62 = vadd.f32 %v3293_v49, %v4432_v1  ;;  %v2418_v40 = vmax.f32 %v2402_v28, 0.0 }
 0x1d7   :  { %v2403_v37 = vadd.f32 %v3289_v57, %v4439_v30  ;;  %2498 = vst.msk [vmem:[%s4545_s5 + $0x30] sm:$0xf] %vm2485_vm1, %v2763_v29  ;;  %v3295_v16 = vadd.f32 %v3294_v62, %v3234_v25  ;;  %v2764_v11 = vpack.c.bf16 %v2418_v40, %v2418_v40 }
 0x1d9   :  { %v2419_v63 = vmax.f32 %v2403_v37, 0.0  ;;  %v2404_v39 = vadd.f32 %v3295_v16, %v4439_v30  ;;  %2499 = vst.msk [vmem:[%s4545_s5 + $0x34] sm:$0xf] %vm2485_vm1, %v2764_v11 }
 0x1db   :  { %v2765_v17 = vpack.c.bf16 %v2419_v63, %v2419_v63  ;;  %v2420_v1 = vmax.f32 %v2404_v39, 0.0 }
 0x1dd   :  { %2500 = vst.msk [vmem:[%s4545_s5 + $0x38] sm:$0xf] %vm2485_vm1, %v2765_v17  ;;  %v2766_v34 = vpack.c.bf16 %v2420_v1, %v2420_v1 }
 0x1df   :  { %2501 = vst.msk [vmem:[%s4545_s5 + $0x3c] sm:$0xf] %vm2485_vm1, %v2766_v34 }

// kernel: unet_forward.21
= control target key start
LH: loop header
LB: loop body
LE: loop exit
PB: predicated region body
PF: predicated region fallthrough
CT: control target
= control target key end

     0   :  { %s4044_s24 = smov 0   ;;  %s4762_s0 = inlined_call_operand.vmem [shape: bf16[512,288], index: 0, kind: input, shape index: {}]   ;;  %s4763_s1 = inlined_call_operand.vmem [shape: bf16[512,576], index: 1, kind: input, shape index: {}]   ;;  %s4764_s2 = inlined_call_operand.vmem [shape: bf16[288,64], index: 2, kind: input, shape index: {}]   ;;  %s4765_s3 = inlined_call_operand.vmem [shape: bf16[576,64], index: 3, kind: input, shape index: {}]   ;;  %s4766_s4 = inlined_call_operand.vmem [shape: f32[1,64], index: 4, kind: input, shape index: {}]   ;;  %s4767_s5 = inlined_call_operand.vmem [shape: bf16[64,128], index: 5, kind: input, shape index: {}]   ;;  %s4768_s6 = inlined_call_operand.vmem [shape: f32[1,128], index: 6, kind: input, shape index: {}]   ;;  %s4769_s7 = inlined_call_operand.vmem [shape: f32[512,128], index: 7, kind: output, shape index: {}]  }
   0x1 LB: > { %s2881_s25 = sadd.s32 4294967295, %s4002_s24   ;;  %p2885_p0 = scmp.ge.s32.totalorder %s4002_s24, 1  ;;  %s4002_s24 = sphi %s4044_s24, %s17_s24  }
   0x2   : > { %p251_p1 = scmp.lt.s32.totalorder %s4002_s24, 3 }
   0x4   : > { %p252_p2 = pnand %p2885_p0, %p251_p1 }
   0x5   : > { %v3762_v0 = vld [vmem:[%s4765_s3 + $0x40] sm:$0xff] (!%p252_p2)   ;;  %s2886_s28 = sshll.u32 (!%p252_p2), %s2881_s25, 5  ;;  %v3764_v2 = vld [vmem:[%s4765_s3 + $0x48] sm:$0xff] (!%p252_p2)   ;;  %v3766_v4 = vld [vmem:[%s4765_s3 + $0x50] sm:$0xff] (!%p252_p2)   ;;  %vm1195_vm0 = vcmask (!%p252_p2), 523264   ;;  %vm2075_vm1 = vcmask (!%p252_p2), 261120  }
   0x6   : > { %255 = sbr.rel (%p252_p2) target bundleno = 763 (0x2fb), region = 48  ;;  %v3763_v1 = vld [vmem:[%s4765_s3] sm:$0xff] (!%p252_p2)   ;;  %3640 = vmatprep.subr.bf16.mxu1 (!%p252_p2), %v3762_v0  ;;  %3130 = vmatprep.subr.bf16.mxu0 (!%p252_p2), %v3762_v0  ;;  %p291_p3 = scmp.lt.s32.totalorder (!%p252_p2), %s2886_s28, 63  ;;  %v3765_v3 = vld [vmem:[%s4765_s3 + $0x8] sm:$0xff] (!%p252_p2)   ;;  %v3767_v5 = vld [vmem:[%s4765_s3 + $0x10] sm:$0xff] (!%p252_p2)  }
   0x7   : > { %3648 = vmatpush3.bf16.msra.mxu1 (!%p252_p2), %v3763_v1  ;;  %3131 = vmatpush3.bf16.msra.mxu0 (!%p252_p2), %v3763_v1  ;;  %v3768_v6 = vld [vmem:[%s4765_s3 + $0x58] sm:$0xff] (!%p252_p2)   ;;  %v3770_v8 = vld [vmem:[%s4765_s3 + $0x60] sm:$0xff] (!%p252_p2)   ;;  %v3772_v10 = vld [vmem:[%s4765_s3 + $0x68] sm:$0xff] (!%p252_p2)  }
   0x8   : > { %3641 = vmatprep.subr.bf16.mxu1 (!%p252_p2), %v3764_v2  ;;  %3132 = vmatprep.subr.bf16.mxu0 (!%p252_p2), %v3764_v2  ;;  %v3769_v7 = vld [vmem:[%s4765_s3 + $0x18] sm:$0xff] (!%p252_p2)   ;;  %v3771_v9 = vld [vmem:[%s4765_s3 + $0x20] sm:$0xff] (!%p252_p2)   ;;  %v3773_v13 = vld [vmem:[%s4765_s3 + $0x28] sm:$0xff] (!%p252_p2)  }
   0x9   : > { %v3774_v14 = vld [vmem:[%s4765_s3 + $0x70] sm:$0xff] (!%p252_p2)   ;;  %v3776_v16 = vld [vmem:[%s4765_s3 + $0x78] sm:$0xff] (!%p252_p2)   ;;  %v3784_v18 = vld [vmem:[%s4765_s3 + $0xc0] sm:$0xff] (!%p252_p2)  }
   0xa   : > { %v3775_v15 = vld [vmem:[%s4765_s3 + $0x30] sm:$0xff] (!%p252_p2)   ;;  %v3777_v17 = vld [vmem:[%s4765_s3 + $0x38] sm:$0xff] (!%p252_p2)   ;;  %v3785_v21 = vld [vmem:[%s4765_s3 + $0x80] sm:$0xff] (!%p252_p2)  }
   0xb   : > { %3649 = vmatpush3.bf16.msra.mxu1 (!%p252_p2), %v3765_v3  ;;  %3133 = vmatpush3.bf16.msra.mxu0 (!%p252_p2), %v3765_v3  ;;  %v3786_v23 = vld [vmem:[%s4765_s3 + $0xc8] sm:$0xff] (!%p252_p2)   ;;  %v3793_v27 = vld [vmem:[%s4765_s3 + $0xd0] sm:$0xff] (!%p252_p2)   ;;  %v3796_v30 = vld [vmem:[%s4765_s3 + $0xd8] sm:$0xff] (!%p252_p2)  }
   0xc   : > { %3642 = vmatprep.subr.bf16.mxu1 (!%p252_p2), %v3766_v4  ;;  %3134 = vmatprep.subr.bf16.mxu0 (!%p252_p2), %v3766_v4  ;;  %v3787_v25 = vld [vmem:[%s4765_s3 + $0x88] sm:$0xff] (!%p252_p2)   ;;  %v3795_v29 = vld [vmem:[%s4765_s3 + $0x90] sm:$0xff] (!%p252_p2)   ;;  %v3797_v33 = vld [vmem:[%s4765_s3 + $0x98] sm:$0xff] (!%p252_p2)  }
   0xd   : > { %s4771_s28 = smov (!%p291_p3, %s2886_s28), 63  ;;  %v3803_v34 = vld [vmem:[%s4765_s3 + $0xe0] sm:$0xff]   ;;  %v3806_v38 = vld [vmem:[%s4765_s3 + $0xe8] sm:$0xff]   ;;  %v3813_v42 = vld [vmem:[%s4765_s3 + $0xf0] sm:$0xff]  }
   0xe   : > { %s3753_s18 = smul.u32 20, %s4771_s28  ;;  %v3805_v37 = vld [vmem:[%s4765_s3 + $0xa0] sm:$0xff]   ;;  %v3807_v41 = vld [vmem:[%s4765_s3 + $0xa8] sm:$0xff]   ;;  %v3815_v45 = vld [vmem:[%s4765_s3 + $0xb0] sm:$0xff]   ;;  %s2891_s8 = sshll.u32 %s4771_s28, 3 }
   0xf   : > { %3650 = vmatpush3.bf16.msra.mxu1 %v3767_v5  ;;  %3135 = vmatpush3.bf16.msra.mxu0 %v3767_v5  ;;  %v3816_v47 = vld [vmem:[%s4765_s3 + $0xf8] sm:$0xff]   ;;  %v3823_v51 = vld [vmem:[%s4764_s2 + $0x40] sm:$0xff]   ;;  %v3837_v57 = vld [vmem:[%s4764_s2 + $0x48] sm:$0xff]   ;;  %s3752_s11 = smul.u32 12, %s4771_s28  ;;  %s4693_s13 = scalar_lea.vmem %s4769_s7, %s2891_s8 }
  0x10   : > { %3643 = vmatprep.subr.bf16.mxu1 %v3768_v6  ;;  %3136 = vmatprep.subr.bf16.mxu0 %v3768_v6  ;;  %s4085_s26 = scalar_lea.vmem %s4763_s1, %s3753_s18  ;;  %v3817_v49 = vld [vmem:[%s4765_s3 + $0xb8] sm:$0xff]   ;;  %v3825_v53 = vld [vmem:[%s4764_s2] sm:$0xff]   ;;  %v3839_v58 = vld [vmem:[%s4764_s2 + $0x8] sm:$0xff]  }
  0x11   : > { %v3780_v11 = vld [vmem:[%s4085_s26 + $0x1e4] ss:$20 sps:$4 sm:$0xff]   ;;  %v3778_v19 = vld [vmem:[%s4085_s26 + $0x1e0] ss:$20 sps:$4 sm:$0xff]   ;;  %v3792_v26 = vld [vmem:[%s4085_s26 + $0x208] ss:$20 sps:$4 sm:$0xff]   ;;  %s4269_s16 = scalar_lea.vmem %s4762_s0, %s3752_s11 }
  0x12   : > { %v3783_v12 = vld [vmem:[%s4085_s26 + $0x4] ss:$20 sps:$4 sm:$0xff]   ;;  %1372 = vmatprep.mubr.bf16.mxu1 %v3780_v11  ;;  %v3781_v20 = vld [vmem:[%s4085_s26] ss:$20 sps:$4 sm:$0xff]   ;;  %v3794_v28 = vld [vmem:[%s4085_s26 + $0x28] ss:$20 sps:$4 sm:$0xff]  }
  0x13   : > { %3651 = vmatpush3.bf16.msra.mxu1 %v3769_v7  ;;  %3137 = vmatpush3.bf16.msra.mxu0 %v3769_v7  ;;  %v3788_v22 = vld [vmem:[%s4085_s26 + $0x20c] ss:$20 sps:$4 sm:$0xff]   ;;  %v3798_v31 = vld [vmem:[%s4085_s26 + $0x234] ss:$20 sps:$4 sm:$0xff]   ;;  %v3802_v35 = vld [vmem:[%s4085_s26 + $0x230] ss:$20 sps:$4 sm:$0xff]  }
  0x14   : > { %3644 = vmatprep.subr.bf16.mxu1 %v3770_v8  ;;  %3138 = vmatprep.subr.bf16.mxu0 %v3770_v8  ;;  %v3790_v24 = vld [vmem:[%s4085_s26 + $0x2c] ss:$20 sps:$4 sm:$0xff]   ;;  %v3800_v32 = vld [vmem:[%s4085_s26 + $0x54] ss:$20 sps:$4 sm:$0xff]   ;;  %v3804_v36 = vld [vmem:[%s4085_s26 + $0x50] ss:$20 sps:$4 sm:$0xff]  }
  0x15   : > { %1276 = vmatprep.mubr.bf16.mxu0 %v3783_v12  ;;  %v3808_v39 = vld [vmem:[%s4085_s26 + $0x25c] ss:$20 sps:$4 sm:$0xff]   ;;  %v3812_v43 = vld [vmem:[%s4085_s26 + $0x258] ss:$20 sps:$4 sm:$0xff]   ;;  %v3824_v52 = vld [vmem:[%s4085_s26 + $0xa0] ss:$20 sps:$4 sm:$0xff]  }
  0x16   : > { %v3810_v40 = vld [vmem:[%s4085_s26 + $0x7c] ss:$20 sps:$4 sm:$0xff]   ;;  %v3814_v44 = vld [vmem:[%s4085_s26 + $0x78] ss:$20 sps:$4 sm:$0xff]   ;;  %v3826_v54 = vld [vmem:[%s4085_s26 + $0x34] ss:$20 sps:$4 sm:$0xff]  }
  0x17   : > { %3652 = vmatpush3.bf16.msra.mxu1 %v3771_v9  ;;  %3139 = vmatpush3.bf16.msra.mxu0 %v3771_v9  ;;  %v3820_v46 = vld [vmem:[%s4085_s26 + $0xc] ss:$20 sps:$4 sm:$0xff]   ;;  %v3821_v48 = vld [vmem:[%s4085_s26 + $0xa4] ss:$20 sps:$4 sm:$0xff]   ;;  %v3818_v50 = vld [vmem:[%s4085_s26 + $0x8] ss:$20 sps:$4 sm:$0xff]  }
  0x18   : > { %3645 = vmatprep.subr.bf16.mxu1 %v3772_v10  ;;  %3140 = vmatprep.subr.bf16.mxu0 %v3772_v10  ;;  %v3854_v55 = vld [vmem:[%s4765_s3 + $0x100] sm:$0xff]   ;;  %v3831_v60 = vld [vmem:[%s4085_s26 + $0xc8] ss:$20 sps:$4 sm:$0xff]   ;;  %v3851_v61 = vld [vmem:[%s4764_s2 + $0x50] sm:$0xff]  }
  0x19   : > { %v3828_v56 = vld [vmem:[%s4085_s26 + $0xcc] ss:$20 sps:$4 sm:$0xff]   ;;  %v3830_v59 = vld [vmem:[%s4085_s26 + $0x30] ss:$20 sps:$4 sm:$0xff]   ;;  %v3834_v63 = vld [vmem:[%s4085_s26 + $0xf4] ss:$20 sps:$4 sm:$0xff]  }
  0x1a   : > { %v3832_v62 = vld [vmem:[%s4085_s26 + $0x5c] ss:$20 sps:$4 sm:$0xff]   ;;  %v3869_v0 = vld [vmem:[%s4765_s3 + $0x108] sm:$0xff]   ;;  %v3840_v7 = vld [vmem:[%s4085_s26 + $0x84] ss:$20 sps:$4 sm:$0xff]  }
  0x1b   : > { %3653 = vmatpush3.bf16.msra.mxu1 %v3773_v13  ;;  %3141 = vmatpush3.bf16.msra.mxu0 %v3773_v13  ;;  %v3853_v1 = vld [vmem:[%s4764_s2 + $0x10] sm:$0xff]   ;;  %v3866_v2 = vld [vmem:[%s4764_s2 + $0x58] sm:$0xff]   ;;  %v3882_v10 = vld [vmem:[%s4764_s2 + $0x60] sm:$0xff]  }
  0x1c   : > { %3646 = vmatprep.subr.bf16.mxu1 %v3774_v14  ;;  %3142 = vmatprep.subr.bf16.mxu0 %v3774_v14  ;;  %v3876_v3 = vld [vmem:[%s4765_s3 + $0x110] sm:$0xff]   ;;  %v3836_v4 = vld [vmem:[%s4085_s26 + $0x58] ss:$20 sps:$4 sm:$0xff]   ;;  %v3884_v11 = vld [vmem:[%s4764_s2 + $0x20] sm:$0xff]  }
  0x1d   : > { %v3838_v5 = vld [vmem:[%s4085_s26 + $0xf0] ss:$20 sps:$4 sm:$0xff]   ;;  %v3868_v6 = vld [vmem:[%s4764_s2 + $0x18] sm:$0xff]   ;;  %v3844_v12 = vld [vmem:[%s4085_s26 + $0x80] ss:$20 sps:$4 sm:$0xff]  }
  0x1e   : > { %v3877_v8 = vld [vmem:[%s4765_s3 + $0x118] sm:$0xff]   ;;  %v3846_v14 = vld [vmem:[%s4085_s26 + $0xac] ss:$20 sps:$4 sm:$0xff]  }
  0x1f   : > { %3654 = vmatpush3.bf16.msra.mxu1 %v3775_v15  ;;  %3143 = vmatpush3.bf16.msra.mxu0 %v3775_v15  ;;  %v3842_v9 = vld [vmem:[%s4085_s26 + $0x11c] ss:$20 sps:$4 sm:$0xff]   ;;  %v3845_v13 = vld [vmem:[%s4085_s26 + $0x118] ss:$20 sps:$4 sm:$0xff]  }
  0x20   : > { %3647 = vmatprep.subr.bf16.mxu1 %v3776_v16  ;;  %3144 = vmatprep.subr.bf16.mxu0 %v3776_v16  ;;  %v3848_v15 = vld [vmem:[%s4085_s26 + $0x144] ss:$20 sps:$4 sm:$0xff]   ;;  %v3894_v16 = vld [vmem:[%s4764_s2 + $0x68] sm:$0xff]  }
  0x23   : > { %3655 = vmatpush3.bf16.msra.mxu1 %v3777_v17  ;;  %3145 = vmatpush3.bf16.msra.mxu0 %v3777_v17  ;;  %v3896_v17 = vld [vmem:[%s4764_s2 + $0x28] sm:$0xff]  }
  0x24   : > { %3242 = vmatprep.subr.bf16.mxu1 %v3784_v18  ;;  %3524 = vmatprep.subr.bf16.mxu0 %v3854_v55  ;;  %v3850_v18 = vld [vmem:[%s4085_s26 + $0xa8] ss:$20 sps:$4 sm:$0xff]  }
  0x26   : > { %1373 = vmatmul.mubr.bf16.vlgmr.msra.gmra.mrb[0].mxu1 %v3778_v19  ;;  %1277 = vmatmul.mubr.bf16.vlgmr.msra.gmra.mrb[0].mxu0 %v3781_v20  ;;  %v3852_v19 = vld [vmem:[%s4085_s26 + $0x140] ss:$20 sps:$4 sm:$0xff]  }
  0x27   : > { %3243 = vmatpush3.bf16.msra.mxu1 %v3785_v21  ;;  %1380 = vmatprep.mubr.bf16.mxu1 %v3788_v22  ;;  %v3855_v20 = vld [vmem:[%s4085_s26 + $0xd4] ss:$20 sps:$4 sm:$0xff]   ;;  %v3857_v21 = vld [vmem:[%s4085_s26 + $0x16c] ss:$20 sps:$4 sm:$0xff]  }
  0x28   : > { %3244 = vmatprep.subr.bf16.mxu1 %v3786_v23  ;;  %1284 = vmatprep.mubr.bf16.mxu0 %v3790_v24  ;;  %v3906_v22 = vld [vmem:[%s4764_s2 + $0x70] sm:$0xff]  }
  0x29   : > { %3525 = vmatpush3.bf16.msra.mxu0 %v3854_v55  ;;  %v3908_v23 = vld [vmem:[%s4764_s2 + $0x30] sm:$0xff]  }
  0x2a   : > { %3526 = vmatprep.subr.bf16.mxu0 %v3869_v0  ;;  %v3859_v24 = vld [vmem:[%s4085_s26 + $0xd0] ss:$20 sps:$4 sm:$0xff]  }
  0x2b   : > { %3245 = vmatpush3.bf16.msra.mxu1 %v3787_v25  ;;  %v3860_v25 = vld [vmem:[%s4085_s26 + $0x168] ss:$20 sps:$4 sm:$0xff]   ;;  %v3905_v55 = vld [vmem:[%s4085_s26 + $0x150] ss:$20 sps:$4 sm:$0xff]  }
  0x2c   : > { %3246 = vmatprep.subr.bf16.mxu1 %v3793_v27  ;;  %v3863_v27 = vld [vmem:[%s4085_s26 + $0x194] ss:$20 sps:$4 sm:$0xff]  }
  0x2d   : > { %3527 = vmatpush3.bf16.msra.mxu0 %v3869_v0  ;;  %v3916_v0 = vld [vmem:[%s4085_s26 + $0x238] ss:$20 sps:$4 sm:$0xff]  }
  0x2e   : > { %1381 = vmatmul.mubr.bf16.gmra.mrb[4].mxu1 %v3792_v26  ;;  %1285 = vmatmul.mubr.bf16.gmra.mrb[4].mxu0 %v3794_v28  ;;  %v3861_v26 = vld [vmem:[%s4085_s26 + $0xfc] ss:$20 sps:$4 sm:$0xff]  }
  0x2f   : > { %3247 = vmatpush3.bf16.msra.mxu1 %v3795_v29  ;;  %1388 = vmatprep.mubr.bf16.mxu1 %v3798_v31  ;;  %v3918_v28 = vld [vmem:[%s4764_s2 + $0x78] sm:$0xff]   ;;  %v3867_v31 = vld [vmem:[%s4085_s26 + $0x190] ss:$20 sps:$4 sm:$0xff]  }
  0x30   : > { %3248 = vmatprep.subr.bf16.mxu1 %v3796_v30  ;;  %1292 = vmatprep.mubr.bf16.mxu0 %v3800_v32  ;;  %v3920_v29 = vld [vmem:[%s4764_s2 + $0x38] sm:$0xff]  }
  0x31   : > { %3528 = vmatprep.subr.bf16.mxu0 %v3876_v3  ;;  %v3865_v30 = vld [vmem:[%s4085_s26 + $0xf8] ss:$20 sps:$4 sm:$0xff]  }
  0x32   : > { %3529 = vmatpush3.bf16.msra.mxu0 %v3876_v3  ;;  %v3870_v32 = vld [vmem:[%s4085_s26 + $0x124] ss:$20 sps:$4 sm:$0xff]   ;;  %v3924_v3 = vld [vmem:[%s4085_s26 + $0x240] ss:$20 sps:$4 sm:$0xff]  }
  0x33   : > { %3249 = vmatpush3.bf16.msra.mxu1 %v3797_v33  ;;  %3530 = vmatprep.subr.bf16.mxu0 %v3877_v8  ;;  %v3872_v33 = vld [vmem:[%s4085_s26 + $0x1bc] ss:$20 sps:$4 sm:$0xff]  }
  0x34   : > { %3250 = vmatprep.subr.bf16.mxu1 %v3803_v34  ;;  %v3926_v34 = vld [vmem:[%s4764_s2 + $0x80] sm:$0xff]  }
  0x36   : > { %1389 = vmatmul.mubr.bf16.gmra.mrb[8].mxu1 %v3802_v35  ;;  %1293 = vmatmul.mubr.bf16.gmra.mrb[8].mxu0 %v3804_v36  ;;  %v3874_v35 = vld [vmem:[%s4085_s26 + $0x120] ss:$20 sps:$4 sm:$0xff]   ;;  %v3875_v36 = vld [vmem:[%s4085_s26 + $0x1b8] ss:$20 sps:$4 sm:$0xff]  }
  0x37   : > { %3251 = vmatpush3.bf16.msra.mxu1 %v3805_v37  ;;  %1396 = vmatprep.mubr.bf16.mxu1 %v3808_v39  ;;  %v3878_v37 = vld [vmem:[%s4085_s26 + $0x14c] ss:$20 sps:$4 sm:$0xff]   ;;  %v3880_v39 = vld [vmem:[%s4085_s26 + $0x148] ss:$20 sps:$4 sm:$0xff]  }
  0x38   : > { %3252 = vmatprep.subr.bf16.mxu1 %v3806_v38  ;;  %1300 = vmatprep.mubr.bf16.mxu0 %v3810_v40  ;;  %v3881_v38 = vld [vmem:[%s4085_s26 + $0x10] ss:$20 sps:$4 sm:$0xff]   ;;  %v3883_v40 = vld [vmem:[%s4085_s26 + $0x38] ss:$20 sps:$4 sm:$0xff]  }
  0x39   : > { %3531 = vmatpush3.bf16.msra.mxu0 %v3877_v8  ;;  %v3928_v8 = vld [vmem:[%s4269_s16] ss:$12 sps:$4 sm:$0xff]  }
  0x3a   : > { %3564 = vmatprep.subr.bf16.mxu0 %v3926_v34 }
  0x3b   : > { %3253 = vmatpush3.bf16.msra.mxu1 %v3807_v41  ;;  %v3885_v41 = vld [vmem:[%s4085_s26 + $0x174] ss:$20 sps:$4 sm:$0xff]  }
  0x3c   : > { %3254 = vmatprep.subr.bf16.mxu1 %v3813_v42  ;;  %v3888_v42 = vld [vmem:[%s4085_s26 + $0x60] ss:$20 sps:$4 sm:$0xff]  }
  0x3e   : > { %1397 = vmatmul.mubr.bf16.gmra.mrb[12].mxu1 %v3812_v43  ;;  %1301 = vmatmul.mubr.bf16.gmra.mrb[12].mxu0 %v3814_v44  ;;  %v3927_v43 = vld [vmem:[%s4764_s2 + $0x88] sm:$0xff]   ;;  %v3887_v44 = vld [vmem:[%s4085_s26 + $0x170] ss:$20 sps:$4 sm:$0xff]  }
  0x3f   : > { %3255 = vmatpush3.bf16.msra.mxu1 %v3815_v45  ;;  %1437 = vmatprep.mubr.bf16.mxu1 %v3820_v46  ;;  %v3889_v45 = vld [vmem:[%s4085_s26 + $0x88] ss:$20 sps:$4 sm:$0xff]  }
  0x40   : > { %3256 = vmatprep.subr.bf16.mxu1 %v3816_v47  ;;  %1308 = vmatprep.mubr.bf16.mxu0 %v3821_v48  ;;  %v3890_v46 = vld [vmem:[%s4085_s26 + $0x19c] ss:$20 sps:$4 sm:$0xff]   ;;  %v3892_v48 = vld [vmem:[%s4085_s26 + $0x198] ss:$20 sps:$4 sm:$0xff]  }
  0x41   : > { %v3893_v47 = vld [vmem:[%s4085_s26 + $0xb0] ss:$20 sps:$4 sm:$0xff]  }
  0x43   : > { %3257 = vmatpush3.bf16.msra.mxu1 %v3817_v49  ;;  %v3895_v49 = vld [vmem:[%s4085_s26 + $0xd8] ss:$20 sps:$4 sm:$0xff]  }
  0x44   : > { %3374 = vmatprep.subr.bf16.mxu1 %v3823_v51  ;;  %v3900_v51 = vld [vmem:[%s4085_s26 + $0x100] ss:$20 sps:$4 sm:$0xff]  }
  0x46   : > { %1438 = vmatmul.mubr.bf16.vlgmr.msra.gmra.mrb[16].mxu1 %v3818_v50  ;;  %1309 = vmatmul.mubr.bf16.gmra.mrb[16].mxu0 %v3824_v52  ;;  %v3897_v50 = vld [vmem:[%s4085_s26 + $0x1c4] ss:$20 sps:$4 sm:$0xff]   ;;  %v3899_v52 = vld [vmem:[%s4085_s26 + $0x1c0] ss:$20 sps:$4 sm:$0xff]  }
  0x47   : > { %3375 = vmatpush3.bf16.msra.mxu1 %v3825_v53  ;;  %1445 = vmatprep.mubr.bf16.mxu1 %v3826_v54  ;;  %v3901_v53 = vld [vmem:[%s4085_s26 + $0x128] ss:$20 sps:$4 sm:$0xff]   ;;  %v3902_v54 = vld [vmem:[%s4085_s26 + $0x1ec] ss:$20 sps:$4 sm:$0xff]  }
  0x48   : > { %1316 = vmatprep.mubr.bf16.mxu0 %v3828_v56  ;;  %3376 = vmatprep.subr.bf16.mxu1 %v3837_v57  ;;  %v3904_v56 = vld [vmem:[%s4085_s26 + $0x1e8] ss:$20 sps:$4 sm:$0xff]   ;;  %v3907_v57 = vld [vmem:[%s4085_s26 + $0x178] ss:$20 sps:$4 sm:$0xff]  }
  0x4b   : > { %3377 = vmatpush3.bf16.msra.mxu1 %v3839_v58  ;;  %v3909_v58 = vld [vmem:[%s4085_s26 + $0x214] ss:$20 sps:$4 sm:$0xff]  }
  0x4c   : > { %3378 = vmatprep.subr.bf16.mxu1 %v3851_v61  ;;  %v3913_v61 = vld [vmem:[%s4085_s26 + $0x1c8] ss:$20 sps:$4 sm:$0xff]  }
  0x4e   : > { %1446 = vmatmul.mubr.bf16.gmra.mrb[20].mxu1 %v3830_v59  ;;  %1317 = vmatmul.mubr.bf16.gmra.mrb[20].mxu0 %v3831_v60  ;;  %v3912_v59 = vld [vmem:[%s4085_s26 + $0x1a0] ss:$20 sps:$4 sm:$0xff]   ;;  %v3911_v60 = vld [vmem:[%s4085_s26 + $0x210] ss:$20 sps:$4 sm:$0xff]  }
  0x4f   : > { %1453 = vmatprep.mubr.bf16.mxu1 %v3832_v62  ;;  %1324 = vmatprep.mubr.bf16.mxu0 %v3834_v63  ;;  %v3914_v62 = vld [vmem:[%s4085_s26 + $0x23c] ss:$20 sps:$4 sm:$0xff]  }
  0x50   : > { %3379 = vmatpush3.bf16.msra.mxu1 %v3853_v1  ;;  %v3917_v63 = vld [vmem:[%s4085_s26 + $0x1f0] ss:$20 sps:$4 sm:$0xff]   ;;  %v3919_v1 = vld [vmem:[%s4085_s26 + $0x218] ss:$20 sps:$4 sm:$0xff]  }
  0x51   : > { %3380 = vmatprep.subr.bf16.mxu1 %v3866_v2  ;;  %v3921_v2 = vld [vmem:[%s4085_s26 + $0x264] ss:$20 sps:$4 sm:$0xff]  }
  0x54   : > { %3381 = vmatpush3.bf16.msra.mxu1 %v3868_v6  ;;  %v3930_v6 = vld [vmem:[%s4269_s16 + $0x4] ss:$12 sps:$4 sm:$0xff]  }
  0x55   : > { %3382 = vmatprep.subr.bf16.mxu1 %v3882_v10  ;;  %v3933_v10 = vld [vmem:[%s4269_s16 + $0x1c] ss:$12 sps:$4 sm:$0xff]  }
  0x56   : > { %1454 = vmatmul.mubr.bf16.gmra.mrb[24].mxu1 %v3836_v4  ;;  %1325 = vmatmul.mubr.bf16.gmra.mrb[24].mxu0 %v3838_v5  ;;  %v3923_v4 = vld [vmem:[%s4085_s26 + $0x260] ss:$20 sps:$4 sm:$0xff]   ;;  %v3925_v5 = vld [vmem:[%s4085_s26 + $0x268] ss:$20 sps:$4 sm:$0xff]  }
  0x57   : > { %1461 = vmatprep.mubr.bf16.mxu1 %v3840_v7  ;;  %1332 = vmatprep.mubr.bf16.mxu0 %v3842_v9  ;;  %v3931_v7 = vld [vmem:[%s4269_s16 + $0x8] ss:$12 sps:$4 sm:$0xff]   ;;  %v3932_v9 = vld [vmem:[%s4269_s16 + $0x20] ss:$12 sps:$4 sm:$0xff]  }
  0x58   : > { %3383 = vmatpush3.bf16.msra.mxu1 %v3884_v11  ;;  %v3936_v11 = vld [vmem:[%s4269_s16 + $0x38] ss:$12 sps:$4 sm:$0xff]  }
  0x59   : > { %3384 = vmatprep.subr.bf16.mxu1 %v3894_v16  ;;  %v3940_v16 = vld [vmem:[%s4269_s16 + $0x30] ss:$12 sps:$4 sm:$0xff]  }
  0x5c   : > { %3385 = vmatpush3.bf16.msra.mxu1 %v3896_v17  ;;  %v3942_v17 = vld [vmem:[%s4269_s16 + $0x80] ss:$12 sps:$4 sm:$0xff]  }
  0x5d   : > { %3386 = vmatprep.subr.bf16.mxu1 %v3906_v22  ;;  %v3948_v22 = vld [vmem:[%s4269_s16 + $0x64] ss:$12 sps:$4 sm:$0xff]  }
  0x5e   : > { %1462 = vmatmul.mubr.bf16.gmra.mrb[28].mxu1 %v3844_v12  ;;  %1333 = vmatmul.mubr.bf16.gmra.mrb[28].mxu0 %v3845_v13  ;;  %v3935_v12 = vld [vmem:[%s4269_s16 + $0x18] ss:$12 sps:$4 sm:$0xff]   ;;  %v3937_v13 = vld [vmem:[%s4269_s16 + $0x50] ss:$12 sps:$4 sm:$0xff]  }
  0x5f   : > { %1469 = vmatprep.mubr.bf16.mxu1 %v3846_v14  ;;  %1340 = vmatprep.mubr.bf16.mxu0 %v3848_v15  ;;  %v3938_v14 = vld [vmem:[%s4269_s16 + $0x34] ss:$12 sps:$4 sm:$0xff]  }
  0x60   : > { %3387 = vmatpush3.bf16.msra.mxu1 %v3908_v23  ;;  %v3941_v15 = vld [vmem:[%s4269_s16 + $0x68] ss:$12 sps:$4 sm:$0xff]  }
  0x61   : > { %3388 = vmatprep.subr.bf16.mxu1 %v3918_v28  ;;  %v3951_v23 = vld [vmem:[%s4269_s16 + $0xc8] ss:$12 sps:$4 sm:$0xff]   ;;  %v3955_v28 = vld [vmem:[%s4269_s16 + $0x78] ss:$12 sps:$4 sm:$0xff]  }
  0x64   : > { %3389 = vmatpush3.bf16.msra.mxu1 %v3920_v29  ;;  %v3957_v29 = vld [vmem:[%s4269_s16 + $0x110] ss:$12 sps:$4 sm:$0xff]  }
  0x66   : > { %1470 = vmatmul.mubr.bf16.gmra.mrb[32].mxu1 %v3850_v18  ;;  %1341 = vmatmul.mubr.bf16.gmra.mrb[32].mxu0 %v3852_v19  ;;  %v3943_v18 = vld [vmem:[%s4269_s16 + $0x4c] ss:$12 sps:$4 sm:$0xff]  }
  0x67   : > { %1477 = vmatprep.mubr.bf16.mxu1 %v3855_v20  ;;  %1348 = vmatprep.mubr.bf16.mxu0 %v3857_v21  ;;  %v3946_v19 = vld [vmem:[%s4269_s16 + $0x98] ss:$12 sps:$4 sm:$0xff]   ;;  %v3945_v20 = vld [vmem:[%s4269_s16 + $0x48] ss:$12 sps:$4 sm:$0xff]   ;;  %v3947_v21 = vld [vmem:[%s4269_s16 + $0xb0] ss:$12 sps:$4 sm:$0xff]  }
  0x6e   : > { %1478 = vmatmul.mubr.bf16.gmra.mrb[36].mxu1 %v3859_v24  ;;  %1349 = vmatmul.mubr.bf16.gmra.mrb[36].mxu0 %v3860_v25  ;;  %v3950_v24 = vld [vmem:[%s4269_s16 + $0x60] ss:$12 sps:$4 sm:$0xff]  }
  0x6f   : > { %1485 = vmatprep.mubr.bf16.mxu1 %v3861_v26  ;;  %1356 = vmatprep.mubr.bf16.mxu0 %v3863_v27  ;;  %v3952_v25 = vld [vmem:[%s4269_s16 + $0xe0] ss:$12 sps:$4 sm:$0xff]   ;;  %v3953_v26 = vld [vmem:[%s4269_s16 + $0x7c] ss:$12 sps:$4 sm:$0xff]   ;;  %v3956_v27 = vld [vmem:[%s4269_s16 + $0xf8] ss:$12 sps:$4 sm:$0xff]  }
  0x76   : > { %1486 = vmatmul.mubr.bf16.gmra.mrb[40].mxu1 %v3865_v30  ;;  %1357 = vmatmul.mubr.bf16.gmra.mrb[40].mxu0 %v3867_v31  ;;  %v3958_v30 = vld [vmem:[%s4269_s16 + $0x94] ss:$12 sps:$4 sm:$0xff]  }
  0x77   : > { %1493 = vmatprep.mubr.bf16.mxu1 %v3870_v32  ;;  %1364 = vmatprep.mubr.bf16.mxu0 %v3872_v33  ;;  %v3961_v31 = vld [vmem:[%s4269_s16 + $0x128] ss:$12 sps:$4 sm:$0xff]   ;;  %v3960_v32 = vld [vmem:[%s4269_s16 + $0x90] ss:$12 sps:$4 sm:$0xff]   ;;  %v3962_v33 = vld [vmem:[%s4269_s16 + $0x140] ss:$12 sps:$4 sm:$0xff]  }
  0x7e   : > { %1494 = vmatmul.mubr.bf16.gmra.mrb[44].mxu1 %v3874_v35  ;;  %1365 = vmatmul.mubr.bf16.gmra.mrb[44].mxu0 %v3875_v36  ;;  %v3966_v35 = vld [vmem:[%s4269_s16 + $0x158] ss:$12 sps:$4 sm:$0xff]  }
  0x7f   : > { %1501 = vmatprep.mubr.bf16.mxu1 %v3878_v37  ;;  %3532 = vmatprep.mubr.msk.bf16.mxu0 %vm1195_vm0, %v3881_v38 }
  0x86   : > { %1502 = vmatmul.mubr.bf16.gmra.mrb[48].mxu1 %v3880_v39  ;;  %3533 = vmatmul.mubr.msk.bf16.vlgmr.msra.gmra.mrb[48].mxu0 %vm1195_vm0, %v3883_v40  ;;  %v3965_v39 = vld [vmem:[%s4269_s16 + $0xa8] ss:$12 sps:$4 sm:$0xff]   ;;  %v3967_v40 = vld [vmem:[%s4269_s16 + $0x170] ss:$12 sps:$4 sm:$0xff]  }
  0x87   : > { %1509 = vmatprep.mubr.bf16.mxu1 %v3885_v41  ;;  %3536 = vmatprep.mubr.msk.bf16.mxu0 %vm1195_vm0, %v3888_v42 }
  0x88   : > { %3565 = vmatpush3.bf16.msra.mxu0 %v3926_v34  ;;  %v3963_v34 = vld [vmem:[%s4269_s16 + $0xac] ss:$12 sps:$4 sm:$0xff]  }
  0x89   : > { %3566 = vmatprep.subr.bf16.mxu0 %v3927_v43 }
  0x8c   : > { %3567 = vmatpush3.bf16.msra.mxu0 %v3927_v43 }
  0x8e   : > { %1510 = vmatmul.mubr.bf16.gmra.mrb[52].mxu1 %v3887_v44  ;;  %3537 = vmatmul.mubr.msk.bf16.gmra.mrb[52].mxu0 %vm1195_vm0, %v3889_v45  ;;  %v3968_v44 = vld [vmem:[%s4269_s16 + $0xc4] ss:$12 sps:$4 sm:$0xff]  }
  0x8f   : > { %1517 = vmatprep.mubr.bf16.mxu1 %v3890_v46  ;;  %3540 = vmatprep.mubr.msk.bf16.mxu0 %vm1195_vm0, %v3893_v47 }
  0x96   : > { %1518 = vmatmul.mubr.bf16.gmra.mrb[56].mxu1 %v3892_v48  ;;  %3541 = vmatmul.mubr.msk.bf16.gmra.mrb[56].mxu0 %vm1195_vm0, %v3895_v49 }
  0x97   : > { %1525 = vmatprep.mubr.bf16.mxu1 %v3897_v50  ;;  %3544 = vmatprep.mubr.msk.bf16.mxu0 %vm1195_vm0, %v3900_v51 }
  0x9e   : > { %1526 = vmatmul.mubr.bf16.gmra.mrb[60].mxu1 %v3899_v52  ;;  %3545 = vmatmul.mubr.msk.bf16.gmra.mrb[60].mxu0 %vm1195_vm0, %v3901_v53 }
  0x9f   : > { %1533 = vmatprep.mubr.bf16.mxu1 %v3902_v54  ;;  %3548 = vmatprep.mubr.msk.bf16.mxu0 %vm1195_vm0, %v3905_v55  ;;  %v3970_v54 = vld [vmem:[%s4269_s16 + $0xc0] ss:$12 sps:$4 sm:$0xff]  }
  0xa6   : > { %1534 = vmatmul.mubr.bf16.gmra.mrb[64].mxu1 %v3904_v56  ;;  %3549 = vmatmul.mubr.msk.bf16.gmra.mrb[64].mxu0 %vm1195_vm0, %v3907_v57 }
  0xa7   : > { %1541 = vmatprep.mubr.bf16.mxu1 %v3909_v58  ;;  %3552 = vmatprep.mubr.msk.bf16.mxu0 %vm1195_vm0, %v3912_v59  ;;  %v3971_v58 = vld [vmem:[%s4269_s16 + $0xdc] ss:$12 sps:$4 sm:$0xff]  }
  0xae   : > { %1542 = vmatmul.mubr.bf16.gmra.mrb[68].mxu1 %v3911_v60  ;;  %3553 = vmatmul.mubr.msk.bf16.gmra.mrb[68].mxu0 %vm1195_vm0, %v3913_v61 }
  0xaf   : > { %1549 = vmatprep.mubr.bf16.mxu1 %v3914_v62  ;;  %3556 = vmatprep.mubr.msk.bf16.mxu0 %vm1195_vm0, %v3917_v63 }
  0xb6   : > { %1550 = vmatmul.mubr.bf16.gmra.mrb[72].mxu1 %v3916_v0  ;;  %3557 = vmatmul.mubr.msk.bf16.gmra.mrb[72].mxu0 %vm1195_vm0, %v3919_v1 }
  0xb7   : > { %1557 = vmatprep.mubr.bf16.mxu1 %v3921_v2  ;;  %3560 = vmatprep.mubr.msk.bf16.mxu0 %vm1195_vm0, %v3924_v3 }
  0xbe   : > { %1558 = vmatmul.mubr.bf16.gmra.mrb[76].mxu1 %v3923_v4  ;;  %3561 = vmatmul.mubr.msk.bf16.gmra.mrb[76].mxu0 %vm1195_vm0, %v3925_v5  ;;  %v3973_v4 = vld [vmem:[%s4269_s16 + $0xd8] ss:$12 sps:$4 sm:$0xff]  }
  0xbf   : > { %2156 = vmatprep.mubr.bf16.mxu1 %v3930_v6  ;;  %3568 = vmatprep.mubr.msk.bf16.mxu0 %vm2075_vm1, %v3931_v7 }
  0xc6   : > { %2157 = vmatmul.mubr.bf16.vlgmr.msra.gmra.mrb[80].mxu1 %v3928_v8  ;;  %3569 = vmatmul.mubr.msk.bf16.vlgmr.msra.gmra.mrb[48].mxu0 %vm2075_vm1, %v3932_v9  ;;  %v3974_v8 = vld [vmem:[%s4269_s16 + $0xf4] ss:$12 sps:$4 sm:$0xff]  }
  0xc7   : > { %2164 = vmatprep.mubr.bf16.mxu1 %v3933_v10  ;;  %3572 = vmatprep.mubr.msk.bf16.mxu0 %vm2075_vm1, %v3936_v11 }
  0xce   : > { %2165 = vmatmul.mubr.bf16.gmra.mrb[84].mxu1 %v3935_v12  ;;  %3573 = vmatmul.mubr.msk.bf16.gmra.mrb[52].mxu0 %vm2075_vm1, %v3937_v13 }
  0xcf   : > { %2172 = vmatprep.mubr.bf16.mxu1 %v3938_v14  ;;  %3576 = vmatprep.mubr.msk.bf16.mxu0 %vm2075_vm1, %v3941_v15 }
  0xd6   : > { %2173 = vmatmul.mubr.bf16.gmra.mrb[88].mxu1 %v3940_v16  ;;  %3577 = vmatmul.mubr.msk.bf16.gmra.mrb[56].mxu0 %vm2075_vm1, %v3942_v17 }
  0xd7   : > { %2180 = vmatprep.mubr.bf16.mxu1 %v3943_v18  ;;  %3580 = vmatprep.mubr.msk.bf16.mxu0 %vm2075_vm1, %v3946_v19  ;;  %v3976_v18 = vld [vmem:[%s4269_s16 + $0xf0] ss:$12 sps:$4 sm:$0xff]  }
  0xde   : > { %2181 = vmatmul.mubr.bf16.gmra.mrb[92].mxu1 %v3945_v20  ;;  %3581 = vmatmul.mubr.msk.bf16.gmra.mrb[60].mxu0 %vm2075_vm1, %v3947_v21 }
  0xdf   : > { %2188 = vmatprep.mubr.bf16.mxu1 %v3948_v22  ;;  %3584 = vmatprep.mubr.msk.bf16.mxu0 %vm2075_vm1, %v3951_v23  ;;  %v3977_v22 = vld [vmem:[%s4269_s16 + $0x10c] ss:$12 sps:$4 sm:$0xff]  }
  0xe6   : > { %2189 = vmatmul.mubr.bf16.gmra.mrb[96].mxu1 %v3950_v24  ;;  %3585 = vmatmul.mubr.msk.bf16.gmra.mrb[64].mxu0 %vm2075_vm1, %v3952_v25 }
  0xe7   : > { %2196 = vmatprep.mubr.bf16.mxu1 %v3953_v26  ;;  %3588 = vmatprep.mubr.msk.bf16.mxu0 %vm2075_vm1, %v3956_v27 }
  0xee   : > { %2197 = vmatmul.mubr.bf16.gmra.mrb[100].mxu1 %v3955_v28  ;;  %3589 = vmatmul.mubr.msk.bf16.gmra.mrb[68].mxu0 %vm2075_vm1, %v3957_v29 }
  0xef   : > { %2204 = vmatprep.mubr.bf16.mxu1 %v3958_v30  ;;  %3592 = vmatprep.mubr.msk.bf16.mxu0 %vm2075_vm1, %v3961_v31 }
  0xf6   : > { %2205 = vmatmul.mubr.bf16.gmra.mrb[104].mxu1 %v3960_v32  ;;  %3593 = vmatmul.mubr.msk.bf16.gmra.mrb[72].mxu0 %vm2075_vm1, %v3962_v33  ;;  %v3979_v32 = vld [vmem:[%s4269_s16 + $0x108] ss:$12 sps:$4 sm:$0xff]  }
  0xf7   : > { %2212 = vmatprep.mubr.bf16.mxu1 %v3963_v34  ;;  %3596 = vmatprep.mubr.msk.bf16.mxu0 %vm2075_vm1, %v3966_v35 }
  0xf9   : > { %v3218_v36 = vpop.f32.mrb[0].mxu1  ;;  %v3146_v37 = vpop.f32.mrb[0].mxu0 }
  0xfa   : > { %v3219_v38 = vpop.f32.mrb[1].mxu1  ;;  %v3147_v41 = vpop.f32.mrb[1].mxu0 }
  0xfb   : > { %v4371_v42 = vadd.f32 %v3219_v38, %v3218_v36  ;;  %v3221_v43 = vpop.f32.mrb[2].mxu1  ;;  %v4374_v45 = vadd.f32 %v3147_v41, %v3146_v37  ;;  %v3149_v46 = vpop.f32.mrb[2].mxu0  ;;  %v3980_v36 = vld [vmem:[%s4269_s16 + $0x124] ss:$12 sps:$4 sm:$0xff]  }
  0xfc   : > { %v3222_v47 = vpop.f32.mrb[3].mxu1  ;;  %v3150_v48 = vpop.f32.mrb[3].mxu0 }
  0xfd   : > { %v4376_v49 = vadd.f32 %v3222_v47, %v3221_v43  ;;  %v4378_v50 = vadd.f32 %v3150_v48, %v3149_v46  ;;  %v3992_v47 = vld [vmem:[%s4767_s5] sm:$0xff]  }
  0xfe   : > { %2213 = vmatmul.mubr.bf16.gmra.mrb[108].mxu1 %v3965_v39  ;;  %3597 = vmatmul.mubr.msk.bf16.gmra.mrb[76].mxu0 %vm2075_vm1, %v3967_v40 }
  0xff   : > { %2220 = vmatprep.mubr.bf16.mxu1 %v3968_v44  ;;  %3600 = vmatprep.subr.bf16.mxu0 %v3992_v47 }
 0x100   : > { %3601 = vmatpush3.bf16.msra.mxu0 %v3992_v47 }
 0x101   : > { %v3224_v51 = vpop.f32.mrb[4].mxu1  ;;  %v3152_v52 = vpop.f32.mrb[4].mxu0 }
 0x102   : > { %v3225_v53 = vpop.f32.mrb[5].mxu1  ;;  %v3153_v55 = vpop.f32.mrb[5].mxu0 }
 0x103   : > { %v4382_v56 = vadd.f32 %v3225_v53, %v3224_v51  ;;  %v3227_v57 = vpop.f32.mrb[6].mxu1  ;;  %v4385_v59 = vadd.f32 %v3153_v55, %v3152_v52  ;;  %v3155_v60 = vpop.f32.mrb[6].mxu0  ;;  %v3982_v53 = vld [vmem:[%s4269_s16 + $0x120] ss:$12 sps:$4 sm:$0xff]  }
 0x104   : > { %v3228_v61 = vpop.f32.mrb[7].mxu1  ;;  %v3156_v62 = vpop.f32.mrb[7].mxu0 }
 0x105   : > { %v4387_v63 = vadd.f32 %v3228_v61, %v3227_v57  ;;  %v4389_v0 = vadd.f32 %v3156_v62, %v3155_v60  ;;  %v3983_v57 = vld [vmem:[%s4269_s16 + $0x13c] ss:$12 sps:$4 sm:$0xff]  }
 0x106   : > { %2221 = vmatmul.mubr.bf16.gmra.mrb[112].mxu1 %v3970_v54 }
 0x107   : > { %2228 = vmatprep.mubr.bf16.mxu1 %v3971_v58 }
 0x109   : > { %v3230_v1 = vpop.f32.mrb[8].mxu1  ;;  %v3158_v2 = vpop.f32.mrb[8].mxu0 }
 0x10a   : > { %v3231_v3 = vpop.f32.mrb[9].mxu1  ;;  %v3159_v5 = vpop.f32.mrb[9].mxu0 }
 0x10b   : > { %v4392_v6 = vadd.f32 %v3231_v3, %v3230_v1  ;;  %v3233_v7 = vpop.f32.mrb[10].mxu1  ;;  %v4395_v9 = vadd.f32 %v3159_v5, %v3158_v2  ;;  %v3161_v10 = vpop.f32.mrb[10].mxu0  ;;  %v3994_v5 = vld [vmem:[%s4767_s5 + $0x10] sm:$0xff]  }
 0x10c   : > { %v3234_v11 = vpop.f32.mrb[11].mxu1  ;;  %v3162_v12 = vpop.f32.mrb[11].mxu0 }
 0x10d   : > { %v4397_v13 = vadd.f32 %v3234_v11, %v3233_v7  ;;  %v4399_v14 = vadd.f32 %v3162_v12, %v3161_v10  ;;  %v3985_v10 = vld [vmem:[%s4269_s16 + $0x138] ss:$12 sps:$4 sm:$0xff]  }
 0x10e   : > { %2229 = vmatmul.mubr.bf16.gmra.mrb[116].mxu1 %v3973_v4 }
 0x10f   : > { %2236 = vmatprep.mubr.bf16.mxu1 %v3974_v8 }
 0x111   : > { %v3236_v15 = vpop.f32.mrb[12].mxu1  ;;  %v3164_v16 = vpop.f32.mrb[12].mxu0 }
 0x112   : > { %v3237_v17 = vpop.f32.mrb[13].mxu1  ;;  %v3165_v19 = vpop.f32.mrb[13].mxu0 }
 0x113   : > { %v4402_v20 = vadd.f32 %v3237_v17, %v3236_v15  ;;  %v3239_v21 = vpop.f32.mrb[14].mxu1  ;;  %v4405_v23 = vadd.f32 %v3165_v19, %v3164_v16  ;;  %v3167_v24 = vpop.f32.mrb[14].mxu0  ;;  %v3986_v16 = vld [vmem:[%s4269_s16 + $0x154] ss:$12 sps:$4 sm:$0xff]  }
 0x114   : > { %v3240_v25 = vpop.f32.mrb[15].mxu1  ;;  %v3168_v26 = vpop.f32.mrb[15].mxu0 }
 0x115   : > { %v4407_v27 = vadd.f32 %v3240_v25, %v3239_v21  ;;  %v4409_v28 = vadd.f32 %v3168_v26, %v3167_v24 }
 0x116   : > { %2237 = vmatmul.mubr.bf16.gmra.mrb[120].mxu1 %v3976_v18  ;;  %v3995_v18 = vld [vmem:[%s4767_s5 + $0x18] sm:$0xff]  }
 0x117   : > { %2244 = vmatprep.mubr.bf16.mxu1 %v3977_v22 }
 0x119   : > { %v3258_v29 = vpop.f32.mrb[16].mxu1  ;;  %v3170_v30 = vpop.f32.mrb[16].mxu0 }
 0x11a   : > { %v3259_v31 = vpop.f32.mrb[17].mxu1  ;;  %v3171_v33 = vpop.f32.mrb[17].mxu0 }
 0x11b   : > { %v3260_v34 = vadd.f32 %v3259_v31, %v3258_v29  ;;  %v3261_v35 = vpop.f32.mrb[18].mxu1  ;;  %v4413_v37 = vadd.f32 %v3171_v33, %v3170_v30  ;;  %v3173_v38 = vpop.f32.mrb[18].mxu0 }
 0x11c   : > { %v3262_v39 = vpop.f32.mrb[19].mxu1  ;;  %v3174_v40 = vpop.f32.mrb[19].mxu0 }
 0x11d   : > { %v4416_v41 = vadd.f32 %v3260_v34, %v4374_v45  ;;  %v3263_v43 = vadd.f32 %v3262_v39, %v3261_v35  ;;  %v4418_v44 = vadd.f32 %v3174_v40, %v3173_v38 }
 0x11e   : > { %2245 = vmatmul.mubr.bf16.gmra.mrb[124].mxu1 %v3979_v32  ;;  %v3988_v32 = vld [vmem:[%s4269_s16 + $0x150] ss:$12 sps:$4 sm:$0xff]  }
 0x11f   : > { %v4421_v46 = vadd.f32 %v3263_v43, %v4378_v50  ;;  %2252 = vmatprep.mubr.bf16.mxu1 %v3980_v36  ;;  %v3993_v50 = vld [vmem:[%s4767_s5 + $0x8] sm:$0xff]  }
 0x120   : > { %3602 = vmatprep.subr.bf16.mxu0 %v3993_v50 }
 0x121   : > { %v3264_v48 = vpop.f32.mrb[20].mxu1  ;;  %v3176_v51 = vpop.f32.mrb[20].mxu0  ;;  %3603 = vmatpush3.bf16.msra.mxu0 %v3993_v50 }
 0x122   : > { %v3265_v52 = vpop.f32.mrb[21].mxu1  ;;  %v3177_v45 = vpop.f32.mrb[21].mxu0  ;;  %3604 = vmatprep.subr.bf16.mxu0 %v3994_v5 }
 0x123   : > { %v3266_v54 = vadd.f32 %v3265_v52, %v3264_v48  ;;  %v3267_v55 = vpop.f32.mrb[22].mxu1  ;;  %v4428_v58 = vadd.f32 %v3177_v45, %v3176_v51  ;;  %v3179_v60 = vpop.f32.mrb[22].mxu0  ;;  %v3991_v45 = vld [vmem:[%s4269_s16 + $0x168] ss:$12 sps:$4 sm:$0xff]  }
 0x124   : > { %v3268_v61 = vpop.f32.mrb[23].mxu1  ;;  %v3180_v62 = vpop.f32.mrb[23].mxu0 }
 0x125   : > { %v4434_v1 = vadd.f32 %v3266_v54, %v4385_v59  ;;  %v3269_v2 = vadd.f32 %v3268_v61, %v3267_v55  ;;  %v4436_v3 = vadd.f32 %v3180_v62, %v3179_v60  ;;  %3605 = vmatpush3.bf16.msra.mxu0 %v3994_v5 }
 0x126   : > { %2253 = vmatmul.mubr.bf16.gmra.mrb[128].mxu1 %v3982_v53  ;;  %3606 = vmatprep.subr.bf16.mxu0 %v3995_v18 }
 0x127   : > { %v4439_v4 = vadd.f32 %v3269_v2, %v4389_v0  ;;  %2260 = vmatprep.mubr.bf16.mxu1 %v3983_v57 }
 0x129   : > { %v3270_v7 = vpop.f32.mrb[24].mxu1  ;;  %v3182_v8 = vpop.f32.mrb[24].mxu0  ;;  %3607 = vmatpush3.bf16.msra.mxu0 %v3995_v18 }
 0x12a   : > { %v3271_v59 = vpop.f32.mrb[25].mxu1  ;;  %v3183_v11 = vpop.f32.mrb[25].mxu0 }
 0x12b   : > { %v3272_v12 = vadd.f32 %v3271_v59, %v3270_v7  ;;  %v3273_v15 = vpop.f32.mrb[26].mxu1  ;;  %v4446_v17 = vadd.f32 %v3183_v11, %v3182_v8  ;;  %v3185_v0 = vpop.f32.mrb[26].mxu0 }
 0x12c   : > { %v3274_v19 = vpop.f32.mrb[27].mxu1  ;;  %v3186_v21 = vpop.f32.mrb[27].mxu0 }
 0x12d   : > { %v4452_v22 = vadd.f32 %v3272_v12, %v4395_v9  ;;  %v3275_v24 = vadd.f32 %v3274_v19, %v3273_v15  ;;  %v4454_v25 = vadd.f32 %v3186_v21, %v3185_v0  ;;  %v3989_v9 = vld [vmem:[%s4269_s16 + $0x16c] ss:$12 sps:$4 sm:$0xff]  }
 0x12e   : > { %2261 = vmatmul.mubr.bf16.gmra.mrb[132].mxu1 %v3985_v10 }
 0x12f   : > { %v4457_v26 = vadd.f32 %v3275_v24, %v4399_v14  ;;  %2268 = vmatprep.mubr.bf16.mxu1 %v3986_v16 }
 0x131   : > { %v3276_v29 = vpop.f32.mrb[28].mxu1  ;;  %v3188_v30 = vpop.f32.mrb[28].mxu0 }
 0x132   : > { %v3277_v31 = vpop.f32.mrb[29].mxu1  ;;  %v3189_v33 = vpop.f32.mrb[29].mxu0 }
 0x133   : > { %v3278_v34 = vadd.f32 %v3277_v31, %v3276_v29  ;;  %v3279_v35 = vpop.f32.mrb[30].mxu1  ;;  %v4461_v36 = vadd.f32 %v3189_v33, %v3188_v30  ;;  %v3191_v38 = vpop.f32.mrb[30].mxu0 }
 0x134   : > { %v3280_v39 = vpop.f32.mrb[31].mxu1  ;;  %v3192_v40 = vpop.f32.mrb[31].mxu0 }
 0x135   : > { %v4464_v43 = vadd.f32 %v3278_v34, %v4405_v23  ;;  %v3281_v14 = vadd.f32 %v3280_v39, %v3279_v35  ;;  %v3193_v47 = vadd.f32 %v3192_v40, %v3191_v38 }
 0x136   : > { %2269 = vmatmul.mubr.bf16.gmra.mrb[136].mxu1 %v3988_v32 }
 0x137   : > { %v4467_v48 = vadd.f32 %v3281_v14, %v4409_v28  ;;  %2276 = vmatprep.mubr.bf16.mxu1 %v3989_v9 }
 0x139   : > { %v3282_v51 = vpop.f32.mrb[32].mxu1  ;;  %v3194_v52 = vpop.f32.mrb[32].mxu0 }
 0x13a   : > { %v3283_v53 = vpop.f32.mrb[33].mxu1  ;;  %v3195_v54 = vpop.f32.mrb[33].mxu0 }
 0x13b   : > { %v3284_v55 = vadd.f32 %v3283_v53, %v3282_v51  ;;  %v3285_v57 = vpop.f32.mrb[34].mxu1  ;;  %v3196_v60 = vadd.f32 %v3195_v54, %v3194_v52  ;;  %v3197_v50 = vpop.f32.mrb[34].mxu0 }
 0x13c   : > { %v3286_v61 = vpop.f32.mrb[35].mxu1  ;;  %v3198_v62 = vpop.f32.mrb[35].mxu0 }
 0x13d   : > { %v4471_v23 = vadd.f32 %v3284_v55, %v4413_v37  ;;  %v3287_v2 = vadd.f32 %v3286_v61, %v3285_v57  ;;  %v3199_v5 = vadd.f32 %v3198_v62, %v3197_v50 }
 0x13e   : > { %2277 = vmatmul.mubr.bf16.gmra.mrb[140].mxu1 %v3991_v45 }
 0x13f   : > { %v4474_v28 = vadd.f32 %v3287_v2, %v4418_v44 }
 0x141   : > { %v3288_v7 = vpop.f32.mrb[36].mxu1  ;;  %v3200_v8 = vpop.f32.mrb[36].mxu0 }
 0x142   : > { %v3289_v59 = vpop.f32.mrb[37].mxu1  ;;  %v3201_v10 = vpop.f32.mrb[37].mxu0 }
 0x143   : > { %v3290_v11 = vadd.f32 %v3289_v59, %v3288_v7  ;;  %v3291_v12 = vpop.f32.mrb[38].mxu1  ;;  %v3202_v15 = vadd.f32 %v3201_v10, %v3200_v8  ;;  %v3203_v16 = vpop.f32.mrb[38].mxu0 }
 0x144   : > { %v3292_v0 = vpop.f32.mrb[39].mxu1  ;;  %v3204_v18 = vpop.f32.mrb[39].mxu0 }
 0x145   : > { %v4477_v19 = vadd.f32 %v3290_v11, %v4428_v58  ;;  %v3293_v37 = vadd.f32 %v3292_v0, %v3291_v12  ;;  %v3205_v21 = vadd.f32 %v3204_v18, %v3203_v16 }
 0x147   : > { %v4480_v24 = vadd.f32 %v3293_v37, %v4436_v3 }
 0x149   : > { %v3294_v44 = vpop.f32.mrb[40].mxu1  ;;  %v3206_v29 = vpop.f32.mrb[40].mxu0 }
 0x14a   : > { %v3295_v30 = vpop.f32.mrb[41].mxu1  ;;  %v3207_v31 = vpop.f32.mrb[41].mxu0 }
 0x14b   : > { %v3296_v32 = vadd.f32 %v3295_v30, %v3294_v44  ;;  %v3297_v33 = vpop.f32.mrb[42].mxu1  ;;  %v3208_v34 = vadd.f32 %v3207_v31, %v3206_v29  ;;  %v3209_v35 = vpop.f32.mrb[42].mxu0 }
 0x14c   : > { %v3298_v9 = vpop.f32.mrb[43].mxu1  ;;  %v3210_v38 = vpop.f32.mrb[43].mxu0 }
 0x14d   : > { %v4483_v39 = vadd.f32 %v3296_v32, %v4446_v17  ;;  %v3299_v58 = vadd.f32 %v3298_v9, %v3297_v33  ;;  %v3211_v40 = vadd.f32 %v3210_v38, %v3209_v35 }
 0x14f   : > { %v4486_v14 = vadd.f32 %v3299_v58, %v4454_v25 }
 0x151   : > { %v3300_v3 = vpop.f32.mrb[44].mxu1  ;;  %v3212_v51 = vpop.f32.mrb[44].mxu0 }
 0x152   : > { %v3301_v52 = vpop.f32.mrb[45].mxu1  ;;  %v3213_v53 = vpop.f32.mrb[45].mxu0 }
 0x153   : > { %v3302_v45 = vadd.f32 %v3301_v52, %v3300_v3  ;;  %v3303_v54 = vpop.f32.mrb[46].mxu1  ;;  %v3214_v55 = vadd.f32 %v3213_v53, %v3212_v51  ;;  %v3215_v57 = vpop.f32.mrb[46].mxu0 }
 0x154   : > { %v3304_v50 = vpop.f32.mrb[47].mxu1  ;;  %v3216_v61 = vpop.f32.mrb[47].mxu0 }
 0x155   : > { %v4489_v62 = vadd.f32 %v3302_v45, %v4461_v36  ;;  %v3305_v17 = vadd.f32 %v3304_v50, %v3303_v54  ;;  %v3217_v2 = vadd.f32 %v3216_v61, %v3215_v57 }
 0x157   : > { %v4491_v7 = vadd.f32 %v3305_v17, %v3193_v47 }
 0x159   : > { %v3306_v8 = vpop.f32.mrb[48].mxu1 }
 0x15a   : > { %v3307_v25 = vpop.f32.mrb[49].mxu1 }
 0x15b   : > { %v3308_v59 = vadd.f32 %v3307_v25, %v3306_v8  ;;  %v3309_v10 = vpop.f32.mrb[50].mxu1 }
 0x15c   : > { %v3310_v11 = vpop.f32.mrb[51].mxu1 }
 0x15d   : > { %v4493_v12 = vadd.f32 %v3308_v59, %v3196_v60  ;;  %v3311_v16 = vadd.f32 %v3310_v11, %v3309_v10 }
 0x15f   : > { %v4495_v0 = vadd.f32 %v3311_v16, %v3199_v5 }
 0x161   : > { %v3312_v18 = vpop.f32.mrb[52].mxu1 }
 0x162   : > { %v3313_v37 = vpop.f32.mrb[53].mxu1 }
 0x163   : > { %v3314_v44 = vadd.f32 %v3313_v37, %v3312_v18  ;;  %v3315_v29 = vpop.f32.mrb[54].mxu1 }
 0x164   : > { %v3316_v36 = vpop.f32.mrb[55].mxu1 }
 0x165   : > { %v4497_v30 = vadd.f32 %v3314_v44, %v3202_v15  ;;  %v3317_v31 = vadd.f32 %v3316_v36, %v3315_v29 }
 0x167   : > { %v4499_v47 = vadd.f32 %v3317_v31, %v3205_v21 }
 0x169   : > { %v3318_v32 = vpop.f32.mrb[56].mxu1 }
 0x16a   : > { %v3319_v33 = vpop.f32.mrb[57].mxu1 }
 0x16b   : > { %v3320_v35 = vadd.f32 %v3319_v33, %v3318_v32  ;;  %v3321_v9 = vpop.f32.mrb[58].mxu1 }
 0x16c   : > { %v3322_v38 = vpop.f32.mrb[59].mxu1 }
 0x16d   : > { %v4501_v60 = vadd.f32 %v3320_v35, %v3208_v34  ;;  %v3323_v58 = vadd.f32 %v3322_v38, %v3321_v9 }
 0x16f   : > { %v4503_v5 = vadd.f32 %v3323_v58, %v3211_v40 }
 0x171   : > { %v3324_v3 = vpop.f32.mrb[60].mxu1 }
 0x172   : > { %v3325_v51 = vpop.f32.mrb[61].mxu1 }
 0x173   : > { %v3326_v52 = vadd.f32 %v3325_v51, %v3324_v3  ;;  %v3327_v53 = vpop.f32.mrb[62].mxu1 }
 0x174   : > { %v3328_v45 = vpop.f32.mrb[63].mxu1 }
 0x175   : > { %v4505_v15 = vadd.f32 %v3326_v52, %v3214_v55  ;;  %v3329_v54 = vadd.f32 %v3328_v45, %v3327_v53 }
 0x177   : > { %v4507_v21 = vadd.f32 %v3329_v54, %v3217_v2 }
 0x179   : > { %v3330_v57 = vpop.f32.mrb[64].mxu1 }
 0x17a   : > { %v3331_v50 = vpop.f32.mrb[65].mxu1 }
 0x17b   : > { %v3332_v61 = vadd.f32 %v3331_v50, %v3330_v57  ;;  %v3333_v17 = vpop.f32.mrb[66].mxu1 }
 0x17c   : > { %v3334_v8 = vpop.f32.mrb[67].mxu1 }
 0x17d   : > { %v4510_v34 = vadd.f32 %v3332_v61, %v4371_v42  ;;  %v3335_v40 = vadd.f32 %v3334_v8, %v3333_v17 }
 0x17f   : > { %v4513_v25 = vadd.f32 %v3335_v40, %v4376_v49 }
 0x181   : > { %v3336_v59 = vpop.f32.mrb[68].mxu1 }
 0x182   : > { %v3337_v10 = vpop.f32.mrb[69].mxu1 }
 0x183   : > { %v3338_v11 = vadd.f32 %v3337_v10, %v3336_v59  ;;  %v3339_v55 = vpop.f32.mrb[70].mxu1 }
 0x184   : > { %v3340_v16 = vpop.f32.mrb[71].mxu1 }
 0x185   : > { %v4516_v2 = vadd.f32 %v3338_v11, %v4382_v56  ;;  %v3341_v18 = vadd.f32 %v3340_v16, %v3339_v55 }
 0x187   : > { %v4519_v37 = vadd.f32 %v3341_v18, %v4387_v63 }
 0x189   : > { %v3342_v44 = vpop.f32.mrb[72].mxu1 }
 0x18a   : > { %v3343_v29 = vpop.f32.mrb[73].mxu1 }
 0x18b   : > { %v3344_v42 = vadd.f32 %v3343_v29, %v3342_v44  ;;  %v3345_v36 = vpop.f32.mrb[74].mxu1 }
 0x18c   : > { %v3346_v31 = vpop.f32.mrb[75].mxu1 }
 0x18d   : > { %v4522_v49 = vadd.f32 %v3344_v42, %v4392_v6  ;;  %v3347_v32 = vadd.f32 %v3346_v31, %v3345_v36 }
 0x18f   : > { %v4525_v33 = vadd.f32 %v3347_v32, %v4397_v13 }
 0x191   : > { %v3348_v35 = vpop.f32.mrb[76].mxu1 }
 0x192   : > { %v3349_v9 = vpop.f32.mrb[77].mxu1 }
 0x193   : > { %v3350_v56 = vadd.f32 %v3349_v9, %v3348_v35  ;;  %v3351_v38 = vpop.f32.mrb[78].mxu1 }
 0x194   : > { %v3352_v58 = vpop.f32.mrb[79].mxu1 }
 0x195   : > { %v4528_v63 = vadd.f32 %v3350_v56, %v4402_v20  ;;  %v3353_v3 = vadd.f32 %v3352_v58, %v3351_v38  ;;  %v4537_v20 = vld [vmem:[%s4766_s4] ss:$0 sm:$0xff] }
 0x197   : > { %v4531_v51 = vadd.f32 %v3353_v3, %v4407_v27 }
 0x199   : > { %v3390_v52 = vpop.f32.mrb[80].mxu1  ;;  %v3570_v53 = vpop.f32.mrb[48].mxu0 }
 0x19a   : > { %v3391_v6 = vpop.f32.mrb[81].mxu1  ;;  %v2319_v45 = vpop.f32.mrb[49].mxu0 }
 0x19b   : > { %v3392_v54 = vadd.f32 %v3391_v6, %v3390_v52  ;;  %v3393_v57 = vpop.f32.mrb[82].mxu1  ;;  %v3571_v13 = vpop.f32.mrb[50].mxu0 }
 0x19c   : > { %v3394_v50 = vpop.f32.mrb[83].mxu1  ;;  %v2322_v61 = vpop.f32.mrb[51].mxu0 }
 0x19d   : > { %v3658_v17 = vadd.f32 %v3392_v54, %v4416_v41  ;;  %v3395_v8 = vadd.f32 %v3394_v50, %v3393_v57 }
 0x19f   : > { %v3659_v40 = vadd.f32 %v3658_v17, %v2319_v45  ;;  %v3662_v27 = vadd.f32 %v3395_v8, %v4421_v46 }
 0x1a1   : > { %v2453_v59 = vadd.f32 %v3659_v40, %v4537_v20  ;;  %v3663_v10 = vadd.f32 %v3662_v27, %v2322_v61  ;;  %v3396_v11 = vpop.f32.mrb[84].mxu1  ;;  %v3574_v55 = vpop.f32.mrb[52].mxu0 }
 0x1a2   : > { %v3397_v16 = vpop.f32.mrb[85].mxu1  ;;  %v2335_v18 = vpop.f32.mrb[53].mxu0 }
 0x1a3   : > { %v2454_v44 = vadd.f32 %v3663_v10, %v4537_v20  ;;  %v3398_v29 = vadd.f32 %v3397_v16, %v3396_v11  ;;  %v3399_v41 = vpop.f32.mrb[86].mxu1  ;;  %v3575_v42 = vpop.f32.mrb[54].mxu0  ;;  %v2485_v32 = vmax.f32 %v2453_v59, 0.0 }
 0x1a4   : > { %v3400_v36 = vpop.f32.mrb[87].mxu1  ;;  %v2338_v31 = vpop.f32.mrb[55].mxu0 }
 0x1a5   : > { %v2486_v35 = vmax.f32 %v2454_v44, 0.0  ;;  %v3656_v9 = vadd.f32 %v3398_v29, %v4434_v1  ;;  %v3401_v56 = vadd.f32 %v3400_v36, %v3399_v41 }
 0x1a7   : > { %v2517_v46 = vpack.c.bf16 %v2486_v35, %v2485_v32  ;;  %v3657_v38 = vadd.f32 %v3656_v9, %v3570_v53  ;;  %v3660_v58 = vadd.f32 %v3401_v56, %v4439_v4 }
 0x1a9   : > { %v2455_v3 = vadd.f32 %v3657_v38, %v4537_v20  ;;  %v3661_v52 = vadd.f32 %v3660_v58, %v3571_v13  ;;  %v3402_v6 = vpop.f32.mrb[88].mxu1  ;;  %3608 = vmatprep.mubr.msk.bf16.mxu0 %vm1195_vm0, %v2517_v46  ;;  %v4546_v45 = vpop.f32.mrb[56].mxu0 }
 0x1aa   : > { %v3403_v54 = vpop.f32.mrb[89].mxu1  ;;  %v2351_v57 = vpop.f32.mrb[57].mxu0 }
 0x1ab   : > { %v2456_v50 = vadd.f32 %v3661_v52, %v4537_v20  ;;  %v3404_v61 = vadd.f32 %v3403_v54, %v3402_v6  ;;  %v3405_v17 = vpop.f32.mrb[90].mxu1  ;;  %v4549_v1 = vpop.f32.mrb[58].mxu0  ;;  %v2487_v40 = vmax.f32 %v2455_v3, 0.0 }
 0x1ac   : > { %v3406_v8 = vpop.f32.mrb[91].mxu1  ;;  %v2354_v53 = vpop.f32.mrb[59].mxu0 }
 0x1ad   : > { %v2488_v4 = vmax.f32 %v2456_v50, 0.0  ;;  %v3666_v27 = vadd.f32 %v3404_v61, %v4452_v22  ;;  %v3407_v13 = vadd.f32 %v3406_v8, %v3405_v17 }
 0x1af   : > { %v2518_v59 = vpack.c.bf16 %v2488_v4, %v2487_v40  ;;  %v3667_v10 = vadd.f32 %v3666_v27, %v2335_v18  ;;  %v3670_v11 = vadd.f32 %v3407_v13, %v4457_v26 }
 0x1b1   : > { %v2457_v16 = vadd.f32 %v3667_v10, %v4537_v20  ;;  %v3671_v44 = vadd.f32 %v3670_v11, %v2338_v31  ;;  %v3408_v29 = vpop.f32.mrb[92].mxu1  ;;  %3609 = vmatmul.mubr.msk.bf16.vlgmr.msra.gmra.mrb[80].mxu0 %vm1195_vm0, %v2518_v59  ;;  %v4555_v41 = vpop.f32.mrb[60].mxu0 }
 0x1b2   : > { %v3409_v36 = vpop.f32.mrb[93].mxu1  ;;  %v4557_v32 = vpop.f32.mrb[61].mxu0 }
 0x1b3   : > { %v2458_v35 = vadd.f32 %v3671_v44, %v4537_v20  ;;  %v3410_v9 = vadd.f32 %v3409_v36, %v3408_v29  ;;  %v3411_v22 = vpop.f32.mrb[94].mxu1  ;;  %v4560_v56 = vpop.f32.mrb[62].mxu0  ;;  %v2489_v26 = vmax.f32 %v2457_v16, 0.0 }
 0x1b4   : > { %v3412_v18 = vpop.f32.mrb[95].mxu1  ;;  %v4562_v46 = vpop.f32.mrb[63].mxu0 }
 0x1b5   : > { %v2490_v38 = vmax.f32 %v2458_v35, 0.0  ;;  %v3664_v31 = vadd.f32 %v3410_v9, %v4464_v43  ;;  %v3413_v58 = vadd.f32 %v3412_v18, %v3411_v22 }
 0x1b7   : > { %v3665_v3 = vadd.f32 %v3664_v31, %v3574_v55  ;;  %v3668_v52 = vadd.f32 %v3413_v58, %v4467_v48  ;;  %v2519_v6 = vpack.c.bf16 %v2490_v38, %v2489_v26 }
 0x1b9   : > { %v2459_v54 = vadd.f32 %v3665_v3, %v4537_v20  ;;  %v3669_v50 = vadd.f32 %v3668_v52, %v3575_v42  ;;  %v3414_v61 = vpop.f32.mrb[96].mxu1  ;;  %3612 = vmatprep.mubr.msk.bf16.mxu0 %vm1195_vm0, %v2519_v6  ;;  %v4568_v17 = vpop.f32.mrb[64].mxu0 }
 0x1ba   : > { %v3415_v8 = vpop.f32.mrb[97].mxu1  ;;  %v4570_v40 = vpop.f32.mrb[65].mxu0 }
 0x1bb   : > { %v2460_v4 = vadd.f32 %v3669_v50, %v4537_v20  ;;  %v3416_v27 = vadd.f32 %v3415_v8, %v3414_v61  ;;  %v3417_v43 = vpop.f32.mrb[98].mxu1  ;;  %v4573_v13 = vpop.f32.mrb[66].mxu0  ;;  %v2491_v59 = vmax.f32 %v2459_v54, 0.0 }
 0x1bc   : > { %v3418_v55 = vpop.f32.mrb[99].mxu1  ;;  %v4575_v48 = vpop.f32.mrb[67].mxu0 }
 0x1bd   : > { %v2492_v10 = vmax.f32 %v2460_v4, 0.0  ;;  %v3674_v42 = vadd.f32 %v3416_v27, %v4471_v23  ;;  %v3419_v11 = vadd.f32 %v3418_v55, %v3417_v43 }
 0x1bf   : > { %v3675_v16 = vadd.f32 %v3674_v42, %v2351_v57  ;;  %v3678_v44 = vadd.f32 %v3419_v11, %v4474_v28  ;;  %v2520_v29 = vpack.c.bf16 %v2492_v10, %v2491_v59 }
 0x1c1   : > { %v2461_v36 = vadd.f32 %v3675_v16, %v4537_v20  ;;  %v3679_v35 = vadd.f32 %v3678_v44, %v2354_v53  ;;  %v3420_v9 = vpop.f32.mrb[100].mxu1  ;;  %3613 = vmatmul.mubr.msk.bf16.gmra.mrb[84].mxu0 %vm1195_vm0, %v2520_v29  ;;  %v4581_v22 = vpop.f32.mrb[68].mxu0 }
 0x1c2   : > { %v3421_v18 = vpop.f32.mrb[101].mxu1  ;;  %v4583_v26 = vpop.f32.mrb[69].mxu0 }
 0x1c3   : > { %v2462_v38 = vadd.f32 %v3679_v35, %v4537_v20  ;;  %v3422_v31 = vadd.f32 %v3421_v18, %v3420_v9  ;;  %v3423_v23 = vpop.f32.mrb[102].mxu1  ;;  %v4586_v58 = vpop.f32.mrb[70].mxu0  ;;  %v2493_v3 = vmax.f32 %v2461_v36, 0.0 }
 0x1c4   : > { %v3424_v57 = vpop.f32.mrb[103].mxu1  ;;  %v4588_v28 = vpop.f32.mrb[71].mxu0 }
 0x1c5   : > { %v2494_v52 = vmax.f32 %v2462_v38, 0.0  ;;  %v3672_v53 = vadd.f32 %v3422_v31, %v4477_v19  ;;  %v3425_v6 = vadd.f32 %v3424_v57, %v3423_v23 }
 0x1c7   : > { %v3673_v54 = vadd.f32 %v3672_v53, %v4546_v45  ;;  %v3676_v50 = vadd.f32 %v3425_v6, %v4480_v24  ;;  %v2521_v61 = vpack.c.bf16 %v2494_v52, %v2493_v3 }
 0x1c9   : > { %v2463_v8 = vadd.f32 %v3673_v54, %v4537_v20  ;;  %v3677_v4 = vadd.f32 %v3676_v50, %v4549_v1  ;;  %v3426_v27 = vpop.f32.mrb[104].mxu1  ;;  %3616 = vmatprep.mubr.msk.bf16.mxu0 %vm1195_vm0, %v2521_v61  ;;  %v4596_v43 = vpop.f32.mrb[72].mxu0 }
 0x1ca   : > { %v3427_v55 = vpop.f32.mrb[105].mxu1  ;;  %v4598_v59 = vpop.f32.mrb[73].mxu0 }
 0x1cb   : > { %v2464_v19 = vadd.f32 %v3677_v4, %v4537_v20  ;;  %v3428_v10 = vadd.f32 %v3427_v55, %v3426_v27  ;;  %v3429_v42 = vpop.f32.mrb[106].mxu1  ;;  %v4601_v45 = vpop.f32.mrb[74].mxu0  ;;  %v2495_v16 = vmax.f32 %v2463_v8, 0.0 }
 0x1cc   : > { %v3430_v24 = vpop.f32.mrb[107].mxu1  ;;  %v4603_v11 = vpop.f32.mrb[75].mxu0 }
 0x1cd   : > { %v2496_v44 = vmax.f32 %v2464_v19, 0.0  ;;  %v3682_v1 = vadd.f32 %v3428_v10, %v4483_v39  ;;  %v3431_v29 = vadd.f32 %v3430_v24, %v3429_v42 }
 0x1cf   : > { %v3683_v36 = vadd.f32 %v3682_v1, %v4557_v32  ;;  %v3686_v35 = vadd.f32 %v3431_v29, %v4486_v14  ;;  %v2522_v9 = vpack.c.bf16 %v2496_v44, %v2495_v16 }
 0x1d1   : > { %v2465_v18 = vadd.f32 %v3683_v36, %v4537_v20  ;;  %v3687_v38 = vadd.f32 %v3686_v35, %v4562_v46  ;;  %v3432_v31 = vpop.f32.mrb[108].mxu1  ;;  %3617 = vmatmul.mubr.msk.bf16.gmra.mrb[88].mxu0 %vm1195_vm0, %v2522_v9  ;;  %v4611_v23 = vpop.f32.mrb[76].mxu0 }
 0x1d2   : > { %v3433_v57 = vpop.f32.mrb[109].mxu1  ;;  %v4613_v3 = vpop.f32.mrb[77].mxu0 }
 0x1d3   : > { %v2466_v39 = vadd.f32 %v3687_v38, %v4537_v20  ;;  %v3434_v52 = vadd.f32 %v3433_v57, %v3432_v31  ;;  %v3435_v53 = vpop.f32.mrb[110].mxu1  ;;  %v4616_v32 = vpop.f32.mrb[78].mxu0  ;;  %v2497_v54 = vmax.f32 %v2465_v18, 0.0 }
 0x1d4   : > { %v3436_v14 = vpop.f32.mrb[111].mxu1  ;;  %v4618_v6 = vpop.f32.mrb[79].mxu0 }
 0x1d5   : > { %v2498_v50 = vmax.f32 %v2466_v39, 0.0  ;;  %v3680_v46 = vadd.f32 %v3434_v52, %v4489_v62  ;;  %v3437_v61 = vadd.f32 %v3436_v14, %v3435_v53 }
 0x1d7   : > { %v3681_v8 = vadd.f32 %v3680_v46, %v4555_v41  ;;  %v3684_v4 = vadd.f32 %v3437_v61, %v4491_v7  ;;  %v2523_v27 = vpack.c.bf16 %v2498_v50, %v2497_v54 }
 0x1d9   : > { %v2467_v55 = vadd.f32 %v3681_v8, %v4537_v20  ;;  %v3685_v19 = vadd.f32 %v3684_v4, %v4560_v56  ;;  %v3438_v10 = vpop.f32.mrb[112].mxu1  ;;  %3620 = vmatprep.mubr.msk.bf16.mxu0 %vm1195_vm0, %v2523_v27 }
 0x1da   : > { %v3439_v42 = vpop.f32.mrb[113].mxu1 }
 0x1db   : > { %v2468_v24 = vadd.f32 %v3685_v19, %v4537_v20  ;;  %v3440_v16 = vadd.f32 %v3439_v42, %v3438_v10  ;;  %v3441_v44 = vpop.f32.mrb[114].mxu1  ;;  %v2499_v62 = vmax.f32 %v2467_v55, 0.0 }
 0x1dc   : > { %v3442_v1 = vpop.f32.mrb[115].mxu1 }
 0x1dd   : > { %v2500_v29 = vmax.f32 %v2468_v24, 0.0  ;;  %v3690_v41 = vadd.f32 %v3440_v16, %v4493_v12  ;;  %v3443_v36 = vadd.f32 %v3442_v1, %v3441_v44 }
 0x1df   : > { %v3691_v7 = vadd.f32 %v3690_v41, %v4570_v40  ;;  %v3694_v35 = vadd.f32 %v3443_v36, %v4495_v0  ;;  %v2524_v9 = vpack.c.bf16 %v2500_v29, %v2499_v62 }
 0x1e1   : > { %v2469_v56 = vadd.f32 %v3691_v7, %v4537_v20  ;;  %v3695_v18 = vadd.f32 %v3694_v35, %v4575_v48  ;;  %v3444_v38 = vpop.f32.mrb[116].mxu1  ;;  %3621 = vmatmul.mubr.msk.bf16.gmra.mrb[92].mxu0 %vm1195_vm0, %v2524_v9 }
 0x1e2   : > { %v3445_v31 = vpop.f32.mrb[117].mxu1 }
 0x1e3   : > { %v2470_v57 = vadd.f32 %v3695_v18, %v4537_v20  ;;  %v3446_v39 = vadd.f32 %v3445_v31, %v3444_v38  ;;  %v3447_v52 = vpop.f32.mrb[118].mxu1  ;;  %v2501_v12 = vmax.f32 %v2469_v56, 0.0 }
 0x1e4   : > { %v3448_v53 = vpop.f32.mrb[119].mxu1 }
 0x1e5   : > { %v2502_v14 = vmax.f32 %v2470_v57, 0.0  ;;  %v3688_v40 = vadd.f32 %v3446_v39, %v4497_v30  ;;  %v3449_v54 = vadd.f32 %v3448_v53, %v3447_v52 }
 0x1e7   : > { %v3689_v0 = vadd.f32 %v3688_v40, %v4568_v17  ;;  %v3692_v50 = vadd.f32 %v3449_v54, %v4499_v47  ;;  %v2525_v46 = vpack.c.bf16 %v2502_v14, %v2501_v12 }
 0x1e9   : > { %v2471_v48 = vadd.f32 %v3689_v0, %v4537_v20  ;;  %v3693_v61 = vadd.f32 %v3692_v50, %v4573_v13  ;;  %v3450_v8 = vpop.f32.mrb[120].mxu1  ;;  %3624 = vmatprep.mubr.msk.bf16.mxu0 %vm1195_vm0, %v2525_v46 }
 0x1ea   : > { %v3451_v4 = vpop.f32.mrb[121].mxu1 }
 0x1eb   : > { %v2472_v27 = vadd.f32 %v3693_v61, %v4537_v20  ;;  %v3452_v55 = vadd.f32 %v3451_v4, %v3450_v8  ;;  %v3453_v19 = vpop.f32.mrb[122].mxu1  ;;  %v2503_v30 = vmax.f32 %v2471_v48, 0.0 }
 0x1ec   : > { %v3454_v10 = vpop.f32.mrb[123].mxu1 }
 0x1ed   : > { %v2504_v42 = vmax.f32 %v2472_v27, 0.0  ;;  %v3698_v17 = vadd.f32 %v3452_v55, %v4501_v60  ;;  %v3455_v24 = vadd.f32 %v3454_v10, %v3453_v19 }
 0x1ef   : > { %v3699_v47 = vadd.f32 %v3698_v17, %v4583_v26  ;;  %v3702_v16 = vadd.f32 %v3455_v24, %v4503_v5  ;;  %v2526_v44 = vpack.c.bf16 %v2504_v42, %v2503_v30 }
 0x1f1   : > { %v2473_v13 = vadd.f32 %v3699_v47, %v4537_v20  ;;  %v3703_v1 = vadd.f32 %v3702_v16, %v4588_v28  ;;  %v3456_v62 = vpop.f32.mrb[124].mxu1  ;;  %3625 = vmatmul.mubr.msk.bf16.gmra.mrb[96].mxu0 %vm1195_vm0, %v2526_v44 }
 0x1f2   : > { %v3457_v29 = vpop.f32.mrb[125].mxu1 }
 0x1f3   : > { %v2474_v41 = vadd.f32 %v3703_v1, %v4537_v20  ;;  %v3458_v36 = vadd.f32 %v3457_v29, %v3456_v62  ;;  %v3459_v7 = vpop.f32.mrb[126].mxu1  ;;  %v2505_v60 = vmax.f32 %v2473_v13, 0.0 }
 0x1f4   : > { %v3460_v35 = vpop.f32.mrb[127].mxu1 }
 0x1f5   : > { %v2506_v9 = vmax.f32 %v2474_v41, 0.0  ;;  %v3696_v26 = vadd.f32 %v3458_v36, %v4505_v15  ;;  %v3461_v56 = vadd.f32 %v3460_v35, %v3459_v7 }
 0x1f7   : > { %v3697_v5 = vadd.f32 %v3696_v26, %v4581_v22  ;;  %v3700_v18 = vadd.f32 %v3461_v56, %v4507_v21  ;;  %v2527_v38 = vpack.c.bf16 %v2506_v9, %v2505_v60 }
 0x1f9   : > { %v2475_v28 = vadd.f32 %v3697_v5, %v4537_v20  ;;  %v3701_v31 = vadd.f32 %v3700_v18, %v4586_v58  ;;  %v3462_v57 = vpop.f32.mrb[128].mxu1  ;;  %3628 = vmatprep.mubr.msk.bf16.mxu0 %vm1195_vm0, %v2527_v38 }
 0x1fa   : > { %v3463_v39 = vpop.f32.mrb[129].mxu1 }
 0x1fb   : > { %v2476_v52 = vadd.f32 %v3701_v31, %v4537_v20  ;;  %v3464_v53 = vadd.f32 %v3463_v39, %v3462_v57  ;;  %v3465_v12 = vpop.f32.mrb[130].mxu1  ;;  %v2507_v15 = vmax.f32 %v2475_v28, 0.0 }
 0x1fc   : > { %v3466_v14 = vpop.f32.mrb[131].mxu1 }
 0x1fd   : > { %v2508_v40 = vmax.f32 %v2476_v52, 0.0  ;;  %v3706_v22 = vadd.f32 %v3464_v53, %v4510_v34  ;;  %v3467_v54 = vadd.f32 %v3466_v14, %v3465_v12 }
 0x1ff   : > { %v3707_v21 = vadd.f32 %v3706_v22, %v4598_v59  ;;  %v3710_v0 = vadd.f32 %v3467_v54, %v4513_v25  ;;  %v2528_v50 = vpack.c.bf16 %v2508_v40, %v2507_v15 }
 0x201   : > { %v2477_v58 = vadd.f32 %v3707_v21, %v4537_v20  ;;  %v3711_v46 = vadd.f32 %v3710_v0, %v4603_v11  ;;  %v3468_v48 = vpop.f32.mrb[132].mxu1  ;;  %3629 = vmatmul.mubr.msk.bf16.gmra.mrb[100].mxu0 %vm1195_vm0, %v2528_v50 }
 0x202   : > { %v3469_v61 = vpop.f32.mrb[133].mxu1 }
 0x203   : > { %v2478_v8 = vadd.f32 %v3711_v46, %v4537_v20  ;;  %v3470_v4 = vadd.f32 %v3469_v61, %v3468_v48  ;;  %v3471_v27 = vpop.f32.mrb[134].mxu1  ;;  %v2509_v34 = vmax.f32 %v2477_v58, 0.0 }
 0x204   : > { %v3472_v55 = vpop.f32.mrb[135].mxu1 }
 0x205   : > { %v2510_v19 = vmax.f32 %v2478_v8, 0.0  ;;  %v3704_v59 = vadd.f32 %v3470_v4, %v4516_v2  ;;  %v3473_v10 = vadd.f32 %v3472_v55, %v3471_v27 }
 0x207   : > { %v3705_v25 = vadd.f32 %v3704_v59, %v4596_v43  ;;  %v3708_v30 = vadd.f32 %v3473_v10, %v4519_v37  ;;  %v2529_v42 = vpack.c.bf16 %v2510_v19, %v2509_v34 }
 0x209   : > { %v2479_v11 = vadd.f32 %v3705_v25, %v4537_v20  ;;  %v3709_v17 = vadd.f32 %v3708_v30, %v4601_v45  ;;  %v3474_v24 = vpop.f32.mrb[136].mxu1  ;;  %3632 = vmatprep.mubr.msk.bf16.mxu0 %vm1195_vm0, %v2529_v42 }
 0x20a   : > { %v3475_v47 = vpop.f32.mrb[137].mxu1 }
 0x20b   : > { %v2480_v16 = vadd.f32 %v3709_v17, %v4537_v20  ;;  %v3476_v44 = vadd.f32 %v3475_v47, %v3474_v24  ;;  %v3477_v13 = vpop.f32.mrb[138].mxu1  ;;  %v2511_v2 = vmax.f32 %v2479_v11, 0.0 }
 0x20c   : > { %v3478_v1 = vpop.f32.mrb[139].mxu1 }
 0x20d   : > { %v2512_v62 = vmax.f32 %v2480_v16, 0.0  ;;  %v3714_v43 = vadd.f32 %v3476_v44, %v4522_v49  ;;  %v3479_v29 = vadd.f32 %v3478_v1, %v3477_v13 }
 0x20f   : > { %v3715_v37 = vadd.f32 %v3714_v43, %v4613_v3  ;;  %v3718_v41 = vadd.f32 %v3479_v29, %v4525_v33  ;;  %v2530_v36 = vpack.c.bf16 %v2512_v62, %v2511_v2 }
 0x211   : > { %v2481_v45 = vadd.f32 %v3715_v37, %v4537_v20  ;;  %v3719_v7 = vadd.f32 %v3718_v41, %v4618_v6  ;;  %v3480_v35 = vpop.f32.mrb[140].mxu1  ;;  %3633 = vmatmul.mubr.msk.bf16.gmra.mrb[104].mxu0 %vm1195_vm0, %v2530_v36 }
 0x212   : > { %v3481_v60 = vpop.f32.mrb[141].mxu1 }
 0x213   : > { %v2482_v9 = vadd.f32 %v3719_v7, %v4537_v20  ;;  %v3482_v26 = vadd.f32 %v3481_v60, %v3480_v35  ;;  %v3483_v56 = vpop.f32.mrb[142].mxu1  ;;  %v2513_v49 = vmax.f32 %v2481_v45, 0.0 }
 0x214   : > { %v3484_v5 = vpop.f32.mrb[143].mxu1 }
 0x215   : > { %v2514_v18 = vmax.f32 %v2482_v9, 0.0  ;;  %v3712_v3 = vadd.f32 %v3482_v26, %v4528_v63  ;;  %v3485_v33 = vadd.f32 %v3484_v5, %v3483_v56  ;;  %v4688_v63 = vld [vmem:[%s4768_s6] ss:$0 sm:$0xff] }
 0x217   : > { %v3713_v38 = vadd.f32 %v3712_v3, %v4611_v23  ;;  %v3716_v28 = vadd.f32 %v3485_v33, %v4531_v51  ;;  %v2531_v6 = vpack.c.bf16 %v2514_v18, %v2513_v49 }
 0x219   : > { %v2483_v31 = vadd.f32 %v3713_v38, %v4537_v20  ;;  %v3717_v57 = vadd.f32 %v3716_v28, %v4616_v32  ;;  %3636 = vmatprep.mubr.msk.bf16.mxu0 %vm1195_vm0, %v2531_v6 }
 0x21b   : > { %v2484_v39 = vadd.f32 %v3717_v57, %v4537_v20  ;;  %v2515_v52 = vmax.f32 %v2483_v31, 0.0 }
 0x21d   : > { %v2516_v53 = vmax.f32 %v2484_v39, 0.0 }
 0x21f   : > { %v2532_v12 = vpack.c.bf16 %v2516_v53, %v2515_v52 }
 0x221   : > { %3637 = vmatmul.mubr.msk.bf16.gmra.mrb[108].mxu0 %vm1195_vm0, %v2532_v12 }
 0x284   : > { %v3610_v51 = vpop.f32.mrb[80].mxu0 }
 0x285   : > { %v2663_v20 = vadd.f32 %v3610_v51, %v4688_v63  ;;  %v2654_v23 = vpop.f32.mrb[81].mxu0 }
 0x286   : > { %v2655_v32 = vadd.f32 %v4688_v63, %v2654_v23  ;;  %v3611_v14 = vpop.f32.mrb[82].mxu0 }
 0x287   : > { %2783 = vst [vmem:[%s4693_s13 + $0x10] sm:$0xff] %v2663_v20  ;;  %v2666_v15 = vadd.f32 %v3611_v14, %v4688_v63  ;;  %v2657_v40 = vpop.f32.mrb[83].mxu0 }
 0x288   : > { %2781 = vst [vmem:[%s4693_s13] sm:$0xff] %v2655_v32  ;;  %v2658_v22 = vadd.f32 %v4688_v63, %v2657_v40 }
 0x289   : > { %2784 = vst [vmem:[%s4693_s13 + $0x18] sm:$0xff] %v2666_v15 }
 0x28a   : > { %2782 = vst [vmem:[%s4693_s13 + $0x8] sm:$0xff] %v2658_v22 }
 0x294   : > { %v3614_v54 = vpop.f32.mrb[84].mxu0 }
 0x295   : > { %v2679_v21 = vadd.f32 %v3614_v54, %v4688_v63  ;;  %v2670_v0 = vpop.f32.mrb[85].mxu0 }
 0x296   : > { %v2671_v50 = vadd.f32 %v4688_v63, %v2670_v0  ;;  %v3615_v58 = vpop.f32.mrb[86].mxu0 }
 0x297   : > { %2787 = vst [vmem:[%s4693_s13 + $0x30] sm:$0xff] %v2679_v21  ;;  %v2682_v46 = vadd.f32 %v3615_v58, %v4688_v63  ;;  %v2673_v48 = vpop.f32.mrb[87].mxu0 }
 0x298   : > { %2785 = vst [vmem:[%s4693_s13 + $0x20] sm:$0xff] %v2671_v50  ;;  %v2674_v61 = vadd.f32 %v4688_v63, %v2673_v48 }
 0x299   : > { %2788 = vst [vmem:[%s4693_s13 + $0x38] sm:$0xff] %v2682_v46 }
 0x29a   : > { %2786 = vst [vmem:[%s4693_s13 + $0x28] sm:$0xff] %v2674_v61 }
 0x2a4   : > { %v3618_v8 = vpop.f32.mrb[88].mxu0 }
 0x2a5   : > { %v2695_v4 = vadd.f32 %v3618_v8, %v4688_v63  ;;  %v2686_v27 = vpop.f32.mrb[89].mxu0 }
 0x2a6   : > { %v2687_v55 = vadd.f32 %v4688_v63, %v2686_v27  ;;  %v3619_v34 = vpop.f32.mrb[90].mxu0 }
 0x2a7   : > { %2791 = vst [vmem:[%s4693_s13 + $0x50] sm:$0xff] %v2695_v4  ;;  %v2698_v19 = vadd.f32 %v3619_v34, %v4688_v63  ;;  %v2689_v59 = vpop.f32.mrb[91].mxu0 }
 0x2a8   : > { %2789 = vst [vmem:[%s4693_s13 + $0x40] sm:$0xff] %v2687_v55  ;;  %v2690_v10 = vadd.f32 %v4688_v63, %v2689_v59 }
 0x2a9   : > { %2792 = vst [vmem:[%s4693_s13 + $0x58] sm:$0xff] %v2698_v19 }
 0x2aa   : > { %2790 = vst [vmem:[%s4693_s13 + $0x48] sm:$0xff] %v2690_v10 }
 0x2b4   : > { %v3622_v25 = vpop.f32.mrb[92].mxu0 }
 0x2b5   : > { %v2711_v30 = vadd.f32 %v3622_v25, %v4688_v63  ;;  %v2702_v42 = vpop.f32.mrb[93].mxu0 }
 0x2b6   : > { %v2703_v11 = vadd.f32 %v4688_v63, %v2702_v42  ;;  %v3623_v17 = vpop.f32.mrb[94].mxu0 }
 0x2b7   : > { %2795 = vst [vmem:[%s4693_s13 + $0x70] sm:$0xff] %v2711_v30  ;;  %v2714_v24 = vadd.f32 %v3623_v17, %v4688_v63  ;;  %v2705_v47 = vpop.f32.mrb[95].mxu0 }
 0x2b8   : > { %2793 = vst [vmem:[%s4693_s13 + $0x60] sm:$0xff] %v2703_v11  ;;  %v2706_v16 = vadd.f32 %v4688_v63, %v2705_v47 }
 0x2b9   : > { %2796 = vst [vmem:[%s4693_s13 + $0x78] sm:$0xff] %v2714_v24 }
 0x2ba   : > { %2794 = vst [vmem:[%s4693_s13 + $0x68] sm:$0xff] %v2706_v16 }
 0x2c4   : > { %v3626_v44 = vpop.f32.mrb[96].mxu0 }
 0x2c5   : > { %v2727_v13 = vadd.f32 %v3626_v44, %v4688_v63  ;;  %v2718_v1 = vpop.f32.mrb[97].mxu0 }
 0x2c6   : > { %v2719_v2 = vadd.f32 %v4688_v63, %v2718_v1  ;;  %v3627_v62 = vpop.f32.mrb[98].mxu0 }
 0x2c7   : > { %2799 = vst [vmem:[%s4693_s13 + $0x90] sm:$0xff] %v2727_v13  ;;  %v2730_v43 = vadd.f32 %v3627_v62, %v4688_v63  ;;  %v2721_v29 = vpop.f32.mrb[99].mxu0 }
 0x2c8   : > { %2797 = vst [vmem:[%s4693_s13 + $0x80] sm:$0xff] %v2719_v2  ;;  %v2722_v37 = vadd.f32 %v4688_v63, %v2721_v29 }
 0x2c9   : > { %2800 = vst [vmem:[%s4693_s13 + $0x98] sm:$0xff] %v2730_v43 }
 0x2ca   : > { %2798 = vst [vmem:[%s4693_s13 + $0x88] sm:$0xff] %v2722_v37 }
 0x2d4   : > { %v3630_v41 = vpop.f32.mrb[100].mxu0 }
 0x2d5   : > { %v2743_v36 = vadd.f32 %v3630_v41, %v4688_v63  ;;  %v2734_v45 = vpop.f32.mrb[101].mxu0 }
 0x2d6   : > { %v2735_v7 = vadd.f32 %v4688_v63, %v2734_v45  ;;  %v3631_v35 = vpop.f32.mrb[102].mxu0 }
 0x2d7   : > { %2803 = vst [vmem:[%s4693_s13 + $0xb0] sm:$0xff] %v2743_v36  ;;  %v2746_v60 = vadd.f32 %v3631_v35, %v4688_v63  ;;  %v2737_v9 = vpop.f32.mrb[103].mxu0 }
 0x2d8   : > { %2801 = vst [vmem:[%s4693_s13 + $0xa0] sm:$0xff] %v2735_v7  ;;  %v2738_v26 = vadd.f32 %v4688_v63, %v2737_v9 }
 0x2d9   : > { %2804 = vst [vmem:[%s4693_s13 + $0xb8] sm:$0xff] %v2746_v60 }
 0x2da   : > { %2802 = vst [vmem:[%s4693_s13 + $0xa8] sm:$0xff] %v2738_v26 }
 0x2e4   : > { %v3634_v56 = vpop.f32.mrb[104].mxu0 }
 0x2e5   : > { %v2759_v5 = vadd.f32 %v3634_v56, %v4688_v63  ;;  %v2750_v49 = vpop.f32.mrb[105].mxu0 }
 0x2e6   : > { %v2751_v18 = vadd.f32 %v4688_v63, %v2750_v49  ;;  %v3635_v3 = vpop.f32.mrb[106].mxu0 }
 0x2e7   : > { %2807 = vst [vmem:[%s4693_s13 + $0xd0] sm:$0xff] %v2759_v5  ;;  %v2762_v33 = vadd.f32 %v3635_v3, %v4688_v63  ;;  %v2753_v38 = vpop.f32.mrb[107].mxu0 }
 0x2e8   : > { %2805 = vst [vmem:[%s4693_s13 + $0xc0] sm:$0xff] %v2751_v18  ;;  %v2754_v28 = vadd.f32 %v4688_v63, %v2753_v38 }
 0x2e9   : > { %2808 = vst [vmem:[%s4693_s13 + $0xd8] sm:$0xff] %v2762_v33 }
 0x2ea   : > { %2806 = vst [vmem:[%s4693_s13 + $0xc8] sm:$0xff] %v2754_v28 }
 0x2f4   : > { %v3638_v6 = vpop.f32.mrb[108].mxu0 }
 0x2f5   : > { %v2775_v31 = vadd.f32 %v3638_v6, %v4688_v63  ;;  %v2766_v57 = vpop.f32.mrb[109].mxu0 }
 0x2f6   : > { %v2767_v39 = vadd.f32 %v4688_v63, %v2766_v57  ;;  %v3639_v52 = vpop.f32.mrb[110].mxu0 }
 0x2f7   : > { %2811 = vst [vmem:[%s4693_s13 + $0xf0] sm:$0xff] %v2775_v31  ;;  %v2778_v53 = vadd.f32 %v3639_v52, %v4688_v63  ;;  %v2769_v12 = vpop.f32.mrb[111].mxu0 }
 0x2f8   : > { %2809 = vst [vmem:[%s4693_s13 + $0xe0] sm:$0xff] %v2767_v39  ;;  %v2770_v51 = vadd.f32 %v4688_v63, %v2769_v12 }
 0x2f9   : > { %2812 = vst [vmem:[%s4693_s13 + $0xf8] sm:$0xff] %v2778_v53 }
 0x2fa   : > { %2810 = vst [vmem:[%s4693_s13 + $0xe8] sm:$0xff] %v2770_v51 }
 0x2fb PF: > { %s17_s24 = sadd.s32 1, %s4002_s24  }
 0x2fc   : > { %p14_p4 = scmp.ge.s32.totalorder %s17_s24, 4  }
 0x2fe   :  { %16 = sbr.rel (!%p14_p4) target bundleno = 1 (0x1), region = 81 }

</bundles_post_ra>
